<compile_context>
chip_gen: v6e
topology: v6e:2x2x1
jax: 0.10.0
libtpu: 0.0.40
codegen_flags: <defaults>
</compile_context>

<pallas_src>
import functools

import jax
import jax.numpy as jnp
from jax import lax
from jax.experimental import pallas as pl
from jax.experimental.pallas import tpu as pltpu


# ------------------------ fixed geometry (28x28 input, forced by fc1) ------------------------
IMG = 28                          # spatial size required by fc1 = Linear(16*7*7, .)
ROW1 = 32                         # lane stride of one padded conv1 input row
SLOT = 32 * ROW1                  # 1024: per-image lane slot used by EVERY layer
CONV1_OFFS = tuple(ROW1 * ki + kj for ki in range(3) for kj in range(3))
ROW2 = 2 * ROW1                   # 64: row stride of the pool1 / conv2 flat grid
CONV2_OFFS = tuple(ROW2 * ki + 2 * kj for ki in range(3) for kj in range(3))
POOL2_HW = 7
FCW = 896                         # 7*128: per-image fc1 feature window (valid cols <= 792)
P1U_PAD = 256                     # scratch tail so last image's conv2 taps stay in bounds


# --------------------------------------- fused kernel ---------------------------------------
def _cnn_fused_kernel(x_ref, w1_ref, b1_ref, w2_ref, b2_ref, wfc_ref, bfc_ref,
                      out_ref, p1u_ref):
    """Whole CNN forward for one batch block; every intermediate stays in VMEM."""
    f32 = jnp.float32
    B = out_ref.shape[0]                      # images in this block (static)
    co1 = w1_ref.shape[0]
    co2 = w2_ref.shape[0]
    tot = B * SLOT
    L1 = tot - 128                            # conv1 output length  (B*1024 - 128)
    Lm1 = tot - 164                           # pool1 output length
    L2 = tot                                  # conv2 output length (lane aligned)
    Lm2 = tot - 128                           # pool2 output length

    # ---- conv1 (3x3, p=1) + bias + ReLU: ONE MXU matmul for the whole block ----
    # RHS rows = 9 shifted views of the flat padded input slab (K = 9*Cin),
    # columns = flat output position b*1024 + 32*h + w (lane dense, all images).
    rhs1 = jnp.concatenate([x_ref[:, o:o + L1] for o in CONV1_OFFS], axis=0)
    a1 = jnp.maximum(
        jnp.dot(w1_ref[...], rhs1, preferred_element_type=f32) + b1_ref[...], 0.0)

    # ---- fused 2x2/2 maxpool #1: max of 4 shifted slices, kept uncompacted ----
    # pooled (r, s) lives at per-image column 64*r + 2*s.
    m1 = jnp.maximum(
        jnp.maximum(a1[:, 0:Lm1], a1[:, 1:1 + Lm1]),
        jnp.maximum(a1[:, ROW1:ROW1 + Lm1], a1[:, ROW1 + 1:ROW1 + 1 + Lm1]))

    # ---- build conv2's zero-padded input with one bulk shifted, masked store ----
    # p1u per-image column 64*r' + 2*s' holds the 16x16 zero-padded pool1 map.
    # Because every layer uses the same 1024-lane per-image stride, dest = src+66
    # for ALL images, so the old 14-row scatter collapses to a single store.
    # The mask zeroes exactly the padding ring conv2 reads (r' or s' in {0,15}).
    src = lax.broadcasted_iota(jnp.int32, (1, Lm1), 1)
    dst = (src + 66) & (SLOT - 1)             # per-image destination offset
    r = dst >> 6                              # padded pool row  (0..15)
    s = dst & 63                              # 2 * padded pool col on even lanes
    keep = (r != 0) & (r != 15) & (s != 0) & (s != 30)
    p1u_ref[:, 0:66] = jnp.zeros((co1, 66), f32)
    p1u_ref[:, 66:66 + Lm1] = jnp.where(keep, m1, 0.0)
    p1u_ref[:, 66 + Lm1:] = jnp.zeros((co1, p1u_ref.shape[1] - 66 - Lm1), f32)

    # ---- conv2 (3x3, p=1) + bias + ReLU: 9 accumulating MXU matmuls ----
    # (co2, co1) @ (co1, L2) per tap straight from the scratch -- no (9*co1, L2)
    # concatenated RHS is ever materialized.
    a2 = jnp.dot(w2_ref[:, 0:co1],
                 p1u_ref[:, CONV2_OFFS[0]:CONV2_OFFS[0] + L2],
                 preferred_element_type=f32)
    for t in range(1, 9):
        o = CONV2_OFFS[t]
        a2 = a2 + jnp.dot(w2_ref[:, t * co1:(t + 1) * co1],
                          p1u_ref[:, o:o + L2], preferred_element_type=f32)
    a2 = jnp.maximum(a2 + b2_ref[...], 0.0)

    # ---- fused 2x2/2 maxpool #2 (valid values at per-image column 128*j + 4*k) ----
    m2 = jnp.maximum(
        jnp.maximum(a2[:, 0:Lm2], a2[:, 2:2 + Lm2]),
        jnp.maximum(a2[:, ROW2:ROW2 + Lm2], a2[:, ROW2 + 2:ROW2 + 2 + Lm2]))

    # ---- fc1: one dot_general batched over the 16 channels + VPU reduce ----
    # Per-image 896-wide windows start at lane-aligned offsets b*1024, so the
    # stack is pure vreg copies; pre-scattered zero weights mask garbage columns.
    m2b = jnp.stack([m2[:, b * SLOT:b * SLOT + FCW] for b in range(B)], axis=1)
    part = jnp.einsum('cbl,cnl->cbn', m2b, wfc_ref[...],
                      preferred_element_type=f32)               # (co2, B, nc)
    out_ref[...] = (part.sum(axis=0) + bfc_ref[...]).astype(out_ref.dtype)


# ------------------------------------- wrapper / glue --------------------------------------
def prepare_params(params):
    """One-time weight relayout, hoisted out of the forward pass."""
    w1, b1, w2, b2, wfc, bfc = params
    co1, cin = w1.shape[0], w1.shape[1]
    co2 = w2.shape[0]
    nc = wfc.shape[0]
    # conv taps -> (Cout, 9*Cin); column order (ki, kj, cin) matches the order
    # of the 9 shifted input slices used in the kernel.
    w1m = jnp.transpose(w1, (0, 2, 3, 1)).reshape(co1, 9 * cin).astype(jnp.float32)
    w2m = jnp.transpose(w2, (0, 2, 3, 1)).reshape(co2, 9 * co1).astype(jnp.float32)
    # fc weight: torch flattens (c, h, w); the kernel's pooled feature (c, j, k)
    # lives at per-image column 128*j + 4*k of the 896-wide window, so
    # pre-scatter per input channel (zeros elsewhere mask garbage columns).
    col = (2 * ROW2 * jnp.arange(POOL2_HW)[:, None]
           + 4 * jnp.arange(POOL2_HW)[None, :]).reshape(-1)                # (49,)
    vals = jnp.transpose(wfc.reshape(nc, co2, POOL2_HW, POOL2_HW),
                         (1, 0, 2, 3)).reshape(co2, nc, POOL2_HW * POOL2_HW)
    wfcm = jnp.zeros((co2, nc, FCW), jnp.float32).at[:, :, col].set(vals)
    return (w1m, b1.reshape(co1, 1), w2m, b2.reshape(co2, 1), wfcm,
            bfc.reshape(1, nc))


@functools.partial(jax.jit, static_argnums=(2,))
def cnn_forward(x_nchw, prepped, block_batch=16):
    w1m, b1c, w2m, b2c, wfcm, bfcr = prepped
    n, cin, h, w = x_nchw.shape
    assert h == IMG and w == IMG, "fc1 = Linear(16*7*7, .) requires 28x28 inputs"
    nc = bfcr.shape[1]
    co1 = w1m.shape[0]

    bb = n if n < block_batch else block_batch
    if n > block_batch:
        assert block_batch % 8 == 0, "block_batch must be a multiple of 8"
    n_pad = -(-n // bb) * bb
    if n_pad != n:
        x_nchw = jnp.pad(x_nchw, ((0, n_pad - n), (0, 0), (0, 0), (0, 0)))

    # Lane-dense flat input: each image/channel fills a 32x32 = 1024-lane slot
    # (1 top / 1 left zero pad, extra zeros on the far side); images are laid
    # side by side so one grid step convolves bb images at once.
    xflat = jnp.pad(x_nchw, ((0, 0), (0, 0), (1, 3), (1, 3)))
    xflat = jnp.transpose(xflat, (1, 0, 2, 3)).reshape(cin, n_pad * SLOT)

    out = pl.pallas_call(
        _cnn_fused_kernel,
        out_shape=jax.ShapeDtypeStruct((n_pad, nc), jnp.float32),
        grid_spec=pltpu.PrefetchScalarGridSpec(
            num_scalar_prefetch=0,
            grid=(n_pad // bb,),
            in_specs=[
                pl.BlockSpec((cin, bb * SLOT), lambda i: (0, i)),
                # constant-index weight blocks (a further option is
                # pipeline_mode=pl.Buffered(1) to skip double buffering them)
                pl.BlockSpec(w1m.shape, lambda i: (0, 0)),
                pl.BlockSpec(b1c.shape, lambda i: (0, 0)),
                pl.BlockSpec(w2m.shape, lambda i: (0, 0)),
                pl.BlockSpec(b2c.shape, lambda i: (0, 0)),
                pl.BlockSpec(wfcm.shape, lambda i: (0, 0, 0)),
                pl.BlockSpec(bfcr.shape, lambda i: (0, 0)),
            ],
            out_specs=pl.BlockSpec((bb, nc), lambda i: (i, 0)),
            scratch_shapes=[pltpu.VMEM((co1, bb * SLOT + P1U_PAD), jnp.float32)],
        ),
        compiler_params=pltpu.CompilerParams(dimension_semantics=("parallel",)),
    )(xflat, w1m, b1c, w2m, b2c, wfcm, bfcr)
    return out[:n]


# ---------------------------------- params / reference -------------------------------------
def kaiming_uniform(key, shape, fan_in):
    bound = (6.0 / fan_in) ** 0.5
    return jax.random.uniform(key, shape, jnp.float32, -bound, bound)


def init_params(key, in_channels=1, num_classes=10):
    k1, k2, k3 = jax.random.split(key, 3)
    w1 = kaiming_uniform(k1, (8, in_channels, 3, 3), in_channels * 9)     # conv1
    b1 = jnp.zeros((8,), jnp.float32)
    w2 = kaiming_uniform(k2, (16, 8, 3, 3), 8 * 9)                        # conv2
    b2 = jnp.zeros((16,), jnp.float32)
    wfc = kaiming_uniform(k3, (num_classes, 16 * 7 * 7), 16 * 7 * 7)      # fc1
    bfc = jnp.zeros((num_classes,), jnp.float32)
    return w1, b1, w2, b2, wfc, bfc


def cnn_reference(x_nchw, params):
    """Pure-JAX reference with PyTorch semantics (NCHW)."""
    w1, b1, w2, b2, wfc, bfc = params

    def conv(x, w, b):
        y = lax.conv_general_dilated(
            x, w, (1, 1), ((1, 1), (1, 1)),
            dimension_numbers=("NCHW", "OIHW", "NCHW"))
        return jax.nn.relu(y + b.reshape(1, -1, 1, 1))

    def pool(x):
        return lax.reduce_window(
            x, -jnp.inf, lax.max, (1, 1, 2, 2), (1, 1, 2, 2), "VALID")

    x = pool(conv(x_nchw, w1, b1))
    x = pool(conv(x, w2, b2))
    flat = x.reshape(x.shape[0], -1)
    return flat @ wfc.T + bfc


if __name__ == "__main__":
    key = jax.random.PRNGKey(0)
    pkey, xkey = jax.random.split(key)
    params = init_params(pkey, in_channels=1, num_classes=10)
    # fc1 = Linear(16*7*7, 10) forces 28x28 spatial input; batch kept small (2).
    x = jax.random.normal(xkey, (2, 1, 28, 28), jnp.float32)

    prepped = prepare_params(params)         # one-time weight relayout (hoisted)
    out = jax.block_until_ready(cnn_forward(x, prepped))
    assert out.shape == (2, 10)

    ref = cnn_reference(x, params)
    if not jnp.allclose(out, ref, atol=1e-3, rtol=1e-3):
        raise AssertionError("Pallas CNN output does not match JAX reference")
    print("KERNEL_OK")
</pallas_src>

<mosaic_0001>
module attributes {stable_mosaic.version = 11 : i64} {
  func.func @_cnn_fused_kernel(%arg0: i32, %arg1: memref<1x2048xf32, #tpu.memory_space<vmem>>, %arg2: memref<8x9xf32, #tpu.memory_space<vmem>>, %arg3: memref<8x1xf32, #tpu.memory_space<vmem>>, %arg4: memref<16x72xf32, #tpu.memory_space<vmem>>, %arg5: memref<16x1xf32, #tpu.memory_space<vmem>>, %arg6: memref<16x10x896xf32, #tpu.memory_space<vmem>>, %arg7: memref<1x10xf32, #tpu.memory_space<vmem>>, %arg8: memref<2x10xf32, #tpu.memory_space<vmem>>, %arg9: memref<8x2304xf32, #tpu.memory_space<vmem>>) attributes {dimension_semantics = [#tpu.dimension_semantics<parallel>], iteration_bounds = array<i64: 1>, scalar_prefetch = 0 : i64, scratch_operands = 1 : i64, tpu.core_type = #tpu.core_type<tc>, window_params = [{transform_indices = @transform_0, window_bounds = array<i64: 1, 2048>}, {pipeline_mode = #tpu.pipeline_mode<synchronous>, transform_indices = @transform_1, window_bounds = array<i64: 8, 9>}, {pipeline_mode = #tpu.pipeline_mode<synchronous>, transform_indices = @transform_2, window_bounds = array<i64: 8, 1>}, {pipeline_mode = #tpu.pipeline_mode<synchronous>, transform_indices = @transform_3, window_bounds = array<i64: 16, 72>}, {pipeline_mode = #tpu.pipeline_mode<synchronous>, transform_indices = @transform_4, window_bounds = array<i64: 16, 1>}, {pipeline_mode = #tpu.pipeline_mode<synchronous>, transform_indices = @transform_5, window_bounds = array<i64: 16, 10, 896>}, {pipeline_mode = #tpu.pipeline_mode<synchronous>, transform_indices = @transform_6, window_bounds = array<i64: 1, 10>}, {transform_indices = @transform_7, window_bounds = array<i64: 2, 10>}]} {
    %c0 = arith.constant 0 : index
    %c0_0 = arith.constant 0 : index
    %0 = vector.load %arg1[%c0, %c0_0] : memref<1x2048xf32, #tpu.memory_space<vmem>>, vector<1x1920xf32>
    %c0_1 = arith.constant 0 : index
    %c1 = arith.constant 1 : index
    %1 = vector.load %arg1[%c0_1, %c1] : memref<1x2048xf32, #tpu.memory_space<vmem>>, vector<1x1920xf32>
    %c0_2 = arith.constant 0 : index
    %c2 = arith.constant 2 : index
    %2 = vector.load %arg1[%c0_2, %c2] : memref<1x2048xf32, #tpu.memory_space<vmem>>, vector<1x1920xf32>
    %c0_3 = arith.constant 0 : index
    %c32 = arith.constant 32 : index
    %3 = vector.load %arg1[%c0_3, %c32] : memref<1x2048xf32, #tpu.memory_space<vmem>>, vector<1x1920xf32>
    %c0_4 = arith.constant 0 : index
    %c33 = arith.constant 33 : index
    %4 = vector.load %arg1[%c0_4, %c33] : memref<1x2048xf32, #tpu.memory_space<vmem>>, vector<1x1920xf32>
    %c0_5 = arith.constant 0 : index
    %c34 = arith.constant 34 : index
    %5 = vector.load %arg1[%c0_5, %c34] : memref<1x2048xf32, #tpu.memory_space<vmem>>, vector<1x1920xf32>
    %c0_6 = arith.constant 0 : index
    %c64 = arith.constant 64 : index
    %6 = vector.load %arg1[%c0_6, %c64] : memref<1x2048xf32, #tpu.memory_space<vmem>>, vector<1x1920xf32>
    %c0_7 = arith.constant 0 : index
    %c65 = arith.constant 65 : index
    %7 = vector.load %arg1[%c0_7, %c65] : memref<1x2048xf32, #tpu.memory_space<vmem>>, vector<1x1920xf32>
    %c0_8 = arith.constant 0 : index
    %c66 = arith.constant 66 : index
    %8 = vector.load %arg1[%c0_8, %c66] : memref<1x2048xf32, #tpu.memory_space<vmem>>, vector<1x1920xf32>
    %9 = tpu.concatenate %0, %1, %2, %3, %4, %5, %6, %7, %8 in 0 : vector<1x1920xf32>, vector<1x1920xf32>, vector<1x1920xf32>, vector<1x1920xf32>, vector<1x1920xf32>, vector<1x1920xf32>, vector<1x1920xf32>, vector<1x1920xf32>, vector<1x1920xf32> -> vector<9x1920xf32>
    %c0_9 = arith.constant 0 : index
    %c0_10 = arith.constant 0 : index
    %10 = vector.load %arg2[%c0_9, %c0_10] : memref<8x9xf32, #tpu.memory_space<vmem>>, vector<8x9xf32>
    %cst = arith.constant dense<0.000000e+00> : vector<8x1920xf32>
    %11 = tpu.matmul %10, %9, %cst {dimension_numbers = #tpu.dot_dimension_numbers<[1], [0], [0], [1], [0, 0, 1, 1], [], []>} : vector<8x9xf32>, vector<9x1920xf32>, vector<8x1920xf32> -> vector<8x1920xf32>
    %c0_11 = arith.constant 0 : index
    %c0_12 = arith.constant 0 : index
    %12 = vector.load %arg3[%c0_11, %c0_12] : memref<8x1xf32, #tpu.memory_space<vmem>>, vector<8x1xf32>
    %13 = vector.broadcast %12 : vector<8x1xf32> to vector<8x1920xf32>
    %14 = arith.addf %11, %13 : vector<8x1920xf32>
    %cst_13 = arith.constant 0.000000e+00 : f32
    %15 = vector.broadcast %cst_13 : f32 to vector<8x1920xf32>
    %16 = arith.maximumf %14, %15 : vector<8x1920xf32>
    %17 = vector.extract_strided_slice %16 {offsets = [0, 0], sizes = [8, 1884], strides = [1, 1]} : vector<8x1920xf32> to vector<8x1884xf32>
    %18 = vector.extract_strided_slice %16 {offsets = [0, 1], sizes = [8, 1884], strides = [1, 1]} : vector<8x1920xf32> to vector<8x1884xf32>
    %19 = arith.maximumf %17, %18 : vector<8x1884xf32>
    %20 = vector.extract_strided_slice %16 {offsets = [0, 32], sizes = [8, 1884], strides = [1, 1]} : vector<8x1920xf32> to vector<8x1884xf32>
    %21 = vector.extract_strided_slice %16 {offsets = [0, 33], sizes = [8, 1884], strides = [1, 1]} : vector<8x1920xf32> to vector<8x1884xf32>
    %22 = arith.maximumf %20, %21 : vector<8x1884xf32>
    %23 = arith.maximumf %19, %22 : vector<8x1884xf32>
    %24 = tpu.iota {dimensions = array<i32: 1>} : vector<1x1884xi32>
    %c66_i32 = arith.constant 66 : i32
    %25 = vector.broadcast %c66_i32 : i32 to vector<1x1884xi32>
    %26 = arith.addi %24, %25 : vector<1x1884xi32>
    %c1023_i32 = arith.constant 1023 : i32
    %27 = vector.broadcast %c1023_i32 : i32 to vector<1x1884xi32>
    %28 = arith.andi %26, %27 : vector<1x1884xi32>
    %c6_i32 = arith.constant 6 : i32
    %29 = vector.broadcast %c6_i32 : i32 to vector<1x1884xi32>
    %30 = arith.shrsi %28, %29 : vector<1x1884xi32>
    %c63_i32 = arith.constant 63 : i32
    %31 = vector.broadcast %c63_i32 : i32 to vector<1x1884xi32>
    %32 = arith.andi %28, %31 : vector<1x1884xi32>
    %c0_i32 = arith.constant 0 : i32
    %33 = vector.broadcast %c0_i32 : i32 to vector<1x1884xi32>
    %34 = arith.cmpi ne, %30, %33 : vector<1x1884xi32>
    %c15_i32 = arith.constant 15 : i32
    %35 = vector.broadcast %c15_i32 : i32 to vector<1x1884xi32>
    %36 = arith.cmpi ne, %30, %35 : vector<1x1884xi32>
    %37 = arith.andi %34, %36 : vector<1x1884xi1>
    %c0_i32_14 = arith.constant 0 : i32
    %38 = vector.broadcast %c0_i32_14 : i32 to vector<1x1884xi32>
    %39 = arith.cmpi ne, %32, %38 : vector<1x1884xi32>
    %40 = arith.andi %37, %39 : vector<1x1884xi1>
    %c30_i32 = arith.constant 30 : i32
    %41 = vector.broadcast %c30_i32 : i32 to vector<1x1884xi32>
    %42 = arith.cmpi ne, %32, %41 : vector<1x1884xi32>
    %43 = arith.andi %40, %42 : vector<1x1884xi1>
    %cst_15 = arith.constant 0.000000e+00 : f32
    %44 = vector.broadcast %cst_15 : f32 to vector<8x66xf32>
    %c0_16 = arith.constant 0 : index
    %c0_17 = arith.constant 0 : index
    %45 = vector.load %arg9[%c0_16, %c0_17] : memref<8x2304xf32, #tpu.memory_space<vmem>>, vector<8x66xf32>
    tpu.vector_store %arg9[%c0_16, %c0_17], %44 {strides = array<i32>} : memref<8x2304xf32, #tpu.memory_space<vmem>>, vector<8x66xf32>,
    %cst_18 = arith.constant 0.000000e+00 : f32
    %46 = vector.shape_cast %43 : vector<1x1884xi1> to vector<1x1884xi1>
    %47 = vector.broadcast %46 : vector<1x1884xi1> to vector<8x1884xi1>
    %48 = vector.broadcast %cst_18 : f32 to vector<8x1884xf32>
    %49 = arith.select %47, %23, %48 : vector<8x1884xi1>, vector<8x1884xf32>
    %c0_19 = arith.constant 0 : index
    %c66_20 = arith.constant 66 : index
    %50 = vector.load %arg9[%c0_19, %c66_20] : memref<8x2304xf32, #tpu.memory_space<vmem>>, vector<8x1884xf32>
    tpu.vector_store %arg9[%c0_19, %c66_20], %49 {strides = array<i32>} : memref<8x2304xf32, #tpu.memory_space<vmem>>, vector<8x1884xf32>,
    %cst_21 = arith.constant 0.000000e+00 : f32
    %51 = vector.broadcast %cst_21 : f32 to vector<8x354xf32>
    %c0_22 = arith.constant 0 : index
    %c1950 = arith.constant 1950 : index
    %52 = vector.load %arg9[%c0_22, %c1950] : memref<8x2304xf32, #tpu.memory_space<vmem>>, vector<8x354xf32>
    tpu.vector_store %arg9[%c0_22, %c1950], %51 {strides = array<i32>} : memref<8x2304xf32, #tpu.memory_space<vmem>>, vector<8x354xf32>,
    %c0_23 = arith.constant 0 : index
    %c0_24 = arith.constant 0 : index
    %53 = vector.load %arg4[%c0_23, %c0_24] : memref<16x72xf32, #tpu.memory_space<vmem>>, vector<16x8xf32>
    %c0_25 = arith.constant 0 : index
    %c0_26 = arith.constant 0 : index
    %54 = vector.load %arg9[%c0_25, %c0_26] : memref<8x2304xf32, #tpu.memory_space<vmem>>, vector<8x2048xf32>
    %cst_27 = arith.constant dense<0.000000e+00> : vector<16x2048xf32>
    %55 = tpu.matmul %53, %54, %cst_27 {dimension_numbers = #tpu.dot_dimension_numbers<[1], [0], [0], [1], [0, 0, 1, 1], [], []>} : vector<16x8xf32>, vector<8x2048xf32>, vector<16x2048xf32> -> vector<16x2048xf32>
    %c0_28 = arith.constant 0 : index
    %c8 = arith.constant 8 : index
    %56 = vector.load %arg4[%c0_28, %c8] : memref<16x72xf32, #tpu.memory_space<vmem>>, vector<16x8xf32>
    %c0_29 = arith.constant 0 : index
    %c2_30 = arith.constant 2 : index
    %57 = vector.load %arg9[%c0_29, %c2_30] : memref<8x2304xf32, #tpu.memory_space<vmem>>, vector<8x2048xf32>
    %cst_31 = arith.constant dense<0.000000e+00> : vector<16x2048xf32>
    %58 = tpu.matmul %56, %57, %cst_31 {dimension_numbers = #tpu.dot_dimension_numbers<[1], [0], [0], [1], [0, 0, 1, 1], [], []>} : vector<16x8xf32>, vector<8x2048xf32>, vector<16x2048xf32> -> vector<16x2048xf32>
    %59 = arith.addf %55, %58 : vector<16x2048xf32>
    %c0_32 = arith.constant 0 : index
    %c16 = arith.constant 16 : index
    %60 = vector.load %arg4[%c0_32, %c16] : memref<16x72xf32, #tpu.memory_space<vmem>>, vector<16x8xf32>
    %c0_33 = arith.constant 0 : index
    %c4 = arith.constant 4 : index
    %61 = vector.load %arg9[%c0_33, %c4] : memref<8x2304xf32, #tpu.memory_space<vmem>>, vector<8x2048xf32>
    %cst_34 = arith.constant dense<0.000000e+00> : vector<16x2048xf32>
    %62 = tpu.matmul %60, %61, %cst_34 {dimension_numbers = #tpu.dot_dimension_numbers<[1], [0], [0], [1], [0, 0, 1, 1], [], []>} : vector<16x8xf32>, vector<8x2048xf32>, vector<16x2048xf32> -> vector<16x2048xf32>
    %63 = arith.addf %59, %62 : vector<16x2048xf32>
    %c0_35 = arith.constant 0 : index
    %c24 = arith.constant 24 : index
    %64 = vector.load %arg4[%c0_35, %c24] : memref<16x72xf32, #tpu.memory_space<vmem>>, vector<16x8xf32>
    %c0_36 = arith.constant 0 : index
    %c64_37 = arith.constant 64 : index
    %65 = vector.load %arg9[%c0_36, %c64_37] : memref<8x2304xf32, #tpu.memory_space<vmem>>, vector<8x2048xf32>
    %cst_38 = arith.constant dense<0.000000e+00> : vector<16x2048xf32>
    %66 = tpu.matmul %64, %65, %cst_38 {dimension_numbers = #tpu.dot_dimension_numbers<[1], [0], [0], [1], [0, 0, 1, 1], [], []>} : vector<16x8xf32>, vector<8x2048xf32>, vector<16x2048xf32> -> vector<16x2048xf32>
    %67 = arith.addf %63, %66 : vector<16x2048xf32>
    %c0_39 = arith.constant 0 : index
    %c32_40 = arith.constant 32 : index
    %68 = vector.load %arg4[%c0_39, %c32_40] : memref<16x72xf32, #tpu.memory_space<vmem>>, vector<16x8xf32>
    %c0_41 = arith.constant 0 : index
    %c66_42 = arith.constant 66 : index
    %69 = vector.load %arg9[%c0_41, %c66_42] : memref<8x2304xf32, #tpu.memory_space<vmem>>, vector<8x2048xf32>
    %cst_43 = arith.constant dense<0.000000e+00> : vector<16x2048xf32>
    %70 = tpu.matmul %68, %69, %cst_43 {dimension_numbers = #tpu.dot_dimension_numbers<[1], [0], [0], [1], [0, 0, 1, 1], [], []>} : vector<16x8xf32>, vector<8x2048xf32>, vector<16x2048xf32> -> vector<16x2048xf32>
    %71 = arith.addf %67, %70 : vector<16x2048xf32>
    %c0_44 = arith.constant 0 : index
    %c40 = arith.constant 40 : index
    %72 = vector.load %arg4[%c0_44, %c40] : memref<16x72xf32, #tpu.memory_space<vmem>>, vector<16x8xf32>
    %c0_45 = arith.constant 0 : index
    %c68 = arith.constant 68 : index
    %73 = vector.load %arg9[%c0_45, %c68] : memref<8x2304xf32, #tpu.memory_space<vmem>>, vector<8x2048xf32>
    %cst_46 = arith.constant dense<0.000000e+00> : vector<16x2048xf32>
    %74 = tpu.matmul %72, %73, %cst_46 {dimension_numbers = #tpu.dot_dimension_numbers<[1], [0], [0], [1], [0, 0, 1, 1], [], []>} : vector<16x8xf32>, vector<8x2048xf32>, vector<16x2048xf32> -> vector<16x2048xf32>
    %75 = arith.addf %71, %74 : vector<16x2048xf32>
    %c0_47 = arith.constant 0 : index
    %c48 = arith.constant 48 : index
    %76 = vector.load %arg4[%c0_47, %c48] : memref<16x72xf32, #tpu.memory_space<vmem>>, vector<16x8xf32>
    %c0_48 = arith.constant 0 : index
    %c128 = arith.constant 128 : index
    %77 = vector.load %arg9[%c0_48, %c128] : memref<8x2304xf32, #tpu.memory_space<vmem>>, vector<8x2048xf32>
    %cst_49 = arith.constant dense<0.000000e+00> : vector<16x2048xf32>
    %78 = tpu.matmul %76, %77, %cst_49 {dimension_numbers = #tpu.dot_dimension_numbers<[1], [0], [0], [1], [0, 0, 1, 1], [], []>} : vector<16x8xf32>, vector<8x2048xf32>, vector<16x2048xf32> -> vector<16x2048xf32>
    %79 = arith.addf %75, %78 : vector<16x2048xf32>
    %c0_50 = arith.constant 0 : index
    %c56 = arith.constant 56 : index
    %80 = vector.load %arg4[%c0_50, %c56] : memref<16x72xf32, #tpu.memory_space<vmem>>, vector<16x8xf32>
    %c0_51 = arith.constant 0 : index
    %c130 = arith.constant 130 : index
    %81 = vector.load %arg9[%c0_51, %c130] : memref<8x2304xf32, #tpu.memory_space<vmem>>, vector<8x2048xf32>
    %cst_52 = arith.constant dense<0.000000e+00> : vector<16x2048xf32>
    %82 = tpu.matmul %80, %81, %cst_52 {dimension_numbers = #tpu.dot_dimension_numbers<[1], [0], [0], [1], [0, 0, 1, 1], [], []>} : vector<16x8xf32>, vector<8x2048xf32>, vector<16x2048xf32> -> vector<16x2048xf32>
    %83 = arith.addf %79, %82 : vector<16x2048xf32>
    %c0_53 = arith.constant 0 : index
    %c64_54 = arith.constant 64 : index
    %84 = vector.load %arg4[%c0_53, %c64_54] : memref<16x72xf32, #tpu.memory_space<vmem>>, vector<16x8xf32>
    %c0_55 = arith.constant 0 : index
    %c132 = arith.constant 132 : index
    %85 = vector.load %arg9[%c0_55, %c132] : memref<8x2304xf32, #tpu.memory_space<vmem>>, vector<8x2048xf32>
    %cst_56 = arith.constant dense<0.000000e+00> : vector<16x2048xf32>
    %86 = tpu.matmul %84, %85, %cst_56 {dimension_numbers = #tpu.dot_dimension_numbers<[1], [0], [0], [1], [0, 0, 1, 1], [], []>} : vector<16x8xf32>, vector<8x2048xf32>, vector<16x2048xf32> -> vector<16x2048xf32>
    %87 = arith.addf %83, %86 : vector<16x2048xf32>
    %c0_57 = arith.constant 0 : index
    %c0_58 = arith.constant 0 : index
    %88 = vector.load %arg5[%c0_57, %c0_58] : memref<16x1xf32, #tpu.memory_space<vmem>>, vector<16x1xf32>
    %89 = vector.broadcast %88 : vector<16x1xf32> to vector<16x2048xf32>
    %90 = arith.addf %87, %89 : vector<16x2048xf32>
    %cst_59 = arith.constant 0.000000e+00 : f32
    %91 = vector.broadcast %cst_59 : f32 to vector<16x2048xf32>
    %92 = arith.maximumf %90, %91 : vector<16x2048xf32>
    %93 = vector.extract_strided_slice %92 {offsets = [0, 0], sizes = [16, 1920], strides = [1, 1]} : vector<16x2048xf32> to vector<16x1920xf32>
    %94 = vector.extract_strided_slice %92 {offsets = [0, 2], sizes = [16, 1920], strides = [1, 1]} : vector<16x2048xf32> to vector<16x1920xf32>
    %95 = arith.maximumf %93, %94 : vector<16x1920xf32>
    %96 = vector.extract_strided_slice %92 {offsets = [0, 64], sizes = [16, 1920], strides = [1, 1]} : vector<16x2048xf32> to vector<16x1920xf32>
    %97 = vector.extract_strided_slice %92 {offsets = [0, 66], sizes = [16, 1920], strides = [1, 1]} : vector<16x2048xf32> to vector<16x1920xf32>
    %98 = arith.maximumf %96, %97 : vector<16x1920xf32>
    %99 = arith.maximumf %95, %98 : vector<16x1920xf32>
    %100 = vector.extract_strided_slice %99 {offsets = [0, 0], sizes = [16, 896], strides = [1, 1]} : vector<16x1920xf32> to vector<16x896xf32>
    %101 = vector.extract_strided_slice %99 {offsets = [0, 1024], sizes = [16, 896], strides = [1, 1]} : vector<16x1920xf32> to vector<16x896xf32>
    %102 = vector.shape_cast %100 : vector<16x896xf32> to vector<16x1x896xf32>
    %103 = vector.shape_cast %101 : vector<16x896xf32> to vector<16x1x896xf32>
    %104 = tpu.concatenate %102, %103 in 1 : vector<16x1x896xf32>, vector<16x1x896xf32> -> vector<16x2x896xf32>
    %c0_60 = arith.constant 0 : index
    %c0_61 = arith.constant 0 : index
    %c0_62 = arith.constant 0 : index
    %105 = vector.load %arg6[%c0_60, %c0_61, %c0_62] : memref<16x10x896xf32, #tpu.memory_space<vmem>>, vector<16x10x896xf32>
    "tpu.trace_start"() <{level = 10 : i32, message = "cbl,cnl->cbn"}> : () -> ()
    %cst_63 = arith.constant dense<0.000000e+00> : vector<16x2x10xf32>
    %106 = tpu.matmul %104, %105, %cst_63 {dimension_numbers = #tpu.dot_dimension_numbers<[2], [2], [1], [1], [0, 0, 0, 1, 1, 1], [0], [0]>} : vector<16x2x896xf32>, vector<16x10x896xf32>, vector<16x2x10xf32> -> vector<16x2x10xf32>
    "tpu.trace_stop"() : () -> ()
    %cst_64 = arith.constant dense<0.000000e+00> : vector<2x10xf32>
    %107 = vector.multi_reduction <add>, %106, %cst_64 [0] : vector<16x2x10xf32> to vector<2x10xf32>
    %c0_65 = arith.constant 0 : index
    %c0_66 = arith.constant 0 : index
    %108 = vector.load %arg7[%c0_65, %c0_66] : memref<1x10xf32, #tpu.memory_space<vmem>>, vector<1x10xf32>
    %109 = vector.broadcast %108 : vector<1x10xf32> to vector<2x10xf32>
    %110 = arith.addf %107, %109 : vector<2x10xf32>
    %c0_67 = arith.constant 0 : index
    %c0_68 = arith.constant 0 : index
    %111 = vector.load %arg8[%c0_67, %c0_68] : memref<2x10xf32, #tpu.memory_space<vmem>>, vector<2x10xf32>
    tpu.vector_store %arg8[%c0_67, %c0_68], %110 {strides = array<i32>} : memref<2x10xf32, #tpu.memory_space<vmem>>, vector<2x10xf32>,
    return
  }
  func.func @transform_0(%arg0: i32) -> (i32, i32) {
    %c0_i32 = arith.constant 0 : i32
    %c0_i32_0 = arith.constant 0 : i32
    return %c0_i32, %arg0 : i32, i32
  }
  func.func @transform_1(%arg0: i32) -> (i32, i32) {
    %c0_i32 = arith.constant 0 : i32
    %c0_i32_0 = arith.constant 0 : i32
    %c0_i32_1 = arith.constant 0 : i32
    return %c0_i32, %c0_i32_0 : i32, i32
  }
  func.func @transform_2(%arg0: i32) -> (i32, i32) {
    %c0_i32 = arith.constant 0 : i32
    %c0_i32_0 = arith.constant 0 : i32
    %c0_i32_1 = arith.constant 0 : i32
    return %c0_i32, %c0_i32_0 : i32, i32
  }
  func.func @transform_3(%arg0: i32) -> (i32, i32) {
    %c0_i32 = arith.constant 0 : i32
    %c0_i32_0 = arith.constant 0 : i32
    %c0_i32_1 = arith.constant 0 : i32
    return %c0_i32, %c0_i32_0 : i32, i32
  }
  func.func @transform_4(%arg0: i32) -> (i32, i32) {
    %c0_i32 = arith.constant 0 : i32
    %c0_i32_0 = arith.constant 0 : i32
    %c0_i32_1 = arith.constant 0 : i32
    return %c0_i32, %c0_i32_0 : i32, i32
  }
  func.func @transform_5(%arg0: i32) -> (i32, i32, i32) {
    %c0_i32 = arith.constant 0 : i32
    %c0_i32_0 = arith.constant 0 : i32
    %c0_i32_1 = arith.constant 0 : i32
    %c0_i32_2 = arith.constant 0 : i32
    return %c0_i32, %c0_i32_0, %c0_i32_1 : i32, i32, i32
  }
  func.func @transform_6(%arg0: i32) -> (i32, i32) {
    %c0_i32 = arith.constant 0 : i32
    %c0_i32_0 = arith.constant 0 : i32
    %c0_i32_1 = arith.constant 0 : i32
    return %c0_i32, %c0_i32_0 : i32, i32
  }
  func.func @transform_7(%arg0: i32) -> (i32, i32) {
    %c0_i32 = arith.constant 0 : i32
    %c0_i32_0 = arith.constant 0 : i32
    return %arg0, %c0_i32 : i32, i32
  }
}

</mosaic_0001>

<bundles_post_ra>
// kernel: cnn_forward.1
= control target key start
LH: loop header
LB: loop body
LE: loop exit
PB: predicated region body
PF: predicated region fallthrough
CT: control target
= control target key end

     0   :  { %v21012_v0 = vlaneseq  ;;  %s21004_s0 = inlined_call_operand.vmem [shape: f32[1,2048], index: 0, kind: input, shape index: {}]   ;;  %s21005_s1 = inlined_call_operand.vmem [shape: f32[8,9], index: 1, kind: input, shape index: {}]   ;;  %s21006_s2 = inlined_call_operand.vmem [shape: f32[8,1], index: 2, kind: input, shape index: {}]   ;;  %s21007_s3 = inlined_call_operand.vmem [shape: f32[16,72], index: 3, kind: input, shape index: {}]   ;;  %s21008_s4 = inlined_call_operand.vmem [shape: f32[16,1], index: 4, kind: input, shape index: {}]   ;;  %s21009_s5 = inlined_call_operand.vmem [shape: f32[16,10,896], index: 5, kind: input, shape index: {}]   ;;  %s21010_s6 = inlined_call_operand.vmem [shape: f32[1,10], index: 6, kind: input, shape index: {}]   ;;  %s21011_s7 = inlined_call_operand.hbm [shape: f32[2,10], index: 7, kind: output, shape index: {}]  }
   0x2   :  { %v15757_v1 = vshrl.u32 %v21012_v0, 7 }
   0x4   :  { %21065 = vst [vmem:[#allocation6_spill] sm:$0xff] %v15757_v1 }
   0x5   :  { %12 = vsyncpa [#allocation4], 0  ;;  %v29_v2 = vld [vmem:[%s21004_s0] sm:$0xff]  ;;  %v15763_v3 = vsub.s32 1, %v15757_v1  ;;  %v15766_v4 = vsub.s32 0, %v15757_v1  ;;  %v15769_v5 = vsub.s32 2, %v15757_v1 }
   0x6   :  { %s15694_s26 = smov 127   ;;  %v15785_v9 = vsub.s32 3, %v15757_v1  ;;  %s15695_s27 = smov 126   ;;  %v15795_v11 = vsub.s32 4, %v15757_v1  ;;  %v15817_v13 = vsub.s32 5, %v15757_v1  ;;  %v15827_v15 = vsub.s32 6, %v15757_v1 }
   0x7   :  { %21066 = vst [vmem:[#allocation7_spill] sm:$0xff] %v15763_v3  ;;  %21067 = vst [vmem:[#allocation8_spill] sm:$0xff] %v15766_v4  ;;  %v15772_v6 = vrot.slane %v29_v2, %v15763_v3  ;;  %v15775_v7 = vrot.slane %v29_v2, %v15766_v4  ;;  %v15782_v8 = vrot.slane %v29_v2, %v15769_v5  ;;  %s15696_s28 = smov 96   ;;  %s15697_s29 = smov 95   ;;  %v21013_v17 = vsub.s32 7, %v15757_v1  ;;  %v15872_v19 = vld [vmem:[%s21004_s0 + $0x8] sm:$0xff] }
   0x8   :  { %21068 = vst [vmem:[#allocation9_spill] sm:$0xff] %v15769_v5  ;;  %21069 = vst [vmem:[#allocation10_spill] sm:$0xff] %v15785_v9  ;;  %v15792_v10 = vrot.slane %v29_v2, %v15785_v9  ;;  %v15802_v12 = vrot.slane %v29_v2, %v15795_v11  ;;  %v15824_v14 = vrot.slane %v29_v2, %v15817_v13  ;;  %s15698_s30 = smov 94   ;;  %s15699_s8 = smov 64   ;;  %v21014_v21 = vmov 0.0  }
   0x9   :  { %176 = vrot.lane.b32.xlu0 %v15772_v6, %s15694_s26  ;;  %174 = vrot.lane.b32.xlu1 %v15775_v7, %s15694_s26  ;;  %21070 = vst [vmem:[#allocation11_spill] sm:$0xff] %v15795_v11  ;;  %21071 = vst [vmem:[#allocation12_spill] sm:$0xff] %v15817_v13  ;;  %v15834_v16 = vrot.slane %v29_v2, %v15827_v15  ;;  %s15700_s9 = smov 62   ;;  %v15867_v18 = vrot.slane %v29_v2, %v21013_v17  ;;  %s15701_s0 = smov 63   ;;  %v15703_v50 = vmov 0   ;;  %vm21035_vm0 = vcmask 506880  }
   0xa   :  { %21072 = vst [vmem:[#allocation13_spill] sm:$0xff] %v15827_v15  ;;  %v15880_v20 = vrot.slane %v15872_v19, %v15766_v4  ;;  %1899 = vst [vmem:[#allocation2 + $0x80] sm:$0xff] %v21014_v21  ;;  %880 = vmatprep.mubr.f32.mxu0 %v21014_v21  ;;  %951 = vmatprep.mubr.f32.mxu1 %v21014_v21  ;;  %v15987_v34 = vrot.slane %v15872_v19, %v15763_v3  ;;  %vm21034_vm1 = vcmask 1040384   ;;  %vm21037_vm2 = vcmask 1031168   ;;  %s15706_s17 = smov 120   ;;  %s15708_s20 = smov 112  }
   0xb   :  { %21073 = vst [vmem:[#allocation14_spill] sm:$0xff] %v15867_v18  ;;  %v15991_v35 = vrot.slane %v15872_v19, %v15769_v5  ;;  %v16019_v42 = vrot.slane %v15872_v19, %v15785_v9  ;;  %v16023_v43 = vrot.slane %v15872_v19, %v15795_v11  ;;  %15639 = vset.pattern.permute.xlu0 %v15703_v50  ;;  %vm206_vm3 = vcmask 1039360   ;;  %s15709_s21 = smov 104   ;;  %s15710_s22 = smov 60  }
   0xc   :  { %21074 = vst [vmem:[#allocation15_spill] sm:$0xff] %v15880_v20  ;;  %21075 = vst [vmem:[#allocation16_spill] sm:$0xff] %v15987_v34  ;;  %15650 = vset.pattern.permute.xlu1 %v15703_v50  ;;  %vm21039_vm4 = vcmask 785408   ;;  %vm395_vm5 = vcmask 777216   ;;  %vm679_vm6 = vcmask 1041408   ;;  %vm458_vm7 = vcmask 769024  }
   0xd   :  { %178 = vrot.lane.b32.xlu0 %v15782_v8, %s15694_s26  ;;  %239 = vrot.lane.b32.xlu1 %v15772_v6, %s15695_s27  ;;  %21076 = vst [vmem:[#allocation17_spill] sm:$0xff] %v15991_v35  ;;  %vm695_vm8 = vcmask 1042432   ;;  %vm21036_vm9 = vcmask 523264   ;;  %vm711_vm10 = vcmask 1043456   ;;  %vm584_vm11 = vcmask 515072   ;;  %s15711_s23 = smov 88  }
   0xe   :  { %vm21030_vm12 = vcmask 1044480   ;;  %vm743_vm13 = vcmask 1045504   ;;  %vm759_vm14 = vcmask 1046528   ;;  %vm21033_vm15 = vcmask 72704   ;;  %s15712_s24 = smov 80   ;;  %s15713_s25 = smov 72  }
   0xf   :  { %s15715_s11 = smov [#allocation3]  }
  0x11   :  { %241 = vrot.lane.b32.xlu0 %v15782_v8, %s15695_s27  ;;  %180 = vrot.lane.b32.xlu1 %v15792_v10, %s15694_s26 }
  0x15   :  { %182 = vrot.lane.b32.xlu0 %v15802_v12, %s15694_s26  ;;  %237 = vrot.lane.b32.xlu1 %v15775_v7, %s15695_s27 }
  0x19   :  { %302 = vrot.lane.b32.xlu0 %v15772_v6, %s15696_s28  ;;  %304 = vrot.lane.b32.xlu1 %v15782_v8, %s15696_s28 }
  0x1d   :  { %243 = vrot.lane.b32.xlu0 %v15792_v10, %s15695_s27  ;;  %245 = vrot.lane.b32.xlu1 %v15802_v12, %s15695_s27 }
  0x21   :  { %300 = vrot.lane.b32.xlu0 %v15775_v7, %s15696_s28  ;;  %365 = vrot.lane.b32.xlu1 %v15772_v6, %s15697_s29 }
  0x25   :  { %367 = vrot.lane.b32.xlu0 %v15782_v8, %s15697_s29  ;;  %184 = vrot.lane.b32.xlu1 %v15824_v14, %s15694_s26 }
  0x29   :  { %186 = vrot.lane.b32.xlu0 %v15834_v16, %s15694_s26  ;;  %306 = vrot.lane.b32.xlu1 %v15792_v10, %s15696_s28 }
  0x2d   :  { %308 = vrot.lane.b32.xlu0 %v15802_v12, %s15696_s28  ;;  %363 = vrot.lane.b32.xlu1 %v15775_v7, %s15697_s29 }
  0x31   :  { %428 = vrot.lane.b32.xlu0 %v15772_v6, %s15698_s30  ;;  %430 = vrot.lane.b32.xlu1 %v15782_v8, %s15698_s30 }
  0x35   :  { %247 = vrot.lane.b32.xlu0 %v15824_v14, %s15695_s27  ;;  %249 = vrot.lane.b32.xlu1 %v15834_v16, %s15695_s27 }
  0x39   :  { %369 = vrot.lane.b32.xlu0 %v15792_v10, %s15697_s29  ;;  %371 = vrot.lane.b32.xlu1 %v15802_v12, %s15697_s29 }
  0x3d   :  { %426 = vrot.lane.b32.xlu0 %v15775_v7, %s15698_s30  ;;  %491 = vrot.lane.b32.xlu1 %v15772_v6, %s15699_s8 }
  0x41   :  { %493 = vrot.lane.b32.xlu0 %v15782_v8, %s15699_s8  ;;  %617 = vrot.lane.b32.xlu1 %v15772_v6, %s15700_s9 }
  0x45   :  { %619 = vrot.lane.b32.xlu0 %v15782_v8, %s15700_s9  ;;  %188 = vrot.lane.b32.xlu1 %v15867_v18, %s15694_s26 }
  0x49   :  { %190 = vrot.lane.b32.xlu0 %v15880_v20, %s15694_s26  ;;  %310 = vrot.lane.b32.xlu1 %v15824_v14, %s15696_s28 }
  0x4d   :  { %312 = vrot.lane.b32.xlu0 %v15834_v16, %s15696_s28  ;;  %432 = vrot.lane.b32.xlu1 %v15792_v10, %s15698_s30 }
  0x51   :  { %434 = vrot.lane.b32.xlu0 %v15802_v12, %s15698_s30  ;;  %489 = vrot.lane.b32.xlu1 %v15775_v7, %s15699_s8 }
  0x55   :  { %554 = vrot.lane.b32.xlu0 %v15772_v6, %s15701_s0  ;;  %556 = vrot.lane.b32.xlu1 %v15782_v8, %s15701_s0 }
  0x59   :  { %615 = vrot.lane.b32.xlu0 %v15775_v7, %s15700_s9  ;;  %251 = vrot.lane.b32.xlu1 %v15867_v18, %s15695_s27 }
  0x5d   :  { %253 = vrot.lane.b32.xlu0 %v15880_v20, %s15695_s27  ;;  %373 = vrot.lane.b32.xlu1 %v15824_v14, %s15697_s29 }
  0x61   :  { %375 = vrot.lane.b32.xlu0 %v15834_v16, %s15697_s29  ;;  %495 = vrot.lane.b32.xlu1 %v15792_v10, %s15699_s8 }
  0x65   :  { %497 = vrot.lane.b32.xlu0 %v15802_v12, %s15699_s8  ;;  %552 = vrot.lane.b32.xlu1 %v15775_v7, %s15701_s0 }
  0x69   :  { %621 = vrot.lane.b32.xlu0 %v15792_v10, %s15700_s9  ;;  %623 = vrot.lane.b32.xlu1 %v15802_v12, %s15700_s9 }
  0x6d   :  { %314 = vrot.lane.b32.xlu0 %v15867_v18, %s15696_s28  ;;  %316 = vrot.lane.b32.xlu1 %v15880_v20, %s15696_s28 }
  0x71   :  { %436 = vrot.lane.b32.xlu0 %v15824_v14, %s15698_s30  ;;  %438 = vrot.lane.b32.xlu1 %v15834_v16, %s15698_s30 }
  0x75   :  { %558 = vrot.lane.b32.xlu0 %v15792_v10, %s15701_s0  ;;  %560 = vrot.lane.b32.xlu1 %v15802_v12, %s15701_s0 }
  0x79   :  { %377 = vrot.lane.b32.xlu0 %v15867_v18, %s15697_s29  ;;  %379 = vrot.lane.b32.xlu1 %v15880_v20, %s15697_s29 }
  0x7b   :  { %v15937_v22 = vpop.permute.xlu0 %176  ;;  %v15939_v23 = vpop.permute.xlu1 %174 }
  0x7d   :  { %499 = vrot.lane.b32.xlu0 %v15824_v14, %s15699_s8  ;;  %501 = vrot.lane.b32.xlu1 %v15834_v16, %s15699_s8 }
  0x7f   :  { %v15945_v24 = vpop.permute.xlu0 %178  ;;  %v15947_v25 = vpop.permute.xlu1 %239 }
  0x81   :  { %625 = vrot.lane.b32.xlu0 %v15824_v14, %s15700_s9  ;;  %627 = vrot.lane.b32.xlu1 %v15834_v16, %s15700_s9 }
  0x83   :  { %v15953_v26 = vpop.permute.xlu0 %241  ;;  %v15955_v27 = vpop.permute.xlu1 %180 }
  0x84   :  { %v271_v0 = vsel %vm21037_vm2, %v15947_v25, %v15953_v26 }
  0x85   :  { %440 = vrot.lane.b32.xlu0 %v15867_v18, %s15698_s30  ;;  %442 = vrot.lane.b32.xlu1 %v15880_v20, %s15698_s30 }
  0x87   :  { %v15961_v28 = vpop.permute.xlu0 %182  ;;  %v15963_v29 = vpop.permute.xlu1 %237 }
  0x89   :  { %562 = vrot.lane.b32.xlu0 %v15824_v14, %s15701_s0  ;;  %564 = vrot.lane.b32.xlu1 %v15834_v16, %s15701_s0 }
  0x8b   :  { %v15969_v30 = vpop.permute.xlu0 %302  ;;  %v15971_v31 = vpop.permute.xlu1 %304 }
  0x8c   :  { %v334_v17 = vsel %vm21039_vm4, %v15969_v30, %v15971_v31 }
  0x8d   :  { %503 = vrot.lane.b32.xlu0 %v15867_v18, %s15699_s8  ;;  %505 = vrot.lane.b32.xlu1 %v15880_v20, %s15699_s8 }
  0x8f   :  { %v15977_v32 = vpop.permute.xlu0 %243  ;;  %v15979_v33 = vpop.permute.xlu1 %245 }
  0x91   :  { %629 = vrot.lane.b32.xlu0 %v15867_v18, %s15700_s9  ;;  %631 = vrot.lane.b32.xlu1 %v15880_v20, %s15700_s9 }
  0x93   :  { %v15993_v36 = vpop.permute.xlu0 %300  ;;  %v15995_v37 = vpop.permute.xlu1 %365 }
  0x95   :  { %192 = vrot.lane.b32.xlu0 %v15987_v34, %s15694_s26  ;;  %194 = vrot.lane.b32.xlu1 %v15991_v35, %s15694_s26 }
  0x97   :  { %v16001_v38 = vpop.permute.xlu0 %367  ;;  %v16003_v39 = vpop.permute.xlu1 %184 }
  0x98   :  { %v397_v4 = vsel %vm395_vm5, %v15995_v37, %v16001_v38 }
  0x99   :  { %566 = vrot.lane.b32.xlu0 %v15867_v18, %s15701_s0  ;;  %568 = vrot.lane.b32.xlu1 %v15880_v20, %s15701_s0 }
  0x9b   :  { %v16009_v40 = vpop.permute.xlu0 %186  ;;  %v16011_v41 = vpop.permute.xlu1 %306 }
  0x9d   :  { %255 = vrot.lane.b32.xlu0 %v15987_v34, %s15695_s27  ;;  %257 = vrot.lane.b32.xlu1 %v15991_v35, %s15695_s27 }
  0x9f   :  { %v16025_v44 = vpop.permute.xlu0 %308  ;;  %v16027_v45 = vpop.permute.xlu1 %363 }
  0xa1   :  { %196 = vrot.lane.b32.xlu0 %v16019_v42, %s15694_s26  ;;  %198 = vrot.lane.b32.xlu1 %v16023_v43, %s15694_s26 }
  0xa3   :  { %v16033_v46 = vpop.permute.xlu0 %428  ;;  %v16035_v47 = vpop.permute.xlu1 %430 }
  0xa4   :  { %v460_v3 = vsel %vm458_vm7, %v16033_v46, %v16035_v47 }
  0xa5   :  { %318 = vrot.lane.b32.xlu0 %v15987_v34, %s15696_s28  ;;  %320 = vrot.lane.b32.xlu1 %v15991_v35, %s15696_s28 }
  0xa7   :  { %v16041_v48 = vpop.permute.xlu0 %247  ;;  %v16043_v49 = vpop.permute.xlu1 %249 }
  0xa9   :  { %259 = vrot.lane.b32.xlu0 %v16019_v42, %s15695_s27  ;;  %261 = vrot.lane.b32.xlu1 %v16023_v43, %s15695_s27 }
  0xab   :  { %v16049_v51 = vpop.permute.xlu0 %369  ;;  %v16051_v52 = vpop.permute.xlu1 %371 }
  0xad   :  { %381 = vrot.lane.b32.xlu0 %v15987_v34, %s15697_s29  ;;  %383 = vrot.lane.b32.xlu1 %v15991_v35, %s15697_s29 }
  0xaf   :  { %v16057_v53 = vpop.permute.xlu0 %426  ;;  %v16059_v54 = vpop.permute.xlu1 %491 }
  0xb1   :  { %322 = vrot.lane.b32.xlu0 %v16019_v42, %s15696_s28  ;;  %324 = vrot.lane.b32.xlu1 %v16023_v43, %s15696_s28 }
  0xb3   :  { %v16065_v55 = vpop.permute.xlu0 %493  ;;  %v618_v56 = vpop.permute.xlu1 %617 }
  0xb5   :  { %444 = vrot.lane.b32.xlu0 %v15987_v34, %s15698_s30  ;;  %446 = vrot.lane.b32.xlu1 %v15991_v35, %s15698_s30 }
  0xb7   :  { %v16071_v57 = vpop.permute.xlu0 %619  ;;  %v16073_v58 = vpop.permute.xlu1 %188 }
  0xb8   :  { %v649_v59 = vsel %vm21035_vm0, %v618_v56, %v16071_v57 }
  0xb9   :  { %385 = vrot.lane.b32.xlu0 %v16019_v42, %s15697_s29  ;;  %387 = vrot.lane.b32.xlu1 %v16023_v43, %s15697_s29 }
  0xba   :  { %15279 = vmatprep.subr.msk.mxu0 %vm21034_vm1, %v649_v59  ;;  %v208_v59 = vsel %vm206_vm3, %v15937_v22, %v15945_v24 }
  0xbb   :  { %v16082_v60 = vpop.permute.xlu0 %190  ;;  %v16084_v61 = vpop.permute.xlu1 %310  ;;  %v665_v5 = vsel %vm21034_vm1, %v15772_v6, %v208_v59  ;;  %v523_v59 = vsel %vm21036_vm9, %v16059_v54, %v16065_v55 }
  0xbc   :  { %v681_v9 = vsel %vm679_vm6, %v665_v5, %v271_v0 }
  0xbd   :  { %507 = vrot.lane.b32.xlu0 %v15987_v34, %s15699_s8  ;;  %509 = vrot.lane.b32.xlu1 %v15991_v35, %s15699_s8  ;;  %v697_v6 = vsel %vm695_vm8, %v681_v9, %v334_v17 }
  0xbe   :  { %v713_v0 = vsel %vm711_vm10, %v697_v6, %v397_v4 }
  0xbf   :  { %v16090_v62 = vpop.permute.xlu0 %312  ;;  %v16092_v63 = vpop.permute.xlu1 %432 }
  0xc1   :  { %633 = vrot.lane.b32.xlu0 %v15987_v34, %s15700_s9  ;;  %635 = vrot.lane.b32.xlu1 %v15991_v35, %s15700_s9 }
  0xc3   :  { %v16098_v2 = vpop.permute.xlu0 %434  ;;  %v490_v50 = vpop.permute.xlu1 %489 }
  0xc5   :  { %448 = vrot.lane.b32.xlu0 %v16019_v42, %s15698_s30  ;;  %450 = vrot.lane.b32.xlu1 %v16023_v43, %s15698_s30 }
  0xc7   :  { %v555_v21 = vpop.permute.xlu0 %554  ;;  %v16113_v11 = vpop.permute.xlu1 %556 }
  0xc8   :  { %v586_v5 = vsel %vm584_vm11, %v555_v21, %v16113_v11 }
  0xc9   :  { %570 = vrot.lane.b32.xlu0 %v15987_v34, %s15701_s0  ;;  %572 = vrot.lane.b32.xlu1 %v15991_v35, %s15701_s0  ;;  %v729_v34 = vsel %vm21030_vm12, %v713_v0, %v460_v3  ;;  %v207_v3 = vsel %vm206_vm3, %v15939_v23, %v15937_v22  ;;  %v333_v22 = vsel %vm21039_vm4, %v15993_v36, %v15969_v30 }
  0xca   :  { %v745_v9 = vsel %vm743_vm13, %v729_v34, %v523_v59  ;;  %v16162_v34 = vrot.slane %v15872_v19, %v15817_v13  ;;  %v664_v23 = vsel %vm21034_vm1, %v15775_v7, %v207_v3  ;;  %v459_v0 = vsel %vm458_vm7, %v16057_v53, %v16033_v46 }
  0xcb   :  { %v616_v20 = vpop.permute.xlu0 %615  ;;  %v16135_v18 = vpop.permute.xlu1 %251  ;;  %v761_v4 = vsel %vm759_vm14, %v745_v9, %v586_v5  ;;  %v522_v30 = vsel %vm21036_vm9, %v490_v50, %v16059_v54  ;;  %v16198_v54 = vld [vmem:[%s21005_s1] sm:$0xff] }
  0xcc   :  { %v648_v35 = vsel %vm21035_vm0, %v616_v20, %v618_v56  ;;  %v270_v20 = vsel %vm21037_vm2, %v15963_v29, %v15947_v25  ;;  %v396_v25 = vsel %vm395_vm5, %v16027_v45, %v15995_v37 }
  0xcd   :  { %511 = vrot.lane.b32.xlu0 %v16019_v42, %s15699_s8  ;;  %513 = vrot.lane.b32.xlu1 %v16023_v43, %s15699_s8  ;;  %v680_v59 = vsel %vm679_vm6, %v664_v23, %v270_v20  ;;  %v21077_v20 = vmov 0.0  }
  0xce   :  { %15280 = vmatpush1.msk.msra.mxu0 %vm21034_vm1, %v648_v35  ;;  %v16166_v35 = vrot.slane %v15872_v19, %v15827_v15  ;;  %v696_v5 = vsel %vm695_vm8, %v680_v59, %v333_v22  ;;  %v209_v22 = vsel %vm206_vm3, %v15945_v24, %v15955_v27  ;;  %v272_v59 = vsel %vm21037_vm2, %v15953_v26, %v15977_v32 }
  0xcf   :  { %846 = vmatprep.subr.mxu0 %v761_v4  ;;  %v16146_v17 = vpop.permute.xlu0 %253  ;;  %v16148_v6 = vpop.permute.xlu1 %373  ;;  %v712_v7 = vsel %vm711_vm10, %v696_v5, %v396_v25  ;;  %v335_v24 = vsel %vm21039_vm4, %v15971_v31, %v16011_v41  ;;  %v666_v26 = vsel %vm21034_vm1, %v15782_v8, %v209_v22 }
  0xd0   :  { %v728_v36 = vsel %vm21030_vm12, %v712_v7, %v459_v0  ;;  %v273_v0 = vsel %vm21037_vm2, %v15977_v32, %v15979_v33  ;;  %v336_v32 = vsel %vm21039_vm4, %v16011_v41, %v16025_v44  ;;  %v398_v7 = vsel %vm395_vm5, %v16001_v38, %v16049_v51 }
  0xd1   :  { %637 = vrot.lane.b32.xlu0 %v16019_v42, %s15700_s9  ;;  %639 = vrot.lane.b32.xlu1 %v16023_v43, %s15700_s9  ;;  %v744_v53 = vsel %vm743_vm13, %v728_v36, %v522_v30  ;;  %v682_v30 = vsel %vm679_vm6, %v666_v26, %v272_v59 }
  0xd2   :  { %v698_v41 = vsel %vm695_vm8, %v682_v30, %v335_v24 }
  0xd3   :  { %v16176_v29 = vpop.permute.xlu0 %375  ;;  %v496_v56 = vpop.permute.xlu1 %495 }
  0xd5   :  { %200 = vrot.lane.b32.xlu0 %v16162_v34, %s15694_s26  ;;  %202 = vrot.lane.b32.xlu1 %v16166_v35, %s15694_s26 }
  0xd7   :  { %v16191_v37 = vpop.permute.xlu0 %497  ;;  %v553_v45 = vpop.permute.xlu1 %552 }
  0xd8   :  { %v585_v46 = vsel %vm584_vm11, %v553_v45, %v555_v21 }
  0xd9   :  { %574 = vrot.lane.b32.xlu0 %v16019_v42, %s15701_s0  ;;  %576 = vrot.lane.b32.xlu1 %v16023_v43, %s15701_s0  ;;  %v760_v50 = vsel %vm759_vm14, %v744_v53, %v585_v46  ;;  %v462_v46 = vsel %vm458_vm7, %v16092_v63, %v16098_v2  ;;  %v525_v53 = vsel %vm21036_vm9, %v496_v56, %v16191_v37 }
  0xda   :  { %847 = vmatpush1.msra.mxu0 %v760_v50 }
  0xdb   :  { %v622_v9 = vpop.permute.xlu0 %621  ;;  %v16205_v4 = vpop.permute.xlu1 %623  ;;  %15281 = vmatmul.mubr.msk.f32.vlgmr.msra.gmra.mxu0 %vm21033_vm15, %v16198_v54 }
  0xdc   :  { %v651_v21 = vsel %vm21035_vm0, %v622_v9, %v16205_v4  ;;  %v650_v3 = vsel %vm21035_vm0, %v16071_v57, %v622_v9  ;;  %1022 = vmatprep.mubr.f32.mxu0 %v21077_v20  ;;  %v210_v57 = vsel %vm206_vm3, %v15955_v27, %v15961_v28  ;;  %v21078_v27 = vsub.s32 7, %v15757_v1 }
  0xdd   :  { %263 = vrot.lane.b32.xlu0 %v16162_v34, %s15695_s27  ;;  %265 = vrot.lane.b32.xlu1 %v16166_v35, %s15695_s27  ;;  %v667_v31 = vsel %vm21034_vm1, %v15792_v10, %v210_v57  ;;  %v461_v10 = vsel %vm458_vm7, %v16035_v47, %v16092_v63  ;;  %v714_v47 = vsel %vm711_vm10, %v698_v41, %v398_v7 }
  0xde   :  { %15282 = vmatprep.subr.msk.mxu1 %vm21034_vm1, %v651_v21  ;;  %v16246_v5 = vrot.slane %v15872_v19, %v21078_v27  ;;  %v399_v19 = vsel %vm395_vm5, %v16049_v51, %v16051_v52  ;;  %v683_v8 = vsel %vm679_vm6, %v667_v31, %v273_v0  ;;  %v524_v51 = vsel %vm21036_vm9, %v16065_v55, %v496_v56 }
  0xdf   :  { %15283 = vmatpush1.msk.msra.mxu1 %vm21034_vm1, %v650_v3  ;;  %v16223_v23 = vpop.permute.xlu0 %314  ;;  %v16225_v25 = vpop.permute.xlu1 %316  ;;  %v699_v38 = vsel %vm695_vm8, %v683_v8, %v336_v32  ;;  %v730_v63 = vsel %vm21030_vm12, %v714_v47, %v461_v10  ;;  %v211_v32 = vsel %vm206_vm3, %v15961_v28, %v16003_v39  ;;  %v212_v7 = vsel %vm206_vm3, %v16003_v39, %v16009_v40 }
  0xe0   :  { %v715_v50 = vsel %vm711_vm10, %v699_v38, %v399_v19  ;;  %v746_v57 = vsel %vm743_vm13, %v730_v63, %v524_v51  ;;  %v274_v19 = vsel %vm21037_vm2, %v15979_v33, %v16041_v48  ;;  %v275_v10 = vsel %vm21037_vm2, %v16041_v48, %v16043_v49 }
  0xe1   :  { %326 = vrot.lane.b32.xlu0 %v16162_v34, %s15696_s28  ;;  %328 = vrot.lane.b32.xlu1 %v16166_v35, %s15696_s28  ;;  %v731_v9 = vsel %vm21030_vm12, %v715_v50, %v462_v46  ;;  %v337_v28 = vsel %vm21039_vm4, %v16025_v44, %v16084_v61  ;;  %v668_v33 = vsel %vm21034_vm1, %v15802_v12, %v211_v32 }
  0xe2   :  { %v747_v22 = vsel %vm743_vm13, %v731_v9, %v525_v53  ;;  %v338_v39 = vsel %vm21039_vm4, %v16084_v61, %v16090_v62  ;;  %v669_v48 = vsel %vm21034_vm1, %v15824_v14, %v212_v7  ;;  %v684_v44 = vsel %vm679_vm6, %v668_v33, %v274_v19 }
  0xe3   :  { %v437_v36 = vpop.permute.xlu0 %436  ;;  %v16262_v45 = vpop.permute.xlu1 %438  ;;  %v401_v46 = vsel %vm395_vm5, %v16148_v6, %v16176_v29  ;;  %v685_v61 = vsel %vm679_vm6, %v669_v48, %v275_v10  ;;  %v700_v51 = vsel %vm695_vm8, %v684_v44, %v337_v28  ;;  %v214_v7 = vsel %vm206_vm3, %v16073_v58, %v16082_v60 }
  0xe4   :  { %v463_v14 = vsel %vm458_vm7, %v16098_v2, %v437_v36  ;;  %v464_v53 = vsel %vm458_vm7, %v437_v36, %v16262_v45  ;;  %v277_v10 = vsel %vm21037_vm2, %v16135_v18, %v16146_v17 }
  0xe5   :  { %204 = vrot.lane.b32.xlu0 %v16246_v5, %s15694_s26  ;;  %389 = vrot.lane.b32.xlu1 %v16162_v34, %s15697_s29 }
  0xe7   :  { %v559_v21 = vpop.permute.xlu0 %558  ;;  %v561_v3 = vpop.permute.xlu1 %560 }
  0xe8   :  { %v587_v55 = vsel %vm584_vm11, %v16113_v11, %v559_v21  ;;  %v588_v56 = vsel %vm584_vm11, %v559_v21, %v561_v3 }
  0xe9   :  { %391 = vrot.lane.b32.xlu0 %v16166_v35, %s15697_s29  ;;  %267 = vrot.lane.b32.xlu1 %v16246_v5, %s15695_s27  ;;  %v763_v59 = vsel %vm759_vm14, %v747_v22, %v588_v56  ;;  %v762_v0 = vsel %vm759_vm14, %v746_v57, %v587_v55 }
  0xea   :  { %917 = vmatprep.subr.mxu1 %v763_v59 }
  0xeb   :  { %v16296_v24 = vpop.permute.xlu0 %377  ;;  %v16298_v11 = vpop.permute.xlu1 %379  ;;  %918 = vmatpush1.msra.mxu1 %v762_v0 }
  0xec   :  { %15284 = vmatmul.mubr.msk.f32.vlgmr.msra.gmra.mxu1 %vm21033_vm15, %v16198_v54 }
  0xed   :  { %452 = vrot.lane.b32.xlu0 %v16162_v34, %s15698_s30  ;;  %454 = vrot.lane.b32.xlu1 %v16166_v35, %s15698_s30 }
  0xee   :  { %1093 = vmatprep.mubr.f32.mxu1 %v21077_v20 }
  0xef   :  { %v500_v27 = vpop.permute.xlu0 %499  ;;  %v16307_v26 = vpop.permute.xlu1 %501 }
  0xf0   :  { %v527_v47 = vsel %vm21036_vm9, %v500_v27, %v16307_v26 }
  0xf1   :  { %330 = vrot.lane.b32.xlu0 %v16246_v5, %s15696_s28  ;;  %515 = vrot.lane.b32.xlu1 %v16162_v34, %s15699_s8 }
  0xf3   :  { %v626_v31 = vpop.permute.xlu0 %625  ;;  %v628_v30 = vpop.permute.xlu1 %627 }
  0xf4   :  { %v652_v8 = vsel %vm21035_vm0, %v16205_v4, %v626_v31  ;;  %v653_v41 = vsel %vm21035_vm0, %v626_v31, %v628_v30  ;;  %v400_v4 = vsel %vm395_vm5, %v16051_v52, %v16148_v6  ;;  %v701_v52 = vsel %vm695_vm8, %v685_v61, %v338_v39 }
  0xf5   :  { %517 = vrot.lane.b32.xlu0 %v16166_v35, %s15699_s8  ;;  %641 = vrot.lane.b32.xlu1 %v16162_v34, %s15700_s9  ;;  %v526_v6 = vsel %vm21036_vm9, %v16191_v37, %v500_v27  ;;  %v716_v50 = vsel %vm711_vm10, %v700_v51, %v400_v4  ;;  %v717_v2 = vsel %vm711_vm10, %v701_v52, %v401_v46 }
  0xf6   :  { %15285 = vmatprep.subr.msk.mxu0 %vm21034_vm1, %v653_v41  ;;  %v732_v36 = vsel %vm21030_vm12, %v716_v50, %v463_v14  ;;  %v733_v63 = vsel %vm21030_vm12, %v717_v2, %v464_v53  ;;  %v213_v31 = vsel %vm206_vm3, %v16009_v40, %v16073_v58  ;;  %v276_v41 = vsel %vm21037_vm2, %v16043_v49, %v16135_v18  ;;  %v776_v18 = vld [vmem:[%s21006_s2] sm:$0xff]  ;;  %s15705_s2 = smov 66  }
  0xf7   :  { %15286 = vmatpush1.msk.msra.mxu0 %vm21034_vm1, %v652_v8  ;;  %v441_v12 = vpop.permute.xlu0 %440  ;;  %v16351_v38 = vpop.permute.xlu1 %442  ;;  %v749_v56 = vsel %vm743_vm13, %v733_v63, %v527_v47  ;;  %v748_v22 = vsel %vm743_vm13, %v732_v36, %v526_v6  ;;  %v339_v40 = vsel %vm21039_vm4, %v16090_v62, %v16223_v23  ;;  %v340_v58 = vsel %vm21039_vm4, %v16223_v23, %v16225_v25 }
  0xf8   :  { %v670_v49 = vsel %vm21034_vm1, %v15834_v16, %v213_v31  ;;  %v402_v62 = vsel %vm395_vm5, %v16176_v29, %v16296_v24  ;;  %v403_v23 = vsel %vm395_vm5, %v16296_v24, %v16298_v11  ;;  %v465_v48 = vsel %vm458_vm7, %v16262_v45, %v441_v12 }
  0xf9   :  { %643 = vrot.lane.b32.xlu0 %v16166_v35, %s15700_s9  ;;  %393 = vrot.lane.b32.xlu1 %v16246_v5, %s15697_s29  ;;  %v686_v39 = vsel %vm679_vm6, %v670_v49, %v276_v41  ;;  %v466_v44 = vsel %vm458_vm7, %v441_v12, %v16351_v38 }
  0xfa   :  { %v702_v29 = vsel %vm695_vm8, %v686_v39, %v339_v40 }
  0xfb   :  { %v563_v9 = vpop.permute.xlu0 %562  ;;  %v565_v21 = vpop.permute.xlu1 %564  ;;  %v718_v61 = vsel %vm711_vm10, %v702_v29, %v402_v62 }
  0xfc   :  { %v589_v37 = vsel %vm584_vm11, %v561_v3, %v563_v9  ;;  %v590_v55 = vsel %vm584_vm11, %v563_v9, %v565_v21  ;;  %v734_v45 = vsel %vm21030_vm12, %v718_v61, %v465_v48 }
  0xfd   :  { %578 = vrot.lane.b32.xlu0 %v16162_v34, %s15701_s0  ;;  %580 = vrot.lane.b32.xlu1 %v16166_v35, %s15701_s0  ;;  %v765_v57 = vsel %vm759_vm14, %v749_v56, %v590_v55  ;;  %v764_v59 = vsel %vm759_vm14, %v748_v22, %v589_v37 }
  0xfe   :  { %988 = vmatprep.subr.mxu0 %v765_v57 }
  0xff   :  { %v504_v0 = vpop.permute.xlu0 %503  ;;  %v16382_v27 = vpop.permute.xlu1 %505  ;;  %989 = vmatpush1.msra.mxu0 %v764_v59 }
 0x100   :  { %15287 = vmatmul.mubr.msk.f32.vlgmr.msra.gmra.mxu0 %vm21033_vm15, %v16198_v54  ;;  %v528_v24 = vsel %vm21036_vm9, %v16307_v26, %v504_v0  ;;  %v529_v46 = vsel %vm21036_vm9, %v504_v0, %v16382_v27 }
 0x101   :  { %456 = vrot.lane.b32.xlu0 %v16246_v5, %s15698_s30  ;;  %519 = vrot.lane.b32.xlu1 %v16246_v5, %s15699_s8  ;;  %v750_v47 = vsel %vm743_vm13, %v734_v45, %v528_v24 }
 0x102   :  { %1164 = vmatprep.mubr.f32.mxu0 %v21077_v20 }
 0x103   :  { %v630_v3 = vpop.permute.xlu0 %629  ;;  %v16391_v32 = vpop.permute.xlu1 %631 }
 0x104   :  { %v654_v19 = vsel %vm21035_vm0, %v628_v30, %v630_v3  ;;  %v655_v8 = vsel %vm21035_vm0, %v630_v3, %v16391_v32  ;;  %v21079_v30 = vld [vmem:[#allocation14_spill] sm:$0xff] }
 0x105   :  { %645 = vrot.lane.b32.xlu0 %v16246_v5, %s15700_s9  ;;  %582 = vrot.lane.b32.xlu1 %v16246_v5, %s15701_s0  ;;  %v671_v5 = vsel %vm21034_vm1, %v21079_v30, %v214_v7  ;;  %s15271_s0 = sshll.u32 %s15715_s11, 4  ;;  %s15272_s0 = int_to_ptr.vmem [resolvable:$true] %s15271_s0 }
 0x106   :  { %15288 = vmatprep.subr.msk.mxu1 %vm21034_vm1, %v655_v8  ;;  %v687_v16 = vsel %vm679_vm6, %v671_v5, %v277_v10  ;;  %s15672_s12 = scalar_lea.vmem %s15272_s0, 32  ;;  %p15677_p1 = scmp.lt.s32.totalorder %s15272_s0, %s15272_s0 }
 0x107   :  { %15289 = vmatpush1.msk.msra.mxu1 %vm21034_vm1, %v654_v19  ;;  %v193_v28 = vpop.permute.xlu0 %192  ;;  %v16433_v33 = vpop.permute.xlu1 %194  ;;  %v703_v4 = vsel %vm695_vm8, %v687_v16, %v340_v58  ;;  %v21081_v16 = vld [vmem:[#allocation16_spill] sm:$0xff]  ;;  %p15673_p0 = scmp.ne.s32.totalorder %s15272_s0, %s15672_s12  ;;  %p15678_p2 = scmp.lt.s32.totalorder %s15672_s12, %s15672_s12 }
 0x108   :  { %v719_v51 = vsel %vm711_vm10, %v703_v4, %v403_v23  ;;  %v216_v49 = vsel %vm206_vm3, %v193_v28, %v16433_v33 }
 0x109   :  { %779 = vperm.xlu0 %15639, %v776_v18   ;;  %v735_v14 = vsel %vm21030_vm12, %v719_v51, %v466_v44  ;;  %v215_v18 = vsel %vm206_vm3, %v16082_v60, %v193_v28  ;;  %v21080_v28 = vld [vmem:[#allocation15_spill] sm:$0xff]  ;;  %v673_v48 = vsel %vm21034_vm1, %v21081_v16, %v216_v49  ;;  %p15679_p3 = por %p15678_p2, %p15677_p1 }
 0x10a   :  { %v751_v26 = vsel %vm743_vm13, %v735_v14, %v529_v46 }
 0x10b   :  { %v567_v12 = vpop.permute.xlu0 %566  ;;  %v569_v53 = vpop.permute.xlu1 %568  ;;  %p15680_p4 = pnand %p15679_p3, %p15673_p0 }
 0x10c   :  { %v591_v52 = vsel %vm584_vm11, %v565_v21, %v567_v12  ;;  %v592_v6 = vsel %vm584_vm11, %v567_v12, %v569_v53 }
 0x10d   :  { %v767_v50 = vsel %vm759_vm14, %v751_v26, %v592_v6  ;;  %v766_v2 = vsel %vm759_vm14, %v750_v47, %v591_v52 }
 0x10e   :  { %1059 = vmatprep.subr.mxu1 %v767_v50 }
 0x10f   :  { %v256_v36 = vpop.permute.xlu0 %255  ;;  %v16457_v63 = vpop.permute.xlu1 %257  ;;  %1060 = vmatpush1.msra.mxu1 %v766_v2 }
 0x110   :  { %15290 = vmatmul.mubr.msk.f32.vlgmr.msra.gmra.mxu1 %vm21033_vm15, %v16198_v54  ;;  %v278_v62 = vsel %vm21037_vm2, %v16146_v17, %v256_v36  ;;  %v279_v23 = vsel %vm21037_vm2, %v256_v36, %v16457_v63 }
 0x111   :  { %1235 = vmatprep.mubr.f32.mxu1 %v21077_v20  ;;  %v689_v24 = vsel %vm679_vm6, %v673_v48, %v279_v23 }
 0x113   :  { %v16462_v9 = vpop.permute.xlu0 %196  ;;  %v16464_v21 = vpop.permute.xlu1 %198 }
 0x114   :  { %v218_v49 = vsel %vm206_vm3, %v16462_v9, %v16464_v21 }
 0x117   :  { %v319_v37 = vpop.permute.xlu0 %318  ;;  %v16466_v55 = vpop.permute.xlu1 %320 }
 0x118   :  { %v341_v39 = vsel %vm21039_vm4, %v16225_v25, %v319_v37  ;;  %v342_v60 = vsel %vm21039_vm4, %v319_v37, %v16466_v55 }
 0x11b   :  { %v16468_v56 = vpop.permute.xlu0 %259  ;;  %v16470_v22 = vpop.permute.xlu1 %261 }
 0x11c   :  { %v281_v23 = vsel %vm21037_vm2, %v16468_v56, %v16470_v22 }
 0x11f   :  { %v382_v57 = vpop.permute.xlu0 %381  ;;  %v16472_v59 = vpop.permute.xlu1 %383 }
 0x120   :  { %v404_v17 = vsel %vm395_vm5, %v16298_v11, %v382_v57  ;;  %v405_v44 = vsel %vm395_vm5, %v382_v57, %v16472_v59  ;;  %v705_v11 = vsel %vm695_vm8, %v689_v24, %v342_v60 }
 0x121   :  { %v721_v52 = vsel %vm711_vm10, %v705_v11, %v405_v44 }
 0x123   :  { %v16474_v0 = vpop.permute.xlu0 %322  ;;  %v16476_v3 = vpop.permute.xlu1 %324 }
 0x127   :  { %v445_v31 = vpop.permute.xlu0 %444  ;;  %v16478_v7 = vpop.permute.xlu1 %446 }
 0x128   :  { %v467_v46 = vsel %vm458_vm7, %v16351_v38, %v445_v31  ;;  %v468_v61 = vsel %vm458_vm7, %v445_v31, %v16478_v7 }
 0x129   :  { %v737_v38 = vsel %vm21030_vm12, %v721_v52, %v468_v61 }
 0x12b   :  { %v16480_v19 = vpop.permute.xlu0 %385  ;;  %v16482_v8 = vpop.permute.xlu1 %387 }
 0x12f   :  { %v508_v41 = vpop.permute.xlu0 %507  ;;  %v16484_v10 = vpop.permute.xlu1 %509 }
 0x130   :  { %v530_v45 = vsel %vm21036_vm9, %v16382_v27, %v508_v41  ;;  %v531_v14 = vsel %vm21036_vm9, %v508_v41, %v16484_v10 }
 0x131   :  { %v753_v36 = vsel %vm743_vm13, %v737_v38, %v531_v14 }
 0x133   :  { %v634_v40 = vpop.permute.xlu0 %633  ;;  %v636_v58 = vpop.permute.xlu1 %635 }
 0x134   :  { %v656_v30 = vsel %vm21035_vm0, %v16391_v32, %v634_v40  ;;  %v657_v5 = vsel %vm21035_vm0, %v634_v40, %v636_v58  ;;  %v672_v32 = vsel %vm21034_vm1, %v21080_v28, %v215_v18  ;;  %v217_v18 = vsel %vm206_vm3, %v16433_v33, %v16462_v9 }
 0x135   :  { %15291 = vmatprep.subr.msk.mxu0 %vm21034_vm1, %v657_v5  ;;  %v688_v25 = vsel %vm679_vm6, %v672_v32, %v278_v62  ;;  %v280_v62 = vsel %vm21037_vm2, %v16457_v63, %v16468_v56  ;;  %v343_v33 = vsel %vm21039_vm4, %v16466_v55, %v16474_v0  ;;  %v344_v9 = vsel %vm21039_vm4, %v16474_v0, %v16476_v3 }
 0x136   :  { %15292 = vmatpush1.msk.msra.mxu0 %vm21034_vm1, %v656_v30  ;;  %v704_v51 = vsel %vm695_vm8, %v688_v25, %v341_v39  ;;  %v675_v63 = vsel %vm21034_vm1, %v16019_v42, %v218_v49  ;;  %v406_v56 = vsel %vm395_vm5, %v16472_v59, %v16480_v19  ;;  %v407_v55 = vsel %vm395_vm5, %v16480_v19, %v16482_v8 }
 0x137   :  { %v449_v29 = vpop.permute.xlu0 %448  ;;  %v16511_v4 = vpop.permute.xlu1 %450  ;;  %v720_v12 = vsel %vm711_vm10, %v704_v51, %v404_v17  ;;  %v691_v32 = vsel %vm679_vm6, %v675_v63, %v281_v23 }
 0x138   :  { %v736_v6 = vsel %vm21030_vm12, %v720_v12, %v467_v46  ;;  %v469_v16 = vsel %vm458_vm7, %v16478_v7, %v449_v29  ;;  %v470_v42 = vsel %vm458_vm7, %v449_v29, %v16511_v4  ;;  %v707_v59 = vsel %vm695_vm8, %v691_v32, %v344_v9 }
 0x139   :  { %v752_v27 = vsel %vm743_vm13, %v736_v6, %v530_v45  ;;  %v723_v25 = vsel %vm711_vm10, %v707_v59, %v407_v55 }
 0x13a   :  { %v739_v7 = vsel %vm21030_vm12, %v723_v25, %v470_v42 }
 0x13b   :  { %v571_v26 = vpop.permute.xlu0 %570  ;;  %v573_v47 = vpop.permute.xlu1 %572 }
 0x13c   :  { %v593_v50 = vsel %vm584_vm11, %v569_v53, %v571_v26  ;;  %v594_v2 = vsel %vm584_vm11, %v571_v26, %v573_v47 }
 0x13d   :  { %v769_v37 = vsel %vm759_vm14, %v753_v36, %v594_v2  ;;  %v768_v57 = vsel %vm759_vm14, %v752_v27, %v593_v50 }
 0x13e   :  { %1130 = vmatprep.subr.mxu0 %v769_v37 }
 0x13f   :  { %v512_v31 = vpop.permute.xlu0 %511  ;;  %v16535_v41 = vpop.permute.xlu1 %513  ;;  %1131 = vmatpush1.msra.mxu0 %v768_v57 }
 0x140   :  { %15293 = vmatmul.mubr.msk.f32.vlgmr.msra.gmra.mxu0 %vm21033_vm15, %v16198_v54  ;;  %v532_v19 = vsel %vm21036_vm9, %v16484_v10, %v512_v31  ;;  %v533_v17 = vsel %vm21036_vm9, %v512_v31, %v16535_v41 }
 0x141   :  { %1306 = vmatprep.mubr.f32.mxu0 %v21077_v20  ;;  %v755_v11 = vsel %vm743_vm13, %v739_v7, %v533_v17 }
 0x143   :  { %v638_v53 = vpop.permute.xlu0 %637  ;;  %v16540_v40 = vpop.permute.xlu1 %639 }
 0x144   :  { %v658_v30 = vsel %vm21035_vm0, %v636_v58, %v638_v53  ;;  %v659_v5 = vsel %vm21035_vm0, %v638_v53, %v16540_v40  ;;  %v21082_v58 = vld [vmem:[#allocation17_spill] sm:$0xff] }
 0x145   :  { %15294 = vmatprep.subr.msk.mxu1 %vm21034_vm1, %v659_v5  ;;  %v674_v39 = vsel %vm21034_vm1, %v21082_v58, %v217_v18 }
 0x146   :  { %15295 = vmatpush1.msk.msra.mxu1 %vm21034_vm1, %v658_v30  ;;  %v690_v0 = vsel %vm679_vm6, %v674_v39, %v280_v62 }
 0x147   :  { %v201_v60 = vpop.permute.xlu0 %200  ;;  %v16575_v28 = vpop.permute.xlu1 %202  ;;  %v706_v48 = vsel %vm695_vm8, %v690_v0, %v343_v33 }
 0x148   :  { %v722_v44 = vsel %vm711_vm10, %v706_v48, %v406_v56  ;;  %v219_v31 = vsel %vm206_vm3, %v16464_v21, %v201_v60  ;;  %v220_v53 = vsel %vm206_vm3, %v201_v60, %v16575_v28 }
 0x149   :  { %v738_v24 = vsel %vm21030_vm12, %v722_v44, %v469_v16  ;;  %vm21031_vm12 = vmmov 0   ;;  %v676_v23 = vsel %vm21034_vm1, %v16023_v43, %v219_v31  ;;  %v677_v33 = vsel %vm21034_vm1, %v16162_v34, %v220_v53 }
 0x14a   :  { %v754_v10 = vsel %vm743_vm13, %v738_v24, %v532_v19 }
 0x14b   :  { %v575_v46 = vpop.permute.xlu0 %574  ;;  %v577_v29 = vpop.permute.xlu1 %576 }
 0x14c   :  { %v595_v61 = vsel %vm584_vm11, %v573_v47, %v575_v46  ;;  %v596_v51 = vsel %vm584_vm11, %v575_v46, %v577_v29 }
 0x14d   :  { %v771_v45 = vsel %vm759_vm14, %v755_v11, %v596_v51  ;;  %v770_v14 = vsel %vm759_vm14, %v754_v10, %v595_v61 }
 0x14e   :  { %1201 = vmatprep.subr.mxu1 %v771_v45 }
 0x14f   :  { %v264_v12 = vpop.permute.xlu0 %263  ;;  %v266_v52 = vpop.permute.xlu1 %265  ;;  %1202 = vmatpush1.msra.mxu1 %v770_v14 }
 0x150   :  { %15296 = vmatmul.mubr.msk.f32.vlgmr.msra.gmra.mxu1 %vm21033_vm15, %v16198_v54  ;;  %15498 = vmatprep.subr.mxu1 %v21077_v20  ;;  %v282_v30 = vsel %vm21037_vm2, %v16470_v22, %v264_v12  ;;  %v283_v5 = vsel %vm21037_vm2, %v264_v12, %v266_v52 }
 0x151   :  { %15502 = vmatprep.mubr.msk.f32.mxu1 %vm21031_vm12, %v21077_v20  ;;  %v692_v9 = vsel %vm679_vm6, %v676_v23, %v282_v30  ;;  %v693_v58 = vsel %vm679_vm6, %v677_v33, %v283_v5  ;;  %vm21083_vm12 = vcmask 1044480  }
 0x152   :  { %vm21084_vm15 = vmmov %vm21083_vm12 }
 0x153   :  { %v327_v6 = vpop.permute.xlu0 %326  ;;  %v329_v38 = vpop.permute.xlu1 %328 }
 0x154   :  { %v345_v62 = vsel %vm21039_vm4, %v16476_v3, %v327_v6  ;;  %v346_v21 = vsel %vm21039_vm4, %v327_v6, %v329_v38 }
 0x155   :  { %v708_v3 = vsel %vm695_vm8, %v692_v9, %v345_v62  ;;  %v709_v60 = vsel %vm695_vm8, %v693_v58, %v346_v21 }
 0x157   :  { %v205_v26 = vpop.permute.xlu0 %204  ;;  %v390_v47 = vpop.permute.xlu1 %389 }
 0x158   :  { %v408_v22 = vsel %vm395_vm5, %v16482_v8, %v390_v47  ;;  %v221_v16 = vsel %vm206_vm3, %v16575_v28, %v205_v26 }
 0x159   :  { %v678_v7 = vsel %vm21034_vm1, %v16166_v35, %v221_v16 }
 0x15b   :  { %v392_v50 = vpop.permute.xlu0 %391  ;;  %v268_v2 = vpop.permute.xlu1 %267 }
 0x15c   :  { %v409_v39 = vsel %vm395_vm5, %v390_v47, %v392_v50  ;;  %v284_v48 = vsel %vm21037_vm2, %v266_v52, %v268_v2 }
 0x15d   :  { %v725_v42 = vsel %vm711_vm10, %v709_v60, %v409_v39  ;;  %v694_v11 = vsel %vm679_vm6, %v678_v7, %v284_v48 }
 0x15f   :  { %v453_v36 = vpop.permute.xlu0 %452  ;;  %v455_v27 = vpop.permute.xlu1 %454 }
 0x160   :  { %v471_v43 = vsel %vm458_vm7, %v16511_v4, %v453_v36  ;;  %v472_v34 = vsel %vm458_vm7, %v453_v36, %v455_v27  ;;  %v724_v4 = vsel %vm711_vm10, %v708_v3, %v408_v22  ;;  %v16670_v36 = vld [vmem:[#allocation2 + $0x80] sm:$0xff] }
 0x161   :  { %v741_v59 = vsel %vm21084_vm15, %v725_v42, %v472_v34 }
 0x163   :  { %v331_v37 = vpop.permute.xlu0 %330  ;;  %v516_v57 = vpop.permute.xlu1 %515 }
 0x164   :  { %v534_v0 = vsel %vm21036_vm9, %v16535_v41, %v516_v57  ;;  %v740_v41 = vsel %vm21083_vm12, %v724_v4, %v471_v43  ;;  %v347_v19 = vsel %vm21039_vm4, %v329_v38, %v331_v37  ;;  %vm21085_vm12 = vcmask 72704  }
 0x165   :  { %v756_v24 = vsel %vm743_vm13, %v740_v41, %v534_v0  ;;  %vm21087_vm6 = vmmov %vm21085_vm12 }
 0x167   :  { %v518_v18 = vpop.permute.xlu0 %517  ;;  %v642_v49 = vpop.permute.xlu1 %641 }
 0x168   :  { %v535_v8 = vsel %vm21036_vm9, %v516_v57, %v518_v18  ;;  %v660_v32 = vsel %vm21035_vm0, %v16540_v40, %v642_v49 }
 0x169   :  { %v757_v25 = vsel %vm743_vm13, %v741_v59, %v535_v8 }
 0x16b   :  { %v644_v63 = vpop.permute.xlu0 %643  ;;  %v394_v56 = vpop.permute.xlu1 %393 }
 0x16c   :  { %v661_v55 = vsel %vm21035_vm0, %v642_v49, %v644_v63  ;;  %v410_v46 = vsel %vm395_vm5, %v392_v50, %v394_v56  ;;  %vm21086_vm5 = vmmov %vm21084_vm15 }
 0x16d   :  { %15297 = vmatprep.subr.msk.mxu0 %vm21034_vm1, %v661_v55 }
 0x16e   :  { %15298 = vmatpush1.msk.msra.mxu0 %vm21034_vm1, %v660_v32 }
 0x16f   :  { %v579_v40 = vpop.permute.xlu0 %578  ;;  %v581_v17 = vpop.permute.xlu1 %580 }
 0x170   :  { %v597_v44 = vsel %vm584_vm11, %v577_v29, %v579_v40  ;;  %v598_v28 = vsel %vm584_vm11, %v579_v40, %v581_v17  ;;  %v710_v29 = vsel %vm695_vm8, %v694_v11, %v347_v19 }
 0x171   :  { %v773_v61 = vsel %vm759_vm14, %v757_v25, %v598_v28  ;;  %v772_v51 = vsel %vm759_vm14, %v756_v24, %v597_v44  ;;  %v726_v14 = vsel %vm711_vm10, %v710_v29, %v410_v46  ;;  %vm21038_vm10 = vcmask 539648  }
 0x172   :  { %1272 = vmatprep.subr.mxu0 %v773_v61  ;;  %1758 = vst.msk [vmem:[#allocation2] sm:$0xff] %vm21038_vm10, %v16670_v36 }
 0x173   :  { %v457_v10 = vpop.permute.xlu0 %456  ;;  %v520_v45 = vpop.permute.xlu1 %519  ;;  %1273 = vmatpush1.msra.mxu0 %v772_v51 }
 0x174   :  { %v473_v12 = vsel %vm458_vm7, %v455_v27, %v457_v10  ;;  %15299 = vmatmul.mubr.msk.f32.vlgmr.msra.gmra.mxu0 %vm21085_vm12, %v16198_v54  ;;  %v536_v52 = vsel %vm21036_vm9, %v518_v18, %v520_v45 }
 0x175   :  { %v742_v35 = vsel %vm21086_vm5, %v726_v14, %v473_v12  ;;  %2078 = vmatprep.mubr.f32.mxu0 %v21077_v20 }
 0x176   :  { %v758_v26 = vsel %vm743_vm13, %v742_v35, %v536_v52 }
 0x177   :  { %v646_v6 = vpop.permute.xlu0 %645  ;;  %v583_v38 = vpop.permute.xlu1 %582 }
 0x178   :  { %v662_v47 = vsel %vm21035_vm0, %v644_v63, %v646_v6  ;;  %v599_v50 = vsel %vm584_vm11, %v581_v17, %v583_v38 }
 0x179   :  { %15499 = vmatpush3.msk.msra.mxu1 %vm21034_vm1, %v662_v47  ;;  %v774_v2 = vsel %vm759_vm14, %v758_v26, %v599_v50 }
 0x17a   :  { %15500 = vmatprep.subr.mxu1 %v21077_v20 }
 0x17b   :  { %15501 = vmatpush3.msra.mxu1 %v774_v2 }
 0x17c   :  { %15503 = vmatmul.mubr.msk.f32.vlgmr.msra.gmra.mxu1 %vm21087_vm6, %v16198_v54 }
 0x17d   :  { %2155 = vmatprep.mubr.f32.mxu1 %v16670_v36 }
 0x184   :  { %v16673_v27 = vpop.permute.xlu0 %779 }
 0x19b   :  { %v882_v37 = vpop.f32.mrf.mxu0 }
 0x19c   :  { %v883_v57 = vadd.f32 %v882_v37, %v16673_v27 }
 0x19d   :  { %v884_v31 = vpop.f32.mrf.mxu0 }
 0x19e   :  { %v1383_v53 = vmax.f32 %v883_v57, 0.0  ;;  %v16677_v18 = vadd.f32 %v884_v31, %v16673_v27 }
 0x1a0   :  { %v1384_v20 = vmax.f32 %v16677_v18, 0.0  ;;  %1413 = vrot.lane.b32.xlu1 %v1383_v53, %s15694_s26 }
 0x1a4   :  { %1415 = vrot.lane.b32.xlu1 %v1384_v20, %s15694_s26 }
 0x1ac   :  { %v953_v54 = vpop.f32.mrf.mxu1 }
 0x1ad   :  { %v954_v49 = vadd.f32 %v953_v54, %v16673_v27 }
 0x1ae   :  { %v955_v30 = vpop.f32.mrf.mxu1 }
 0x1af   :  { %v1385_v5 = vmax.f32 %v954_v49, 0.0  ;;  %v16686_v62 = vadd.f32 %v955_v30, %v16673_v27 }
 0x1b1   :  { %v1386_v23 = vmax.f32 %v16686_v62, 0.0  ;;  %1417 = vrot.lane.b32.xlu0 %v1385_v5, %s15694_s26 }
 0x1b3   :  { %1419 = vrot.lane.b32.xlu1 %v1386_v23, %s15694_s26 }
 0x1c0   :  { %v1024_v33 = vpop.f32.mrf.mxu0 }
 0x1c1   :  { %v1025_v21 = vadd.f32 %v1024_v33, %v16673_v27 }
 0x1c2   :  { %v1026_v9 = vpop.f32.mrf.mxu0 }
 0x1c3   :  { %v1387_v58 = vmax.f32 %v1025_v21, 0.0  ;;  %v16695_v22 = vadd.f32 %v1026_v9, %v16673_v27 }
 0x1c5   :  { %v1388_v39 = vmax.f32 %v16695_v22, 0.0  ;;  %1421 = vrot.lane.b32.xlu0 %v1387_v58, %s15694_s26 }
 0x1c7   :  { %1423 = vrot.lane.b32.xlu1 %v1388_v39, %s15694_s26 }
 0x1d0   :  { %v1095_v63 = vpop.f32.mrf.mxu1 }
 0x1d1   :  { %v16703_v56 = vadd.f32 %v1095_v63, %v16673_v27 }
 0x1d2   :  { %v1097_v3 = vpop.f32.mrf.mxu1 }
 0x1d3   :  { %v1389_v43 = vmax.f32 %v16703_v56, 0.0  ;;  %v16707_v34 = vadd.f32 %v1097_v3, %v16673_v27  ;;  %v21088_v3 = vlaneseq }
 0x1d5   :  { %v1390_v55 = vmax.f32 %v16707_v34, 0.0  ;;  %1425 = vrot.lane.b32.xlu0 %v1389_v43, %s15694_s26 }
 0x1d7   :  { %1427 = vrot.lane.b32.xlu1 %v1390_v55, %s15694_s26 }
 0x200   :  { %v1166_v60 = vpop.f32.mrf.mxu0 }
 0x201   :  { %v16715_v0 = vadd.f32 %v1166_v60, %v16673_v27 }
 0x202   :  { %v1168_v8 = vpop.f32.mrf.mxu0 }
 0x203   :  { %v1391_v32 = vmax.f32 %v16715_v0, 0.0  ;;  %v16719_v16 = vadd.f32 %v1168_v8, %v16673_v27 }
 0x205   :  { %v1392_v4 = vmax.f32 %v16719_v16, 0.0  ;;  %1429 = vrot.lane.b32.xlu0 %v1391_v32, %s15694_s26 }
 0x207   :  { %1431 = vrot.lane.b32.xlu1 %v1392_v4, %s15694_s26 }
 0x210   :  { %v1237_v42 = vpop.f32.mrf.mxu1 }
 0x211   :  { %v16727_v48 = vadd.f32 %v1237_v42, %v16673_v27 }
 0x212   :  { %v1239_v41 = vpop.f32.mrf.mxu1  ;;  %v1414_v17 = vpop.permute.xlu1 %1413 }
 0x213   :  { %v1393_v59 = vmax.f32 %v16727_v48, 0.0  ;;  %v16731_v19 = vadd.f32 %v1239_v41, %v16673_v27 }
 0x215   :  { %v1394_v40 = vmax.f32 %v16731_v19, 0.0  ;;  %1433 = vrot.lane.b32.xlu0 %v1393_v59, %s15694_s26 }
 0x216   :  { %v1416_v28 = vpop.permute.xlu1 %1415 }
 0x217   :  { %1435 = vrot.lane.b32.xlu1 %v1394_v40, %s15694_s26  ;;  %v1443_v51 = vsel %vm206_vm3, %v1414_v17, %v1416_v28 }
 0x218   :  { %v16753_v10 = vmax.f32 %v1383_v53, %v1443_v51 }
 0x223   :  { %v1418_v45 = vpop.permute.xlu0 %1417 }
 0x224   :  { %v1444_v38 = vsel %vm206_vm3, %v1416_v28, %v1418_v45 }
 0x225   :  { %v1420_v11 = vpop.permute.xlu1 %1419  ;;  %v16771_v2 = vmax.f32 %v1384_v20, %v1444_v38 }
 0x226   :  { %v1445_v12 = vsel %vm206_vm3, %v1418_v45, %v1420_v11 }
 0x227   :  { %v16763_v26 = vmax.f32 %v1385_v5, %v1445_v12 }
 0x234   :  { %v1308_v44 = vpop.f32.mrf.mxu0 }
 0x235   :  { %v16739_v25 = vadd.f32 %v1308_v44, %v16673_v27 }
 0x236   :  { %v1310_v24 = vpop.f32.mrf.mxu0 }
 0x237   :  { %v1395_v7 = vmax.f32 %v16739_v25, 0.0  ;;  %v16743_v46 = vadd.f32 %v1310_v24, %v16673_v27  ;;  %v1422_v47 = vpop.permute.xlu0 %1421 }
 0x239   :  { %v1396_v61 = vmax.f32 %v16743_v46, 0.0  ;;  %1437 = vrot.lane.b32.xlu0 %v1395_v7, %s15694_s26  ;;  %v1424_v52 = vpop.permute.xlu1 %1423 }
 0x23a   :  { %v1447_v50 = vsel %vm206_vm3, %v1422_v47, %v1424_v52 }
 0x23b   :  { %1439 = vrot.lane.b32.xlu1 %v1396_v61, %s15694_s26  ;;  %v16776_v37 = vmax.f32 %v1387_v58, %v1447_v50 }
 0x23c   :  { %v1379_v29 = vpop.f32.mrf.mxu1 }
 0x23d   :  { %v16756_v14 = vadd.f32 %v1379_v29, %v16673_v27  ;;  %v1446_v27 = vsel %vm206_vm3, %v1420_v11, %v1422_v47 }
 0x23e   :  { %v15504_v35 = vpop.f32.mrf.mxu1  ;;  %v16782_v57 = vmax.f32 %v1386_v23, %v1446_v27 }
 0x23f   :  { %v1397_v6 = vmax.f32 %v16756_v14, 0.0  ;;  %1502 = vrot.lane.b32.xlu1 %v16753_v10, %s15696_s28  ;;  %v21095_v14 = vmov 0 }
 0x241   :  { %1441 = vrot.lane.b32.xlu0 %v1397_v6, %s15694_s26 }
 0x243   :  { %1506 = vrot.lane.b32.xlu1 %v16763_v26, %s15696_s28 }
 0x245   :  { %1504 = vrot.lane.b32.xlu0 %v16771_v2, %s15696_s28 }
 0x247   :  { %v1426_v31 = vpop.permute.xlu0 %1425  ;;  %1510 = vrot.lane.b32.xlu1 %v16776_v37, %s15696_s28 }
 0x248   :  { %v1448_v53 = vsel %vm206_vm3, %v1424_v52, %v1426_v31 }
 0x249   :  { %1508 = vrot.lane.b32.xlu0 %v16782_v57, %s15696_s28  ;;  %v1428_v18 = vpop.permute.xlu1 %1427  ;;  %v16792_v54 = vmax.f32 %v1388_v39, %v1448_v53 }
 0x24a   :  { %v1449_v20 = vsel %vm206_vm3, %v1426_v31, %v1428_v18 }
 0x24b   :  { %v16794_v49 = vmax.f32 %v1389_v43, %v1449_v20  ;;  %v16825_v43 = vand.u32 127, %v21088_v3 }
 0x24d   :  { %1512 = vrot.lane.b32.xlu0 %v16792_v54, %s15696_s28  ;;  %1514 = vrot.lane.b32.xlu1 %v16794_v49, %s15696_s28  ;;  %v1578_v34 = vadd.s32 128, %v16825_v43  ;;  %v1579_v60 = vadd.s32 256, %v16825_v43  ;;  %v1582_v17 = vadd.s32 640, %v16825_v43 }
 0x24f   :  { %v1593_v0 = vadd.s32 66, %v1578_v34  ;;  %v1594_v16 = vadd.s32 66, %v1579_v60  ;;  %v1597_v45 = vadd.s32 66, %v1582_v17 }
 0x251   :  { %v1609_v41 = vand.u32 1023, %v1594_v16  ;;  %v1612_v19 = vand.u32 1023, %v1597_v45  ;;  %v1584_v45 = vadd.s32 896, %v16825_v43 }
 0x253   :  { %v1624_v51 = vshra.s32 %v1609_v41, 6  ;;  %v1639_v50 = vand.u32 63, %v1609_v41  ;;  %v1599_v35 = vadd.s32 66, %v1584_v45 }
 0x255   :  { %vm1654_vm12 = vcmp.ne.s32.totalorder %v1624_v51, 0  ;;  %vm1669_vm5 = vcmp.ne.s32.totalorder %v1624_v51, 15  ;;  %vm1699_vm9 = vcmp.ne.s32.totalorder %v1639_v50, 0 }
 0x256   :  { %vm1684_vm0 = vmand %vm1654_vm12, %vm1669_vm5 }
 0x277   :  { %v1430_v30 = vpop.permute.xlu0 %1429 }
 0x278   :  { %v1450_v5 = vsel %vm206_vm3, %v1428_v18, %v1430_v30 }
 0x279   :  { %v16803_v62 = vmax.f32 %v1390_v55, %v1450_v5  ;;  %v1432_v23 = vpop.permute.xlu1 %1431  ;;  %v1592_v55 = vadd.s32 66, %v16825_v43  ;;  %v1627_v5 = vshra.s32 %v1612_v19, 6 }
 0x27a   :  { %v1451_v33 = vsel %vm206_vm3, %v1430_v30, %v1432_v23 }
 0x27b   :  { %v16806_v21 = vmax.f32 %v1391_v32, %v1451_v33  ;;  %1516 = vrot.lane.b32.xlu0 %v16803_v62, %s15696_s28  ;;  %v1607_v8 = vand.u32 1023, %v1592_v55  ;;  %v1580_v32 = vadd.s32 384, %v16825_v43  ;;  %vm1672_vm5 = vcmp.ne.s32.totalorder %v1627_v5, 15 }
 0x27d   :  { %1518 = vrot.lane.b32.xlu1 %v16806_v21, %s15696_s28  ;;  %v1622_v42 = vshra.s32 %v1607_v8, 6  ;;  %v1595_v48 = vadd.s32 66, %v1580_v32  ;;  %v1637_v44 = vand.u32 63, %v1607_v8 }
 0x27f   :  { %vm1652_vm7 = vcmp.ne.s32.totalorder %v1622_v42, 0  ;;  %vm1667_vm8 = vcmp.ne.s32.totalorder %v1622_v42, 15  ;;  %v1610_v24 = vand.u32 1023, %v1595_v48  ;;  %vm1697_vm13 = vcmp.ne.s32.totalorder %v1637_v44, 0 }
 0x280   :  { %vm16834_vm11 = vmand %vm1652_vm7, %vm1667_vm8  ;;  %vm1727_vm7 = vcmp.ne.s32.totalorder %v1637_v44, 30 }
 0x281   :  { %v1625_v27 = vshra.s32 %v1610_v24, 6  ;;  %vm1712_vm6 = vmand %vm16834_vm11, %vm1697_vm13  ;;  %v1640_v25 = vand.u32 63, %v1610_v24 }
 0x282   :  { %vm16857_vm2 = vmand %vm1712_vm6, %vm1727_vm7  ;;  %vm21099_vm6 = vcmask 785408  }
 0x283   :  { %vm1655_vm10 = vcmp.ne.s32.totalorder %v1625_v27, 0  ;;  %vm1670_vm4 = vcmp.ne.s32.totalorder %v1625_v27, 15  ;;  %vm21100_vm7 = vmmov %vm21099_vm6 }
 0x284   :  { %vm16870_vm12 = vmand %vm1655_vm10, %vm1670_vm4  ;;  %vm1657_vm10 = vcmp.ne.s32.totalorder %v1627_v5, 0 }
 0x287   :  { %v1434_v9 = vpop.permute.xlu0 %1433 }
 0x288   :  { %v1452_v58 = vsel %vm206_vm3, %v1432_v23, %v1434_v9 }
 0x289   :  { %v16815_v22 = vmax.f32 %v1392_v4, %v1452_v58  ;;  %v1436_v39 = vpop.permute.xlu1 %1435  ;;  %v1608_v4 = vand.u32 1023, %v1593_v0 }
 0x28a   :  { %v1453_v63 = vsel %vm206_vm3, %v1434_v9, %v1436_v39 }
 0x28b   :  { %v16818_v56 = vmax.f32 %v1393_v59, %v1453_v63  ;;  %1520 = vrot.lane.b32.xlu0 %v16815_v22, %s15696_s28  ;;  %v1581_v59 = vadd.s32 512, %v16825_v43  ;;  %v1623_v28 = vshra.s32 %v1608_v4, 6  ;;  %v1638_v52 = vand.u32 63, %v1608_v4 }
 0x28d   :  { %1522 = vrot.lane.b32.xlu1 %v16818_v56, %s15696_s28  ;;  %v1596_v11 = vadd.s32 66, %v1581_v59  ;;  %vm1653_vm14 = vcmp.ne.s32.totalorder %v1623_v28, 0  ;;  %vm1668_vm15 = vcmp.ne.s32.totalorder %v1623_v28, 15  ;;  %vm1698_vm1 = vcmp.ne.s32.totalorder %v1638_v52, 0 }
 0x28e   :  { %vm1683_vm8 = vmand %vm1653_vm14, %vm1668_vm15  ;;  %vm1728_vm13 = vcmp.ne.s32.totalorder %v1638_v52, 30  ;;  %vm1729_vm15 = vcmp.ne.s32.totalorder %v1639_v50, 30 }
 0x28f   :  { %v1611_v53 = vand.u32 1023, %v1596_v11  ;;  %vm1713_vm11 = vmand %vm1683_vm8, %vm1698_vm1  ;;  %vm1700_vm1 = vcmp.ne.s32.totalorder %v1640_v25, 0 }
 0x290   :  { %vm1714_vm14 = vmand %vm1684_vm0, %vm1699_vm9 }
 0x291   :  { %v1626_v20 = vshra.s32 %v1611_v53, 6  ;;  %v1641_v63 = vand.u32 63, %v1611_v53  ;;  %vm16882_vm4 = vmand %vm1714_vm14, %vm1729_vm15  ;;  %v1586_v53 = vadd.s32 1152, %v16825_v43 }
 0x292   :  { %vm1715_vm8 = vmand %vm16870_vm12, %vm1700_vm1 }
 0x293   :  { %vm1656_vm0 = vcmp.ne.s32.totalorder %v1626_v20, 0  ;;  %vm1671_vm9 = vcmp.ne.s32.totalorder %v1626_v20, 15  ;;  %vm16892_vm14 = vmand %vm1657_vm10, %vm1672_vm5 }
 0x294   :  { %vm21104_vm1 = vmmov %vm21100_vm7 }
 0x2ab   :  { %v1438_v29 = vpop.permute.xlu0 %1437 }
 0x2ac   :  { %v1454_v12 = vsel %vm206_vm3, %v1436_v39, %v1438_v29 }
 0x2ad   :  { %v16842_v38 = vmax.f32 %v1394_v40, %v1454_v12  ;;  %v1440_v47 = vpop.permute.xlu1 %1439 }
 0x2ae   :  { %v1455_v31 = vsel %vm206_vm3, %v1438_v29, %v1440_v47  ;;  %v1583_v29 = vadd.s32 768, %v16825_v43 }
 0x2af   :  { %v16847_v18 = vmax.f32 %v1395_v7, %v1455_v31  ;;  %1524 = vrot.lane.b32.xlu0 %v16842_v38, %s15696_s28 }
 0x2b0   :  { %v1598_v12 = vadd.s32 66, %v1583_v29 }
 0x2b1   :  { %1526 = vrot.lane.b32.xlu1 %v16847_v18, %s15696_s28  ;;  %v1503_v40 = vpop.permute.xlu1 %1502 }
 0x2b2   :  { %v1613_v52 = vand.u32 1023, %v1598_v12 }
 0x2b3   :  { %v1442_v30 = vpop.permute.xlu0 %1441 }
 0x2b4   :  { %v1456_v23 = vsel %vm206_vm3, %v1440_v47, %v1442_v30  ;;  %v16864_v33 = vmax.f32 %v1397_v6, %v1442_v30  ;;  %vm16876_vm3 = vmand %vm1713_vm11, %vm1728_vm13  ;;  %v1642_v6 = vand.u32 63, %v1612_v19  ;;  %vm1730_vm11 = vcmp.ne.s32.totalorder %v1640_v25, 30 }
 0x2b5   :  { %v16868_v9 = vmax.f32 %v1396_v61, %v1456_v23  ;;  %v1507_v58 = vpop.permute.xlu1 %1506  ;;  %v21096_v14 = vsel %vm16876_vm3, 4294967295, %v21095_v14  ;;  %vm1686_vm13 = vmand %vm1656_vm0, %vm1671_vm9  ;;  %vm1701_vm3 = vcmp.ne.s32.totalorder %v1641_v63, 0  ;;  %vm1731_vm9 = vcmp.ne.s32.totalorder %v1641_v63, 30 }
 0x2b6   :  { %1530 = vrot.lane.b32.xlu1 %v16864_v33, %s15696_s28  ;;  %vm1702_vm15 = vcmp.ne.s32.totalorder %v1642_v6, 0  ;;  %vm1745_vm12 = vmand %vm1715_vm8, %vm1730_vm11  ;;  %vm1732_vm10 = vcmp.ne.s32.totalorder %v1642_v6, 30  ;;  %v1614_v47 = vand.u32 1023, %v1599_v35  ;;  %v1628_v50 = vshra.s32 %v1613_v52, 6 }
 0x2b7   :  { %v1505_v46 = vpop.permute.xlu0 %1504  ;;  %1528 = vrot.lane.b32.xlu0 %v16868_v9, %s15696_s28  ;;  %vm1716_vm0 = vmand %vm1686_vm13, %vm1701_vm3  ;;  %v1643_v31 = vand.u32 63, %v1613_v52 }
 0x2b8   :  { %v1532_v3 = vsel %vm21099_vm6, %v1503_v40, %v1505_v46  ;;  %v1533_v34 = vsel %vm21100_vm7, %v1505_v46, %v1507_v58  ;;  %vm21103_vm6 = vnez %v21096_v14  ;;  %vm21105_vm7 = vmmov %vm21104_vm1  ;;  %v1629_v27 = vshra.s32 %v1614_v47, 6 }
 0x2b9   :  { %v1561_v55 = vmax.f32 %v16753_v10, %v1532_v3  ;;  %v1562_v60 = vmax.f32 %v16771_v2, %v1533_v34  ;;  %v1511_v8 = vpop.permute.xlu1 %1510  ;;  %vm1746_vm5 = vmand %vm1716_vm0, %vm1731_vm9  ;;  %vm1673_vm13 = vcmp.ne.s32.totalorder %v1628_v50, 15  ;;  %vm1733_vm9 = vcmp.ne.s32.totalorder %v1643_v31, 30 }
 0x2ba   :  { %vm21106_vm8 = vmmov %vm21104_vm1  ;;  %v1601_v40 = vadd.s32 66, %v1586_v53 }
 0x2bb   :  { %v1509_v32 = vpop.permute.xlu0 %1508  ;;  %v1789_v16 = vsel %vm16857_vm2, %v1561_v55, 0.0  ;;  %v1790_v4 = vsel %vm21103_vm6, %v1562_v60, 0.0  ;;  %vm1717_vm2 = vmand %vm16892_vm14, %vm1702_vm15  ;;  %vm1659_vm14 = vcmp.ne.s32.totalorder %v1629_v27, 0  ;;  %vm1674_vm15 = vcmp.ne.s32.totalorder %v1629_v27, 15 }
 0x2bc   :  { %v1534_v10 = vsel %vm21104_vm1, %v1507_v58, %v1509_v32  ;;  %v1535_v2 = vsel %vm21105_vm7, %v1509_v32, %v1511_v8  ;;  %1819 = vrot.lane.b32.xlu0 %v1789_v16, %s15705_s2  ;;  %1821 = vrot.lane.b32.xlu1 %v1790_v4, %s15705_s2  ;;  %vm21107_vm3 = vmmov %vm21104_vm1  ;;  %v1616_v23 = vand.u32 1023, %v1601_v40  ;;  %v1587_v16 = vadd.s32 1280, %v16825_v43 }
 0x2bd   :  { %v1563_v42 = vmax.f32 %v16763_v26, %v1534_v10  ;;  %v1564_v48 = vmax.f32 %v16782_v57, %v1535_v2  ;;  %vm1747_vm11 = vmand %vm1717_vm2, %vm1732_vm10  ;;  %v1588_v4 = vadd.s32 1408, %v16825_v43 }
 0x2be   :  { %vm1689_vm1 = vmand %vm1659_vm14, %vm1674_vm15  ;;  %v1631_v46 = vshra.s32 %v1616_v23, 6  ;;  %v1646_v3 = vand.u32 63, %v1616_v23  ;;  %v1602_v10 = vadd.s32 66, %v1587_v16 }
 0x2bf   :  { %v1513_v41 = vpop.permute.xlu0 %1512  ;;  %v1515_v59 = vpop.permute.xlu1 %1514  ;;  %v1791_v17 = vsel %vm16882_vm4, %v1563_v42, 0.0  ;;  %v1792_v44 = vsel %vm1745_vm12, %v1564_v48, 0.0  ;;  %vm1658_vm4 = vcmp.ne.s32.totalorder %v1628_v50, 0  ;;  %vm1703_vm12 = vcmp.ne.s32.totalorder %v1643_v31, 0 }
 0x2c0   :  { %v1536_v28 = vsel %vm21106_vm8, %v1511_v8, %v1513_v41  ;;  %v1537_v24 = vsel %vm21107_vm3, %v1513_v41, %v1515_v59  ;;  %1823 = vrot.lane.b32.xlu0 %v1791_v17, %s15705_s2  ;;  %1825 = vrot.lane.b32.xlu1 %v1792_v44, %s15705_s2  ;;  %vm1688_vm6 = vmand %vm1658_vm4, %vm1673_vm13  ;;  %vm1661_vm14 = vcmp.ne.s32.totalorder %v1631_v46, 0  ;;  %vm1676_vm15 = vcmp.ne.s32.totalorder %v1631_v46, 15 }
 0x2c1   :  { %v1565_v26 = vmax.f32 %v16776_v37, %v1536_v28  ;;  %v1566_v57 = vmax.f32 %v16792_v54, %v1537_v24  ;;  %v1585_v37 = vadd.s32 1024, %v16825_v43  ;;  %v1644_v54 = vand.u32 63, %v1614_v47  ;;  %vm1718_vm0 = vmand %vm1688_vm6, %vm1703_vm12 }
 0x2c2   :  { %vm1748_vm8 = vmand %vm1718_vm0, %vm1733_vm9  ;;  %v1603_v2 = vadd.s32 66, %v1588_v4  ;;  %v1617_v42 = vand.u32 1023, %v1602_v10  ;;  %v1590_v41 = vadd.s32 1664, %v16825_v43  ;;  %v1591_v28 = vadd.s32 1792, %v16825_v43 }
 0x2c3   :  { %v1793_v51 = vsel %vm1746_vm5, %v1565_v26, 0.0  ;;  %v1794_v11 = vsel %vm1747_vm11, %v1566_v57, 0.0  ;;  %v1600_v19 = vadd.s32 66, %v1585_v37  ;;  %vm1704_vm7 = vcmp.ne.s32.totalorder %v1644_v54, 0  ;;  %vm21108_vm5 = vmmov %vm21107_vm3 }
 0x2c4   :  { %1827 = vrot.lane.b32.xlu0 %v1793_v51, %s15705_s2  ;;  %1829 = vrot.lane.b32.xlu1 %v1794_v11, %s15705_s2  ;;  %vm1719_vm2 = vmand %vm1689_vm1, %vm1704_vm7  ;;  %vm1734_vm10 = vcmp.ne.s32.totalorder %v1644_v54, 30  ;;  %vm1706_vm7 = vcmp.ne.s32.totalorder %v1646_v3, 0  ;;  %v1618_v48 = vand.u32 1023, %v1603_v2  ;;  %v1605_v44 = vadd.s32 66, %v1590_v41 }
 0x2c5   :  { %v1615_v7 = vand.u32 1023, %v1600_v19  ;;  %vm1749_vm11 = vmand %vm1719_vm2, %vm1734_vm10  ;;  %vm1736_vm10 = vcmp.ne.s32.totalorder %v1646_v3, 30  ;;  %v1647_v24 = vand.u32 63, %v1617_v42  ;;  %v1606_v11 = vadd.s32 66, %v1591_v28 }
 0x2c6   :  { %vm1691_vm1 = vmand %vm1661_vm14, %vm1676_vm15  ;;  %v1633_v17 = vshra.s32 %v1618_v48, 6  ;;  %v1648_v26 = vand.u32 63, %v1618_v48  ;;  %v1620_v51 = vand.u32 1023, %v1605_v44 }
 0x2c7   :  { %v1630_v14 = vshra.s32 %v1615_v7, 6  ;;  %v1645_v61 = vand.u32 63, %v1615_v7  ;;  %vm1721_vm2 = vmand %vm1691_vm1, %vm1706_vm7  ;;  %v1621_v12 = vand.u32 1023, %v1606_v11 }
 0x2c8   :  { %vm1663_vm14 = vcmp.ne.s32.totalorder %v1633_v17, 0  ;;  %vm1678_vm15 = vcmp.ne.s32.totalorder %v1633_v17, 15  ;;  %vm1708_vm7 = vcmp.ne.s32.totalorder %v1648_v26, 0  ;;  %v1635_v45 = vshra.s32 %v1620_v51, 6 }
 0x2c9   :  { %vm1660_vm4 = vcmp.ne.s32.totalorder %v1630_v14, 0  ;;  %vm1675_vm13 = vcmp.ne.s32.totalorder %v1630_v14, 15  ;;  %vm1705_vm12 = vcmp.ne.s32.totalorder %v1645_v61, 0  ;;  %vm1735_vm9 = vcmp.ne.s32.totalorder %v1645_v61, 30  ;;  %vm1693_vm1 = vmand %vm1663_vm14, %vm1678_vm15 }
 0x2ca   :  { %vm1690_vm6 = vmand %vm1660_vm4, %vm1675_vm13  ;;  %v1650_v35 = vand.u32 63, %v1620_v51  ;;  %v1636_v47 = vshra.s32 %v1621_v12, 6  ;;  %v1651_v53 = vand.u32 63, %v1621_v12 }
 0x2cb   :  { %vm1720_vm0 = vmand %vm1690_vm6, %vm1705_vm12  ;;  %vm1707_vm12 = vcmp.ne.s32.totalorder %v1647_v24, 0 }
 0x2ed   :  { %v1517_v25 = vpop.permute.xlu0 %1516 }
 0x2ee   :  { %v1538_v20 = vsel %vm21108_vm5, %v1515_v59, %v1517_v25  ;;  %vm21109_vm5 = vmmov %vm21107_vm3  ;;  %v1632_v59 = vshra.s32 %v1617_v42, 6 }
 0x2ef   :  { %v1567_v30 = vmax.f32 %v16794_v49, %v1538_v20  ;;  %v1519_v5 = vpop.permute.xlu1 %1518 }
 0x2f0   :  { %v1539_v58 = vsel %vm21107_vm3, %v1517_v25, %v1519_v5  ;;  %vm1662_vm4 = vcmp.ne.s32.totalorder %v1632_v59, 0  ;;  %vm1677_vm13 = vcmp.ne.s32.totalorder %v1632_v59, 15 }
 0x2f1   :  { %v1568_v39 = vmax.f32 %v16803_v62, %v1539_v58  ;;  %v1795_v63 = vsel %vm1748_vm8, %v1567_v30, 0.0  ;;  %vm1750_vm8 = vmand %vm1720_vm0, %vm1735_vm9  ;;  %vm1737_vm9 = vcmp.ne.s32.totalorder %v1647_v24, 30 }
 0x2f2   :  { %1831 = vrot.lane.b32.xlu0 %v1795_v63, %s15705_s2  ;;  %vm1692_vm6 = vmand %vm1662_vm4, %vm1677_vm13  ;;  %vm1680_vm4 = vcmp.ne.s32.totalorder %v1635_v45, 15  ;;  %vm21110_vm13 = vcmask 785408  }
 0x2f3   :  { %v1796_v6 = vsel %vm1749_vm11, %v1568_v39, 0.0  ;;  %vm1751_vm11 = vmand %vm1721_vm2, %vm1736_vm10  ;;  %vm1738_vm10 = vcmp.ne.s32.totalorder %v1648_v26, 30 }
 0x2f4   :  { %1833 = vrot.lane.b32.xlu1 %v1796_v6, %s15705_s2  ;;  %vm1722_vm0 = vmand %vm1692_vm6, %vm1707_vm12 }
 0x2f5   :  { %vm1723_vm2 = vmand %vm1693_vm1, %vm1708_vm7  ;;  %vm1710_vm7 = vcmp.ne.s32.totalorder %v1650_v35, 0 }
 0x2f6   :  { %vm16941_vm14 = vmand %vm1723_vm2, %vm1738_vm10 }
 0x2f7   :  { %vm21113_vm12 = vmmov %vm21110_vm13 }
 0x2fd   :  { %v1521_v49 = vpop.permute.xlu0 %1520 }
 0x2fe   :  { %v1540_v62 = vsel %vm21109_vm5, %v1519_v5, %v1521_v49 }
 0x2ff   :  { %v1569_v34 = vmax.f32 %v16806_v21, %v1540_v62  ;;  %v1523_v55 = vpop.permute.xlu1 %1522  ;;  %v1589_v21 = vadd.s32 1536, %v16825_v43 }
 0x300   :  { %v1541_v60 = vsel %vm21107_vm3, %v1521_v49, %v1523_v55  ;;  %vm1752_vm3 = vmand %vm1722_vm0, %vm1737_vm9  ;;  %vm1666_vm0 = vcmp.ne.s32.totalorder %v1636_v47, 0  ;;  %vm1681_vm9 = vcmp.ne.s32.totalorder %v1636_v47, 15  ;;  %v16979_v49 = vld [vmem:[%s21007_s3] sm:$0xff] }
 0x301   :  { %v1570_v0 = vmax.f32 %v16815_v22, %v1541_v60  ;;  %v1797_v8 = vsel %vm1750_vm8, %v1569_v34, 0.0  ;;  %v1604_v22 = vadd.s32 66, %v1589_v21 }
 0x302   :  { %1835 = vrot.lane.b32.xlu0 %v1797_v8, %s15705_s2 }
 0x303   :  { %v1798_v32 = vsel %vm1751_vm11, %v1570_v0, 0.0  ;;  %v1619_v57 = vand.u32 1023, %v1604_v22  ;;  %vm1665_vm11 = vcmp.ne.s32.totalorder %v1635_v45, 0 }
 0x304   :  { %1837 = vrot.lane.b32.xlu1 %v1798_v32, %s15705_s2  ;;  %vm1695_vm1 = vmand %vm1665_vm11, %vm1680_vm4  ;;  %vm1711_vm11 = vcmp.ne.s32.totalorder %v1651_v53, 0 }
 0x305   :  { %v1634_v29 = vshra.s32 %v1619_v57, 6  ;;  %v1649_v43 = vand.u32 63, %v1619_v57 }
 0x307   :  { %vm1664_vm5 = vcmp.ne.s32.totalorder %v1634_v29, 0  ;;  %vm1679_vm8 = vcmp.ne.s32.totalorder %v1634_v29, 15  ;;  %vm1709_vm6 = vcmp.ne.s32.totalorder %v1649_v43, 0  ;;  %vm1739_vm10 = vcmp.ne.s32.totalorder %v1649_v43, 30 }
 0x308   :  { %vm1694_vm15 = vmand %vm1664_vm5, %vm1679_vm8  ;;  %vm1740_vm5 = vcmp.ne.s32.totalorder %v1650_v35, 30 }
 0x309   :  { %vm1724_vm2 = vmand %vm1694_vm15, %vm1709_vm6 }
 0x30a   :  { %vm1696_vm8 = vmand %vm1666_vm0, %vm1681_vm9  ;;  %vm21115_vm0 = vcmask 539648  }
 0x30b   :  { %vm1754_vm4 = vmand %vm1724_vm2, %vm1739_vm10 }
 0x30c   :  { %vm1726_vm15 = vmand %vm1696_vm8, %vm1711_vm11 }
 0x30d   :  { %vm21116_vm9 = vmmov %vm21115_vm0 }
 0x30e   :  { %vm21117_vm2 = vmmov %vm21115_vm0 }
 0x30f   :  { %vm21118_vm10 = vmmov %vm21115_vm0 }
 0x310   :  { %vm21121_vm8 = vmmov %vm21115_vm0 }
 0x311   :  { %vm21122_vm11 = vmmov %vm21115_vm0 }
 0x321   :  { %v1525_v52 = vpop.permute.xlu0 %1524 }
 0x322   :  { %v1542_v50 = vsel %vm21110_vm13, %v1523_v55, %v1525_v52  ;;  %vm1725_vm13 = vmand %vm1695_vm1, %vm1710_vm7  ;;  %vm1879_vm1 = vcmask 1048080  }
 0x323   :  { %v1571_v31 = vmax.f32 %v16818_v56, %v1542_v50  ;;  %v1527_v37 = vpop.permute.xlu1 %1526  ;;  %vm1755_vm6 = vmand %vm1725_vm13, %vm1740_vm5 }
 0x324   :  { %v1543_v54 = vsel %vm21113_vm12, %v1525_v52, %v1527_v37  ;;  %vm21119_vm13 = vmmov %vm21115_vm0 }
 0x325   :  { %v1572_v19 = vmax.f32 %v16842_v38, %v1543_v54  ;;  %v1799_v40 = vsel %vm1752_vm3, %v1571_v31, 0.0  ;;  %vm21114_vm3 = vmmov %vm21113_vm12 }
 0x326   :  { %1839 = vrot.lane.b32.xlu0 %v1799_v40, %s15705_s2  ;;  %vm21120_vm5 = vmmov %vm21115_vm0  ;;  %v17144_v40 = vld [vmem:[#allocation2 + $0x80] sm:$0xff] }
 0x327   :  { %v1800_v56 = vsel %vm16941_vm14, %v1572_v19, 0.0  ;;  %vm1741_vm14 = vcmp.ne.s32.totalorder %v1651_v53, 30 }
 0x328   :  { %1841 = vrot.lane.b32.xlu1 %v1800_v56, %s15705_s2  ;;  %v1531_v25 = vpop.permute.xlu1 %1530  ;;  %vm1756_vm7 = vmand %vm1726_vm15, %vm1741_vm14  ;;  %vm1895_vm14 = vcmask 244736  }
 0x329   :  { %v1529_v7 = vpop.permute.xlu0 %1528  ;;  %v1575_v23 = vmax.f32 %v16864_v33, %v1531_v25  ;;  %vm21127_vm15 = vmmov %vm21115_vm0 }
 0x32a   :  { %v1544_v38 = vsel %vm21113_vm12, %v1527_v37, %v1529_v7  ;;  %v1545_v20 = vsel %vm21114_vm3, %v1529_v7, %v1531_v25  ;;  %vm21124_vm12 = vmmov %vm21115_vm0 }
 0x32b   :  { %v1573_v30 = vmax.f32 %v16847_v18, %v1544_v38  ;;  %v1574_v5 = vmax.f32 %v16868_v9, %v1545_v20  ;;  %v16965_v18 = vld [vmem:[%s21007_s3 + $0x8] sm:$0xff]  ;;  %v1803_v33 = vsel %vm1756_vm7, %v1575_v23, 0.0  ;;  %vm21125_vm3 = vmmov %vm21115_vm0  ;;  %s15707_s3 = smov 124  }
 0x32c   :  { %vm21128_vm7 = vmmov %vm21115_vm0 }
 0x32d   :  { %v1801_v58 = vsel %vm1754_vm4, %v1573_v30, 0.0  ;;  %v1802_v39 = vsel %vm1755_vm6, %v1574_v5, 0.0  ;;  %vm21123_vm4 = vmmov %vm21115_vm0 }
 0x32e   :  { %v1820_v63 = vpop.permute.xlu0 %1819  ;;  %1843 = vrot.lane.b32.xlu0 %v1801_v58, %s15705_s2  ;;  %1845 = vrot.lane.b32.xlu1 %v1802_v39, %s15705_s2  ;;  %v1822_v14 = vpop.permute.xlu1 %1821  ;;  %vm21126_vm6 = vmmov %vm21115_vm0 }
 0x32f   :  { %1880 = vst.msk [vmem:[#allocation2] sm:$0xff] %vm1879_vm1, %v1820_v63  ;;  %v16960_v6 = vsel %vm21115_vm0, %v1820_v63, %v1822_v14  ;;  %vm1897_vm1 = vcmask 1047792   ;;  %vm21129_vm0 = vcmask 1031168  }
 0x330   :  { %1881 = vst [vmem:[#allocation2 + $0x8] sm:$0xff] %v16960_v6 }
 0x332   :  { %v1824_v9 = vpop.permute.xlu0 %1823  ;;  %1847 = vrot.lane.b32.xlu0 %v1803_v33, %s15705_s2  ;;  %v1826_v46 = vpop.permute.xlu1 %1825  ;;  %1924 = vrot.lane.b32.xlu1 %v16965_v18, %s15706_s17 }
 0x333   :  { %v16971_v61 = vsel %vm21116_vm9, %v1822_v14, %v1824_v9  ;;  %v16974_v3 = vsel %vm21117_vm2, %v1824_v9, %v1826_v46  ;;  %vm21130_vm9 = vmmov %vm21129_vm0  ;;  %vm2009_vm2 = vcmask 64512  }
 0x334   :  { %1882 = vst [vmem:[#allocation2 + $0x10] sm:$0xff] %v16971_v61  ;;  %1883 = vst [vmem:[#allocation2 + $0x18] sm:$0xff] %v16974_v3 }
 0x336   :  { %v1828_v62 = vpop.permute.xlu0 %1827  ;;  %v1830_v34 = vpop.permute.xlu1 %1829  ;;  %v16983_v55 = vld [vmem:[#allocation2] sm:$0xff]  ;;  %1922 = vrot.lane.b32.xlu0 %v16979_v49, %s15706_s17 }
 0x337   :  { %v16987_v60 = vsel %vm21118_vm10, %v1826_v46, %v1828_v62  ;;  %v16990_v0 = vsel %vm21119_vm13, %v1828_v62, %v1830_v34  ;;  %1943 = vrot.lane.b32.xlu1 %v16983_v55, %s15695_s27  ;;  %vm21131_vm10 = vmmov %vm21129_vm0 }
 0x338   :  { %1884 = vst [vmem:[#allocation2 + $0x20] sm:$0xff] %v16987_v60  ;;  %1885 = vst [vmem:[#allocation2 + $0x28] sm:$0xff] %v16990_v0 }
 0x339   :  { %vm21132_vm13 = vmmov %vm21129_vm0 }
 0x33a   :  { %1947 = vrot.lane.b32.xlu0 %v16971_v61, %s15695_s27 }
 0x33b   :  { %1945 = vrot.lane.b32.xlu1 %v16960_v6, %s15695_s27 }
 0x33e   :  { %1951 = vrot.lane.b32.xlu0 %v16987_v60, %s15695_s27 }
 0x33f   :  { %1949 = vrot.lane.b32.xlu1 %v16974_v3, %s15695_s27 }
 0x342   :  { %1953 = vrot.lane.b32.xlu0 %v16990_v0, %s15695_s27 }
 0x364   :  { %v1832_v8 = vpop.permute.xlu0 %1831 }
 0x365   :  { %v17007_v32 = vsel %vm21120_vm5, %v1830_v34, %v1832_v8  ;;  %vm21133_vm5 = vmmov %vm21129_vm0 }
 0x366   :  { %1886 = vst [vmem:[#allocation2 + $0x30] sm:$0xff] %v17007_v32  ;;  %v1834_v16 = vpop.permute.xlu1 %1833  ;;  %1955 = vrot.lane.b32.xlu1 %v17007_v32, %s15695_s27 }
 0x367   :  { %v17013_v4 = vsel %vm21121_vm8, %v1832_v8, %v1834_v16  ;;  %vm21134_vm8 = vmmov %vm21129_vm0 }
 0x368   :  { %1887 = vst [vmem:[#allocation2 + $0x38] sm:$0xff] %v17013_v4  ;;  %1957 = vrot.lane.b32.xlu0 %v17013_v4, %s15695_s27 }
 0x374   :  { %v1836_v10 = vpop.permute.xlu0 %1835 }
 0x375   :  { %v17019_v2 = vsel %vm21122_vm11, %v1834_v16, %v1836_v10  ;;  %vm21135_vm11 = vmmov %vm21129_vm0 }
 0x376   :  { %1888 = vst [vmem:[#allocation2 + $0x40] sm:$0xff] %v17019_v2  ;;  %v1838_v42 = vpop.permute.xlu1 %1837  ;;  %1959 = vrot.lane.b32.xlu1 %v17019_v2, %s15695_s27 }
 0x377   :  { %v17025_v21 = vsel %vm21123_vm4, %v1836_v10, %v1838_v42  ;;  %vm21136_vm4 = vmmov %vm21129_vm0 }
 0x378   :  { %1889 = vst [vmem:[#allocation2 + $0x48] sm:$0xff] %v17025_v21  ;;  %1961 = vrot.lane.b32.xlu0 %v17025_v21, %s15695_s27 }
 0x398   :  { %v1840_v48 = vpop.permute.xlu0 %1839 }
 0x399   :  { %v17031_v41 = vsel %vm21124_vm12, %v1838_v42, %v1840_v48  ;;  %vm21137_vm12 = vmmov %vm21129_vm0 }
 0x39a   :  { %1890 = vst [vmem:[#allocation2 + $0x50] sm:$0xff] %v17031_v41  ;;  %v1842_v59 = vpop.permute.xlu1 %1841  ;;  %1963 = vrot.lane.b32.xlu1 %v17031_v41, %s15695_s27 }
 0x39b   :  { %v17037_v22 = vsel %vm21125_vm3, %v1840_v48, %v1842_v59  ;;  %vm21138_vm3 = vmmov %vm21129_vm0 }
 0x39c   :  { %1891 = vst [vmem:[#allocation2 + $0x58] sm:$0xff] %v17037_v22  ;;  %1965 = vrot.lane.b32.xlu0 %v17037_v22, %s15695_s27 }
 0x3a0   :  { %v1844_v17 = vpop.permute.xlu0 %1843  ;;  %v1846_v44 = vpop.permute.xlu1 %1845 }
 0x3a1   :  { %v17043_v28 = vsel %vm21126_vm6, %v1842_v59, %v1844_v17  ;;  %v17046_v24 = vsel %vm21127_vm15, %v1844_v17, %v1846_v44  ;;  %vm21139_vm6 = vmmov %vm21129_vm0 }
 0x3a2   :  { %1892 = vst [vmem:[#allocation2 + $0x60] sm:$0xff] %v17043_v28  ;;  %1893 = vst [vmem:[#allocation2 + $0x68] sm:$0xff] %v17046_v24  ;;  %1967 = vrot.lane.b32.xlu1 %v17043_v28, %s15695_s27  ;;  %1969 = vrot.lane.b32.xlu0 %v17046_v24, %s15695_s27 }
 0x3a3   :  { %vm21140_vm15 = vmmov %vm21129_vm0 }
 0x3a4   :  { %v1848_v26 = vpop.permute.xlu0 %1847  ;;  %v17054_v57 = vpop.permute.xlu1 %1924 }
 0x3a5   :  { %v17057_v51 = vsel %vm21128_vm7, %v1846_v44, %v1848_v26  ;;  %1896 = vst.msk [vmem:[#allocation2 + $0x78] sm:$0xff] %vm1895_vm14, %v1848_v26  ;;  %vm21141_vm14 = vmmov %vm21129_vm0 }
 0x3a6   :  { %1894 = vst [vmem:[#allocation2 + $0x70] sm:$0xff] %v17057_v51  ;;  %1898 = vst.msk [vmem:[#allocation2 + $0x78] sm:$0xff] %vm1897_vm1, %v16670_v36  ;;  %1971 = vrot.lane.b32.xlu1 %v17057_v51, %s15695_s27 }
 0x3a7   :  { %vm21142_vm1 = vmmov %vm21129_vm0 }
 0x3a8   :  { %v17063_v11 = vpop.permute.xlu0 %1922  ;;  %vm21143_vm7 = vmmov %vm21129_vm0 }
 0x3a9   :  { %v1944_v29 = vpop.permute.xlu1 %1943 }
 0x3aa   :  { %1975 = vrot.lane.b32.xlu1 %v16670_v36, %s15695_s27 }
 0x3ac   :  { %v1948_v45 = vpop.permute.xlu0 %1947 }
 0x3ad   :  { %v1946_v12 = vpop.permute.xlu1 %1945  ;;  %v17067_v43 = vld [vmem:[#allocation2 + $0x78] sm:$0xff] }
 0x3ae   :  { %1973 = vrot.lane.b32.xlu0 %v17067_v43, %s15695_s27  ;;  %v1978_v35 = vsel %vm21129_vm0, %v1946_v12, %v1948_v45  ;;  %v1977_v52 = vsel %vm21130_vm9, %v1944_v29, %v1946_v12  ;;  %3258 = vrot.lane.b32.xlu1 %v16971_v61, %s15707_s3  ;;  %vm3288_vm9 = vcmask 1014784  }
 0x3af   :  { %2044 = vmatprep.subr.mxu0 %v1978_v35 }
 0x3b0   :  { %2045 = vmatpush1.msra.mxu0 %v1977_v52  ;;  %v1952_v47 = vpop.permute.xlu0 %1951 }
 0x3b1   :  { %v1950_v50 = vpop.permute.xlu1 %1949  ;;  %15302 = vmatmul.mubr.msk.f32.vlgmr.msra.gmra.mxu0 %vm2009_vm2, %v17063_v11 }
 0x3b2   :  { %3256 = vrot.lane.b32.xlu0 %v16960_v6, %s15707_s3  ;;  %v1980_v27 = vsel %vm21131_vm10, %v1950_v50, %v1952_v47  ;;  %v1979_v31 = vsel %vm21132_vm13, %v1948_v45, %v1950_v50  ;;  %3262 = vrot.lane.b32.xlu1 %v16987_v60, %s15707_s3  ;;  %vm21144_vm10 = vcmask 523264  }
 0x3b3   :  { %2121 = vmatprep.subr.mxu1 %v1980_v27  ;;  %2084 = vmatprep.mubr.f32.mxu0 %v16670_v36  ;;  %vm21145_vm13 = vmmov %vm21144_vm10 }
 0x3b4   :  { %2122 = vmatpush1.msra.mxu1 %v1979_v31  ;;  %v1954_v37 = vpop.permute.xlu0 %1953 }
 0x3b5   :  { %15304 = vmatmul.mubr.msk.f32.vlgmr.msra.gmra.mxu1 %vm2009_vm2, %v17063_v11  ;;  %15303 = vmatmul.mubr.msk.f32.gmra.mxu0 %vm2009_vm2, %v17054_v57  ;;  %v1981_v19 = vsel %vm21134_vm8, %v1952_v47, %v1954_v37 }
 0x3b6   :  { %3260 = vrot.lane.b32.xlu0 %v16974_v3, %s15707_s3  ;;  %3250 = vrot.lane.b32.xlu1 %v16979_v49, %s15708_s20 }
 0x3b7   :  { %2161 = vmatprep.mubr.f32.mxu1 %v16670_v36  ;;  %2232 = vmatprep.mubr.f32.mxu0 %v16670_v36 }
 0x3b9   :  { %15305 = vmatmul.mubr.msk.f32.gmra.mxu1 %vm2009_vm2, %v17054_v57 }
 0x3ba   :  { %3254 = vrot.lane.b32.xlu0 %v16983_v55, %s15707_s3  ;;  %3264 = vrot.lane.b32.xlu1 %v16990_v0, %s15707_s3 }
 0x3bb   :  { %2309 = vmatprep.mubr.f32.mxu1 %v16670_v36 }
 0x3be   :  { %3252 = vrot.lane.b32.xlu0 %v16965_v18, %s15708_s20  ;;  %3268 = vrot.lane.b32.xlu1 %v17013_v4, %s15707_s3 }
 0x3c2   :  { %3266 = vrot.lane.b32.xlu0 %v17007_v32, %s15707_s3  ;;  %3272 = vrot.lane.b32.xlu1 %v17025_v21, %s15707_s3 }
 0x3c6   :  { %3270 = vrot.lane.b32.xlu0 %v17019_v2, %s15707_s3  ;;  %3284 = vrot.lane.b32.xlu1 %v17067_v43, %s15707_s3 }
 0x3ca   :  { %3274 = vrot.lane.b32.xlu0 %v17031_v41, %s15707_s3  ;;  %3979 = vrot.lane.b32.xlu1 %v16960_v6, %s15699_s8 }
 0x3ce   :  { %3286 = vrot.lane.b32.xlu0 %v16670_v36, %s15707_s3  ;;  %3983 = vrot.lane.b32.xlu1 %v16974_v3, %s15699_s8 }
 0x3d2   :  { %3981 = vrot.lane.b32.xlu0 %v16971_v61, %s15699_s8  ;;  %3977 = vrot.lane.b32.xlu1 %v16983_v55, %s15699_s8 }
 0x3d6   :  { %3985 = vrot.lane.b32.xlu0 %v16987_v60, %s15699_s8  ;;  %3975 = vrot.lane.b32.xlu1 %v16965_v18, %s15709_s21 }
 0x3d8   :  { %v1956_v54 = vpop.permute.xlu1 %1955 }
 0x3d9   :  { %v1982_v53 = vsel %vm21133_vm5, %v1954_v37, %v1956_v54  ;;  %vm21146_vm5 = vmmov %vm21144_vm10 }
 0x3da   :  { %3973 = vrot.lane.b32.xlu0 %v16979_v49, %s15709_s21  ;;  %3276 = vrot.lane.b32.xlu1 %v17037_v22, %s15707_s3  ;;  %vm21147_vm8 = vmmov %vm21146_vm5 }
 0x3db   :  { %2198 = vmatprep.subr.mxu0 %v1982_v53 }
 0x3dc   :  { %2199 = vmatpush1.msra.mxu0 %v1981_v19 }
 0x3dd   :  { %15306 = vmatmul.mubr.msk.f32.vlgmr.msra.gmra.mxu0 %vm2009_vm2, %v17063_v11 }
 0x3de   :  { %3278 = vrot.lane.b32.xlu0 %v17043_v28, %s15707_s3  ;;  %3989 = vrot.lane.b32.xlu1 %v17007_v32, %s15699_s8 }
 0x3df   :  { %2238 = vmatprep.mubr.f32.mxu0 %v16670_v36  ;;  %v1958_v36 = vpop.permute.xlu0 %1957 }
 0x3e0   :  { %v1983_v7 = vsel %vm21136_vm4, %v1956_v54, %v1958_v36  ;;  %vm21149_vm4 = vmmov %vm21146_vm5 }
 0x3e1   :  { %15307 = vmatmul.mubr.msk.f32.gmra.mxu0 %vm2009_vm2, %v17054_v57 }
 0x3e2   :  { %3987 = vrot.lane.b32.xlu0 %v16990_v0, %s15699_s8  ;;  %3280 = vrot.lane.b32.xlu1 %v17046_v24, %s15707_s3 }
 0x3e3   :  { %2386 = vmatprep.mubr.f32.mxu0 %v17144_v40 }
 0x3e6   :  { %3282 = vrot.lane.b32.xlu0 %v17057_v51, %s15707_s3  ;;  %3993 = vrot.lane.b32.xlu1 %v17019_v2, %s15699_s8 }
 0x3e8   :  { %v1960_v56 = vpop.permute.xlu1 %1959 }
 0x3e9   :  { %v1984_v25 = vsel %vm21135_vm11, %v1958_v36, %v1960_v56  ;;  %vm21148_vm11 = vmmov %vm21146_vm5 }
 0x3ea   :  { %3991 = vrot.lane.b32.xlu0 %v17013_v4, %s15699_s8  ;;  %3997 = vrot.lane.b32.xlu1 %v17031_v41, %s15699_s8  ;;  %v1962_v38 = vpop.permute.xlu0 %1961 }
 0x3eb   :  { %2275 = vmatprep.subr.mxu1 %v1984_v25  ;;  %v1985_v5 = vsel %vm21138_vm3, %v1960_v56, %v1962_v38  ;;  %vm21151_vm3 = vmmov %vm21149_vm4 }
 0x3ec   :  { %2276 = vmatpush1.msra.mxu1 %v1983_v7 }
 0x3ed   :  { %15308 = vmatmul.mubr.msk.f32.vlgmr.msra.gmra.mxu1 %vm2009_vm2, %v17063_v11 }
 0x3ee   :  { %3995 = vrot.lane.b32.xlu0 %v17025_v21, %s15699_s8  ;;  %4009 = vrot.lane.b32.xlu1 %v17144_v40, %s15699_s8 }
 0x3ef   :  { %2315 = vmatprep.mubr.f32.mxu1 %v17144_v40 }
 0x3f1   :  { %15309 = vmatmul.mubr.msk.f32.gmra.mxu1 %vm2009_vm2, %v17054_v57 }
 0x3f2   :  { %4007 = vrot.lane.b32.xlu0 %v17067_v43, %s15699_s8  ;;  %4703 = vrot.lane.b32.xlu1 %v16971_v61, %s15700_s9 }
 0x3f3   :  { %2463 = vmatprep.mubr.f32.mxu1 %v17144_v40 }
 0x3f6   :  { %4701 = vrot.lane.b32.xlu0 %v16960_v6, %s15700_s9  ;;  %4707 = vrot.lane.b32.xlu1 %v16987_v60, %s15700_s9 }
 0x3fa   :  { %4705 = vrot.lane.b32.xlu0 %v16974_v3, %s15700_s9  ;;  %4001 = vrot.lane.b32.xlu1 %v17043_v28, %s15699_s8 }
 0x3fe   :  { %3999 = vrot.lane.b32.xlu0 %v17037_v22, %s15699_s8  ;;  %4695 = vrot.lane.b32.xlu1 %v16979_v49, %s15696_s28 }
 0x402   :  { %4699 = vrot.lane.b32.xlu0 %v16983_v55, %s15700_s9  ;;  %4005 = vrot.lane.b32.xlu1 %v17057_v51, %s15699_s8 }
 0x406   :  { %4003 = vrot.lane.b32.xlu0 %v17046_v24, %s15699_s8  ;;  %4709 = vrot.lane.b32.xlu1 %v16990_v0, %s15700_s9 }
 0x40a   :  { %4697 = vrot.lane.b32.xlu0 %v16965_v18, %s15696_s28  ;;  %4713 = vrot.lane.b32.xlu1 %v17013_v4, %s15700_s9 }
 0x40c   :  { %v1964_v20 = vpop.permute.xlu1 %1963 }
 0x40d   :  { %v1986_v30 = vsel %vm21137_vm12, %v1962_v38, %v1964_v20  ;;  %vm21150_vm12 = vmmov %vm21149_vm4 }
 0x40e   :  { %4711 = vrot.lane.b32.xlu0 %v17007_v32, %s15700_s9  ;;  %4717 = vrot.lane.b32.xlu1 %v17025_v21, %s15700_s9  ;;  %v1966_v23 = vpop.permute.xlu0 %1965 }
 0x40f   :  { %2352 = vmatprep.subr.mxu0 %v1986_v30  ;;  %v1987_v63 = vsel %vm21140_vm15, %v1964_v20, %v1966_v23  ;;  %vm21153_vm15 = vmmov %vm21151_vm3 }
 0x410   :  { %2353 = vmatpush1.msra.mxu0 %v1985_v5 }
 0x411   :  { %15310 = vmatmul.mubr.msk.f32.vlgmr.msra.gmra.mxu0 %vm2009_vm2, %v17063_v11 }
 0x412   :  { %4715 = vrot.lane.b32.xlu0 %v17019_v2, %s15700_s9  ;;  %4729 = vrot.lane.b32.xlu1 %v17067_v43, %s15700_s9 }
 0x413   :  { %2392 = vmatprep.mubr.f32.mxu0 %v17144_v40 }
 0x414   :  { %v1968_v58 = vpop.permute.xlu1 %1967  ;;  %v1970_v14 = vpop.permute.xlu0 %1969 }
 0x415   :  { %15311 = vmatmul.mubr.msk.f32.gmra.mxu0 %vm2009_vm2, %v17054_v57  ;;  %v1988_v39 = vsel %vm21139_vm6, %v1966_v23, %v1968_v58  ;;  %v1989_v46 = vsel %vm21142_vm1, %v1968_v58, %v1970_v14  ;;  %vm21152_vm6 = vmmov %vm21151_vm3 }
 0x416   :  { %4719 = vrot.lane.b32.xlu0 %v17031_v41, %s15700_s9  ;;  %5423 = vrot.lane.b32.xlu1 %v16960_v6, %s15710_s22  ;;  %vm21155_vm1 = vmmov %vm21151_vm3 }
 0x417   :  { %2429 = vmatprep.subr.mxu1 %v1988_v39  ;;  %2540 = vmatprep.mubr.f32.mxu0 %v17144_v40 }
 0x418   :  { %2430 = vmatpush1.msra.mxu1 %v1987_v63  ;;  %v1972_v33 = vpop.permute.xlu1 %1971 }
 0x419   :  { %15312 = vmatmul.mubr.msk.f32.vlgmr.msra.gmra.mxu1 %vm2009_vm2, %v17063_v11  ;;  %v1990_v9 = vsel %vm21141_vm14, %v1970_v14, %v1972_v33  ;;  %vm21154_vm14 = vmmov %vm21151_vm3 }
 0x41a   :  { %4731 = vrot.lane.b32.xlu0 %v17144_v40, %s15700_s9  ;;  %4721 = vrot.lane.b32.xlu1 %v17037_v22, %s15700_s9 }
 0x41b   :  { %2506 = vmatprep.subr.mxu0 %v1990_v9  ;;  %2469 = vmatprep.mubr.f32.mxu1 %v17144_v40 }
 0x41c   :  { %2507 = vmatpush1.msra.mxu0 %v1989_v46  ;;  %v1976_v62 = vpop.permute.xlu1 %1975 }
 0x41d   :  { %15313 = vmatmul.mubr.msk.f32.gmra.mxu1 %vm2009_vm2, %v17054_v57  ;;  %15314 = vmatmul.mubr.msk.f32.vlgmr.msra.gmra.mxu0 %vm2009_vm2, %v17063_v11 }
 0x41e   :  { %4723 = vrot.lane.b32.xlu0 %v17043_v28, %s15700_s9  ;;  %2664 = vmatprep.subr.mxu0 %v16960_v6 }
 0x41f   :  { %2665 = vmatpush1.msra.mxu0 %v16983_v55  ;;  %5427 = vrot.lane.b32.xlu1 %v16974_v3, %s15710_s22 }
 0x420   :  { %v1974_v34 = vpop.permute.xlu0 %1973  ;;  %2818 = vmatprep.subr.mxu0 %v16990_v0  ;;  %2546 = vmatprep.mubr.f32.mxu0 %v17144_v40  ;;  %v17238_v8 = vpop.permute.xlu1 %3258 }
 0x421   :  { %v1992_v16 = vsel %vm21143_vm7, %v1974_v34, %v1976_v62  ;;  %v1991_v10 = vsel %vm21129_vm0, %v1972_v33, %v1974_v34  ;;  %2617 = vmatprep.mubr.f32.mxu1 %v17144_v40  ;;  %15315 = vmatmul.mubr.msk.f32.gmra.mxu0 %vm2009_vm2, %v17054_v57  ;;  %vm21156_vm7 = vmmov %vm21155_vm1 }
 0x422   :  { %5425 = vrot.lane.b32.xlu0 %v16971_v61, %s15710_s22  ;;  %2583 = vmatprep.subr.mxu1 %v1992_v16  ;;  %vm21157_vm0 = vmmov %vm21155_vm1 }
 0x423   :  { %2584 = vmatpush1.msra.mxu1 %v1991_v10  ;;  %4725 = vrot.lane.b32.xlu1 %v17046_v24, %s15700_s9 }
 0x424   :  { %v17249_v42 = vpop.permute.xlu0 %3256  ;;  %15316 = vmatmul.mubr.msk.f32.vlgmr.msra.gmra.mxu1 %vm2009_vm2, %v17063_v11  ;;  %2741 = vmatprep.subr.mxu1 %v16974_v3  ;;  %v17254_v48 = vpop.permute.xlu1 %3262 }
 0x425   :  { %2742 = vmatpush1.msra.mxu1 %v16971_v61  ;;  %2623 = vmatprep.mubr.f32.mxu1 %v17144_v40  ;;  %v3290_v35 = vsel %vm3288_vm9, %v17249_v42, %v17238_v8 }
 0x426   :  { %4727 = vrot.lane.b32.xlu0 %v17057_v51, %s15700_s9  ;;  %2895 = vmatprep.subr.mxu1 %v17013_v4 }
 0x427   :  { %2698 = vmatprep.mubr.f32.mxu0 %v17144_v40  ;;  %5421 = vrot.lane.b32.xlu1 %v16983_v55, %s15710_s22 }
 0x428   :  { %v17264_v59 = vpop.permute.xlu0 %3260  ;;  %15317 = vmatmul.mubr.msk.f32.gmra.mxu1 %vm2009_vm2, %v17054_v57  ;;  %15318 = vmatmul.mubr.msk.f32.vlgmr.msra.gmra.mxu0 %vm2009_vm2, %v16979_v49  ;;  %v17270_v17 = vpop.permute.xlu1 %3250 }
 0x429   :  { %2819 = vmatpush1.msra.mxu0 %v16987_v60  ;;  %2704 = vmatprep.mubr.f32.mxu0 %v17144_v40  ;;  %v3292_v50 = vsel %vm3288_vm9, %v17264_v59, %v17254_v48  ;;  %v3291_v19 = vsel %vm3288_vm9, %v17238_v8, %v17264_v59 }
 0x42a   :  { %5429 = vrot.lane.b32.xlu0 %v16987_v60, %s15710_s22  ;;  %2972 = vmatprep.subr.mxu0 %v17025_v21 }
 0x42b   :  { %2775 = vmatprep.mubr.f32.mxu1 %v17144_v40  ;;  %5419 = vrot.lane.b32.xlu1 %v16965_v18, %s15711_s23 }
 0x42c   :  { %v3255_v55 = vpop.permute.xlu0 %3254  ;;  %15319 = vmatmul.mubr.msk.f32.gmra.mxu0 %vm2009_vm2, %v16965_v18  ;;  %15320 = vmatmul.mubr.msk.f32.vlgmr.msra.gmra.mxu1 %vm2009_vm2, %v16979_v49  ;;  %v17283_v44 = vpop.permute.xlu1 %3264 }
 0x42d   :  { %2896 = vmatpush1.msra.mxu1 %v17007_v32  ;;  %2781 = vmatprep.mubr.f32.mxu1 %v17144_v40  ;;  %v3289_v27 = vsel %vm3288_vm9, %v3255_v55, %v17249_v42  ;;  %v3293_v7 = vsel %vm3288_vm9, %v17254_v48, %v17283_v44 }
 0x42e   :  { %5417 = vrot.lane.b32.xlu0 %v16979_v49, %s15711_s23  ;;  %3049 = vmatprep.subr.mxu1 %v17037_v22 }
 0x42f   :  { %2852 = vmatprep.mubr.f32.mxu0 %v17144_v40  ;;  %5433 = vrot.lane.b32.xlu1 %v17007_v32, %s15710_s22 }
 0x430   :  { %v17292_v26 = vpop.permute.xlu0 %3252  ;;  %15321 = vmatmul.mubr.msk.f32.gmra.mxu1 %vm2009_vm2, %v16965_v18  ;;  %15322 = vmatmul.mubr.msk.f32.vlgmr.msra.gmra.mxu0 %vm2009_vm2, %v16979_v49  ;;  %v17298_v57 = vpop.permute.xlu1 %3268 }
 0x431   :  { %2973 = vmatpush1.msra.mxu0 %v17019_v2  ;;  %2858 = vmatprep.mubr.f32.mxu0 %v17144_v40 }
 0x432   :  { %5431 = vrot.lane.b32.xlu0 %v16990_v0, %s15710_s22  ;;  %3126 = vmatprep.subr.mxu0 %v17046_v24 }
 0x433   :  { %2929 = vmatprep.mubr.f32.mxu1 %v17144_v40  ;;  %5437 = vrot.lane.b32.xlu1 %v17019_v2, %s15710_s22 }
 0x434   :  { %v17308_v11 = vpop.permute.xlu0 %3266  ;;  %15323 = vmatmul.mubr.msk.f32.gmra.mxu0 %vm2009_vm2, %v16965_v18  ;;  %15324 = vmatmul.mubr.msk.f32.vlgmr.msra.gmra.mxu1 %vm2009_vm2, %v16979_v49  ;;  %v17314_v29 = vpop.permute.xlu1 %3272 }
 0x435   :  { %3050 = vmatpush1.msra.mxu1 %v17031_v41  ;;  %2935 = vmatprep.mubr.f32.mxu1 %v17144_v40  ;;  %v3294_v54 = vsel %vm3288_vm9, %v17283_v44, %v17308_v11  ;;  %v3295_v5 = vsel %vm3288_vm9, %v17308_v11, %v17298_v57 }
 0x436   :  { %5435 = vrot.lane.b32.xlu0 %v17013_v4, %s15710_s22  ;;  %3006 = vmatprep.mubr.f32.mxu0 %v17144_v40 }
 0x437   :  { %5441 = vrot.lane.b32.xlu1 %v17031_v41, %s15710_s22  ;;  %3203 = vmatprep.subr.mxu1 %v17067_v43 }
 0x438   :  { %v17324_v45 = vpop.permute.xlu0 %3270  ;;  %15325 = vmatmul.mubr.msk.f32.gmra.mxu1 %vm2009_vm2, %v16965_v18  ;;  %15326 = vmatmul.mubr.msk.f32.vlgmr.msra.gmra.mxu0 %vm2009_vm2, %v16979_v49  ;;  %v17330_v12 = vpop.permute.xlu1 %3284 }
 0x439   :  { %3127 = vmatpush1.msra.mxu0 %v17043_v28  ;;  %3012 = vmatprep.mubr.f32.mxu0 %v17144_v40  ;;  %v3296_v56 = vsel %vm3288_vm9, %v17298_v57, %v17324_v45  ;;  %v3297_v39 = vsel %vm3288_vm9, %v17324_v45, %v17314_v29 }
 0x43a   :  { %5439 = vrot.lane.b32.xlu0 %v17025_v21, %s15710_s22  ;;  %3355 = vmatprep.subr.mxu0 %v3290_v35 }
 0x43b   :  { %3083 = vmatprep.mubr.f32.mxu1 %v17144_v40  ;;  %5445 = vrot.lane.b32.xlu1 %v17043_v28, %s15710_s22 }
 0x43c   :  { %v17342_v52 = vpop.permute.xlu0 %3274  ;;  %15327 = vmatmul.mubr.msk.f32.gmra.mxu0 %vm2009_vm2, %v16965_v18  ;;  %15328 = vmatmul.mubr.msk.f32.vlgmr.msra.gmra.mxu1 %vm2009_vm2, %v16979_v49  ;;  %v17348_v47 = vpop.permute.xlu1 %3979 }
 0x43d   :  { %3204 = vmatpush1.msra.mxu1 %v17057_v51  ;;  %3089 = vmatprep.mubr.f32.mxu1 %v17144_v40  ;;  %v3298_v20 = vsel %vm3288_vm9, %v17314_v29, %v17342_v52 }
 0x43e   :  { %5443 = vrot.lane.b32.xlu0 %v17037_v22, %s15710_s22  ;;  %3432 = vmatprep.subr.mxu1 %v3292_v50 }
 0x43f   :  { %3160 = vmatprep.mubr.f32.mxu0 %v17144_v40  ;;  %5449 = vrot.lane.b32.xlu1 %v17057_v51, %s15710_s22 }
 0x440   :  { %v17362_v31 = vpop.permute.xlu0 %3286  ;;  %15329 = vmatmul.mubr.msk.f32.gmra.mxu1 %vm2009_vm2, %v16965_v18  ;;  %15330 = vmatmul.mubr.msk.f32.vlgmr.msra.gmra.mxu0 %vm2009_vm2, %v16979_v49  ;;  %v17368_v37 = vpop.permute.xlu1 %3983 }
 0x441   :  { %3356 = vmatpush1.msra.mxu0 %v3289_v27  ;;  %3166 = vmatprep.mubr.f32.mxu0 %v17144_v40  ;;  %v3304_v62 = vsel %vm3288_vm9, %v17330_v12, %v17362_v31 }
 0x442   :  { %5447 = vrot.lane.b32.xlu0 %v17046_v24, %s15710_s22  ;;  %3509 = vmatprep.subr.mxu0 %v3294_v54 }
 0x443   :  { %3237 = vmatprep.mubr.f32.mxu1 %v17144_v40  ;;  %5453 = vrot.lane.b32.xlu1 %v17144_v40, %s15710_s22 }
 0x444   :  { %v17379_v53 = vpop.permute.xlu0 %3981  ;;  %15331 = vmatmul.mubr.msk.f32.gmra.mxu0 %vm2009_vm2, %v16965_v18  ;;  %15332 = vmatmul.mubr.msk.f32.vlgmr.msra.gmra.mxu1 %vm2009_vm2, %v16979_v49  ;;  %v17388_v36 = vpop.permute.xlu1 %3977 }
 0x445   :  { %3433 = vmatpush1.msra.mxu1 %v3291_v19  ;;  %3243 = vmatprep.mubr.f32.mxu1 %v17144_v40  ;;  %v4012_v59 = vsel %vm21144_vm10, %v17348_v47, %v17379_v53  ;;  %v4011_v57 = vsel %vm21146_vm5, %v17388_v36, %v17348_v47  ;;  %vm21158_vm10 = vmmov %vm21157_vm0  ;;  %vm21160_vm5 = vcmask 506880  }
 0x446   :  { %5451 = vrot.lane.b32.xlu0 %v17067_v43, %s15710_s22  ;;  %3586 = vmatprep.subr.mxu1 %v3296_v56 }
 0x447   :  { %3389 = vmatprep.mubr.f32.mxu0 %v17144_v40  ;;  %6142 = vrot.lane.b32.xlu1 %v16965_v18, %s15712_s24 }
 0x448   :  { %v17398_v25 = vpop.permute.xlu0 %3985  ;;  %15333 = vmatmul.mubr.msk.f32.gmra.mxu1 %vm2009_vm2, %v16965_v18  ;;  %15334 = vmatmul.mubr.msk.f32.vlgmr.msra.gmra.mxu0 %vm2009_vm2, %v17270_v17  ;;  %v17407_v38 = vpop.permute.xlu1 %3975 }
 0x449   :  { %3510 = vmatpush1.msra.mxu0 %v3293_v7  ;;  %3395 = vmatprep.mubr.f32.mxu0 %v17144_v40  ;;  %v4014_v44 = vsel %vm21145_vm13, %v17368_v37, %v17398_v25  ;;  %vm21159_vm13 = vmmov %vm21157_vm0 }
 0x44a   :  { %6140 = vrot.lane.b32.xlu0 %v16979_v49, %s15712_s24  ;;  %3663 = vmatprep.subr.mxu0 %v3298_v20 }
 0x44b   :  { %3466 = vmatprep.mubr.f32.mxu1 %v17144_v40  ;;  %6838 = vrot.lane.b32.xlu1 %v16974_v3, %s15695_s27 }
 0x44c   :  { %v17417_v30 = vpop.permute.xlu0 %3973  ;;  %15335 = vmatmul.mubr.msk.f32.gmra.mxu0 %vm2009_vm2, %v17292_v26  ;;  %15336 = vmatmul.mubr.msk.f32.vlgmr.msra.gmra.mxu1 %vm2009_vm2, %v17270_v17  ;;  %v3277_v23 = vpop.permute.xlu1 %3276 }
 0x44d   :  { %3587 = vmatpush1.msra.mxu1 %v3295_v5  ;;  %3472 = vmatprep.mubr.f32.mxu1 %v17144_v40  ;;  %v3299_v9 = vsel %vm3288_vm9, %v17342_v52, %v3277_v23  ;;  %v4013_v52 = vsel %vm21148_vm11, %v17379_v53, %v17368_v37  ;;  %vm21162_vm11 = vmmov %vm21160_vm5 }
 0x44e   :  { %6836 = vrot.lane.b32.xlu0 %v16971_v61, %s15695_s27  ;;  %3543 = vmatprep.mubr.f32.mxu0 %v17144_v40 }
 0x44f   :  { %6842 = vrot.lane.b32.xlu1 %v16990_v0, %s15695_s27 }
 0x450   :  { %v3279_v58 = vpop.permute.xlu0 %3278  ;;  %15337 = vmatmul.mubr.msk.f32.gmra.mxu1 %vm2009_vm2, %v17292_v26  ;;  %15338 = vmatmul.mubr.msk.f32.vlgmr.msra.gmra.mxu0 %vm2009_vm2, %v17270_v17  ;;  %v17439_v63 = vpop.permute.xlu1 %3989 }
 0x451   :  { %3664 = vmatpush1.msra.mxu0 %v3297_v39  ;;  %v3300_v14 = vsel %vm3288_vm9, %v3277_v23, %v3279_v58  ;;  %3549 = vmatprep.mubr.f32.mxu0 %v17144_v40 }
 0x452   :  { %6840 = vrot.lane.b32.xlu0 %v16987_v60, %s15695_s27  ;;  %3740 = vmatprep.subr.mxu1 %v3300_v14 }
 0x453   :  { %3620 = vmatprep.mubr.f32.mxu1 %v17144_v40  ;;  %6813 = vrot.lane.b32.xlu1 %v16979_v49, %s15713_s25 }
 0x454   :  { %v17447_v33 = vpop.permute.xlu0 %3987  ;;  %15339 = vmatmul.mubr.msk.f32.gmra.mxu0 %vm2009_vm2, %v17292_v26  ;;  %15340 = vmatmul.mubr.msk.f32.vlgmr.msra.gmra.mxu1 %vm2009_vm2, %v17270_v17  ;;  %v3281_v46 = vpop.permute.xlu1 %3280 }
 0x455   :  { %3741 = vmatpush1.msra.mxu1 %v3299_v9  ;;  %3626 = vmatprep.mubr.f32.mxu1 %v17144_v40  ;;  %v3301_v10 = vsel %vm3288_vm9, %v3279_v58, %v3281_v46  ;;  %v4016_v45 = vsel %vm21147_vm8, %v17447_v33, %v17439_v63  ;;  %v4015_v27 = vsel %vm21150_vm12, %v17398_v25, %v17447_v33  ;;  %vm21161_vm8 = vmmov %vm21160_vm5 }
 0x456   :  { %6834 = vrot.lane.b32.xlu0 %v16960_v6, %s15695_s27  ;;  %3894 = vmatprep.subr.mxu1 %v3304_v62 }
 0x457   :  { %3697 = vmatprep.mubr.f32.mxu0 %v17144_v40  ;;  %6844 = vrot.lane.b32.xlu1 %v17007_v32, %s15695_s27 }
 0x458   :  { %v3283_v34 = vpop.permute.xlu0 %3282  ;;  %15341 = vmatmul.mubr.msk.f32.gmra.mxu1 %vm2009_vm2, %v17292_v26  ;;  %15342 = vmatmul.mubr.msk.f32.vlgmr.msra.gmra.mxu0 %vm2009_vm2, %v17270_v17  ;;  %v17468_v8 = vpop.permute.xlu1 %3993 }
 0x459   :  { %v3302_v16 = vsel %vm3288_vm9, %v3281_v46, %v3283_v34  ;;  %3703 = vmatprep.mubr.f32.mxu0 %v17144_v40  ;;  %3774 = vmatprep.mubr.f32.mxu1 %v17144_v40  ;;  %v3303_v48 = vsel %vm3288_vm9, %v3283_v34, %v17330_v12  ;;  %v17509_v12 = vpack.i.bf16 %v17144_v40, %v17144_v40 }
 0x45a   :  { %6815 = vrot.lane.b32.xlu0 %v16965_v18, %s15713_s25  ;;  %3817 = vmatprep.subr.mxu0 %v3302_v16 }
 0x45b   :  { %3818 = vmatpush1.msra.mxu0 %v3301_v10  ;;  %6848 = vrot.lane.b32.xlu1 %v17019_v2, %s15695_s27 }
 0x45c   :  { %v3992_v42 = vpop.permute.xlu0 %3991  ;;  %15343 = vmatmul.mubr.msk.f32.gmra.mxu0 %vm2009_vm2, %v17292_v26  ;;  %15344 = vmatmul.mubr.msk.f32.vlgmr.msra.gmra.mxu1 %vm2009_vm2, %v17270_v17  ;;  %v17486_v55 = vpop.permute.xlu1 %3997 }
 0x45d   :  { %3895 = vmatpush1.msra.mxu1 %v3303_v48  ;;  %4077 = vmatprep.subr.mxu0 %v4012_v59  ;;  %v4018_v50 = vsel %vm21149_vm4, %v3992_v42, %v17468_v8  ;;  %v4017_v54 = vsel %vm21152_vm6, %v17439_v63, %v3992_v42  ;;  %vm21163_vm4 = vmmov %vm21160_vm5 }
 0x45e   :  { %6846 = vrot.lane.b32.xlu0 %v17013_v4, %s15695_s27  ;;  %4154 = vmatprep.subr.mxu1 %v4014_v44  ;;  %vm21164_vm12 = vmmov %vm21163_vm4 }
 0x45f   :  { %3780 = vmatprep.mubr.f32.mxu1 %v17144_v40  ;;  %3851 = vmatprep.mubr.f32.mxu0 %v17144_v40 }
 0x460   :  { %v3996_v11 = vpop.permute.xlu0 %3995  ;;  %15345 = vmatmul.mubr.msk.f32.gmra.mxu1 %vm2009_vm2, %v17292_v26  ;;  %15346 = vmatmul.mubr.msk.f32.vlgmr.msra.gmra.mxu0 %vm2009_vm2, %v17270_v17  ;;  %v4010_v29 = vpop.permute.xlu1 %4009 }
 0x461   :  { %4078 = vmatpush1.msra.mxu0 %v4011_v57  ;;  %6852 = vrot.lane.b32.xlu1 %v17031_v41, %s15695_s27  ;;  %v4020_v37 = vsel %vm21151_vm3, %v3996_v11, %v17486_v55  ;;  %v4019_v36 = vsel %vm21153_vm15, %v17468_v8, %v3996_v11  ;;  %vm21165_vm3 = vmmov %vm21163_vm4 }
 0x462   :  { %6850 = vrot.lane.b32.xlu0 %v17025_v21, %s15695_s27  ;;  %4231 = vmatprep.subr.mxu0 %v4016_v45  ;;  %vm21166_vm6 = vmmov %vm21165_vm3 }
 0x463   :  { %3857 = vmatprep.mubr.f32.mxu0 %v17144_v40  ;;  %3928 = vmatprep.mubr.f32.mxu1 %v17144_v40  ;;  %vm21167_vm15 = vmmov %vm21165_vm3 }
 0x464   :  { %v17515_v35 = vpop.permute.xlu0 %4007  ;;  %15347 = vmatmul.mubr.msk.f32.gmra.mxu0 %vm2009_vm2, %v17292_v26  ;;  %15348 = vmatmul.mubr.msk.f32.vlgmr.msra.gmra.mxu1 %vm2009_vm2, %v17270_v17  ;;  %v17524_v47 = vpop.permute.xlu1 %4703 }
 0x465   :  { %4155 = vmatpush1.msra.mxu1 %v4013_v52  ;;  %15641 = vrot.lane.b32.xlu1 %v17509_v12, %s15695_s27 }
 0x466   :  { %6862 = vrot.lane.b32.xlu0 %v17067_v43, %s15695_s27  ;;  %4308 = vmatprep.subr.mxu1 %v4018_v50 }
 0x467   :  { %3934 = vmatprep.mubr.f32.mxu1 %v17144_v40  ;;  %4111 = vmatprep.mubr.f32.mxu0 %v17144_v40 }
 0x468   :  { %v17534_v17 = vpop.permute.xlu0 %4701  ;;  %15349 = vmatmul.mubr.msk.f32.gmra.mxu1 %vm2009_vm2, %v17292_v26  ;;  %15350 = vmatmul.mubr.msk.f32.vlgmr.msra.gmra.mxu0 %vm2009_vm2, %v17417_v30  ;;  %v17543_v31 = vpop.permute.xlu1 %4707 }
 0x469   :  { %4232 = vmatpush1.msra.mxu0 %v4015_v27  ;;  %6856 = vrot.lane.b32.xlu1 %v17043_v28, %s15695_s27  ;;  %v4734_v39 = vsel %vm21160_vm5, %v17534_v17, %v17524_v47 }
 0x46a   :  { %6854 = vrot.lane.b32.xlu0 %v17037_v22, %s15695_s27  ;;  %4385 = vmatprep.subr.mxu0 %v4020_v37 }
 0x46b   :  { %4117 = vmatprep.mubr.f32.mxu0 %v17144_v40  ;;  %4188 = vmatprep.mubr.f32.mxu1 %v17144_v40 }
 0x46c   :  { %v17553_v26 = vpop.permute.xlu0 %4705  ;;  %15351 = vmatmul.mubr.msk.f32.gmra.mxu0 %vm2009_vm2, %v17407_v38  ;;  %15352 = vmatmul.mubr.msk.f32.vlgmr.msra.gmra.mxu1 %vm2009_vm2, %v17417_v30  ;;  %v4002_v53 = vpop.permute.xlu1 %4001 }
 0x46d   :  { %4309 = vmatpush1.msra.mxu1 %v4017_v54  ;;  %7560 = vrot.lane.b32.xlu1 %v16974_v3, %s15707_s3  ;;  %v4736_v63 = vsel %vm21161_vm8, %v17553_v26, %v17543_v31  ;;  %v4735_v46 = vsel %vm21164_vm12, %v17524_v47, %v17553_v26 }
 0x46e   :  { %6858 = vrot.lane.b32.xlu0 %v17046_v24, %s15695_s27  ;;  %4194 = vmatprep.mubr.f32.mxu1 %v17144_v40 }
 0x46f   :  { %4265 = vmatprep.mubr.f32.mxu0 %v17144_v40 }
 0x470   :  { %v4000_v19 = vpop.permute.xlu0 %3999  ;;  %15353 = vmatmul.mubr.msk.f32.gmra.mxu1 %vm2009_vm2, %v17407_v38  ;;  %15354 = vmatmul.mubr.msk.f32.vlgmr.msra.gmra.mxu0 %vm2009_vm2, %v17417_v30  ;;  %v17573_v56 = vpop.permute.xlu1 %4695 }
 0x471   :  { %4386 = vmatpush1.msra.mxu0 %v4019_v36  ;;  %6860 = vrot.lane.b32.xlu1 %v17057_v51, %s15695_s27  ;;  %v4022_v3 = vsel %vm21154_vm14, %v4000_v19, %v4002_v53  ;;  %v4021_v7 = vsel %vm21155_vm1, %v17486_v55, %v4000_v19  ;;  %vm21168_vm14 = vmmov %vm21165_vm3 }
 0x472   :  { %7558 = vrot.lane.b32.xlu0 %v16971_v61, %s15707_s3  ;;  %4462 = vmatprep.subr.mxu1 %v4022_v3  ;;  %v4026_v61 = vsel %vm21156_vm7, %v17515_v35, %v4010_v29  ;;  %vm21169_vm1 = vmmov %vm21165_vm3 }
 0x473   :  { %4271 = vmatprep.mubr.f32.mxu0 %v17144_v40  ;;  %4342 = vmatprep.mubr.f32.mxu1 %v17144_v40  ;;  %vm21170_vm7 = vmmov %vm21169_vm1 }
 0x474   :  { %v4700_v25 = vpop.permute.xlu0 %4699  ;;  %15355 = vmatmul.mubr.msk.f32.gmra.mxu0 %vm2009_vm2, %v17407_v38  ;;  %15356 = vmatmul.mubr.msk.f32.vlgmr.msra.gmra.mxu1 %vm2009_vm2, %v17417_v30  ;;  %v4006_v20 = vpop.permute.xlu1 %4005 }
 0x475   :  { %4463 = vmatpush1.msra.mxu1 %v4021_v7  ;;  %7564 = vrot.lane.b32.xlu1 %v16990_v0, %s15707_s3  ;;  %v4733_v9 = vsel %vm21162_vm11, %v4700_v25, %v17534_v17 }
 0x476   :  { %7562 = vrot.lane.b32.xlu0 %v16987_v60, %s15707_s3  ;;  %4616 = vmatprep.subr.mxu1 %v4026_v61 }
 0x477   :  { %4348 = vmatprep.mubr.f32.mxu1 %v17144_v40  ;;  %4419 = vmatprep.mubr.f32.mxu0 %v17144_v40 }
 0x478   :  { %v4004_v5 = vpop.permute.xlu0 %4003  ;;  %15357 = vmatmul.mubr.msk.f32.gmra.mxu1 %vm2009_vm2, %v17407_v38  ;;  %15358 = vmatmul.mubr.msk.f32.vlgmr.msra.gmra.mxu0 %vm2009_vm2, %v17417_v30  ;;  %v4710_v23 = vpop.permute.xlu1 %4709 }
 0x479   :  { %7552 = vrot.lane.b32.xlu1 %v16979_v49, %s15699_s8  ;;  %v4024_v0 = vsel %vm21157_vm0, %v4004_v5, %v4006_v20  ;;  %4425 = vmatprep.mubr.f32.mxu0 %v17144_v40  ;;  %v4023_v60 = vsel %vm21158_vm10, %v4002_v53, %v4004_v5  ;;  %v4025_v49 = vsel %vm21159_vm13, %v4006_v20, %v17515_v35  ;;  %vm21171_vm0 = vmmov %vm21169_vm1  ;;  %vm5455_vm13 = vcmask 490496  }
 0x47a   :  { %7556 = vrot.lane.b32.xlu0 %v16960_v6, %s15707_s3  ;;  %4539 = vmatprep.subr.mxu0 %v4024_v0  ;;  %vm21172_vm10 = vmmov %vm21171_vm0 }
 0x47b   :  { %4496 = vmatprep.mubr.f32.mxu1 %v17144_v40  ;;  %4540 = vmatpush1.msra.mxu0 %v4023_v60  ;;  %vm21173_vm5 = vmmov %vm21171_vm0 }
 0x47c   :  { %v17608_v58 = vpop.permute.xlu0 %4697  ;;  %15359 = vmatmul.mubr.msk.f32.gmra.mxu0 %vm2009_vm2, %v17407_v38  ;;  %15360 = vmatmul.mubr.msk.f32.vlgmr.msra.gmra.mxu1 %vm2009_vm2, %v17417_v30  ;;  %v4714_v6 = vpop.permute.xlu1 %4713  ;;  %vm21174_vm8 = vmmov %vm21171_vm0 }
 0x47d   :  { %4617 = vmatpush1.msra.mxu1 %v4025_v49  ;;  %4799 = vmatprep.subr.mxu0 %v4734_v39  ;;  %vm21175_vm11 = vmmov %vm21171_vm0 }
 0x47e   :  { %7554 = vrot.lane.b32.xlu0 %v16965_v18, %s15699_s8  ;;  %4876 = vmatprep.subr.mxu1 %v4736_v63 }
 0x47f   :  { %7566 = vrot.lane.b32.xlu1 %v17007_v32, %s15707_s3  ;;  %4502 = vmatprep.mubr.f32.mxu1 %v17144_v40 }
 0x480   :  { %v4712_v14 = vpop.permute.xlu0 %4711  ;;  %4573 = vmatprep.mubr.f32.mxu0 %v17144_v40  ;;  %15361 = vmatmul.mubr.msk.f32.gmra.mxu1 %vm2009_vm2, %v17407_v38  ;;  %v4718_v33 = vpop.permute.xlu1 %4717 }
 0x481   :  { %15362 = vmatmul.mubr.msk.f32.vlgmr.msra.gmra.mxu0 %vm2009_vm2, %v17417_v30  ;;  %v4738_v18 = vsel %vm21163_vm4, %v4710_v23, %v4712_v14  ;;  %4650 = vmatprep.mubr.f32.mxu1 %v17144_v40  ;;  %vm21180_vm4 = vcmask 1031168  }
 0x482   :  { %7568 = vrot.lane.b32.xlu0 %v17013_v4, %s15707_s3  ;;  %4800 = vmatpush1.msra.mxu0 %v4733_v9  ;;  %v17791_v9 = vpop.f32.mrf.mxu1  ;;  %vm21181_vm12 = vmmov %vm21180_vm4 }
 0x483   :  { %4953 = vmatprep.subr.mxu0 %v4738_v18  ;;  %7570 = vrot.lane.b32.xlu1 %v17019_v2, %s15707_s3  ;;  %v17793_v18 = vld [vmem:[#allocation2 + $0x80] sm:$0xff] }
 0x484   :  { %v4716_v32 = vpop.permute.xlu0 %4715  ;;  %4579 = vmatprep.mubr.f32.mxu0 %v17144_v40  ;;  %15364 = vmatmul.mubr.msk.f32.vlgmr.msra.gmra.mxu1 %vm2009_vm2, %v17417_v30  ;;  %v17646_v62 = vpop.permute.xlu1 %4729 }
 0x485   :  { %15363 = vmatmul.mubr.msk.f32.gmra.mxu0 %vm2009_vm2, %v17407_v38  ;;  %4877 = vmatpush1.msra.mxu1 %v4735_v46  ;;  %v4740_v4 = vsel %vm21165_vm3, %v4714_v6, %v4716_v32  ;;  %v15654_v46 = vld [vmem:[#allocation2 + $0x10] sm:$0xff]  ;;  %vm21182_vm3 = vmmov %vm21180_vm4 }
 0x486   :  { %7572 = vrot.lane.b32.xlu0 %v17025_v21, %s15707_s3  ;;  %5030 = vmatprep.subr.mxu1 %v4740_v4  ;;  %v4737_v21 = vsel %vm21166_vm6, %v17543_v31, %v4710_v23  ;;  %v17769_v23 = vpop.f32.mrf.mxu0  ;;  %vm21183_vm6 = vmmov %vm21182_vm3 }
 0x487   :  { %7574 = vrot.lane.b32.xlu1 %v17031_v41, %s15707_s3  ;;  %4656 = vmatprep.mubr.f32.mxu1 %v17144_v40 }
 0x488   :  { %v4720_v2 = vpop.permute.xlu0 %4719  ;;  %4833 = vmatprep.mubr.f32.mxu0 %v17144_v40  ;;  %15365 = vmatmul.mubr.msk.f32.gmra.mxu1 %vm2009_vm2, %v17407_v38  ;;  %v17659_v30 = vpop.permute.xlu1 %5423  ;;  %v4739_v38 = vsel %vm21168_vm14, %v4712_v14, %v4714_v6  ;;  %vm21185_vm14 = vmmov %vm21182_vm3 }
 0x489   :  { %15366 = vmatmul.mubr.msk.f32.vlgmr.msra.gmra.mxu0 %vm2009_vm2, %v17573_v56  ;;  %v4742_v34 = vsel %vm21167_vm15, %v4718_v33, %v4720_v2  ;;  %4910 = vmatprep.mubr.f32.mxu1 %v17144_v40  ;;  %v17779_v39 = vpop.f32.mrf.mxu0  ;;  %vm21184_vm15 = vmmov %vm21182_vm3 }
 0x48a   :  { %7576 = vrot.lane.b32.xlu0 %v17037_v22, %s15707_s3  ;;  %4954 = vmatpush1.msra.mxu0 %v4737_v21  ;;  %21176 = vst [vmem:[#allocation14_spill] sm:$0xff] %v17779_v39 }
 0x48b   :  { %5107 = vmatprep.subr.mxu0 %v4742_v34  ;;  %7578 = vrot.lane.b32.xlu1 %v17043_v28, %s15707_s3  ;;  %v4741_v28 = vsel %vm21169_vm1, %v4716_v32, %v4718_v33  ;;  %v17796_v32 = vpop.f32.mrf.mxu0  ;;  %vm21186_vm1 = vmmov %vm21182_vm3 }
 0x48c   :  { %v4732_v41 = vpop.permute.xlu0 %4731  ;;  %4839 = vmatprep.mubr.f32.mxu0 %v17144_v40  ;;  %15368 = vmatmul.mubr.msk.f32.vlgmr.msra.gmra.mxu1 %vm2009_vm2, %v17573_v56  ;;  %v4722_v8 = vpop.permute.xlu1 %4721 }
 0x48d   :  { %15367 = vmatmul.mubr.msk.f32.gmra.mxu0 %vm2009_vm2, %v17608_v58  ;;  %5031 = vmatpush1.msra.mxu1 %v4739_v38  ;;  %v4743_v42 = vsel %vm21171_vm0, %v4720_v2, %v4722_v8  ;;  %v17807_v2 = vpop.f32.mrf.mxu1  ;;  %v17810_v21 = vpop.f32.mrf.mxu0  ;;  %vm21189_vm0 = vmmov %vm21186_vm1 }
 0x48e   :  { %7580 = vrot.lane.b32.xlu0 %v17046_v24, %s15707_s3  ;;  %4916 = vmatprep.mubr.f32.mxu1 %v17144_v40  ;;  %21177 = vst [vmem:[#allocation15_spill] sm:$0xff] %v17807_v2 }
 0x48f   :  { %7582 = vrot.lane.b32.xlu1 %v17057_v51, %s15707_s3  ;;  %4987 = vmatprep.mubr.f32.mxu0 %v17144_v40  ;;  %v8274_v51 = vld [vmem:[%s21008_s4] sm:$0xff]  ;;  %v17822_v38 = vpop.f32.mrf.mxu1 }
 0x490   :  { %v4724_v22 = vpop.permute.xlu0 %4723  ;;  %15369 = vmatmul.mubr.msk.f32.gmra.mxu1 %vm2009_vm2, %v17608_v58 }
 0x491   :  { %15370 = vmatmul.mubr.msk.f32.vlgmr.msra.gmra.mxu0 %vm2009_vm2, %v17573_v56  ;;  %v4744_v16 = vsel %vm21170_vm7, %v4722_v8, %v4724_v22  ;;  %5064 = vmatprep.mubr.f32.mxu1 %v17144_v40  ;;  %v5428_v24 = vpop.permute.xlu1 %5427  ;;  %v15656_v8 = vld [vmem:[#allocation2 + $0x8] sm:$0xff]  ;;  %vm21187_vm7 = vmmov %vm21186_vm1 }
 0x492   :  { %7584 = vrot.lane.b32.xlu0 %v17067_v43, %s15707_s3  ;;  %5108 = vmatpush1.msra.mxu0 %v4741_v28  ;;  %v4748_v43 = vsel %vm21172_vm10, %v17646_v62, %v4732_v41  ;;  %v15657_v28 = vld [vmem:[#allocation2 + $0x30] sm:$0xff]  ;;  %vm21190_vm10 = vmmov %vm21189_vm0 }
 0x493   :  { %5184 = vmatprep.subr.mxu1 %v4744_v16  ;;  %4993 = vmatprep.mubr.f32.mxu0 %v17144_v40 }
 0x494   :  { %v5426_v10 = vpop.permute.xlu0 %5425  ;;  %15372 = vmatmul.mubr.msk.f32.vlgmr.msra.gmra.mxu1 %vm2009_vm2, %v17573_v56  ;;  %15646 = vrot.lane.b32.xlu1 %v17509_v12, %s15707_s3 }
 0x495   :  { %15371 = vmatmul.mubr.msk.f32.gmra.mxu0 %vm2009_vm2, %v17608_v58  ;;  %5185 = vmatpush1.msra.mxu1 %v4743_v42  ;;  %v4726_v48 = vpop.permute.xlu1 %4725  ;;  %v5457_v11 = vsel %vm5455_vm13, %v17659_v30, %v5426_v10  ;;  %v5458_v27 = vsel %vm5455_vm13, %v5426_v10, %v5428_v24  ;;  %v17835_v10 = vpop.f32.mrf.mxu1  ;;  %v15659_v42 = vld [vmem:[#allocation2 + $0x40] sm:$0xff] }
 0x496   :  { %8278 = vperm.xlu0 %15639, %v8274_v51   ;;  %5338 = vmatprep.subr.mxu1 %v4748_v43  ;;  %v4745_v57 = vsel %vm21174_vm8, %v4724_v22, %v4726_v48  ;;  %vm21195_vm8 = vmmov %vm21189_vm0 }
 0x497   :  { %5070 = vmatprep.mubr.f32.mxu1 %v17144_v40  ;;  %5141 = vmatprep.mubr.f32.mxu0 %v17144_v40 }
 0x498   :  { %v4728_v59 = vpop.permute.xlu0 %4727  ;;  %15373 = vmatmul.mubr.msk.f32.gmra.mxu1 %vm2009_vm2, %v17608_v58 }
 0x499   :  { %15374 = vmatmul.mubr.msk.f32.vlgmr.msra.gmra.mxu0 %vm2009_vm2, %v17573_v56  ;;  %v4746_v55 = vsel %vm21173_vm5, %v4726_v48, %v4728_v59  ;;  %5218 = vmatprep.mubr.f32.mxu1 %v17144_v40  ;;  %v5422_v44 = vpop.permute.xlu1 %5421  ;;  %v4747_v45 = vsel %vm21175_vm11, %v4728_v59, %v17646_v62  ;;  %vm21193_vm5 = vmmov %vm21189_vm0 }
 0x49a   :  { %5261 = vmatprep.subr.mxu0 %v4746_v55  ;;  %5147 = vmatprep.mubr.f32.mxu0 %v17144_v40  ;;  %v5456_v47 = vsel %vm5455_vm13, %v5422_v44, %v17659_v30  ;;  %v15655_v30 = vld [vmem:[#allocation2 + $0x20] sm:$0xff]  ;;  %v15660_v44 = vld [vmem:[#allocation2 + $0x28] sm:$0xff]  ;;  %vm21196_vm11 = vmmov %vm21189_vm0 }
 0x49b   :  { %5262 = vmatpush1.msra.mxu0 %v4745_v57 }
 0x49c   :  { %v5430_v29 = vpop.permute.xlu0 %5429  ;;  %15376 = vmatmul.mubr.msk.f32.vlgmr.msra.gmra.mxu1 %vm2009_vm2, %v17573_v56  ;;  %5522 = vmatprep.subr.mxu0 %v5457_v11  ;;  %v15661_v11 = vld [vmem:[#allocation2 + $0x50] sm:$0xff] }
 0x49d   :  { %15375 = vmatmul.mubr.msk.f32.gmra.mxu0 %vm2009_vm2, %v17608_v58  ;;  %5339 = vmatpush1.msra.mxu1 %v4747_v45  ;;  %v5459_v12 = vsel %vm5455_vm13, %v5428_v24, %v5430_v29  ;;  %v17724_v35 = vpop.permute.xlu1 %5419  ;;  %v17825_v22 = vpop.f32.mrf.mxu0  ;;  %v15658_v24 = vld [vmem:[#allocation2 + $0x18] sm:$0xff] }
 0x49e   :  { %5599 = vmatprep.subr.mxu1 %v5459_v12  ;;  %5224 = vmatprep.mubr.f32.mxu1 %v17144_v40  ;;  %v15662_v45 = vld [vmem:[#allocation2 + $0x38] sm:$0xff] }
 0x49f   :  { %5295 = vmatprep.mubr.f32.mxu0 %v17144_v40  ;;  %v17838_v43 = vpop.f32.mrf.mxu0 }
 0x4a0   :  { %v17728_v52 = vpop.permute.xlu0 %5417  ;;  %15377 = vmatmul.mubr.msk.f32.gmra.mxu1 %vm2009_vm2, %v17608_v58  ;;  %21178 = vst [vmem:[#allocation16_spill] sm:$0xff] %v17838_v43 }
 0x4a1   :  { %15378 = vmatmul.mubr.msk.f32.vlgmr.msra.gmra.mxu0 %vm2009_vm2, %v17573_v56  ;;  %5372 = vmatprep.mubr.f32.mxu1 %v17144_v40  ;;  %v5434_v50 = vpop.permute.xlu1 %5433  ;;  %v17853_v57 = vpop.f32.mrf.mxu0 }
 0x4a2   :  { %5523 = vmatpush1.msra.mxu0 %v5456_v47  ;;  %5301 = vmatprep.mubr.f32.mxu0 %v17144_v40 }
 0x4a3   :  { %v17866_v47 = vpop.f32.mrf.mxu0 }
 0x4a4   :  { %v5432_v17 = vpop.permute.xlu0 %5431  ;;  %15380 = vmatmul.mubr.msk.f32.vlgmr.msra.gmra.mxu1 %vm2009_vm2, %v17573_v56 }
 0x4a5   :  { %15379 = vmatmul.mubr.msk.f32.gmra.mxu0 %vm2009_vm2, %v17608_v58  ;;  %5600 = vmatpush1.msra.mxu1 %v5458_v27  ;;  %v5461_v31 = vsel %vm5455_vm13, %v5432_v17, %v5434_v50  ;;  %v5438_v37 = vpop.permute.xlu1 %5437  ;;  %v5460_v26 = vsel %vm5455_vm13, %v5430_v29, %v5432_v17 }
 0x4a6   :  { %5676 = vmatprep.subr.mxu0 %v5461_v31  ;;  %5378 = vmatprep.mubr.f32.mxu1 %v17144_v40  ;;  %v15664_v31 = vld [vmem:[#allocation2 + $0x48] sm:$0xff] }
 0x4a7   :  { %5556 = vmatprep.mubr.f32.mxu0 %v17144_v40 }
 0x4a8   :  { %v5436_v54 = vpop.permute.xlu0 %5435  ;;  %15381 = vmatmul.mubr.msk.f32.gmra.mxu1 %vm2009_vm2, %v17608_v58 }
 0x4a9   :  { %15382 = vmatmul.mubr.msk.f32.vlgmr.msra.gmra.mxu0 %vm2009_vm2, %v17728_v52  ;;  %v5463_v53 = vsel %vm5455_vm13, %v5436_v54, %v5438_v37  ;;  %5633 = vmatprep.mubr.f32.mxu1 %v17144_v40  ;;  %v5442_v19 = vpop.permute.xlu1 %5441  ;;  %v5462_v56 = vsel %vm5455_vm13, %v5434_v50, %v5436_v54 }
 0x4aa   :  { %5677 = vmatpush1.msra.mxu0 %v5460_v26  ;;  %5753 = vmatprep.subr.mxu1 %v5463_v53 }
 0x4ab   :  { %5562 = vmatprep.mubr.f32.mxu0 %v17144_v40 }
 0x4ac   :  { %v5440_v36 = vpop.permute.xlu0 %5439  ;;  %15384 = vmatmul.mubr.msk.f32.vlgmr.msra.gmra.mxu1 %vm2009_vm2, %v17728_v52 }
 0x4ad   :  { %15383 = vmatmul.mubr.msk.f32.gmra.mxu0 %vm2009_vm2, %v17724_v35  ;;  %5754 = vmatpush1.msra.mxu1 %v5462_v56  ;;  %v5465_v3 = vsel %vm5455_vm13, %v5440_v36, %v5442_v19  ;;  %v5446_v25 = vpop.permute.xlu1 %5445  ;;  %v5464_v7 = vsel %vm5455_vm13, %v5438_v37, %v5440_v36  ;;  %v17850_v55 = vpop.f32.mrf.mxu1  ;;  %v15665_v37 = vld [vmem:[#allocation2 + $0x70] sm:$0xff] }
 0x4ae   :  { %5830 = vmatprep.subr.mxu0 %v5465_v3  ;;  %5639 = vmatprep.mubr.f32.mxu1 %v17144_v40 }
 0x4af   :  { %5710 = vmatprep.mubr.f32.mxu0 %v17144_v40 }
 0x4b0   :  { %v5444_v20 = vpop.permute.xlu0 %5443  ;;  %15385 = vmatmul.mubr.msk.f32.gmra.mxu1 %vm2009_vm2, %v17724_v35 }
 0x4b1   :  { %15386 = vmatmul.mubr.msk.f32.vlgmr.msra.gmra.mxu0 %vm2009_vm2, %v17728_v52  ;;  %v5467_v61 = vsel %vm5455_vm13, %v5444_v20, %v5446_v25  ;;  %5787 = vmatprep.mubr.f32.mxu1 %v17144_v40  ;;  %v5450_v5 = vpop.permute.xlu1 %5449  ;;  %v5466_v60 = vsel %vm5455_vm13, %v5442_v19, %v5444_v20  ;;  %v15666_v19 = vld [vmem:[#allocation2 + $0x58] sm:$0xff]  ;;  %v15667_v20 = vld [vmem:[#allocation2 + $0x68] sm:$0xff] }
 0x4b2   :  { %5831 = vmatpush1.msra.mxu0 %v5464_v7  ;;  %5907 = vmatprep.subr.mxu1 %v5467_v61 }
 0x4b3   :  { %5716 = vmatprep.mubr.f32.mxu0 %v17144_v40 }
 0x4b4   :  { %v5448_v0 = vpop.permute.xlu0 %5447  ;;  %15388 = vmatmul.mubr.msk.f32.vlgmr.msra.gmra.mxu1 %vm2009_vm2, %v17728_v52 }
 0x4b5   :  { %15387 = vmatmul.mubr.msk.f32.gmra.mxu0 %vm2009_vm2, %v17724_v35  ;;  %5908 = vmatpush1.msra.mxu1 %v5466_v60  ;;  %v5469_v58 = vsel %vm5455_vm13, %v5448_v0, %v5450_v5  ;;  %v5454_v49 = vpop.permute.xlu1 %5453  ;;  %v5468_v6 = vsel %vm5455_vm13, %v5446_v25, %v5448_v0 }
 0x4b6   :  { %5984 = vmatprep.subr.mxu0 %v5469_v58  ;;  %5793 = vmatprep.mubr.f32.mxu1 %v17144_v40 }
 0x4b7   :  { %5864 = vmatprep.mubr.f32.mxu0 %v17144_v40 }
 0x4b8   :  { %v5452_v63 = vpop.permute.xlu0 %5451  ;;  %15389 = vmatmul.mubr.msk.f32.gmra.mxu1 %vm2009_vm2, %v17724_v35 }
 0x4b9   :  { %15390 = vmatmul.mubr.msk.f32.vlgmr.msra.gmra.mxu0 %vm2009_vm2, %v17728_v52  ;;  %5941 = vmatprep.mubr.f32.mxu1 %v17144_v40  ;;  %v5471_v14 = vsel %vm5455_vm13, %v5452_v63, %v5454_v49  ;;  %v17789_v33 = vpop.permute.xlu1 %6142  ;;  %v5470_v40 = vsel %vm5455_vm13, %v5450_v5, %v5452_v63  ;;  %v15668_v49 = vld [vmem:[#allocation2 + $0x78] sm:$0xff]  ;;  %vm21192_vm13 = vmmov %vm21189_vm0 }
 0x4ba   :  { %5985 = vmatpush1.msra.mxu0 %v5468_v6  ;;  %5870 = vmatprep.mubr.f32.mxu0 %v17793_v18 }
 0x4bb   :  { %6178 = vmatprep.subr.mxu0 %v15654_v46  ;;  %6061 = vmatprep.subr.mxu1 %v5471_v14 }
 0x4bc   :  { %v17798_v62 = vpop.permute.xlu0 %6140  ;;  %15392 = vmatmul.mubr.msk.f32.vlgmr.msra.gmra.mxu1 %vm2009_vm2, %v17728_v52 }
 0x4bd   :  { %15391 = vmatmul.mubr.msk.f32.gmra.mxu0 %vm2009_vm2, %v17724_v35  ;;  %6062 = vmatpush1.msra.mxu1 %v5470_v40  ;;  %v17805_v4 = vpop.permute.xlu1 %6838 }
 0x4be   :  { %6255 = vmatprep.subr.mxu1 %v15655_v30  ;;  %5947 = vmatprep.mubr.f32.mxu1 %v17793_v18 }
 0x4bf   :  { %6018 = vmatprep.mubr.f32.mxu0 %v17793_v18 }
 0x4c0   :  { %v17813_v34 = vpop.permute.xlu0 %6836  ;;  %15393 = vmatmul.mubr.msk.f32.gmra.mxu1 %vm2009_vm2, %v17724_v35 }
 0x4c1   :  { %15394 = vmatmul.mubr.msk.f32.vlgmr.msra.gmra.mxu0 %vm2009_vm2, %v17728_v52  ;;  %6095 = vmatprep.mubr.f32.mxu1 %v17793_v18  ;;  %v17820_v41 = vpop.permute.xlu1 %6842  ;;  %v6869_v61 = vsel %vm21180_vm4, %v17813_v34, %v17805_v4  ;;  %vm21198_vm4 = vmmov %vm21189_vm0 }
 0x4c2   :  { %6179 = vmatpush1.msra.mxu0 %v15656_v8  ;;  %6024 = vmatprep.mubr.f32.mxu0 %v17793_v18 }
 0x4c3   :  { %6332 = vmatprep.subr.mxu0 %v15657_v28 }
 0x4c4   :  { %v17827_v16 = vpop.permute.xlu0 %6840  ;;  %15396 = vmatmul.mubr.msk.f32.vlgmr.msra.gmra.mxu1 %vm2009_vm2, %v17728_v52  ;;  %v15663_v52 = vld [vmem:[#allocation2 + $0x60] sm:$0xff] }
 0x4c5   :  { %15395 = vmatmul.mubr.msk.f32.gmra.mxu0 %vm2009_vm2, %v17724_v35  ;;  %6256 = vmatpush1.msra.mxu1 %v15658_v24  ;;  %v17833_v51 = vpop.permute.xlu1 %6813  ;;  %v6871_v6 = vsel %vm21181_vm12, %v17827_v16, %v17820_v41  ;;  %vm21200_vm12 = vmmov %vm21189_vm0 }
 0x4c6   :  { %6409 = vmatprep.subr.mxu1 %v15659_v42  ;;  %6101 = vmatprep.mubr.f32.mxu1 %v17793_v18 }
 0x4c7   :  { %6212 = vmatprep.mubr.f32.mxu0 %v17793_v18 }
 0x4c8   :  { %v17841_v48 = vpop.permute.xlu0 %6834  ;;  %15397 = vmatmul.mubr.msk.f32.gmra.mxu1 %vm2009_vm2, %v17724_v35  ;;  %v17863_v35 = vpop.f32.mrf.mxu1 }
 0x4c9   :  { %15398 = vmatmul.mubr.msk.f32.vlgmr.msra.gmra.mxu0 %vm2009_vm2, %v17798_v62  ;;  %6289 = vmatprep.mubr.f32.mxu1 %v17793_v18  ;;  %v17848_v59 = vpop.permute.xlu1 %6844  ;;  %21179 = vst [vmem:[#allocation17_spill] sm:$0xff] %v17863_v35  ;;  %v6868_v8 = vsel %vm21182_vm3, %v17841_v48, %v17813_v34  ;;  %vm21312_vm3 = vmmov %vm21189_vm0 }
 0x4ca   :  { %6333 = vmatpush1.msra.mxu0 %v15660_v44  ;;  %6218 = vmatprep.mubr.f32.mxu0 %v17793_v18  ;;  %v17878_v27 = vpop.f32.mrf.mxu1 }
 0x4cb   :  { %6486 = vmatprep.subr.mxu0 %v15661_v11  ;;  %v6870_v11 = vsel %vm21184_vm15, %v17805_v4, %v17827_v16  ;;  %vm21314_vm15 = vmmov %vm21189_vm0 }
 0x4cc   :  { %v17855_v29 = vpop.permute.xlu0 %6815  ;;  %15400 = vmatmul.mubr.msk.f32.vlgmr.msra.gmra.mxu1 %vm2009_vm2, %v17798_v62  ;;  %v17895_v56 = vpop.f32.mrf.mxu1 }
 0x4cd   :  { %15399 = vmatmul.mubr.msk.f32.gmra.mxu0 %vm2009_vm2, %v17789_v33  ;;  %6410 = vmatpush1.msra.mxu1 %v15662_v45  ;;  %v17861_v12 = vpop.permute.xlu1 %6848 }
 0x4ce   :  { %6563 = vmatprep.subr.mxu1 %v15663_v52  ;;  %6295 = vmatprep.mubr.f32.mxu1 %v17793_v18 }
 0x4cf   :  { %6366 = vmatprep.mubr.f32.mxu0 %v17793_v18 }
 0x4d0   :  { %v17869_v50 = vpop.permute.xlu0 %6846  ;;  %15401 = vmatmul.mubr.msk.f32.gmra.mxu1 %vm2009_vm2, %v17789_v33 }
 0x4d1   :  { %15402 = vmatmul.mubr.msk.f32.vlgmr.msra.gmra.mxu0 %vm2009_vm2, %v17798_v62  ;;  %6443 = vmatprep.mubr.f32.mxu1 %v17793_v18  ;;  %v17876_v17 = vpop.f32.mrf.mxu0  ;;  %v6873_v28 = vsel %vm21183_vm6, %v17848_v59, %v17869_v50  ;;  %vm21313_vm6 = vmmov %vm21189_vm0 }
 0x4d2   :  { %6487 = vmatpush1.msra.mxu0 %v15664_v31  ;;  %6372 = vmatprep.mubr.f32.mxu0 %v17793_v18 }
 0x4d3   :  { %6640 = vmatprep.subr.mxu0 %v15665_v37  ;;  %v17881_v26 = vpop.permute.xlu1 %6852  ;;  %v17883_v54 = vpop.f32.mrf.mxu0  ;;  %v6872_v37 = vsel %vm21186_vm1, %v17820_v41, %v17848_v59  ;;  %v6874_v59 = vsel %vm21189_vm0, %v17869_v50, %v17861_v12  ;;  %vm21316_vm1 = vmmov %vm21189_vm0 }
 0x4d4   :  { %v17885_v53 = vpop.permute.xlu0 %6850  ;;  %15404 = vmatmul.mubr.msk.f32.vlgmr.msra.gmra.mxu1 %vm2009_vm2, %v17798_v62 }
 0x4d5   :  { %15403 = vmatmul.mubr.msk.f32.gmra.mxu0 %vm2009_vm2, %v17789_v33  ;;  %6564 = vmatpush1.msra.mxu1 %v15666_v19  ;;  %v17893_v36 = vpop.f32.mrf.mxu0  ;;  %v6875_v45 = vsel %vm21185_vm14, %v17861_v12, %v17885_v53  ;;  %vm21315_vm14 = vmmov %vm21189_vm0 }
 0x4d6   :  { %6449 = vmatprep.mubr.f32.mxu1 %v17793_v18  ;;  %6520 = vmatprep.mubr.f32.mxu0 %v17793_v18 }
 0x4d7   :  { %v17897_v3 = vpop.permute.xlu1 %15641  ;;  %6717 = vmatprep.subr.mxu1 %v17793_v18  ;;  %v17912_v5 = vpop.f32.mrf.mxu0 }
 0x4d8   :  { %v17900_v25 = vpop.permute.xlu0 %6862  ;;  %15405 = vmatmul.mubr.msk.f32.gmra.mxu1 %vm2009_vm2, %v17789_v33  ;;  %v15644_v12 = vunpack.i.h.bf16 %v17897_v3 }
 0x4d9   :  { %15406 = vmatmul.mubr.msk.f32.vlgmr.msra.gmra.mxu0 %vm2009_vm2, %v17798_v62  ;;  %6597 = vmatprep.mubr.f32.mxu1 %v17793_v18  ;;  %v17907_v7 = vpop.f32.mrf.mxu1 }
 0x4da   :  { %6641 = vmatpush1.msra.mxu0 %v15667_v20  ;;  %6526 = vmatprep.mubr.f32.mxu0 %v17793_v18 }
 0x4db   :  { %6934 = vmatprep.subr.mxu0 %v6869_v61  ;;  %v17915_v0 = vpop.permute.xlu1 %6856  ;;  %v17917_v60 = vpop.f32.mrf.mxu1 }
 0x4dc   :  { %v17919_v58 = vpop.permute.xlu0 %6854  ;;  %15408 = vmatmul.mubr.msk.f32.vlgmr.msra.gmra.mxu1 %vm2009_vm2, %v17798_v62 }
 0x4dd   :  { %15407 = vmatmul.mubr.msk.f32.gmra.mxu0 %vm2009_vm2, %v17789_v33  ;;  %6718 = vmatpush1.msra.mxu1 %v15668_v49  ;;  %v17928_v63 = vpop.f32.mrf.mxu0  ;;  %v17931_v14 = vpop.f32.mrf.mxu1  ;;  %v6877_v20 = vsel %vm21187_vm7, %v17881_v26, %v17919_v58  ;;  %vm21317_vm7 = vmmov %vm21189_vm0 }
 0x4de   :  { %7011 = vmatprep.subr.mxu1 %v6871_v6  ;;  %6603 = vmatprep.mubr.f32.mxu1 %v17793_v18 }
 0x4df   :  { %6674 = vmatprep.mubr.f32.mxu0 %v17793_v18  ;;  %v17934_v46 = vpop.permute.xlu1 %7560  ;;  %v17940_v30 = vpop.f32.mrf.mxu0 }
 0x4e0   :  { %v17936_v40 = vpop.permute.xlu0 %6858  ;;  %15409 = vmatmul.mubr.msk.f32.gmra.mxu1 %vm2009_vm2, %v17789_v33  ;;  %v17951_v24 = vpop.f32.mrf.mxu1 }
 0x4e1   :  { %15410 = vmatmul.mubr.msk.f32.vlgmr.msra.gmra.mxu0 %vm2009_vm2, %v17798_v62  ;;  %6751 = vmatprep.mubr.f32.mxu1 %v17793_v18  ;;  %v17954_v42 = vpop.f32.mrf.mxu0 }
 0x4e2   :  { %6935 = vmatpush1.msra.mxu0 %v6868_v8  ;;  %6680 = vmatprep.mubr.f32.mxu0 %v17793_v18 }
 0x4e3   :  { %7088 = vmatprep.subr.mxu0 %v6873_v28  ;;  %v17956_v44 = vpop.permute.xlu1 %6860  ;;  %v17972_v52 = vpop.f32.mrf.mxu0  ;;  %v6879_v28 = vsel %vm21190_vm10, %v17915_v0, %v17936_v40  ;;  %vm21318_vm10 = vmmov %vm21189_vm0 }
 0x4e4   :  { %v17958_v34 = vpop.permute.xlu0 %7558  ;;  %v17960_v48 = vpop.f32.mrf.mxu1  ;;  %15412 = vmatmul.mubr.msk.f32.vlgmr.msra.gmra.mxu1 %vm2009_vm2, %v17798_v62  ;;  %v6881_v13 = vsel %vm21193_vm5, %v17956_v44, %v17900_v25  ;;  %vm21320_vm5 = vmmov %vm21189_vm0 }
 0x4e5   :  { %15411 = vmatmul.mubr.msk.f32.gmra.mxu0 %vm2009_vm2, %v17789_v33  ;;  %7012 = vmatpush1.msra.mxu1 %v6870_v11 }
 0x4e6   :  { %7165 = vmatprep.subr.mxu1 %v6875_v45  ;;  %v17974_v31 = vpop.f32.mrf.mxu1  ;;  %6757 = vmatprep.mubr.f32.mxu1 %v17793_v18 }
 0x4e7   :  { %6968 = vmatprep.mubr.f32.mxu0 %v17793_v18  ;;  %v17978_v62 = vpop.permute.xlu1 %7564 }
 0x4e8   :  { %v17980_v4 = vpop.permute.xlu0 %7562  ;;  %v17982_v16 = vpop.f32.mrf.mxu1  ;;  %15413 = vmatmul.mubr.msk.f32.gmra.mxu1 %vm2009_vm2, %v17789_v33 }
 0x4e9   :  { %v17989_v19 = vpop.f32.mrf.mxu0  ;;  %15414 = vmatmul.mubr.msk.f32.vlgmr.msra.gmra.mxu0 %vm2009_vm2, %v17833_v51  ;;  %7045 = vmatprep.mubr.f32.mxu1 %v17793_v18 }
 0x4ea   :  { %7089 = vmatpush1.msra.mxu0 %v6872_v37  ;;  %v17997_v61 = vpop.f32.mrf.mxu1  ;;  %6974 = vmatprep.mubr.f32.mxu0 %v17793_v18 }
 0x4eb   :  { %7242 = vmatprep.subr.mxu0 %v6877_v20  ;;  %v18000_v33 = vpop.f32.mrf.mxu0  ;;  %v18002_v41 = vpop.permute.xlu1 %7552  ;;  %v6876_v20 = vsel %vm21192_vm13, %v17885_v53, %v17881_v26  ;;  %vm21319_vm13 = vmmov %vm21189_vm0 }
 0x4ec   :  { %21188 = vst [vmem:[#allocation18_spill] sm:$0xff] %v18000_v33  ;;  %v18007_v49 = vpop.permute.xlu0 %7556  ;;  %v18009_v6 = vpop.f32.mrf.mxu1  ;;  %15416 = vmatmul.mubr.msk.f32.vlgmr.msra.gmra.mxu1 %vm2009_vm2, %v17833_v51 }
 0x4ed   :  { %v18013_v8 = vpop.f32.mrf.mxu0  ;;  %15415 = vmatmul.mubr.msk.f32.gmra.mxu0 %vm2009_vm2, %v17855_v29  ;;  %7166 = vmatpush1.msra.mxu1 %v6874_v59  ;;  %v15643_v59 = vunpack.i.l.bf16 %v17897_v3  ;;  %v6878_v3 = vsel %vm21196_vm11, %v17919_v58, %v17915_v0  ;;  %vm21322_vm11 = vmmov %vm21189_vm0 }
 0x4ee   :  { %7319 = vmatprep.subr.mxu1 %v6879_v28  ;;  %v18020_v11 = vpop.f32.mrf.mxu1  ;;  %7051 = vmatprep.mubr.f32.mxu1 %v17793_v18 }
 0x4ef   :  { %21191 = vst [vmem:[#allocation19_spill] sm:$0xff] %v18020_v11  ;;  %v18024_v50 = vpop.f32.mrf.mxu0  ;;  %7122 = vmatprep.mubr.f32.mxu0 %v17793_v18  ;;  %v6883_v53 = vsel %vm21195_vm8, %v15643_v59, %v15644_v12  ;;  %vm21321_vm8 = vmmov %vm21189_vm0 }
 0x4f0   :  { %v18027_v45 = vpop.permute.xlu0 %7554  ;;  %v18029_v37 = vpop.f32.mrf.mxu1  ;;  %15417 = vmatmul.mubr.msk.f32.gmra.mxu1 %vm2009_vm2, %v17855_v29 }
 0x4f1   :  { %v18037_v28 = vpop.f32.mrf.mxu0  ;;  %15418 = vmatmul.mubr.msk.f32.vlgmr.msra.gmra.mxu0 %vm2009_vm2, %v17833_v51  ;;  %v18041_v15 = vpop.permute.xlu1 %7566  ;;  %7199 = vmatprep.mubr.f32.mxu1 %v17793_v18 }
 0x4f2   :  { %7243 = vmatpush1.msra.mxu0 %v6876_v20  ;;  %v18047_v1 = vpop.f32.mrf.mxu1  ;;  %7128 = vmatprep.mubr.f32.mxu0 %v17793_v18 }
 0x4f3   :  { %7396 = vmatprep.subr.mxu0 %v6881_v13  ;;  %v18050_v26 = vpop.f32.mrf.mxu0 }
 0x4f4   :  { %21194 = vst [vmem:[#allocation20_spill] sm:$0xff] %v18050_v26  ;;  %v18056_v35 = vpop.f32.mrf.mxu1  ;;  %15420 = vmatmul.mubr.msk.f32.vlgmr.msra.gmra.mxu1 %vm2009_vm2, %v17833_v51  ;;  %v18064_v13 = vpop.permute.xlu0 %7568 }
 0x4f5   :  { %v18060_v20 = vpop.f32.mrf.mxu0  ;;  %15419 = vmatmul.mubr.msk.f32.gmra.mxu0 %vm2009_vm2, %v17855_v29  ;;  %7320 = vmatpush1.msra.mxu1 %v6878_v3  ;;  %v18069_v12 = vpop.permute.xlu1 %7570 }
 0x4f6   :  { %7473 = vmatprep.subr.mxu1 %v6883_v53  ;;  %v18066_v26 = vpop.f32.mrf.mxu1  ;;  %7205 = vmatprep.mubr.f32.mxu1 %v17793_v18  ;;  %v6880_v53 = vsel %vm21198_vm4, %v17936_v40, %v17956_v44  ;;  %vm21323_vm4 = vmmov %vm21189_vm0 }
 0x4f7   :  { %21197 = vst [vmem:[#allocation21_spill] sm:$0xff] %v18066_v26  ;;  %v2862_v0 = vpop.f32.mrf.mxu0  ;;  %7276 = vmatprep.mubr.f32.mxu0 %v17793_v18 }
 0x4f8   :  { %v18073_v58 = vadd.f32 %v2862_v0, %v17866_v47  ;;  %v18075_v43 = vpop.f32.mrf.mxu1  ;;  %15421 = vmatmul.mubr.msk.f32.gmra.mxu1 %vm2009_vm2, %v17855_v29  ;;  %v7591_v47 = vsel %vm3288_vm9, %v17958_v34, %v17934_v46  ;;  %v18095_v11 = vpop.permute.xlu0 %7572 }
 0x4f9   :  { %v3008_v3 = vpop.f32.mrf.mxu0  ;;  %15422 = vmatmul.mubr.msk.f32.vlgmr.msra.gmra.mxu0 %vm2009_vm2, %v17833_v51  ;;  %7353 = vmatprep.mubr.f32.mxu1 %v17793_v18 }
 0x4fa   :  { %v18086_v26 = vadd.f32 %v3008_v3, %v17876_v17  ;;  %7397 = vmatpush1.msra.mxu0 %v6880_v53  ;;  %v2939_v0 = vpop.f32.mrf.mxu1  ;;  %7282 = vmatprep.mubr.f32.mxu0 %v17793_v18  ;;  %v6882_v53 = vsel %vm21200_vm12, %v17900_v25, %v15643_v59  ;;  %v18104_v3 = vpop.permute.xlu1 %7574  ;;  %vm21324_vm12 = vcmask 523264  }
 0x4fb   :  { %7656 = vmatprep.subr.mxu0 %v7591_v47  ;;  %v18093_v40 = vadd.f32 %v2939_v0, %v17895_v56  ;;  %v3010_v44 = vpop.f32.mrf.mxu0 }
 0x4fc   :  { %v18098_v2 = vadd.f32 %v3010_v44, %v17883_v54  ;;  %v3085_v17 = vpop.f32.mrf.mxu1  ;;  %15424 = vmatmul.mubr.msk.f32.vlgmr.msra.gmra.mxu1 %vm2009_vm2, %v17833_v51  ;;  %v7593_v54 = vsel %vm3288_vm9, %v17980_v4, %v17978_v62 }
 0x4fd   :  { %v3014_v33 = vpop.f32.mrf.mxu0  ;;  %v18107_v47 = vadd.f32 %v3085_v17, %v17907_v7  ;;  %15423 = vmatmul.mubr.msk.f32.gmra.mxu0 %vm2009_vm2, %v17855_v29  ;;  %7474 = vmatpush1.msra.mxu1 %v6882_v53  ;;  %v7595_v53 = vsel %vm3288_vm9, %v18041_v15, %v18064_v13 }
 0x4fe   :  { %21199 = vst [vmem:[#allocation22_spill] sm:$0xff] %v18098_v2  ;;  %v18115_v56 = vadd.f32 %v3014_v33, %v17893_v36  ;;  %7733 = vmatprep.subr.mxu1 %v7593_v54  ;;  %v3087_v0 = vpop.f32.mrf.mxu1  ;;  %7359 = vmatprep.mubr.f32.mxu1 %v17793_v18  ;;  %v7590_v36 = vsel %vm3288_vm9, %v18007_v49, %v17958_v34 }
 0x4ff   :  { %v3016_v25 = vpop.f32.mrf.mxu0  ;;  %v18119_v59 = vadd.f32 %v3087_v0, %v17917_v60  ;;  %7430 = vmatprep.mubr.f32.mxu0 %v17793_v18  ;;  %v18136_v60 = vpop.permute.xlu0 %7576 }
 0x500   :  { %v18123_v7 = vadd.f32 %v3016_v25, %v17912_v5  ;;  %v3091_v44 = vpop.f32.mrf.mxu1  ;;  %15425 = vmatmul.mubr.msk.f32.gmra.mxu1 %vm2009_vm2, %v17855_v29 }
 0x501   :  { %21201 = vst [vmem:[#allocation23_spill] sm:$0xff] %v18119_v59  ;;  %v18131_v33 = vadd.f32 %v3091_v44, %v17931_v14  ;;  %v3162_v17 = vpop.f32.mrf.mxu0  ;;  %15426 = vmatmul.mubr.msk.f32.vlgmr.msra.gmra.mxu0 %vm2009_vm2, %v17833_v51  ;;  %7507 = vmatprep.mubr.f32.mxu1 %v17793_v18  ;;  %v18145_v14 = vpop.permute.xlu1 %7578 }
 0x502   :  { %v18139_v5 = vadd.f32 %v3162_v17, %v17928_v63  ;;  %7657 = vmatpush1.msra.mxu0 %v7590_v36  ;;  %v3093_v34 = vpop.f32.mrf.mxu1  ;;  %7436 = vmatprep.mubr.f32.mxu0 %v17793_v18  ;;  %v7592_v63 = vsel %vm3288_vm9, %v17934_v46, %v17980_v4 }
 0x503   :  { %7810 = vmatprep.subr.mxu0 %v7595_v53  ;;  %v18148_v49 = vadd.f32 %v3093_v34, %v17951_v24  ;;  %v3164_v54 = vpop.f32.mrf.mxu0  ;;  %v7597_v24 = vsel %vm3288_vm9, %v18069_v12, %v18095_v11  ;;  %v18176_v17 = vpop.permute.xlu0 %7580  ;;  %v7594_v34 = vsel %vm3288_vm9, %v17978_v62, %v18041_v15  ;;  %v2778_v15 = vadd.f32 %v18009_v6, %v17791_v9 }
 0x504   :  { %v18154_v0 = vadd.f32 %v3164_v54, %v17940_v30  ;;  %v3239_v25 = vpop.f32.mrf.mxu1  ;;  %15428 = vmatmul.mubr.msk.f32.vlgmr.msra.gmra.mxu1 %vm2009_vm2, %v17833_v51  ;;  %v7601_v9 = vsel %vm3288_vm9, %v18145_v14, %v18176_v17 }
 0x505   :  { %v3168_v44 = vpop.f32.mrf.mxu0  ;;  %v18159_v36 = vadd.f32 %v3239_v25, %v17960_v48  ;;  %15427 = vmatmul.mubr.msk.f32.gmra.mxu0 %vm2009_vm2, %v17855_v29  ;;  %7734 = vmatpush1.msra.mxu1 %v7592_v63  ;;  %v2701_v48 = vadd.f32 %v17989_v19, %v17769_v23  ;;  %v2707_v19 = vadd.f32 %v18013_v8, %v17796_v32 }
 0x506   :  { %21202 = vst [vmem:[#allocation24_spill] sm:$0xff] %v18154_v0  ;;  %v18167_v46 = vadd.f32 %v3168_v44, %v17954_v42  ;;  %7887 = vmatprep.subr.mxu1 %v7597_v24  ;;  %v3241_v30 = vpop.f32.mrf.mxu1  ;;  %7513 = vmatprep.mubr.f32.mxu1 %v17793_v18  ;;  %v7596_v25 = vsel %vm3288_vm9, %v18064_v13, %v18069_v12 }
 0x507   :  { %v3170_v51 = vpop.f32.mrf.mxu0  ;;  %v18171_v4 = vadd.f32 %v3241_v30, %v17974_v31  ;;  %7690 = vmatprep.mubr.f32.mxu0 %v17793_v18  ;;  %v18186_v31 = vpop.permute.xlu1 %7582  ;;  %v2784_v8 = vadd.f32 %v18029_v37, %v17822_v38 }
 0x508   :  { %v18179_v53 = vadd.f32 %v3170_v51, %v17972_v52  ;;  %v3245_v42 = vpop.f32.mrf.mxu1  ;;  %15429 = vmatmul.mubr.msk.f32.gmra.mxu1 %vm2009_vm2, %v17855_v29  ;;  %v7599_v29 = vsel %vm3288_vm9, %v18104_v3, %v18136_v60  ;;  %v7585_v13 = vpop.permute.xlu0 %7584  ;;  %v2855_v51 = vadd.f32 %v18037_v28, %v17825_v22 }
 0x509   :  { %21203 = vst [vmem:[#allocation25_spill] sm:$0xff] %v18171_v4  ;;  %v18189_v54 = vadd.f32 %v3245_v42, %v17982_v16  ;;  %v3391_v63 = vpop.f32.mrf.mxu0  ;;  %15430 = vmatmul.mubr.msk.f32.vlgmr.msra.gmra.mxu0 %vm2009_vm2, %v18002_v41  ;;  %7767 = vmatprep.mubr.f32.mxu1 %v17793_v18  ;;  %v7603_v22 = vsel %vm3288_vm9, %v18186_v31, %v7585_v13 }
 0x50a   :  { %v18194_v23 = vadd.f32 %v3391_v63, %v2701_v48  ;;  %7811 = vmatpush1.msra.mxu0 %v7594_v34  ;;  %v3247_v52 = vpop.f32.mrf.mxu1  ;;  %7696 = vmatprep.mubr.f32.mxu0 %v17793_v18  ;;  %v7598_v63 = vsel %vm3288_vm9, %v18095_v11, %v18104_v3  ;;  %v2932_v11 = vadd.f32 %v18056_v35, %v17850_v55 }
 0x50b   :  { %7964 = vmatprep.subr.mxu0 %v7599_v29  ;;  %v18203_v62 = vadd.f32 %v3247_v52, %v17997_v61  ;;  %v18205_v16 = vpop.f32.mrf.mxu0  ;;  %v15647_v32 = vpop.permute.xlu1 %15646  ;;  %v2861_v52 = vadd.f32 %v18060_v20, %v17853_v57  ;;  %v2938_v35 = vadd.f32 %v18075_v43, %v17878_v27 }
 0x50c   :  { %21204 = vst [vmem:[#allocation26_spill] sm:$0xff] %v18205_v16  ;;  %v3468_v44 = vpop.f32.mrf.mxu1  ;;  %15432 = vmatmul.mubr.msk.f32.vlgmr.msra.gmra.mxu1 %vm2009_vm2, %v18002_v41  ;;  %v15649_v42 = vunpack.i.h.bf16 %v15647_v32  ;;  %v15648_v34 = vunpack.i.l.bf16 %v15647_v32 }
 0x50d   :  { %v3397_v24 = vpop.f32.mrf.mxu0  ;;  %v18214_v30 = vadd.f32 %v3468_v44, %v2778_v15  ;;  %15431 = vmatmul.mubr.msk.f32.gmra.mxu0 %vm2009_vm2, %v18027_v45  ;;  %7888 = vmatpush1.msra.mxu1 %v7596_v25  ;;  %v7600_v15 = vsel %vm3288_vm9, %v18136_v60, %v18145_v14  ;;  %v7602_v14 = vsel %vm3288_vm9, %v18176_v17, %v18186_v31 }
 0x50e   :  { %v18221_v61 = vadd.f32 %v3397_v24, %v2707_v19  ;;  %8041 = vmatprep.subr.mxu1 %v7601_v9  ;;  %v18223_v6 = vpop.f32.mrf.mxu1  ;;  %7773 = vmatprep.mubr.f32.mxu1 %v17793_v18  ;;  %v7605_v25 = vsel %vm3288_vm9, %v15648_v34, %v15649_v42 }
 0x50f   :  { %21205 = vst [vmem:[#allocation27_spill] sm:$0xff] %v18223_v6  ;;  %v18228_v12 = vpop.f32.mrf.mxu0  ;;  %7844 = vmatprep.mubr.f32.mxu0 %v17793_v18 }
 0x510   :  { %v3474_v48 = vpop.f32.mrf.mxu1  ;;  %15433 = vmatmul.mubr.msk.f32.gmra.mxu1 %vm2009_vm2, %v18027_v45 }
 0x511   :  { %v18238_v29 = vadd.f32 %v3474_v48, %v2784_v8  ;;  %v3545_v38 = vpop.f32.mrf.mxu0  ;;  %15434 = vmatmul.mubr.msk.f32.vlgmr.msra.gmra.mxu0 %vm2009_vm2, %v18002_v41  ;;  %7921 = vmatprep.mubr.f32.mxu1 %v17793_v18  ;;  %v7604_v8 = vsel %vm3288_vm9, %v7585_v13, %v15648_v34  ;;  %vm21311_vm9 = vmmov %vm21189_vm0 }
 0x512   :  { %v18243_v37 = vadd.f32 %v3545_v38, %v2855_v51  ;;  %7965 = vmatpush1.msra.mxu0 %v7598_v63  ;;  %v18247_v28 = vpop.f32.mrf.mxu1  ;;  %7850 = vmatprep.mubr.f32.mxu0 %v17793_v18 }
 0x513   :  { %8118 = vmatprep.subr.mxu0 %v7603_v22  ;;  %v18252_v3 = vpop.f32.mrf.mxu0 }
 0x514   :  { %21206 = vst [vmem:[#allocation28_spill] sm:$0xff] %v18252_v3  ;;  %v3622_v19 = vpop.f32.mrf.mxu1  ;;  %15436 = vmatmul.mubr.msk.f32.vlgmr.msra.gmra.mxu1 %vm2009_vm2, %v18002_v41 }
 0x515   :  { %v3551_v44 = vpop.f32.mrf.mxu0  ;;  %v18262_v24 = vadd.f32 %v3622_v19, %v2932_v11  ;;  %15435 = vmatmul.mubr.msk.f32.gmra.mxu0 %vm2009_vm2, %v18027_v45  ;;  %8042 = vmatpush1.msra.mxu1 %v7600_v15 }
 0x516   :  { %v18266_v55 = vadd.f32 %v3551_v44, %v2861_v52  ;;  %v18268_v57 = vpop.f32.mrf.mxu1  ;;  %7927 = vmatprep.mubr.f32.mxu1 %v17793_v18  ;;  %7998 = vmatprep.mubr.f32.mxu0 %v17793_v18 }
 0x517   :  { %21207 = vst [vmem:[#allocation29_spill] sm:$0xff] %v18268_v57  ;;  %v18274_v20 = vpop.f32.mrf.mxu0  ;;  %8195 = vmatprep.subr.mxu1 %v7605_v25 }
 0x518   :  { %v3628_v60 = vpop.f32.mrf.mxu1  ;;  %15437 = vmatmul.mubr.msk.f32.gmra.mxu1 %vm2009_vm2, %v18027_v45 }
 0x519   :  { %v18281_v9 = vadd.f32 %v3628_v60, %v2938_v35  ;;  %v3699_v32 = vpop.f32.mrf.mxu0  ;;  %15438 = vmatmul.mubr.msk.f32.vlgmr.msra.gmra.mxu0 %vm2009_vm2, %v18002_v41  ;;  %8075 = vmatprep.mubr.f32.mxu1 %v17793_v18 }
 0x51a   :  { %v18287_v43 = vadd.f32 %v3699_v32, %v18086_v26  ;;  %8119 = vmatpush1.msra.mxu0 %v7602_v14  ;;  %v18289_v27 = vpop.f32.mrf.mxu1  ;;  %8004 = vmatprep.mubr.f32.mxu0 %v17793_v18 }
 0x51b   :  { %v18293_v51 = vpop.f32.mrf.mxu0 }
 0x51c   :  { %21208 = vst [vmem:[#allocation30_spill] sm:$0xff] %v18293_v51  ;;  %v3776_v17 = vpop.f32.mrf.mxu1  ;;  %15440 = vmatmul.mubr.msk.f32.vlgmr.msra.gmra.mxu1 %vm2009_vm2, %v18002_v41 }
 0x51d   :  { %v3705_v31 = vpop.f32.mrf.mxu0  ;;  %v3951_v48 = vadd.f32 %v3776_v17, %v18107_v47  ;;  %15439 = vmatmul.mubr.msk.f32.gmra.mxu0 %vm2009_vm2, %v18027_v45  ;;  %8196 = vmatpush1.msra.mxu1 %v7604_v8 }
 0x51e   :  { %v3965_v26 = vadd.f32 %v3705_v31, %v18115_v56  ;;  %v18301_v42 = vpop.f32.mrf.mxu1  ;;  %8081 = vmatprep.mubr.f32.mxu1 %v17793_v18  ;;  %8152 = vmatprep.mubr.f32.mxu0 %v17793_v18 }
 0x51f   :  { %21209 = vst [vmem:[#allocation31_spill] sm:$0xff] %v18301_v42  ;;  %v18305_v13 = vpop.f32.mrf.mxu0 }
 0x520   :  { %v3782_v34 = vpop.f32.mrf.mxu1  ;;  %15441 = vmatmul.mubr.msk.f32.gmra.mxu1 %vm2009_vm2, %v18027_v45 }
 0x521   :  { %v3967_v47 = vadd.f32 %v3782_v34, %v18131_v33  ;;  %v3853_v63 = vpop.f32.mrf.mxu0  ;;  %15442 = vmatmul.mubr.msk.f32.vlgmr.msra.gmra.mxu0 %vm2009_vm2, %v18002_v41  ;;  %8229 = vmatprep.mubr.f32.mxu1 %v17793_v18 }
 0x522   :  { %v3953_v56 = vadd.f32 %v3853_v63, %v18139_v5  ;;  %v18314_v38 = vpop.f32.mrf.mxu1  ;;  %8158 = vmatprep.mubr.f32.mxu0 %v17793_v18 }
 0x523   :  { %v18317_v22 = vpop.f32.mrf.mxu0 }
 0x524   :  { %21210 = vst [vmem:[#allocation32_spill] sm:$0xff] %v18317_v22  ;;  %v3930_v11 = vpop.f32.mrf.mxu1  ;;  %15444 = vmatmul.mubr.msk.f32.vlgmr.msra.gmra.mxu1 %vm2009_vm2, %v18002_v41 }
 0x525   :  { %v3859_v52 = vpop.f32.mrf.mxu0  ;;  %v3955_v33 = vadd.f32 %v3930_v11, %v18159_v36  ;;  %15443 = vmatmul.mubr.msk.f32.gmra.mxu0 %vm2009_vm2, %v18027_v45  ;;  %8235 = vmatprep.mubr.f32.mxu1 %v17793_v18 }
 0x526   :  { %v3969_v5 = vadd.f32 %v3859_v52, %v18167_v46  ;;  %v18326_v15 = vpop.f32.mrf.mxu1 }
 0x527   :  { %21211 = vst [vmem:[#allocation33_spill] sm:$0xff] %v18326_v15  ;;  %v18328_v19 = vpop.f32.mrf.mxu0 }
 0x528   :  { %v3936_v25 = vpop.f32.mrf.mxu1  ;;  %15445 = vmatmul.mubr.msk.f32.gmra.mxu1 %vm2009_vm2, %v18027_v45  ;;  %vm21310_vm2 = vmmov %vm21189_vm0 }
 0x529   :  { %v3971_v41 = vadd.f32 %v3936_v25, %v18189_v54  ;;  %v4113_v44 = vpop.f32.mrf.mxu0 }
 0x52a   :  { %v4663_v36 = vadd.f32 %v4113_v44, %v18194_v23  ;;  %v18334_v35 = vpop.f32.mrf.mxu1 }
 0x52b   :  { %v18336_v60 = vpop.f32.mrf.mxu0 }
 0x52c   :  { %21212 = vst [vmem:[#allocation34_spill] sm:$0xff] %v18336_v60  ;;  %v4190_v18 = vpop.f32.mrf.mxu1 }
 0x52d   :  { %v4119_v14 = vpop.f32.mrf.mxu0  ;;  %v4665_v46 = vadd.f32 %v4190_v18, %v18214_v30 }
 0x52e   :  { %v4679_v32 = vadd.f32 %v4119_v14, %v18221_v61  ;;  %v18340_v8 = vpop.f32.mrf.mxu1 }
 0x52f   :  { %21213 = vst [vmem:[#allocation35_spill] sm:$0xff] %v18340_v8  ;;  %v18342_v17 = vpop.f32.mrf.mxu0 }
 0x530   :  { %v4196_v45 = vpop.f32.mrf.mxu1 }
 0x531   :  { %v4681_v54 = vadd.f32 %v4196_v45, %v18238_v29  ;;  %v4267_v31 = vpop.f32.mrf.mxu0 }
 0x532   :  { %v4667_v23 = vadd.f32 %v4267_v31, %v18243_v37  ;;  %v18346_v34 = vpop.f32.mrf.mxu1 }
 0x533   :  { %v18348_v63 = vpop.f32.mrf.mxu0 }
 0x534   :  { %21214 = vst [vmem:[#allocation36_spill] sm:$0xff] %v18348_v63  ;;  %v4344_v11 = vpop.f32.mrf.mxu1 }
 0x535   :  { %v4273_v52 = vpop.f32.mrf.mxu0  ;;  %v4669_v30 = vadd.f32 %v4344_v11, %v18262_v24 }
 0x536   :  { %v4683_v61 = vadd.f32 %v4273_v52, %v18266_v55  ;;  %v18352_v25 = vpop.f32.mrf.mxu1 }
 0x537   :  { %21215 = vst [vmem:[#allocation37_spill] sm:$0xff] %v18352_v25  ;;  %v18354_v44 = vpop.f32.mrf.mxu0 }
 0x538   :  { %v4350_v18 = vpop.f32.mrf.mxu1 }
 0x539   :  { %v4685_v29 = vadd.f32 %v4350_v18, %v18281_v9  ;;  %v4421_v14 = vpop.f32.mrf.mxu0 }
 0x53a   :  { %v4671_v37 = vadd.f32 %v4421_v14, %v18287_v43  ;;  %v18358_v45 = vpop.f32.mrf.mxu1 }
 0x53b   :  { %v18360_v31 = vpop.f32.mrf.mxu0 }
 0x53c   :  { %21216 = vst [vmem:[#allocation38_spill] sm:$0xff] %v18360_v31  ;;  %v4498_v15 = vpop.f32.mrf.mxu1 }
 0x53d   :  { %v4427_v4 = vpop.f32.mrf.mxu0  ;;  %v4673_v22 = vadd.f32 %v4498_v15, %v3951_v48 }
 0x53e   :  { %v4687_v24 = vadd.f32 %v4427_v4, %v3965_v26  ;;  %v18362_v11 = vpop.f32.mrf.mxu1 }
 0x53f   :  { %21217 = vst [vmem:[#allocation39_spill] sm:$0xff] %v18362_v11  ;;  %v18364_v55 = vpop.f32.mrf.mxu0 }
 0x540   :  { %v4504_v52 = vpop.f32.mrf.mxu1 }
 0x541   :  { %v4689_v0 = vadd.f32 %v4504_v52, %v3967_v47  ;;  %v4575_v42 = vpop.f32.mrf.mxu0 }
 0x542   :  { %v4675_v59 = vadd.f32 %v4575_v42, %v3953_v56  ;;  %v18366_v9 = vpop.f32.mrf.mxu1 }
 0x543   :  { %v18368_v18 = vpop.f32.mrf.mxu0 }
 0x544   :  { %21218 = vst [vmem:[#allocation40_spill] sm:$0xff] %v18368_v18  ;;  %v4652_v43 = vpop.f32.mrf.mxu1 }
 0x545   :  { %v4581_v14 = vpop.f32.mrf.mxu0  ;;  %v4677_v51 = vadd.f32 %v4652_v43, %v3955_v33 }
 0x546   :  { %v4691_v31 = vadd.f32 %v4581_v14, %v3969_v5  ;;  %v18370_v2 = vpop.f32.mrf.mxu1 }
 0x547   :  { %21219 = vst [vmem:[#allocation41_spill] sm:$0xff] %v18370_v2  ;;  %v18372_v48 = vpop.f32.mrf.mxu0 }
 0x548   :  { %v4658_v4 = vpop.f32.mrf.mxu1 }
 0x549   :  { %v4693_v26 = vadd.f32 %v4658_v4, %v3971_v41  ;;  %v4835_v15 = vpop.f32.mrf.mxu0 }
 0x54a   :  { %v5385_v11 = vadd.f32 %v4835_v15, %v4663_v36  ;;  %v18374_v25 = vpop.f32.mrf.mxu1 }
 0x54b   :  { %21220 = vst [vmem:[#allocation42_spill] sm:$0xff] %v18374_v25  ;;  %v18376_v47 = vpop.f32.mrf.mxu0 }
 0x54c   :  { %21221 = vst [vmem:[#allocation43_spill] sm:$0xff] %v18376_v47  ;;  %v4912_v42 = vpop.f32.mrf.mxu1 }
 0x54d   :  { %v4841_v56 = vpop.f32.mrf.mxu0  ;;  %v5387_v52 = vadd.f32 %v4912_v42, %v4665_v46 }
 0x54e   :  { %v5401_v18 = vadd.f32 %v4841_v56, %v4679_v32  ;;  %v18378_v63 = vpop.f32.mrf.mxu1 }
 0x54f   :  { %21222 = vst [vmem:[#allocation44_spill] sm:$0xff] %v18378_v63  ;;  %v18380_v33 = vpop.f32.mrf.mxu0 }
 0x550   :  { %v4918_v5 = vpop.f32.mrf.mxu1 }
 0x551   :  { %v5403_v43 = vadd.f32 %v4918_v5, %v4681_v54  ;;  %v4989_v14 = vpop.f32.mrf.mxu0 }
 0x552   :  { %v5389_v2 = vadd.f32 %v4989_v14, %v4667_v23  ;;  %v18382_v57 = vpop.f32.mrf.mxu1 }
 0x553   :  { %v18384_v41 = vpop.f32.mrf.mxu0 }
 0x554   :  { %21223 = vst [vmem:[#allocation45_spill] sm:$0xff] %v18384_v41  ;;  %v5066_v36 = vpop.f32.mrf.mxu1 }
 0x555   :  { %v4995_v4 = vpop.f32.mrf.mxu0  ;;  %v5391_v15 = vadd.f32 %v5066_v36, %v4669_v30 }
 0x556   :  { %v5405_v3 = vadd.f32 %v4995_v4, %v4683_v61  ;;  %v18386_v8 = vpop.f32.mrf.mxu1 }
 0x557   :  { %21224 = vst [vmem:[#allocation46_spill] sm:$0xff] %v18386_v8  ;;  %v18388_v46 = vpop.f32.mrf.mxu0 }
 0x558   :  { %v5072_v32 = vpop.f32.mrf.mxu1 }
 0x559   :  { %v5407_v42 = vadd.f32 %v5072_v32, %v4685_v29  ;;  %v5143_v56 = vpop.f32.mrf.mxu0 }
 0x55a   :  { %v5393_v63 = vadd.f32 %v5143_v56, %v4671_v37  ;;  %v18390_v47 = vpop.f32.mrf.mxu1 }
 0x55b   :  { %v18392_v54 = vpop.f32.mrf.mxu0 }
 0x55c   :  { %21225 = vst [vmem:[#allocation47_spill] sm:$0xff] %v18392_v54  ;;  %v5220_v23 = vpop.f32.mrf.mxu1 }
 0x55d   :  { %v5149_v5 = vpop.f32.mrf.mxu0  ;;  %v5395_v14 = vadd.f32 %v5220_v23, %v4673_v22 }
 0x55e   :  { %v5409_v41 = vadd.f32 %v5149_v5, %v4687_v24  ;;  %v18394_v6 = vpop.f32.mrf.mxu1 }
 0x55f   :  { %21226 = vst [vmem:[#allocation48_spill] sm:$0xff] %v18394_v6  ;;  %v18396_v30 = vpop.f32.mrf.mxu0 }
 0x560   :  { %v5226_v61 = vpop.f32.mrf.mxu1 }
 0x561   :  { %v5411_v36 = vadd.f32 %v5226_v61, %v4689_v0  ;;  %v5297_v4 = vpop.f32.mrf.mxu0 }
 0x562   :  { %v5397_v8 = vadd.f32 %v5297_v4, %v4675_v59  ;;  %v18398_v60 = vpop.f32.mrf.mxu1 }
 0x563   :  { %v18400_v29 = vpop.f32.mrf.mxu0 }
 0x564   :  { %21227 = vst [vmem:[#allocation49_spill] sm:$0xff] %v18400_v29  ;;  %v5374_v37 = vpop.f32.mrf.mxu1 }
 0x565   :  { %v5303_v32 = vpop.f32.mrf.mxu0  ;;  %v5399_v56 = vadd.f32 %v5374_v37, %v4677_v51 }
 0x566   :  { %v5413_v54 = vadd.f32 %v5303_v32, %v4691_v31  ;;  %v18402_v16 = vpop.f32.mrf.mxu1 }
 0x567   :  { %21228 = vst [vmem:[#allocation50_spill] sm:$0xff] %v18402_v16  ;;  %v18404_v22 = vpop.f32.mrf.mxu0 }
 0x568   :  { %v5380_v24 = vpop.f32.mrf.mxu1 }
 0x569   :  { %v5415_v23 = vadd.f32 %v5380_v24, %v4693_v26  ;;  %v5558_v5 = vpop.f32.mrf.mxu0 }
 0x56a   :  { %v18406_v6 = vadd.f32 %v5558_v5, %v5385_v11  ;;  %v18408_v0 = vpop.f32.mrf.mxu1 }
 0x56b   :  { %21230 = vst [vmem:[#allocation52_spill] sm:$0xff] %v18408_v0  ;;  %v18410_v59 = vpop.f32.mrf.mxu0 }
 0x56c   :  { %21229 = vst [vmem:[#allocation51_spill] sm:$0xff] %v18406_v6  ;;  %21231 = vst [vmem:[#allocation53_spill] sm:$0xff] %v18410_v59  ;;  %v5635_v61 = vpop.f32.mrf.mxu1 }
 0x56d   :  { %v5564_v4 = vpop.f32.mrf.mxu0  ;;  %v18412_v29 = vadd.f32 %v5635_v61, %v5387_v52 }
 0x56e   :  { %v6124_v39 = vadd.f32 %v5564_v4, %v5401_v18  ;;  %v18414_v51 = vpop.f32.mrf.mxu1 }
 0x56f   :  { %21232 = vst [vmem:[#allocation54_spill] sm:$0xff] %v18412_v29  ;;  %v5566_v31 = vpop.f32.mrf.mxu0 }
 0x570   :  { %v5641_v37 = vpop.f32.mrf.mxu1 }
 0x571   :  { %v6126_v32 = vadd.f32 %v5641_v37, %v5403_v43  ;;  %v5712_v16 = vpop.f32.mrf.mxu0 }
 0x572   :  { %v18416_v25 = vadd.f32 %v5712_v16, %v5389_v2  ;;  %v5643_v26 = vpop.f32.mrf.mxu1 }
 0x573   :  { %v18418_v11 = vpop.f32.mrf.mxu0 }
 0x574   :  { %21233 = vst [vmem:[#allocation55_spill] sm:$0xff] %v18416_v25  ;;  %21234 = vst [vmem:[#allocation56_spill] sm:$0xff] %v18418_v11  ;;  %v5789_v24 = vpop.f32.mrf.mxu1 }
 0x575   :  { %v5718_v5 = vpop.f32.mrf.mxu0  ;;  %v18420_v6 = vadd.f32 %v5789_v24, %v5391_v15 }
 0x576   :  { %v6128_v59 = vadd.f32 %v5718_v5, %v5405_v3  ;;  %v18422_v0 = vpop.f32.mrf.mxu1 }
 0x577   :  { %v5720_v52 = vpop.f32.mrf.mxu0 }
 0x578   :  { %v5795_v18 = vpop.f32.mrf.mxu1 }
 0x579   :  { %v18424_v61 = vadd.f32 %v5795_v18, %v5407_v42  ;;  %v5866_v4 = vpop.f32.mrf.mxu0 }
 0x57a   :  { %v18426_v29 = vadd.f32 %v5866_v4, %v5393_v63  ;;  %v5797_v43 = vpop.f32.mrf.mxu1 }
 0x57b   :  { %v18428_v2 = vpop.f32.mrf.mxu0 }
 0x57c   :  { %21235 = vst [vmem:[#allocation57_spill] sm:$0xff] %v18426_v29  ;;  %21236 = vst [vmem:[#allocation58_spill] sm:$0xff] %v18428_v2  ;;  %v5943_v16 = vpop.f32.mrf.mxu1 }
 0x57d   :  { %v5872_v37 = vpop.f32.mrf.mxu0  ;;  %v18430_v25 = vadd.f32 %v5943_v16, %v5395_v14 }
 0x57e   :  { %v18432_v11 = vadd.f32 %v5872_v37, %v5409_v41  ;;  %v18434_v15 = vpop.f32.mrf.mxu1  ;;  %v2709_v41 = vadd.f32 %v18024_v50, %v17810_v21 }
 0x57f   :  { %v18436_v3 = vpop.f32.mrf.mxu0 }
 0x580   :  { %v5949_v24 = vpop.f32.mrf.mxu1 }
 0x581   :  { %v18438_v5 = vadd.f32 %v5949_v24, %v5411_v36  ;;  %v6020_v42 = vpop.f32.mrf.mxu0 }
 0x582   :  { %v18440_v18 = vadd.f32 %v6020_v42, %v5397_v8  ;;  %v18442_v63 = vpop.f32.mrf.mxu1  ;;  %v3958_v8 = vadd.f32 %v18228_v12, %v2709_v41  ;;  %v2786_v42 = vadd.f32 %v18047_v1, %v17835_v10 }
 0x583   :  { %v18444_v4 = vpop.f32.mrf.mxu0 }
 0x584   :  { %21237 = vst [vmem:[#allocation59_spill] sm:$0xff] %v18440_v18  ;;  %21238 = vst [vmem:[#allocation60_spill] sm:$0xff] %v18444_v4  ;;  %v6097_v29 = vpop.f32.mrf.mxu1  ;;  %v3960_v21 = vadd.f32 %v18247_v28, %v2786_v42  ;;  %v3962_v28 = vadd.f32 %v18274_v20, %v18073_v58 }
 0x585   :  { %v6026_v2 = vpop.f32.mrf.mxu0  ;;  %v18446_v14 = vadd.f32 %v6097_v29, %v5399_v56  ;;  %v4680_v29 = vadd.f32 %v18342_v17, %v3958_v8 }
 0x586   :  { %v18450_v16 = vadd.f32 %v6026_v2, %v5413_v54  ;;  %v18452_v37 = vpop.f32.mrf.mxu1  ;;  %v4682_v12 = vadd.f32 %v18346_v34, %v3960_v21  ;;  %v4684_v34 = vadd.f32 %v18354_v44, %v3962_v28  ;;  %v3968_v28 = vadd.f32 %v18314_v38, %v18148_v49 }
 0x587   :  { %21239 = vst [vmem:[#allocation61_spill] sm:$0xff] %v18446_v14  ;;  %21240 = vst [vmem:[#allocation62_spill] sm:$0xff] %v18452_v37  ;;  %v18454_v36 = vpop.f32.mrf.mxu0  ;;  %v5402_v54 = vadd.f32 %v18380_v33, %v4680_v29  ;;  %v3970_v49 = vadd.f32 %v18328_v19, %v18179_v53  ;;  %v21243_v19 = vld [vmem:[#allocation42_spill] sm:$0xff] }
 0x588   :  { %v6103_v24 = vpop.f32.mrf.mxu1  ;;  %v5404_v17 = vadd.f32 %v18382_v57, %v4682_v12  ;;  %v5406_v58 = vadd.f32 %v18388_v46, %v4684_v34 }
 0x589   :  { %v18459_v18 = vadd.f32 %v6103_v24, %v5415_v23  ;;  %v18461_v4 = vpop.f32.mrf.mxu0  ;;  %v6125_v1 = vadd.f32 %v5566_v31, %v5402_v54  ;;  %v3964_v31 = vadd.f32 %v18289_v27, %v18093_v40  ;;  %v3966_v40 = vadd.f32 %v18305_v13, %v18123_v7 }
 0x58a   :  { %v18464_v56 = vpop.f32.mrf.mxu1  ;;  %v6127_v33 = vadd.f32 %v5643_v26, %v5404_v17  ;;  %v6129_v54 = vadd.f32 %v5720_v52, %v5406_v58 }
 0x58b   :  { %v18467_v50 = vpop.f32.mrf.mxu0  ;;  %v4686_v26 = vadd.f32 %v18358_v45, %v3964_v31 }
 0x58c   :  { %v18470_v2 = vpop.f32.mrf.mxu1 }
 0x58d   :  { %v6220_v41 = vpop.f32.mrf.mxu0  ;;  %v5408_v44 = vadd.f32 %v18390_v47, %v4686_v26 }
 0x58e   :  { %v18473_v10 = vadd.f32 %v6220_v41, %v6124_v39  ;;  %v18475_v23 = vpop.f32.mrf.mxu1 }
 0x58f   :  { %v6222_v8 = vpop.f32.mrf.mxu0  ;;  %v6131_v46 = vadd.f32 %v5797_v43, %v5408_v44  ;;  %v4690_v43 = vadd.f32 %v18366_v9, %v3968_v28 }
 0x590   :  { %v18480_v24 = vadd.f32 %v6222_v8, %v6125_v1  ;;  %v6297_v42 = vpop.f32.mrf.mxu1 }
 0x591   :  { %v18482_v29 = vadd.f32 %v6297_v42, %v6126_v32  ;;  %v18484_v14 = vpop.f32.mrf.mxu0 }
 0x592   :  { %v6299_v39 = vpop.f32.mrf.mxu1 }
 0x593   :  { %v18489_v21 = vadd.f32 %v6299_v39, %v6127_v33  ;;  %v18491_v57 = vpop.f32.mrf.mxu0 }
 0x594   :  { %v18494_v20 = vpop.f32.mrf.mxu1 }
 0x595   :  { %v6374_v32 = vpop.f32.mrf.mxu0 }
 0x596   :  { %v18497_v12 = vadd.f32 %v6374_v32, %v6128_v59  ;;  %v18499_v41 = vpop.f32.mrf.mxu1  ;;  %v4688_v59 = vadd.f32 %v18364_v55, %v3966_v40  ;;  %v5412_v55 = vadd.f32 %v18398_v60, %v4690_v43 }
 0x597   :  { %v6376_v1 = vpop.f32.mrf.mxu0 }
 0x598   :  { %v18504_v27 = vadd.f32 %v6376_v1, %v6129_v54  ;;  %v6451_v17 = vpop.f32.mrf.mxu1  ;;  %v5410_v7 = vadd.f32 %v18396_v30, %v4688_v59  ;;  %v6135_v30 = vadd.f32 %v18442_v63, %v5412_v55 }
 0x599   :  { %v18507_v8 = vadd.f32 %v6451_v17, %v18424_v61  ;;  %v18509_v45 = vpop.f32.mrf.mxu0 }
 0x59a   :  { %v6453_v52 = vpop.f32.mrf.mxu1  ;;  %v6133_v61 = vadd.f32 %v18436_v3, %v5410_v7  ;;  %v4692_v3 = vadd.f32 %v18372_v48, %v3970_v49  ;;  %v21245_v48 = vld [vmem:[#allocation52_spill] sm:$0xff] }
 0x59b   :  { %v6787_v47 = vadd.f32 %v6453_v52, %v6131_v46  ;;  %v18514_v42 = vpop.f32.mrf.mxu0 }
 0x59c   :  { %v18517_v13 = vpop.f32.mrf.mxu1  ;;  %v5414_v44 = vadd.f32 %v18404_v22, %v4692_v3 }
 0x59d   :  { %v6528_v33 = vpop.f32.mrf.mxu0 }
 0x59e   :  { %v6788_v34 = vadd.f32 %v6528_v33, %v18432_v11  ;;  %v18522_v39 = vpop.f32.mrf.mxu1  ;;  %v3972_v11 = vadd.f32 %v18334_v35, %v18203_v62 }
 0x59f   :  { %v6530_v31 = vpop.f32.mrf.mxu0 }
 0x5a0   :  { %v6789_v38 = vadd.f32 %v6530_v31, %v6133_v61  ;;  %v6605_v58 = vpop.f32.mrf.mxu1  ;;  %v4694_v1 = vadd.f32 %v21243_v19, %v3972_v11 }
 0x5a1   :  { %v6790_v26 = vadd.f32 %v6605_v58, %v18438_v5  ;;  %v18529_v9 = vpop.f32.mrf.mxu0  ;;  %v6137_v5 = vadd.f32 %v18454_v36, %v5414_v44 }
 0x5a2   :  { %v6607_v32 = vpop.f32.mrf.mxu1  ;;  %v5416_v46 = vadd.f32 %v21245_v48, %v4694_v1 }
 0x5a3   :  { %v6791_v54 = vadd.f32 %v6607_v32, %v6135_v30  ;;  %v18534_v60 = vpop.f32.mrf.mxu0 }
 0x5a4   :  { %21241 = vst [vmem:[#allocation63_spill] sm:$0xff] %v18534_v60  ;;  %v18537_v53 = vpop.f32.mrf.mxu1  ;;  %v6139_v52 = vadd.f32 %v18464_v56, %v5416_v46 }
 0x5a5   :  { %21242 = vst [vmem:[#allocation64_spill] sm:$0xff] %v18537_v53  ;;  %v6682_v63 = vpop.f32.mrf.mxu0  ;;  %v21255_v53 = vld [vmem:[#allocation34_spill] sm:$0xff] }
 0x5a6   :  { %v6792_v40 = vadd.f32 %v6682_v63, %v18450_v16  ;;  %v18542_v17 = vpop.f32.mrf.mxu1 }
 0x5a7   :  { %21244 = vst [vmem:[#allocation42_spill] sm:$0xff] %v18542_v17  ;;  %v6684_v59 = vpop.f32.mrf.mxu0 }
 0x5a8   :  { %v18545_v62 = vadd.f32 %v6684_v59, %v6137_v5  ;;  %v6759_v35 = vpop.f32.mrf.mxu1 }
 0x5a9   :  { %v18549_v22 = vadd.f32 %v6759_v35, %v18459_v18  ;;  %v6970_v28 = vpop.f32.mrf.mxu0  ;;  %v21246_v35 = vld [vmem:[#allocation14_spill] sm:$0xff] }
 0x5aa   :  { %v6761_v7 = vpop.f32.mrf.mxu1 }
 0x5ab   :  { %v18551_v43 = vadd.f32 %v6761_v7, %v6139_v52  ;;  %v18553_v36 = vpop.f32.mrf.mxu0  ;;  %v21247_v52 = vld [vmem:[#allocation18_spill] sm:$0xff] }
 0x5ac   :  { %v18555_v16 = vpop.f32.mrf.mxu1  ;;  %v2703_v7 = vadd.f32 %v21247_v52, %v21246_v35 }
 0x5ad   :  { %v6976_v33 = vpop.f32.mrf.mxu0 }
 0x5ae   :  { %v18558_v61 = vadd.f32 %v6976_v33, %v18473_v10  ;;  %v18560_v55 = vpop.f32.mrf.mxu1 }
 0x5af   :  { %v6978_v31 = vpop.f32.mrf.mxu0 }
 0x5b0   :  { %v18563_v56 = vadd.f32 %v6978_v31, %v18480_v24  ;;  %v7053_v18 = vpop.f32.mrf.mxu1 }
 0x5b1   :  { %v18566_v49 = vadd.f32 %v7053_v18, %v18482_v29  ;;  %v18568_v58 = vpop.f32.mrf.mxu0 }
 0x5b2   :  { %v7055_v30 = vpop.f32.mrf.mxu1 }
 0x5b3   :  { %v18571_v3 = vadd.f32 %v7055_v30, %v18489_v21  ;;  %v18573_v32 = vpop.f32.mrf.mxu0 }
 0x5b4   :  { %v18575_v10 = vpop.f32.mrf.mxu1 }
 0x5b5   :  { %v7130_v11 = vpop.f32.mrf.mxu0 }
 0x5b6   :  { %v18578_v44 = vadd.f32 %v7130_v11, %v18497_v12  ;;  %v18580_v24 = vpop.f32.mrf.mxu1 }
 0x5b7   :  { %v7132_v19 = vpop.f32.mrf.mxu0 }
 0x5b8   :  { %v18583_v29 = vadd.f32 %v7132_v19, %v18504_v27  ;;  %v7207_v1 = vpop.f32.mrf.mxu1  ;;  %v21252_v19 = vld [vmem:[#allocation19_spill] sm:$0xff] }
 0x5b9   :  { %v18586_v63 = vadd.f32 %v7207_v1, %v18507_v8  ;;  %v18588_v21 = vpop.f32.mrf.mxu0  ;;  %v21249_v8 = vld [vmem:[#allocation26_spill] sm:$0xff] }
 0x5ba   :  { %v7209_v5 = vpop.f32.mrf.mxu1  ;;  %v3942_v18 = vadd.f32 %v21249_v8, %v2703_v7  ;;  %v21259_v7 = vld [vmem:[#allocation43_spill] sm:$0xff]  ;;  %v21261_v8 = vld [vmem:[#allocation16_spill] sm:$0xff] }
 0x5bb   :  { %v18590_v48 = vadd.f32 %v7209_v5, %v6787_v47  ;;  %v18592_v46 = vpop.f32.mrf.mxu0  ;;  %v21251_v47 = vld [vmem:[#allocation15_spill] sm:$0xff] }
 0x5bc   :  { %v18594_v59 = vpop.f32.mrf.mxu1  ;;  %v2780_v1 = vadd.f32 %v21252_v19, %v21251_v47  ;;  %v4664_v60 = vadd.f32 %v21255_v53, %v3942_v18  ;;  %v21266_v18 = vld [vmem:[#allocation53_spill] sm:$0xff] }
 0x5bd   :  { %v7284_v12 = vpop.f32.mrf.mxu0 }
 0x5be   :  { %v18598_v33 = vadd.f32 %v7284_v12, %v6788_v34  ;;  %v18600_v27 = vpop.f32.mrf.mxu1  ;;  %v21256_v34 = vld [vmem:[#allocation27_spill] sm:$0xff] }
 0x5bf   :  { %v7286_v31 = vpop.f32.mrf.mxu0  ;;  %v3944_v12 = vadd.f32 %v21256_v34, %v2780_v1  ;;  %v21267_v1 = vld [vmem:[#allocation51_spill] sm:$0xff] }
 0x5c0   :  { %21248 = vst [vmem:[#allocation52_spill] sm:$0xff] %v18598_v33  ;;  %v18603_v30 = vadd.f32 %v7286_v31, %v6789_v38  ;;  %v7361_v11 = vpop.f32.mrf.mxu1  ;;  %v5386_v38 = vadd.f32 %v21259_v7, %v4664_v60  ;;  %v21268_v60 = vld [vmem:[#allocation28_spill] sm:$0xff] }
 0x5c1   :  { %v18607_v5 = vadd.f32 %v7361_v11, %v6790_v26  ;;  %v18609_v17 = vpop.f32.mrf.mxu0  ;;  %v21263_v26 = vld [vmem:[#allocation35_spill] sm:$0xff] }
 0x5c2   :  { %21250 = vst [vmem:[#allocation14_spill] sm:$0xff] %v18603_v30  ;;  %21254 = vst [vmem:[#allocation26_spill] sm:$0xff] %v18609_v17  ;;  %v7363_v35 = vpop.f32.mrf.mxu1  ;;  %v21262_v30 = vld [vmem:[#allocation20_spill] sm:$0xff]  ;;  %v4666_v11 = vadd.f32 %v21263_v26, %v3944_v12  ;;  %v21265_v17 = vld [vmem:[#allocation21_spill] sm:$0xff]  ;;  %v6109_v33 = vadd.f32 %v21266_v18, %v5386_v38 }
 0x5c3   :  { %21253 = vst [vmem:[#allocation18_spill] sm:$0xff] %v18607_v5  ;;  %v18613_v52 = vadd.f32 %v7363_v35, %v6791_v54  ;;  %v18615_v37 = vpop.f32.mrf.mxu0  ;;  %v2857_v47 = vadd.f32 %v21262_v30, %v21261_v8  ;;  %v21264_v5 = vld [vmem:[#allocation17_spill] sm:$0xff]  ;;  %v6764_v54 = vadd.f32 %v18461_v4, %v21267_v1  ;;  %v21271_v38 = vld [vmem:[#allocation36_spill] sm:$0xff] }
 0x5c4   :  { %21258 = vst [vmem:[#allocation19_spill] sm:$0xff] %v18615_v37  ;;  %v18618_v31 = vpop.f32.mrf.mxu1  ;;  %v2934_v53 = vadd.f32 %v21265_v17, %v21264_v5  ;;  %v21270_v8 = vld [vmem:[#allocation29_spill] sm:$0xff]  ;;  %v6765_v26 = vadd.f32 %v18467_v50, %v6109_v33 }
 0x5c5   :  { %21257 = vst [vmem:[#allocation15_spill] sm:$0xff] %v18613_v52  ;;  %21260 = vst [vmem:[#allocation34_spill] sm:$0xff] %v18618_v31  ;;  %v7438_v19 = vpop.f32.mrf.mxu0  ;;  %v3946_v7 = vadd.f32 %v21268_v60, %v2857_v47  ;;  %v21269_v52 = vld [vmem:[#allocation44_spill] sm:$0xff]  ;;  %v7520_v37 = vadd.f32 %v6970_v28, %v6764_v54  ;;  %v21274_v1 = vld [vmem:[#allocation45_spill] sm:$0xff] }
 0x5c6   :  { %v18628_v35 = vadd.f32 %v7438_v19, %v6792_v40  ;;  %v18630_v34 = vpop.f32.mrf.mxu1  ;;  %v5388_v31 = vadd.f32 %v21269_v52, %v4666_v11  ;;  %v3948_v12 = vadd.f32 %v21270_v8, %v2934_v53  ;;  %v21272_v19 = vld [vmem:[#allocation54_spill] sm:$0xff]  ;;  %v21273_v11 = vld [vmem:[#allocation37_spill] sm:$0xff]  ;;  %v7521_v50 = vadd.f32 %v18553_v36, %v6765_v26  ;;  %v21277_v8 = vld [vmem:[#allocation23_spill] sm:$0xff] }
 0x5c7   :  { %v7440_v30 = vpop.f32.mrf.mxu0  ;;  %v4668_v4 = vadd.f32 %v21271_v38, %v3946_v7  ;;  %v6766_v18 = vadd.f32 %v18470_v2, %v21272_v19  ;;  %v21276_v7 = vld [vmem:[#allocation30_spill] sm:$0xff] }
 0x5c8   :  { %v18637_v17 = vadd.f32 %v7440_v30, %v18545_v62  ;;  %v7515_v5 = vpop.f32.mrf.mxu1  ;;  %v6111_v40 = vadd.f32 %v18414_v51, %v5388_v31  ;;  %v4670_v53 = vadd.f32 %v21273_v11, %v3948_v12  ;;  %v18648_v62 = vpop.permute.xlu0 %8278  ;;  %v21275_v31 = vld [vmem:[#allocation22_spill] sm:$0xff]  ;;  %v21278_v12 = vld [vmem:[#allocation31_spill] sm:$0xff] }
 0x5c9   :  { %v18644_v47 = vadd.f32 %v7515_v5, %v18549_v22  ;;  %v7692_v52 = vpop.f32.mrf.mxu0  ;;  %v5390_v54 = vadd.f32 %v21274_v1, %v4668_v4  ;;  %v7522_v51 = vadd.f32 %v18555_v16, %v6766_v18  ;;  %v3950_v30 = vadd.f32 %v21276_v7, %v21275_v31  ;;  %v21279_v38 = vld [vmem:[#allocation46_spill] sm:$0xff]  ;;  %v21281_v18 = vld [vmem:[#allocation55_spill] sm:$0xff] }
 0x5ca   :  { %v8242_v28 = vadd.f32 %v7692_v52, %v7520_v37  ;;  %v7517_v33 = vpop.f32.mrf.mxu1  ;;  %v6767_v60 = vadd.f32 %v18475_v23, %v6111_v40  ;;  %v3952_v36 = vadd.f32 %v21278_v12, %v21277_v8  ;;  %v5392_v4 = vadd.f32 %v21279_v38, %v4670_v53  ;;  %v21280_v23 = vld [vmem:[#allocation56_spill] sm:$0xff]  ;;  %v21282_v1 = vld [vmem:[#allocation38_spill] sm:$0xff]  ;;  %v21283_v12 = vld [vmem:[#allocation39_spill] sm:$0xff] }
 0x5cb   :  { %v18654_v2 = vadd.f32 %v7517_v33, %v18551_v43  ;;  %v7694_v22 = vpop.f32.mrf.mxu0  ;;  %v6113_v40 = vadd.f32 %v21280_v23, %v5390_v54  ;;  %v6768_v52 = vadd.f32 %v18484_v14, %v21281_v18  ;;  %v4672_v53 = vadd.f32 %v21282_v1, %v3950_v30  ;;  %v21288_v18 = vld [vmem:[#allocation33_spill] sm:$0xff] }
 0x5cc   :  { %v18661_v37 = vadd.f32 %v18648_v62, %v8242_v28  ;;  %v8243_v26 = vadd.f32 %v7694_v22, %v7521_v50  ;;  %v7769_v5 = vpop.f32.mrf.mxu1  ;;  %v7523_v16 = vadd.f32 %v18560_v55, %v6767_v60  ;;  %v6115_v54 = vadd.f32 %v18422_v0, %v5392_v4 }
 0x5cd   :  { %v7698_v43 = vpop.f32.mrf.mxu0  ;;  %v8244_v19 = vadd.f32 %v7769_v5, %v7522_v51  ;;  %v6769_v14 = vadd.f32 %v18491_v57, %v6113_v40  ;;  %v7524_v22 = vadd.f32 %v18568_v58, %v6768_v52  ;;  %v6770_v0 = vadd.f32 %v18494_v20, %v18420_v6 }
 0x5ce   :  { %v8318_v11 = vmax.f32 %v18661_v37, 0.0  ;;  %v18670_v33 = vadd.f32 %v18648_v62, %v8243_v26  ;;  %v18673_v28 = vadd.f32 %v7698_v43, %v18558_v61  ;;  %v7771_v50 = vpop.f32.mrf.mxu1  ;;  %v21284_v26 = vld [vmem:[#allocation47_spill] sm:$0xff]  ;;  %v6771_v20 = vadd.f32 %v18499_v41, %v6115_v54  ;;  %v21286_v43 = vld [vmem:[#allocation32_spill] sm:$0xff] }
 0x5cf   :  { %v18678_v55 = vadd.f32 %v18648_v62, %v8244_v19  ;;  %v7700_v60 = vpop.f32.mrf.mxu0  ;;  %v8245_v51 = vadd.f32 %v7771_v50, %v7523_v16  ;;  %v5394_v5 = vadd.f32 %v21284_v26, %v4672_v53  ;;  %v7525_v38 = vadd.f32 %v18573_v32, %v6769_v14  ;;  %v21285_v16 = vld [vmem:[#allocation24_spill] sm:$0xff]  ;;  %v21287_v32 = vld [vmem:[#allocation25_spill] sm:$0xff] }
 0x5d0   :  { %v8319_v31 = vmax.f32 %v18670_v33, 0.0  ;;  %v18684_v7 = vadd.f32 %v7700_v60, %v18563_v56  ;;  %8382 = vrot.lane.b32.xlu1 %v8318_v11, %s15695_s27  ;;  %v7775_v61 = vpop.f32.mrf.mxu1  ;;  %v4674_v56 = vadd.f32 %v21283_v12, %v3952_v36  ;;  %v7526_v23 = vadd.f32 %v18575_v10, %v6770_v0  ;;  %v21289_v10 = vld [vmem:[#allocation48_spill] sm:$0xff] }
 0x5d1   :  { %v8320_v30 = vmax.f32 %v18678_v55, 0.0  ;;  %v18693_v8 = vadd.f32 %v18648_v62, %v8245_v51  ;;  %v18696_v57 = vadd.f32 %v7775_v61, %v18566_v49  ;;  %v7846_v58 = vpop.f32.mrf.mxu0  ;;  %v3954_v19 = vadd.f32 %v21286_v43, %v21285_v16  ;;  %v21292_v26 = vld [vmem:[#allocation40_spill] sm:$0xff] }
 0x5d2   :  { %v8246_v4 = vadd.f32 %v7846_v58, %v7524_v22  ;;  %8384 = vrot.lane.b32.xlu0 %v8319_v31, %s15695_s27  ;;  %v7777_v6 = vpop.f32.mrf.mxu1  ;;  %v3956_v52 = vadd.f32 %v21288_v18, %v21287_v32  ;;  %v5396_v53 = vadd.f32 %v21289_v10, %v4674_v56  ;;  %v7527_v60 = vadd.f32 %v18580_v24, %v6771_v20  ;;  %v21291_v22 = vld [vmem:[#allocation57_spill] sm:$0xff] }
 0x5d3   :  { %v8321_v49 = vmax.f32 %v18693_v8, 0.0  ;;  %v18708_v40 = vadd.f32 %v7777_v6, %v18571_v3  ;;  %v7848_v36 = vpop.f32.mrf.mxu0  ;;  %v21290_v3 = vld [vmem:[#allocation58_spill] sm:$0xff]  ;;  %v6772_v61 = vadd.f32 %v18509_v45, %v21291_v22  ;;  %v4676_v24 = vadd.f32 %v21292_v26, %v3954_v19  ;;  %v21293_v19 = vld [vmem:[#allocation41_spill] sm:$0xff] }
 0x5d4   :  { %v18715_v50 = vadd.f32 %v18648_v62, %v8246_v4  ;;  %v8247_v1 = vadd.f32 %v7848_v36, %v7525_v38  ;;  %8386 = vrot.lane.b32.xlu1 %v8320_v30, %s15695_s27  ;;  %v7923_v41 = vpop.f32.mrf.mxu1  ;;  %v6117_v54 = vadd.f32 %v21290_v3, %v5394_v5  ;;  %v6119_v5 = vadd.f32 %v18434_v15, %v5396_v53  ;;  %v21294_v32 = vld [vmem:[#allocation49_spill] sm:$0xff] }
 0x5d5   :  { %v7852_v51 = vpop.f32.mrf.mxu0  ;;  %v8248_v14 = vadd.f32 %v7923_v41, %v7526_v23  ;;  %v7528_v20 = vadd.f32 %v18588_v21, %v6772_v61  ;;  %v6774_v15 = vadd.f32 %v18517_v13, %v18430_v25  ;;  %v5398_v18 = vadd.f32 %v21294_v32, %v4676_v24 }
 0x5d6   :  { %v8322_v0 = vmax.f32 %v18715_v50, 0.0  ;;  %v18727_v58 = vadd.f32 %v18648_v62, %v8247_v1  ;;  %v18730_v12 = vadd.f32 %v7852_v51, %v18578_v44  ;;  %8388 = vrot.lane.b32.xlu0 %v8321_v49, %s15695_s27  ;;  %v7925_v56 = vpop.f32.mrf.mxu1  ;;  %v6773_v6 = vadd.f32 %v18514_v42, %v6117_v54 }
 0x5d7   :  { %v18738_v38 = vadd.f32 %v18648_v62, %v8248_v14  ;;  %v7854_v45 = vpop.f32.mrf.mxu0  ;;  %v8249_v4 = vadd.f32 %v7925_v56, %v7527_v60  ;;  %v6775_v13 = vadd.f32 %v18522_v39, %v6119_v5  ;;  %v7530_v10 = vadd.f32 %v18594_v59, %v6774_v15  ;;  %v21295_v60 = vld [vmem:[#allocation50_spill] sm:$0xff]  ;;  %v21296_v39 = vld [vmem:[#allocation60_spill] sm:$0xff]  ;;  %v21300_v15 = vld [vmem:[#allocation63_spill] sm:$0xff] }
 0x5d8   :  { %v8323_v44 = vmax.f32 %v18727_v58, 0.0  ;;  %v18744_v23 = vadd.f32 %v7854_v45, %v18583_v29  ;;  %8390 = vrot.lane.b32.xlu1 %v8322_v0, %s15695_s27  ;;  %v7929_v36 = vpop.f32.mrf.mxu1  ;;  %v4678_v29 = vadd.f32 %v21293_v19, %v3956_v52  ;;  %v7529_v1 = vadd.f32 %v18592_v46, %v6773_v6  ;;  %v21298_v5 = vld [vmem:[#allocation52_spill] sm:$0xff]  ;;  %v21299_v6 = vld [vmem:[#allocation62_spill] sm:$0xff] }
 0x5d9   :  { %v8324_v16 = vmax.f32 %v18738_v38, 0.0  ;;  %v18753_v43 = vadd.f32 %v18648_v62, %v8249_v4  ;;  %v18756_v42 = vadd.f32 %v7929_v36, %v18586_v63  ;;  %v8000_v21 = vpop.f32.mrf.mxu0  ;;  %v6121_v14 = vadd.f32 %v21296_v39, %v5398_v18  ;;  %v21301_v19 = vld [vmem:[#allocation26_spill] sm:$0xff]  ;;  %v21306_v39 = vld [vmem:[#allocation19_spill] sm:$0xff] }
 0x5da   :  { %v8250_v41 = vadd.f32 %v8000_v21, %v7528_v20  ;;  %8392 = vrot.lane.b32.xlu0 %v8323_v44, %s15695_s27  ;;  %v7931_v25 = vpop.f32.mrf.mxu1  ;;  %v5400_v51 = vadd.f32 %v21295_v60, %v4678_v29  ;;  %v7531_v59 = vadd.f32 %v18600_v27, %v6775_v13  ;;  %v21302_v18 = vld [vmem:[#allocation14_spill] sm:$0xff]  ;;  %v21304_v13 = vld [vmem:[#allocation64_spill] sm:$0xff] }
 0x5db   :  { %v8325_v63 = vmax.f32 %v18753_v43, 0.0  ;;  %v18768_v53 = vadd.f32 %v7931_v25, %v18590_v48  ;;  %v8002_v52 = vpop.f32.mrf.mxu0  ;;  %v21297_v48 = vld [vmem:[#allocation59_spill] sm:$0xff]  ;;  %v6777_v21 = vadd.f32 %v21300_v15, %v6121_v14  ;;  %v21303_v25 = vld [vmem:[#allocation61_spill] sm:$0xff]  ;;  %v10527_v43 = vld [vmem:[%s21009_s5 + $0x38] sm:$0x3] }
 0x5dc   :  { %v18771_v3 = vadd.f32 %v18648_v62, %v8250_v41  ;;  %v8251_v46 = vadd.f32 %v8002_v52, %v7529_v1  ;;  %8394 = vrot.lane.b32.xlu1 %v8324_v16, %s15695_s27  ;;  %v8077_v54 = vpop.f32.mrf.mxu1  ;;  %v6776_v56 = vadd.f32 %v18529_v9, %v21297_v48  ;;  %v6123_v27 = vadd.f32 %v21299_v6, %v5400_v51  ;;  %v21309_v6 = vld [vmem:[#allocation15_spill] sm:$0xff] }
 0x5dd   :  { %v8006_v22 = vpop.f32.mrf.mxu0  ;;  %v8252_v61 = vadd.f32 %v8077_v54, %v7530_v10  ;;  %v6778_v10 = vadd.f32 %v21304_v13, %v21303_v25  ;;  %v21305_v54 = vld [vmem:[#allocation18_spill] sm:$0xff]  ;;  %v7533_v14 = vadd.f32 %v21306_v39, %v6777_v21 }
 0x5de   :  { %v8326_v26 = vmax.f32 %v18771_v3, 0.0  ;;  %v18783_v24 = vadd.f32 %v18648_v62, %v8251_v46  ;;  %v18786_v45 = vadd.f32 %v8006_v22, %v21298_v5  ;;  %8396 = vrot.lane.b32.xlu0 %v8325_v63, %s15695_s27  ;;  %v8079_v4 = vpop.f32.mrf.mxu1  ;;  %v7532_v29 = vadd.f32 %v21301_v19, %v6776_v56  ;;  %v21308_v56 = vld [vmem:[#allocation34_spill] sm:$0xff] }
 0x5df   :  { %v18793_v20 = vadd.f32 %v18648_v62, %v8252_v61  ;;  %v8008_v36 = vpop.f32.mrf.mxu0  ;;  %v8253_v9 = vadd.f32 %v8079_v4, %v7531_v59  ;;  %v21307_v61 = vld [vmem:[#allocation42_spill] sm:$0xff]  ;;  %v7534_v5 = vadd.f32 %v21308_v56, %v6778_v10 }
 0x5e0   :  { %v8327_v32 = vmax.f32 %v18783_v24, 0.0  ;;  %v18799_v1 = vadd.f32 %v8008_v36, %v21302_v18  ;;  %8398 = vrot.lane.b32.xlu1 %v8326_v26, %s15695_s27  ;;  %v8083_v41 = vpop.f32.mrf.mxu1  ;;  %v6779_v48 = vadd.f32 %v21307_v61, %v6123_v27 }
 0x5e1   :  { %v8328_v52 = vmax.f32 %v18793_v20, 0.0  ;;  %v18808_v46 = vadd.f32 %v18648_v62, %v8253_v9  ;;  %v18811_v60 = vadd.f32 %v8083_v41, %v21305_v54  ;;  %v8154_v51 = vpop.f32.mrf.mxu0 }
 0x5e2   :  { %v8254_v59 = vadd.f32 %v8154_v51, %v7532_v29  ;;  %8400 = vrot.lane.b32.xlu0 %v8327_v32, %s15695_s27  ;;  %v8085_v22 = vpop.f32.mrf.mxu1  ;;  %v7535_v29 = vadd.f32 %v18630_v34, %v6779_v48 }
 0x5e3   :  { %v8329_v4 = vmax.f32 %v18808_v46, 0.0  ;;  %v18821_v36 = vadd.f32 %v8085_v22, %v21309_v6  ;;  %v8156_v9 = vpop.f32.mrf.mxu0 }
 0x5e4   :  { %v18824_v15 = vadd.f32 %v18648_v62, %v8254_v59  ;;  %v8255_v21 = vadd.f32 %v8156_v9, %v7533_v14  ;;  %8402 = vrot.lane.b32.xlu1 %v8328_v52, %s15695_s27  ;;  %v8231_v19 = vpop.f32.mrf.mxu1  ;;  %v8275_v14 = vld [vmem:[%s21008_s4 + $0x8] sm:$0xff] }
 0x5e5   :  { %v8256_v27 = vadd.f32 %v8231_v19, %v7534_v5 }
 0x5e6   :  { %v8330_v18 = vmax.f32 %v18824_v15, 0.0  ;;  %v18832_v41 = vadd.f32 %v18648_v62, %v8255_v21  ;;  %8404 = vrot.lane.b32.xlu0 %v8329_v4, %s15695_s27  ;;  %v8233_v25 = vpop.f32.mrf.mxu1 }
 0x5e7   :  { %v18838_v13 = vadd.f32 %v18648_v62, %v8256_v27  ;;  %v8257_v10 = vadd.f32 %v8233_v25, %v7535_v29 }
 0x5e8   :  { %v8331_v54 = vmax.f32 %v18832_v41, 0.0  ;;  %8406 = vrot.lane.b32.xlu1 %v8330_v18, %s15695_s27 }
 0x5e9   :  { %v8332_v34 = vmax.f32 %v18838_v13, 0.0  ;;  %v18846_v51 = vadd.f32 %v18648_v62, %v8257_v10  ;;  %v10528_v13 = vld [vmem:[%s21009_s5 + $0x40] sm:$0x3] }
 0x5ea   :  { %8408 = vrot.lane.b32.xlu0 %v8331_v54, %s15695_s27  ;;  %10772 = vmatprep.subr.mxu0 %v10528_v13 }
 0x5eb   :  { %v8333_v39 = vmax.f32 %v18846_v51, 0.0  ;;  %10773 = vmatpush1.xpose.msra.mxu0 %v10527_v43  ;;  %v10521_v51 = vld [vmem:[%s21009_s5 + $0x8] sm:$0xff] }
 0x5ec   :  { %8410 = vrot.lane.b32.xlu1 %v8332_v34, %s15695_s27  ;;  %10774 = vmatprep.subr.mxu0 %v10521_v51 }
 0x5ee   :  { %8412 = vrot.lane.b32.xlu0 %v8333_v39, %s15695_s27 }
 0x5f0   :  { %8283 = vperm.xlu1 %15650, %v8275_v14  }
 0x642   :  { %v8383_v59 = vpop.permute.xlu1 %8382 }
 0x644   :  { %v8385_v62 = vpop.permute.xlu0 %8384 }
 0x645   :  { %v8446_v22 = vsel %vm21310_vm2, %v8383_v59, %v8385_v62  ;;  %vm21325_vm2 = vmmov %vm21324_vm12 }
 0x646   :  { %v18862_v61 = vmax.f32 %v8318_v11, %v8446_v22  ;;  %v8387_v48 = vpop.permute.xlu1 %8386 }
 0x647   :  { %v8447_v56 = vsel %vm21311_vm9, %v8385_v62, %v8387_v48  ;;  %vm21326_vm9 = vmmov %vm21325_vm2 }
 0x648   :  { %v18867_v5 = vmax.f32 %v8319_v31, %v8447_v56  ;;  %v8389_v6 = vpop.permute.xlu0 %8388  ;;  %8572 = vrot.lane.b32.xlu0 %v18862_v61, %s15699_s8 }
 0x649   :  { %v8448_v9 = vsel %vm21312_vm3, %v8387_v48, %v8389_v6  ;;  %vm21327_vm3 = vmmov %vm21325_vm2 }
 0x64a   :  { %v18874_v21 = vmax.f32 %v8320_v30, %v8448_v9  ;;  %v8391_v37 = vpop.permute.xlu1 %8390  ;;  %8574 = vrot.lane.b32.xlu1 %v18867_v5, %s15699_s8 }
 0x64b   :  { %v8449_v11 = vsel %vm21313_vm6, %v8389_v6, %v8391_v37  ;;  %v10520_v6 = vld [vmem:[%s21009_s5] sm:$0xff]  ;;  %vm21328_vm6 = vmmov %vm21325_vm2 }
 0x64c   :  { %v18881_v33 = vmax.f32 %v8321_v49, %v8449_v11  ;;  %v8393_v31 = vpop.permute.xlu0 %8392  ;;  %8576 = vrot.lane.b32.xlu0 %v18874_v21, %s15699_s8  ;;  %10775 = vmatpush1.xpose.msra.mxu0 %v10520_v6 }
 0x64d   :  { %v8450_v19 = vsel %vm21314_vm15, %v8391_v37, %v8393_v31  ;;  %v10522_v37 = vld [vmem:[%s21009_s5 + $0x10] sm:$0xff]  ;;  %vm21329_vm15 = vmmov %vm21325_vm2 }
 0x64e   :  { %v18888_v55 = vmax.f32 %v8322_v0, %v8450_v19  ;;  %v8395_v30 = vpop.permute.xlu1 %8394  ;;  %8578 = vrot.lane.b32.xlu1 %v18881_v33, %s15699_s8 }
 0x64f   :  { %v8451_v29 = vsel %vm21315_vm14, %v8393_v31, %v8395_v30  ;;  %vm21330_vm14 = vmmov %vm21325_vm2 }
 0x650   :  { %v18895_v8 = vmax.f32 %v8323_v44, %v8451_v29  ;;  %v8397_v49 = vpop.permute.xlu0 %8396  ;;  %8580 = vrot.lane.b32.xlu0 %v18888_v55, %s15699_s8 }
 0x651   :  { %v8452_v27 = vsel %vm21316_vm1, %v8395_v30, %v8397_v49  ;;  %vm21331_vm1 = vmmov %vm21325_vm2 }
 0x652   :  { %v18902_v50 = vmax.f32 %v8324_v16, %v8452_v27  ;;  %v8399_v0 = vpop.permute.xlu1 %8398  ;;  %8582 = vrot.lane.b32.xlu1 %v18895_v8, %s15699_s8  ;;  %v19003_v27 = vld [vmem:[#allocation2 + $0x80] sm:$0xff] }
 0x654   :  { %v8401_v41 = vpop.permute.xlu0 %8400  ;;  %8584 = vrot.lane.b32.xlu0 %v18902_v50, %s15699_s8 }
 0x655   :  { %v8453_v58 = vsel %vm21317_vm7, %v8399_v0, %v8401_v41  ;;  %vm21332_vm7 = vmmov %vm21331_vm1 }
 0x656   :  { %v18911_v44 = vmax.f32 %v8326_v26, %v8453_v58  ;;  %v8403_v25 = vpop.permute.xlu1 %8402 }
 0x657   :  { %v8454_v10 = vsel %vm21189_vm0, %v8401_v41, %v8403_v25  ;;  %vm21333_vm0 = vmmov %vm21331_vm1 }
 0x658   :  { %v18916_v38 = vmax.f32 %v8327_v32, %v8454_v10  ;;  %v8405_v16 = vpop.permute.xlu0 %8404  ;;  %8588 = vrot.lane.b32.xlu1 %v18911_v44, %s15699_s8 }
 0x659   :  { %v8455_v14 = vsel %vm21318_vm10, %v8403_v25, %v8405_v16  ;;  %vm21334_vm10 = vmmov %vm21333_vm0 }
 0x65a   :  { %v18923_v59 = vmax.f32 %v8328_v52, %v8455_v14  ;;  %v8407_v3 = vpop.permute.xlu1 %8406  ;;  %8590 = vrot.lane.b32.xlu0 %v18916_v38, %s15699_s8 }
 0x65b   :  { %v8456_v26 = vsel %vm21319_vm13, %v8405_v16, %v8407_v3  ;;  %vm21335_vm13 = vmmov %vm21333_vm0 }
 0x65c   :  { %v18930_v24 = vmax.f32 %v8329_v4, %v8456_v26  ;;  %v8409_v32 = vpop.permute.xlu0 %8408  ;;  %8592 = vrot.lane.b32.xlu1 %v18923_v59, %s15699_s8  ;;  %v8530_v4 = vsel %vm21322_vm11, %v8397_v49, %v8399_v0  ;;  %vm21341_vm11 = vmmov %vm21323_vm4 }
 0x65d   :  { %v8457_v62 = vsel %vm21320_vm5, %v8407_v3, %v8409_v32  ;;  %v8237_v3 = vpop.f32.mrf.mxu1  ;;  %vm21338_vm5 = vmmov %vm21333_vm0 }
 0x65e   :  { %v18937_v20 = vmax.f32 %v8330_v18, %v8457_v62  ;;  %v8411_v52 = vpop.permute.xlu1 %8410  ;;  %8594 = vrot.lane.b32.xlu0 %v18930_v24, %s15699_s8  ;;  %v8536_v18 = vmax.f32 %v8325_v63, %v8530_v4  ;;  %v10529_v63 = vld [vmem:[%s21009_s5 + $0x48] sm:$0x3] }
 0x65f   :  { %v8458_v22 = vsel %vm21321_vm8, %v8409_v32, %v8411_v52  ;;  %vm21340_vm8 = vmmov %vm21333_vm0 }
 0x660   :  { %v18942_v48 = vmax.f32 %v8331_v54, %v8458_v22  ;;  %8596 = vrot.lane.b32.xlu1 %v18937_v20, %s15699_s8  ;;  %v8413_v46 = vpop.permute.xlu0 %8412  ;;  %v8239_v22 = vpop.f32.mrf.mxu1 }
 0x661   :  { %v8459_v56 = vsel %vm21323_vm4, %v8411_v52, %v8413_v46  ;;  %v8537_v54 = vmax.f32 %v8333_v39, %v8413_v46  ;;  %v10523_v39 = vld [vmem:[%s21009_s5 + $0x18] sm:$0xff] }
 0x662   :  { %v18950_v15 = vmax.f32 %v8332_v34, %v8459_v56  ;;  %8598 = vrot.lane.b32.xlu0 %v18942_v48, %s15699_s8  ;;  %v10530_v34 = vld [vmem:[%s21009_s5 + $0x50] sm:$0x3] }
 0x663   :  { %10842 = vmatprep.subr.mxu1 %v10530_v34 }
 0x664   :  { %8600 = vrot.lane.b32.xlu1 %v18950_v15, %s15699_s8  ;;  %10843 = vmatpush1.xpose.msra.mxu1 %v10529_v63 }
 0x665   :  { %10844 = vmatprep.subr.mxu1 %v10523_v39 }
 0x666   :  { %8586 = vrot.lane.b32.xlu0 %v8536_v18, %s15699_s8 }
 0x668   :  { %8602 = vrot.lane.b32.xlu1 %v8537_v54, %s15699_s8  ;;  %10845 = vmatpush1.xpose.msra.mxu1 %v10522_v37 }
 0x669   :  { %15505 = vmatprep.subr.mxu1 %v19003_v27 }
 0x66b   :  { %v8284_v9 = vpop.permute.xlu1 %8283 }
 0x66c   :  { %v18987_v11 = vadd.f32 %v8284_v9, %v18673_v28  ;;  %v18990_v31 = vadd.f32 %v8284_v9, %v18684_v7  ;;  %v18995_v29 = vadd.f32 %v8284_v9, %v18696_v57  ;;  %v18998_v49 = vadd.f32 %v8284_v9, %v18708_v40  ;;  %v10532_v28 = vld [vmem:[%s21009_s5 + $0x60] sm:$0x3] }
 0x66d   :  { %10912 = vmatprep.subr.mxu0 %v10532_v28  ;;  %v19015_v40 = vadd.f32 %v8284_v9, %v18730_v12  ;;  %v19018_v0 = vadd.f32 %v8284_v9, %v18744_v23  ;;  %v19029_v25 = vadd.f32 %v8284_v9, %v18756_v42  ;;  %v19032_v12 = vadd.f32 %v8284_v9, %v18768_v53  ;;  %v8160_v23 = vpop.f32.mrf.mxu0 }
 0x66e   :  { %v8334_v19 = vmax.f32 %v18987_v11, 0.0  ;;  %v8335_v30 = vmax.f32 %v18990_v31, 0.0  ;;  %v8336_v7 = vmax.f32 %v18995_v29, 0.0  ;;  %v21056_v57 = vmax.f32 %v18998_v49, 0.0 }
 0x66f   :  { %v21057_v41 = vmax.f32 %v19015_v40, 0.0  ;;  %v21054_v58 = vmax.f32 %v19018_v0, 0.0  ;;  %v21055_v10 = vmax.f32 %v19029_v25, 0.0  ;;  %v21046_v16 = vmax.f32 %v19032_v12, 0.0  ;;  %v8162_v53 = vpop.f32.mrf.mxu0 }
 0x670   :  { %8414 = vrot.lane.b32.xlu0 %v8334_v19, %s15695_s27  ;;  %8416 = vrot.lane.b32.xlu1 %v8335_v30, %s15695_s27  ;;  %v19043_v14 = vadd.f32 %v8284_v9, %v18786_v45  ;;  %v19046_v42 = vadd.f32 %v8284_v9, %v18799_v1  ;;  %v19057_v45 = vadd.f32 %v8284_v9, %v18811_v60 }
 0x671   :  { %v19060_v1 = vadd.f32 %v8284_v9, %v18821_v36  ;;  %v8270_v62 = vadd.f32 %v8160_v23, %v18628_v35  ;;  %v8271_v52 = vadd.f32 %v8162_v53, %v18637_v17  ;;  %v8272_v35 = vadd.f32 %v8237_v3, %v18644_v47 }
 0x672   :  { %v21052_v26 = vmax.f32 %v19043_v14, 0.0  ;;  %v21053_v32 = vmax.f32 %v19046_v42, 0.0  ;;  %v21051_v46 = vmax.f32 %v19057_v45, 0.0  ;;  %v8273_v17 = vadd.f32 %v8239_v22, %v18654_v2 }
 0x673   :  { %v21050_v60 = vmax.f32 %v19060_v1, 0.0  ;;  %v19072_v4 = vadd.f32 %v8284_v9, %v8270_v62  ;;  %v19074_v36 = vadd.f32 %v8284_v9, %v8271_v52  ;;  %v19086_v54 = vadd.f32 %v8284_v9, %v8272_v35 }
 0x674   :  { %8418 = vrot.lane.b32.xlu0 %v8336_v7, %s15695_s27  ;;  %8420 = vrot.lane.b32.xlu1 %v21056_v57, %s15695_s27  ;;  %v19088_v13 = vadd.f32 %v8284_v9, %v8273_v17  ;;  %v15714_v3 = vmov 1966171168  }
 0x675   :  { %v21049_v56 = vmax.f32 %v19072_v4, 0.0  ;;  %v21048_v18 = vmax.f32 %v19074_v36, 0.0  ;;  %v21047_v47 = vmax.f32 %v19086_v54, 0.0  ;;  %v8742_v62 = vunpack.c.l.s4 %v15714_v3 }
 0x676   :  { %v21045_v2 = vmax.f32 %v19088_v13, 0.0 }
 0x677   :  { %v8743_v3 = vunpack.c.0.s8 %v8742_v62 }
 0x678   :  { %8422 = vrot.lane.b32.xlu0 %v21057_v41, %s15695_s27  ;;  %8424 = vrot.lane.b32.xlu1 %v21054_v58, %s15695_s27  ;;  %v21346_v58 = vld [vmem:[#allocation8_spill] sm:$0xff]  ;;  %v10531_v41 = vld [vmem:[%s21009_s5 + $0x58] sm:$0x3] }
 0x67c   :  { %8426 = vrot.lane.b32.xlu0 %v21055_v10, %s15695_s27  ;;  %8428 = vrot.lane.b32.xlu1 %v21046_v16, %s15695_s27 }
 0x680   :  { %8430 = vrot.lane.b32.xlu0 %v21052_v26, %s15695_s27  ;;  %8432 = vrot.lane.b32.xlu1 %v21053_v32, %s15695_s27 }
 0x684   :  { %8434 = vrot.lane.b32.xlu0 %v21051_v46, %s15695_s27  ;;  %8436 = vrot.lane.b32.xlu1 %v21050_v60, %s15695_s27 }
 0x688   :  { %8438 = vrot.lane.b32.xlu0 %v21049_v56, %s15695_s27  ;;  %8440 = vrot.lane.b32.xlu1 %v21048_v18, %s15695_s27 }
 0x68c   :  { %8442 = vrot.lane.b32.xlu0 %v21047_v47, %s15695_s27  ;;  %8444 = vrot.lane.b32.xlu1 %v21045_v2, %s15695_s27 }
 0x6ba   :  { %v8573_v34 = vpop.permute.xlu0 %8572 }
 0x6bc   :  { %v8575_v43 = vpop.permute.xlu1 %8574 }
 0x6bd   :  { %v8636_v17 = vsel %vm21326_vm9, %v8573_v34, %v8575_v43 }
 0x6be   :  { %v8577_v63 = vpop.permute.xlu0 %8576 }
 0x6bf   :  { %v8637_v2 = vsel %vm21327_vm3, %v8575_v43, %v8577_v63  ;;  %v19120_v43 = vmax.f32 %v18862_v61, %v8636_v17 }
 0x6c0   :  { %v8579_v51 = vpop.permute.xlu1 %8578 }
 0x6c1   :  { %v8638_v16 = vsel %vm21328_vm6, %v8577_v63, %v8579_v51  ;;  %v19123_v63 = vmax.f32 %v18867_v5, %v8637_v2  ;;  %vm21353_vm6 = vmmov %vm21323_vm4 }
 0x6c2   :  { %v8581_v39 = vpop.permute.xlu0 %8580 }
 0x6c3   :  { %v8639_v52 = vsel %vm21324_vm12, %v8579_v51, %v8581_v39  ;;  %vm21343_vm12 = vmmov %vm21323_vm4 }
 0x6c4   :  { %v8583_v6 = vpop.permute.xlu1 %8582  ;;  %v19111_v18 = vmax.f32 %v18881_v33, %v8639_v52  ;;  %v19126_v33 = vmax.f32 %v18874_v21, %v8638_v16  ;;  %v21336_v16 = vld [vmem:[#allocation6_spill] sm:$0xff] }
 0x6c5   :  { %v8640_v56 = vsel %vm21330_vm14, %v8581_v39, %v8583_v6  ;;  %vm21355_vm14 = vmmov %vm21323_vm4 }
 0x6c6   :  { %v8585_v9 = vpop.permute.xlu0 %8584  ;;  %v8736_v5 = vcombine.low %v19126_v33, %v19111_v18 }
 0x6c7   :  { %v8641_v22 = vsel %vm21325_vm2, %v8583_v6, %v8585_v9  ;;  %vm21348_vm2 = vcmask 1040384  }
 0x6c8   :  { %v19115_v46 = vmax.f32 %v18895_v8, %v8641_v22  ;;  %v19132_v8 = vmax.f32 %v18888_v55, %v8640_v56  ;;  %v19149_v56 = vsub.s32 %v8743_v3, %v21336_v16  ;;  %vm21351_vm9 = vmmov %vm21348_vm2 }
 0x6c9   :  { %vm21352_vm3 = vmmov %vm21348_vm2 }
 0x6ca   :  { %v8589_v37 = vpop.permute.xlu1 %8588  ;;  %21337 = vst [vmem:[#allocation27_spill] sm:$0xff] %v19149_v56 }
 0x6cc   :  { %v8591_v28 = vpop.permute.xlu0 %8590 }
 0x6cd   :  { %v8643_v6 = vsel %vm21333_vm0, %v8589_v37, %v8591_v28  ;;  %v8734_v37 = vcombine.low %v19120_v43, %v19123_v63  ;;  %vm21364_vm0 = vmmov %vm21323_vm4 }
 0x6ce   :  { %v8593_v23 = vpop.permute.xlu1 %8592 }
 0x6cf   :  { %v8644_v26 = vsel %vm21331_vm1, %v8591_v28, %v8593_v23  ;;  %v8747_v22 = vrot.slane %v8734_v37, %v19149_v56  ;;  %vm21360_vm1 = vmmov %vm21348_vm2 }
 0x6d0   :  { %v8595_v53 = vpop.permute.xlu0 %8594  ;;  %v19140_v2 = vmax.f32 %v18916_v38, %v8644_v26  ;;  %v19157_v38 = vmax.f32 %v18911_v44, %v8643_v6 }
 0x6d1   :  { %v8645_v34 = vsel %vm21332_vm7, %v8593_v23, %v8595_v53  ;;  %vm21362_vm7 = vmmov %vm21323_vm4 }
 0x6d2   :  { %v8597_v35 = vpop.permute.xlu1 %8596  ;;  %v19143_v21 = vmax.f32 %v18923_v59, %v8645_v34  ;;  %21339 = vst [vmem:[#allocation43_spill] sm:$0xff] %v19157_v38  ;;  %v9018_v62 = vcombine.low %v19157_v38, %v19140_v2 }
 0x6d3   :  { %v8646_v47 = vsel %vm21329_vm15, %v8595_v53, %v8597_v35  ;;  %vm21354_vm15 = vmmov %vm21348_vm2 }
 0x6d4   :  { %v8599_v60 = vpop.permute.xlu0 %8598  ;;  %v19129_v51 = vmax.f32 %v18930_v24, %v8646_v47  ;;  %v8738_v47 = vcombine.low %v19132_v8, %v19115_v46  ;;  %v9031_v34 = vrot.slane %v9018_v62, %v19149_v56 }
 0x6d5   :  { %v8647_v23 = vsel %vm21334_vm10, %v8597_v35, %v8599_v60  ;;  %vm21365_vm10 = vmmov 0  }
 0x6d6   :  { %v8601_v39 = vpop.permute.xlu1 %8600  ;;  %v9020_v59 = vcombine.low %v19143_v21, %v19129_v51  ;;  %v8775_v52 = vrot.slane %v8738_v47, %v19149_v56 }
 0x6d7   :  { %v8648_v61 = vsel %vm21335_vm13, %v8599_v60, %v8601_v39  ;;  %vm21367_vm13 = vmmov %vm21360_vm1 }
 0x6d8   :  { %v19146_v24 = vmax.f32 %v18942_v48, %v8648_v61  ;;  %v8587_v55 = vpop.permute.xlu0 %8586  ;;  %v19162_v48 = vmax.f32 %v18937_v20, %v8647_v23 }
 0x6d9   :  { %v8642_v60 = vsel %vm21338_vm5, %v8585_v9, %v8587_v55  ;;  %v8761_v9 = vrot.slane %v8736_v5, %v19149_v56  ;;  %vm21369_vm5 = vmmov %vm21360_vm1 }
 0x6da   :  { %v8603_v26 = vpop.permute.xlu1 %8602  ;;  %v19165_v28 = vmax.f32 %v18902_v50, %v8642_v60  ;;  %v9022_v44 = vcombine.low %v19162_v48, %v19146_v24  ;;  %v9045_v50 = vrot.slane %v9020_v59, %v19149_v56 }
 0x6db   :  { %v8649_v53 = vsel %vm21340_vm8, %v8601_v39, %v8603_v26  ;;  %v8797_v3 = vcombine.low %v8747_v22, %v8761_v9  ;;  %v8798_v32 = vcombine.high %v8747_v22, %v8761_v9  ;;  %v21344_v22 = vld [vmem:[#allocation7_spill] sm:$0xff]  ;;  %vm21370_vm8 = vmmov %vm21360_vm1 }
 0x6dc   :  { %v8789_v20 = vrot.slane %v19165_v28, %v19149_v56  ;;  %v19179_v35 = vmax.f32 %v18950_v15, %v8649_v53  ;;  %v9059_v39 = vrot.slane %v9022_v44, %v19149_v56  ;;  %v9081_v23 = vcombine.low %v9031_v34, %v9045_v50 }
 0x6dd   :  { %v19189_v47 = vrot.slane %v8797_v3, %v19149_v56  ;;  %v9082_v15 = vcombine.high %v9031_v34, %v9045_v50 }
 0x6de   :  { %v8801_v17 = vcombine.low %v8775_v52, %v8789_v20  ;;  %v9073_v6 = vrot.slane %v19179_v35, %v19149_v56  ;;  %v8802_v60 = vcombine.high %v8775_v52, %v8789_v20  ;;  %v19192_v59 = vrot.slane %v9081_v23, %v19149_v56 }
 0x6df   :  { %v19207_v52 = vrot.slane %v9082_v15, %v19149_v56  ;;  %v21345_v15 = vld [vmem:[#allocation10_spill] sm:$0xff] }
 0x6e0   :  { %v19186_v61 = vrot.slane %v8801_v17, %v19149_v56  ;;  %v9085_v5 = vcombine.low %v9059_v39, %v9073_v6  ;;  %v9086_v37 = vcombine.high %v9059_v39, %v9073_v6  ;;  %v19210_v20 = vrot.slane %v8802_v60, %v19149_v56 }
 0x6e2   :  { %v8417_v55 = vpop.permute.xlu1 %8416  ;;  %v8415_v16 = vpop.permute.xlu0 %8414  ;;  %v19196_v26 = vcombine.low %v19189_v47, %v19186_v61  ;;  %v19199_v53 = vrot.slane %v9085_v5, %v19149_v56  ;;  %v19213_v3 = vrot.slane %v9086_v37, %v19149_v56 }
 0x6e3   :  { %v8460_v17 = vsel %vm21341_vm11, %v8415_v16, %v8417_v55  ;;  %vm21371_vm11 = vmmov %vm21364_vm0 }
 0x6e4   :  { %v19204_v50 = vcombine.low %v19192_v59, %v19199_v53  ;;  %v19218_v39 = vmax.f32 %v8334_v19, %v8460_v17  ;;  %v9295_v6 = vrot.slane %v19196_v26, %v21344_v22  ;;  %v9303_v60 = vrot.slane %v19196_v26, %v21345_v15  ;;  %v21349_v17 = vld [vmem:[#allocation9_spill] sm:$0xff] }
 0x6e5   :  { %v9291_v11 = vrot.slane %v19196_v26, %v21346_v58  ;;  %v9299_v10 = vrot.slane %v19196_v26, %v21349_v17 }
 0x6e6   :  { %v8421_v62 = vpop.permute.xlu1 %8420  ;;  %v8419_v44 = vpop.permute.xlu0 %8418  ;;  %21342 = vst [vmem:[#allocation16_spill] sm:$0xff] %v19218_v39  ;;  %v9855_v23 = vrot.slane %v19204_v50, %v21344_v22  ;;  %v9863_v37 = vrot.slane %v19204_v50, %v21345_v15  ;;  %v9851_v19 = vrot.slane %v19204_v50, %v21346_v58  ;;  %8604 = vrot.lane.b32.xlu0 %v19218_v39, %s15699_s8 }
 0x6e7   :  { %v8462_v34 = vsel %vm21323_vm4, %v8419_v44, %v8421_v62  ;;  %v8461_v9 = vsel %vm21343_vm12, %v8417_v55, %v8419_v44  ;;  %v9859_v57 = vrot.slane %v19204_v50, %v21349_v17  ;;  %v19258_v39 = vrot.slane %v8798_v32, %v19149_v56  ;;  %v21356_v32 = vld [vmem:[#allocation12_spill] sm:$0xff]  ;;  %vm21372_vm4 = vmmov %vm21364_vm0 }
 0x6e8   :  { %v19235_v55 = vmax.f32 %v8336_v7, %v8462_v34  ;;  %v10409_v44 = vsel %vm21348_vm2, %v9295_v6, %v9855_v23  ;;  %v19249_v29 = vmax.f32 %v8335_v30, %v8461_v9  ;;  %v10411_v7 = vsel %vm21351_vm9, %v9303_v60, %v9863_v37  ;;  %v10533_v6 = vld [vmem:[%s21009_s5 + $0x68] sm:$0x3]  ;;  %vm21373_vm12 = vmmov %vm21360_vm1 }
 0x6e9   :  { %10808 = vmatprep.mubr.f32.mxu0 %v10409_v44  ;;  %v10408_v34 = vsel %vm21352_vm3, %v9291_v11, %v9851_v19  ;;  %10878 = vmatprep.mubr.f32.mxu1 %v10411_v7  ;;  %v10410_v31 = vsel %vm21354_vm15, %v9299_v10, %v9859_v57  ;;  %v10525_v9 = vld [vmem:[%s21009_s5 + $0x28] sm:$0xff]  ;;  %v19269_v11 = vcombine.low %v19207_v52, %v19213_v3  ;;  %v21359_v44 = vmax.f32 %v18998_v49, 0.0  ;;  %vm21376_vm2 = vmmov %vm21364_vm0 }
 0x6ea   :  { %v8425_v5 = vpop.permute.xlu1 %8424  ;;  %v8423_v16 = vpop.permute.xlu0 %8422  ;;  %21347 = vst [vmem:[#allocation20_spill] sm:$0xff] %v19235_v55  ;;  %21350 = vst [vmem:[#allocation35_spill] sm:$0xff] %v19249_v29  ;;  %10809 = vmatmul.mubr.f32.vlgmr.msra.gmra.mxu0 %v10408_v34  ;;  %10879 = vmatmul.mubr.f32.vlgmr.msra.gmra.mxu1 %v10410_v31  ;;  %v9311_v19 = vrot.slane %v19196_v26, %v21356_v32  ;;  %v9871_v57 = vrot.slane %v19204_v50, %v21356_v32  ;;  %v21363_v31 = vld [vmem:[#allocation13_spill] sm:$0xff]  ;;  %v21368_v56 = vmax.f32 %v19018_v0, 0.0  ;;  %v10535_v0 = vld [vmem:[%s21009_s5 + $0x78] sm:$0xff] }
 0x6eb   :  { %v8464_v23 = vsel %vm21353_vm6, %v8423_v16, %v8425_v5  ;;  %v8463_v30 = vsel %vm21355_vm14, %v8421_v62, %v8423_v16  ;;  %10913 = vmatpush1.xpose.msra.mxu0 %v10531_v41  ;;  %v19277_v10 = vcombine.low %v19258_v39, %v19210_v20  ;;  %15506 = vmatpush3.xpose.msra.mxu1 %v10533_v6  ;;  %v21357_v62 = vmax.f32 %v19015_v40, 0.0  ;;  %v10524_v41 = vld [vmem:[%s21009_s5 + $0x20] sm:$0xff]  ;;  %v10526_v40 = vld [vmem:[%s21009_s5 + $0x30] sm:$0xff]  ;;  %vm21377_vm9 = vmmov %vm21364_vm0 }
 0x6ec   :  { %8608 = vrot.lane.b32.xlu0 %v19235_v55, %s15699_s8  ;;  %v19290_v7 = vmax.f32 %v21359_v44, %v8463_v30  ;;  %8606 = vrot.lane.b32.xlu1 %v19249_v29, %s15699_s8  ;;  %v10413_v34 = vsel %vm21360_vm1, %v9311_v19, %v9871_v57  ;;  %v21361_v6 = vld [vmem:[#allocation11_spill] sm:$0xff]  ;;  %v9875_v30 = vrot.slane %v19204_v50, %v21363_v31  ;;  %v21366_v29 = vmax.f32 %v19029_v25, 0.0  ;;  %vm21378_vm3 = vmmov %vm21360_vm1 }
 0x6ed   :  { %v19281_v16 = vmax.f32 %v21357_v62, %v8464_v23  ;;  %10914 = vmatprep.subr.mxu0 %v10525_v9  ;;  %v9867_v23 = vrot.slane %v19204_v50, %v21361_v6  ;;  %10948 = vmatprep.mubr.f32.mxu0 %v10413_v34  ;;  %v10542_v9 = vld [vmem:[%s21009_s5 + $0xb0] sm:$0x3]  ;;  %v9307_v44 = vrot.slane %v19196_v26, %v21361_v6  ;;  %v10544_v50 = vld [vmem:[%s21009_s5 + $0xc0] sm:$0x3]  ;;  %vm21380_vm6 = vmmov %vm21360_vm1 }
 0x6ee   :  { %v19265_v60 = vpop.permute.xlu1 %8428  ;;  %v8427_v37 = vpop.permute.xlu0 %8426  ;;  %15507 = vmatprep.subr.mxu1 %v19003_v27  ;;  %15509 = vmatprep.mubr.msk.f32.mxu1 %vm21365_vm10, %v19003_v27  ;;  %v9883_v34 = vrot.slane %v19269_v11, %v21344_v22  ;;  %vm21382_vm15 = vmmov %vm21360_vm1 }
 0x6ef   :  { %21358 = vst [vmem:[#allocation17_spill] sm:$0xff] %v19281_v16  ;;  %v8466_v49 = vsel %vm21362_vm7, %v8427_v37, %v19265_v60  ;;  %10915 = vmatpush1.xpose.msra.mxu0 %v10524_v41  ;;  %v8465_v62 = vsel %vm21364_vm0, %v8425_v5, %v8427_v37  ;;  %15508 = vmatpush3.xpose.msra.mxu1 %v10526_v40  ;;  %v10541_v37 = vld [vmem:[%s21009_s5 + $0xa8] sm:$0x3]  ;;  %vm21383_vm14 = vmmov %vm21364_vm0 }
 0x6f0   :  { %8612 = vrot.lane.b32.xlu0 %v19281_v16, %s15699_s8  ;;  %v9315_v5 = vrot.slane %v19196_v26, %v21363_v31  ;;  %v9891_v41 = vrot.slane %v19269_v11, %v21345_v15  ;;  %v19331_v55 = vmax.f32 %v21366_v29, %v8466_v49  ;;  %8610 = vrot.lane.b32.xlu1 %v19290_v7, %s15699_s8  ;;  %v10543_v16 = vld [vmem:[%s21009_s5 + $0xb8] sm:$0x3]  ;;  %vm21385_vm1 = vmmov %vm21364_vm0 }
 0x6f1   :  { %v10412_v40 = vsel %vm21367_vm13, %v9307_v44, %v9867_v23  ;;  %11052 = vmatprep.subr.mxu0 %v10542_v9  ;;  %v9323_v26 = vrot.slane %v19277_v10, %v21344_v22  ;;  %v19343_v38 = vmax.f32 %v21368_v56, %v8465_v62  ;;  %11122 = vmatprep.subr.mxu1 %v10544_v50  ;;  %v10537_v62 = vld [vmem:[%s21009_s5 + $0x88] sm:$0xff]  ;;  %v10534_v50 = vld [vmem:[%s21009_s5 + $0x70] sm:$0xff]  ;;  %vm21386_vm7 = vmmov %vm21364_vm0 }
 0x6f2   :  { %v8433_v19 = vpop.permute.xlu1 %8432  ;;  %v19308_v57 = vpop.permute.xlu0 %8430  ;;  %10949 = vmatmul.mubr.f32.vlgmr.msra.gmra.mxu0 %v10412_v40  ;;  %v10414_v25 = vsel %vm21369_vm5, %v9315_v5, %v9875_v30  ;;  %v9331_v29 = vrot.slane %v19277_v10, %v21345_v15  ;;  %v9879_v5 = vrot.slane %v19269_v11, %v21346_v58  ;;  %vm21388_vm0 = vmmov %vm21378_vm3 }
 0x6f3   :  { %15510 = vmatmul.mubr.f32.vlgmr.msra.gmra.mxu1 %v10414_v25  ;;  %11053 = vmatpush1.xpose.msra.mxu0 %v10541_v37  ;;  %v10416_v9 = vsel %vm21370_vm8, %v9323_v26, %v9883_v34  ;;  %v8467_v44 = vsel %vm21371_vm11, %v19308_v57, %v8433_v19  ;;  %v10546_v37 = vld [vmem:[%s21009_s5 + $0xd0] sm:$0x3]  ;;  %v9887_v26 = vrot.slane %v19269_v11, %v21349_v17  ;;  %vm21390_vm13 = vmmov %vm21388_vm0 }
 0x6f4   :  { %11088 = vmatprep.mubr.f32.mxu0 %v10416_v9  ;;  %11123 = vmatpush1.xpose.msra.mxu1 %v10543_v16  ;;  %v10418_v30 = vsel %vm21373_vm12, %v9331_v29, %v9891_v41  ;;  %v21374_v16 = vmax.f32 %v19046_v42, 0.0  ;;  %v21375_v41 = vmax.f32 %v19043_v14, 0.0  ;;  %v9319_v42 = vrot.slane %v19277_v10, %v21346_v58  ;;  %vm21391_vm5 = vmmov %vm21388_vm0 }
 0x6f5   :  { %11158 = vmatprep.mubr.f32.mxu1 %v10418_v30  ;;  %8616 = vrot.lane.b32.xlu0 %v19331_v55, %s15699_s8  ;;  %v9899_v14 = vrot.slane %v19269_v11, %v21356_v32  ;;  %vm21392_vm8 = vmmov %vm21385_vm1 }
 0x6f6   :  { %v8437_v23 = vpop.permute.xlu1 %8436  ;;  %v8435_v49 = vpop.permute.xlu0 %8434  ;;  %v19378_v40 = vmax.f32 %v21375_v41, %v8467_v44  ;;  %8614 = vrot.lane.b32.xlu1 %v19343_v38, %s15699_s8  ;;  %11054 = vmatprep.subr.mxu0 %v10535_v0  ;;  %v9327_v0 = vrot.slane %v19277_v10, %v21349_v17  ;;  %v10415_v30 = vsel %vm21378_vm3, %v9319_v42, %v9879_v5  ;;  %vm21393_vm11 = vmmov %vm21388_vm0 }
 0x6f7   :  { %v8468_v56 = vsel %vm21372_vm4, %v8433_v19, %v8435_v49  ;;  %v10536_v19 = vld [vmem:[%s21009_s5 + $0x80] sm:$0xff]  ;;  %11124 = vmatprep.subr.mxu1 %v10537_v62  ;;  %11055 = vmatpush1.xpose.msra.mxu0 %v10534_v50  ;;  %v8469_v9 = vsel %vm21376_vm2, %v8435_v49, %v8437_v23  ;;  %v9339_v49 = vrot.slane %v19277_v10, %v21356_v32  ;;  %v21379_v62 = vmax.f32 %v19057_v45, 0.0  ;;  %vm21396_vm4 = vmmov %vm21388_vm0 }
 0x6f8   :  { %v19369_v34 = vmax.f32 %v21374_v16, %v8468_v56  ;;  %11125 = vmatpush1.xpose.msra.mxu1 %v10536_v19  ;;  %11192 = vmatprep.subr.mxu0 %v10546_v37  ;;  %v10545_v56 = vld [vmem:[%s21009_s5 + $0xc8] sm:$0x3]  ;;  %v10417_v19 = vsel %vm21380_vm6, %v9327_v0, %v9887_v26  ;;  %v21381_v16 = vmax.f32 %v19060_v1, 0.0  ;;  %v10539_v37 = vld [vmem:[%s21009_s5 + $0x98] sm:$0xff]  ;;  %v19420_v41 = vcombine.high %v19192_v59, %v19199_v53  ;;  %v10538_v1 = vld [vmem:[%s21009_s5 + $0x90] sm:$0xff] }
 0x6f9   :  { %15512 = vmatprep.subr.mxu1 %v19003_v27  ;;  %v19406_v50 = vmax.f32 %v21379_v62, %v8469_v9  ;;  %v10420_v45 = vsel %vm21382_vm15, %v9339_v49, %v9899_v14  ;;  %v10540_v59 = vld [vmem:[%s21009_s5 + $0xa0] sm:$0xff]  ;;  %v9895_v53 = vrot.slane %v19269_v11, %v21361_v6  ;;  %v21384_v14 = vmax.f32 %v19072_v4, 0.0  ;;  %vm21397_vm12 = vmmov %vm21388_vm0 }
 0x6fa   :  { %v8441_v25 = vpop.permute.xlu1 %8440  ;;  %v8439_v29 = vpop.permute.xlu0 %8438  ;;  %8622 = vrot.lane.b32.xlu0 %v19369_v34, %s15699_s8  ;;  %8620 = vrot.lane.b32.xlu1 %v19378_v40, %s15699_s8  ;;  %v9911_v49 = vrot.slane %v19420_v41, %v21344_v22  ;;  %v21387_v62 = vmax.f32 %v19074_v36, 0.0  ;;  %vm21398_vm2 = vmmov %vm21388_vm0 }
 0x6fb   :  { %v8470_v44 = vsel %vm21377_vm9, %v8437_v23, %v8439_v29  ;;  %v10547_v23 = vld [vmem:[%s21009_s5 + $0xd8] sm:$0x3]  ;;  %11089 = vmatmul.mubr.f32.vlgmr.msra.gmra.mxu0 %v10415_v30  ;;  %11159 = vmatmul.mubr.f32.vlgmr.msra.gmra.mxu1 %v10417_v19  ;;  %v8471_v42 = vsel %vm21383_vm14, %v8439_v29, %v8441_v25  ;;  %v10556_v29 = vld [vmem:[%s21009_s5 + $0x120] sm:$0x3]  ;;  %v9335_v30 = vrot.slane %v19277_v10, %v21361_v6  ;;  %vm21401_vm9 = vmmov %vm21388_vm0 }
 0x6fc   :  { %v19413_v5 = vmax.f32 %v21381_v16, %v8470_v44  ;;  %11193 = vmatpush1.xpose.msra.mxu0 %v10545_v56  ;;  %11228 = vmatprep.mubr.f32.mxu0 %v10420_v45  ;;  %v19429_v44 = vcombine.high %v19189_v47, %v19186_v61  ;;  %v19442_v0 = vmax.f32 %v21384_v14, %v8471_v42  ;;  %v10558_v56 = vld [vmem:[%s21009_s5 + $0x130] sm:$0x3]  ;;  %v21389_v45 = vmax.f32 %v19086_v54, 0.0  ;;  %v10548_v14 = vld [vmem:[%s21009_s5 + $0xe0] sm:$0xff]  ;;  %vm21402_vm3 = vmmov %vm21388_vm0 }
 0x6fd   :  { %15513 = vmatpush3.xpose.msra.mxu1 %v10547_v23  ;;  %11194 = vmatprep.subr.mxu0 %v10539_v37  ;;  %v9903_v47 = vrot.slane %v19269_v11, %v21363_v31  ;;  %v9343_v11 = vrot.slane %v19277_v10, %v21363_v31  ;;  %v9919_v23 = vrot.slane %v19420_v41, %v21345_v15  ;;  %v10557_v10 = vld [vmem:[%s21009_s5 + $0x128] sm:$0x3]  ;;  %vm21403_vm6 = vmmov %vm21388_vm0 }
 0x6fe   :  { %v8443_v9 = vpop.permute.xlu0 %8442  ;;  %v8445_v26 = vpop.permute.xlu1 %8444  ;;  %15514 = vmatprep.subr.mxu1 %v19003_v27  ;;  %8624 = vrot.lane.b32.xlu1 %v19406_v50, %s15699_s8  ;;  %v10419_v16 = vsel %vm21388_vm0, %v9335_v30, %v9895_v53  ;;  %v9351_v37 = vrot.slane %v19429_v44, %v21344_v22  ;;  %v8531_v54 = vsel %vm21392_vm8, %v19265_v60, %v19308_v57  ;;  %v10550_v60 = vld [vmem:[%s21009_s5 + $0xf0] sm:$0xff]  ;;  %vm21404_vm15 = vmmov %vm21388_vm0 }
 0x6ff   :  { %8626 = vrot.lane.b32.xlu0 %v19413_v5, %s15699_s8  ;;  %v8472_v61 = vsel %vm21385_vm1, %v8441_v25, %v8443_v9  ;;  %v8473_v4 = vsel %vm21386_vm7, %v8443_v9, %v8445_v26  ;;  %15516 = vmatprep.mubr.msk.f32.mxu1 %vm21365_vm10, %v19003_v27  ;;  %v10555_v25 = vld [vmem:[%s21009_s5 + $0x118] sm:$0x3]  ;;  %v10421_v36 = vsel %vm21390_vm13, %v9343_v11, %v9903_v47  ;;  %v21395_v11 = vmax.f32 %v19088_v13, 0.0  ;;  %v10561_v13 = vld [vmem:[%s21009_s5 + $0x148] sm:$0x3]  ;;  %vm21405_vm14 = vmmov %vm21388_vm0 }
 0x700   :  { %11195 = vmatpush1.xpose.msra.mxu0 %v10538_v1  ;;  %v19470_v19 = vmax.f32 %v21387_v62, %v8472_v61  ;;  %v19482_v42 = vmax.f32 %v21389_v45, %v8473_v4  ;;  %v9359_v9 = vrot.slane %v19429_v44, %v21345_v15  ;;  %v10423_v1 = vsel %vm21391_vm5, %v9351_v37, %v9911_v49  ;;  %v10560_v61 = vld [vmem:[%s21009_s5 + $0x140] sm:$0x3]  ;;  %v10553_v37 = vld [vmem:[%s21009_s5 + $0x108] sm:$0xff]  ;;  %vm21406_vm1 = vmmov %vm21388_vm0 }
 0x701   :  { %15515 = vmatpush3.xpose.msra.mxu1 %v10540_v59  ;;  %11332 = vmatprep.subr.mxu0 %v10556_v29  ;;  %v10549_v59 = vld [vmem:[%s21009_s5 + $0xe8] sm:$0xff]  ;;  %v10551_v29 = vld [vmem:[%s21009_s5 + $0xf8] sm:$0xff]  ;;  %v9907_v57 = vrot.slane %v19420_v41, %v21346_v58  ;;  %v9915_v47 = vrot.slane %v19420_v41, %v21349_v17  ;;  %v9347_v30 = vrot.slane %v19429_v44, %v21346_v58  ;;  %vm21407_vm7 = vmmov %vm21388_vm0 }
 0x702   :  { %11402 = vmatprep.subr.mxu1 %v10558_v56  ;;  %8628 = vrot.lane.b32.xlu1 %v19442_v0, %s15699_s8  ;;  %v10425_v53 = vsel %vm21393_vm11, %v9359_v9, %v9919_v23  ;;  %v21394_v56 = vmax.f32 %v19032_v12, 0.0  ;;  %v9927_v49 = vrot.slane %v19420_v41, %v21356_v32  ;;  %v9355_v23 = vrot.slane %v19429_v44, %v21349_v17  ;;  %v10559_v12 = vld [vmem:[%s21009_s5 + $0x138] sm:$0x3]  ;;  %vm21408_vm13 = vmmov %vm21388_vm0 }
 0x703   :  { %11229 = vmatmul.mubr.f32.vlgmr.msra.gmra.mxu0 %v10419_v16  ;;  %8630 = vrot.lane.b32.xlu0 %v19470_v19, %s15699_s8  ;;  %v10422_v62 = vsel %vm21396_vm4, %v9347_v30, %v9907_v57  ;;  %v9367_v16 = vrot.slane %v19429_v44, %v21356_v32  ;;  %v19545_v45 = vcombine.high %v19207_v52, %v19213_v3  ;;  %v10571_v57 = vld [vmem:[%s21009_s5 + $0x198] sm:$0x3]  ;;  %vm21409_vm5 = vmmov %vm21388_vm0 }
 0x704   :  { %15517 = vmatmul.mubr.f32.vlgmr.msra.gmra.mxu1 %v10421_v36  ;;  %11333 = vmatpush1.xpose.msra.mxu0 %v10555_v25  ;;  %v8538_v4 = vmax.f32 %v21394_v56, %v8531_v54  ;;  %v8539_v25 = vmax.f32 %v21395_v11, %v8445_v26  ;;  %v10424_v26 = vsel %vm21397_vm12, %v9355_v23, %v9915_v47  ;;  %v21399_v54 = vld [vmem:[#allocation43_spill] sm:$0xff]  ;;  %v10565_v23 = vld [vmem:[%s21009_s5 + $0x168] sm:$0xff]  ;;  %vm21410_vm8 = vmmov %vm21388_vm0 }
 0x705   :  { %11368 = vmatprep.mubr.f32.mxu0 %v10423_v1  ;;  %11403 = vmatpush1.xpose.msra.mxu1 %v10557_v10  ;;  %v9024_v10 = vcombine.high %v19179_v35, %v19179_v35  ;;  %v10427_v36 = vsel %vm21398_vm2, %v9367_v16, %v9927_v49  ;;  %v9021_v9 = vcombine.high %v19143_v21, %v19129_v51  ;;  %v10552_v35 = vld [vmem:[%s21009_s5 + $0x100] sm:$0xff]  ;;  %v10554_v51 = vld [vmem:[%s21009_s5 + $0x110] sm:$0xff]  ;;  %v10563_v30 = vld [vmem:[%s21009_s5 + $0x158] sm:$0xff] }
 0x706   :  { %11438 = vmatprep.mubr.f32.mxu1 %v10425_v53  ;;  %8632 = vrot.lane.b32.xlu1 %v19482_v42, %s15699_s8  ;;  %v9023_v1 = vcombine.high %v19162_v48, %v19146_v24  ;;  %v8740_v52 = vcombine.high %v19165_v28, %v19165_v28  ;;  %v19559_v3 = vcombine.high %v19258_v39, %v19210_v20  ;;  %v10570_v24 = vld [vmem:[%s21009_s5 + $0x190] sm:$0x3]  ;;  %vm21411_vm11 = vmmov %vm21388_vm0 }
 0x707   :  { %11334 = vmatprep.subr.mxu0 %v10549_v59  ;;  %11404 = vmatprep.subr.mxu1 %v10551_v29  ;;  %v9923_v21 = vrot.slane %v19420_v41, %v21361_v6  ;;  %v8735_v48 = vcombine.high %v19120_v43, %v19123_v63  ;;  %v8737_v28 = vcombine.high %v19126_v33, %v19111_v18  ;;  %v10572_v59 = vld [vmem:[%s21009_s5 + $0x1a0] sm:$0x3]  ;;  %v10562_v16 = vld [vmem:[%s21009_s5 + $0x150] sm:$0xff]  ;;  %vm21412_vm4 = vmmov %vm21388_vm0 }
 0x708   :  { %11335 = vmatpush1.xpose.msra.mxu0 %v10548_v14  ;;  %8618 = vrot.lane.b32.xlu0 %v8538_v4, %s15699_s8  ;;  %v8739_v20 = vcombine.high %v19132_v8, %v19115_v46  ;;  %v9931_v39 = vrot.slane %v19420_v41, %v21363_v31  ;;  %v9019_v53 = vcombine.high %v21399_v54, %v19140_v2  ;;  %v21400_v43 = vld [vmem:[#allocation27_spill] sm:$0xff]  ;;  %v10569_v2 = vld [vmem:[%s21009_s5 + $0x188] sm:$0x3]  ;;  %vm21413_vm12 = vmmov %vm21388_vm0 }
 0x709   :  { %11405 = vmatpush1.xpose.msra.mxu1 %v10550_v60  ;;  %11472 = vmatprep.subr.mxu0 %v10560_v61  ;;  %v19586_v63 = vrot.slane %v9024_v10, %v21400_v43  ;;  %v9363_v46 = vrot.slane %v19429_v44, %v21361_v6  ;;  %v9939_v18 = vrot.slane %v19545_v45, %v21344_v22  ;;  %vm21414_vm2 = vmmov %vm21388_vm0 }
 0x70a   :  { %15519 = vmatprep.subr.mxu1 %v19003_v27  ;;  %8634 = vrot.lane.b32.xlu1 %v8539_v25, %s15699_s8  ;;  %v19593_v33 = vrot.slane %v9021_v9, %v21400_v43  ;;  %v9371_v8 = vrot.slane %v19429_v44, %v21363_v31  ;;  %v9947_v41 = vrot.slane %v19545_v45, %v21345_v15 }
 0x70b   :  { %11369 = vmatmul.mubr.f32.vlgmr.msra.gmra.mxu0 %v10422_v62  ;;  %v19603_v29 = vrot.slane %v9023_v1, %v21400_v43  ;;  %v19606_v14 = vrot.slane %v8740_v52, %v21400_v43  ;;  %v10426_v60 = vsel %vm21401_vm9, %v9363_v46, %v9923_v21  ;;  %v9379_v44 = vrot.slane %v19559_v3, %v21344_v22  ;;  %vm21415_vm9 = vmmov %vm21388_vm0 }
 0x70c   :  { %11439 = vmatmul.mubr.f32.vlgmr.msra.gmra.mxu1 %v10424_v26  ;;  %11473 = vmatpush1.xpose.msra.mxu0 %v10559_v12  ;;  %v19615_v61 = vrot.slane %v8737_v28, %v21400_v43  ;;  %v19618_v47 = vrot.slane %v8739_v20, %v21400_v43  ;;  %v10428_v56 = vsel %vm21402_vm3, %v9371_v8, %v9931_v39  ;;  %vm21416_vm3 = vmmov %vm21388_vm0 }
 0x70d   :  { %11508 = vmatprep.mubr.f32.mxu0 %v10427_v36  ;;  %15520 = vmatpush3.xpose.msra.mxu1 %v10561_v13  ;;  %v9387_v4 = vrot.slane %v19559_v3, %v21345_v15  ;;  %v19627_v49 = vrot.slane %v9019_v53, %v21400_v43  ;;  %v9087_v11 = vcombine.low %v19603_v29, %v19586_v63  ;;  %v10574_v36 = vld [vmem:[%s21009_s5 + $0x1b0] sm:$0x3]  ;;  %v10567_v53 = vld [vmem:[%s21009_s5 + $0x178] sm:$0xff] }
 0x70e   :  { %11474 = vmatprep.subr.mxu0 %v10553_v37  ;;  %15521 = vmatprep.subr.mxu1 %v19003_v27  ;;  %v10430_v25 = vsel %vm21403_vm6, %v9379_v44, %v9939_v18  ;;  %v19636_v12 = vrot.slane %v8735_v48, %v21400_v43  ;;  %v8803_v26 = vcombine.low %v19618_v47, %v19606_v14  ;;  %v10564_v37 = vld [vmem:[%s21009_s5 + $0x160] sm:$0xff]  ;;  %vm21417_vm6 = vmmov %vm21388_vm0 }
 0x70f   :  { %15523 = vmatprep.mubr.msk.f32.mxu1 %vm21365_vm10, %v19003_v27  ;;  %v10432_v62 = vsel %vm21404_vm15, %v9387_v4, %v9947_v41  ;;  %v9083_v13 = vcombine.low %v19627_v49, %v19593_v33  ;;  %v9935_v10 = vrot.slane %v19545_v45, %v21346_v58  ;;  %v9943_v9 = vrot.slane %v19545_v45, %v21349_v17  ;;  %v10586_v4 = vld [vmem:[%s21009_s5 + $0x210] sm:$0x3]  ;;  %vm21418_vm15 = vmmov %vm21388_vm0 }
 0x710   :  { %11475 = vmatpush1.xpose.msra.mxu0 %v10552_v35  ;;  %v8799_v1 = vcombine.low %v19636_v12, %v19615_v61  ;;  %v19659_v35 = vrot.slane %v9087_v11, %v21400_v43  ;;  %v9375_v52 = vrot.slane %v19559_v3, %v21346_v58  ;;  %v9383_v21 = vrot.slane %v19559_v3, %v21349_v17 }
 0x711   :  { %15522 = vmatpush3.xpose.msra.mxu1 %v10554_v51  ;;  %11612 = vmatprep.subr.mxu0 %v10570_v24  ;;  %v9955_v51 = vrot.slane %v19545_v45, %v21356_v32  ;;  %v10573_v24 = vld [vmem:[%s21009_s5 + $0x1a8] sm:$0x3]  ;;  %v19671_v48 = vrot.slane %v9083_v13, %v21400_v43  ;;  %v19674_v28 = vrot.slane %v8803_v26, %v21400_v43 }
 0x712   :  { %11682 = vmatprep.subr.mxu1 %v10572_v59  ;;  %v10429_v20 = vsel %vm21405_vm14, %v9375_v52, %v9935_v10  ;;  %v9395_v39 = vrot.slane %v19559_v3, %v21356_v32  ;;  %v10575_v59 = vld [vmem:[%s21009_s5 + $0x1b8] sm:$0x3]  ;;  %v10431_v54 = vsel %vm21406_vm1, %v9383_v21, %v9943_v9  ;;  %v19688_v46 = vrot.slane %v8799_v1, %v21400_v43  ;;  %v10585_v13 = vld [vmem:[%s21009_s5 + $0x208] sm:$0x3]  ;;  %v10576_v52 = vld [vmem:[%s21009_s5 + $0x1c0] sm:$0xff] }
 0x713   :  { %11509 = vmatmul.mubr.f32.vlgmr.msra.gmra.mxu0 %v10426_v60  ;;  %v19692_v18 = vcombine.low %v19671_v48, %v19659_v35  ;;  %v10568_v60 = vld [vmem:[%s21009_s5 + $0x180] sm:$0xff]  ;;  %v9951_v44 = vrot.slane %v19545_v45, %v21361_v6  ;;  %v9088_v10 = vcombine.high %v19603_v29, %v19586_v63  ;;  %v10579_v9 = vld [vmem:[%s21009_s5 + $0x1d8] sm:$0xff]  ;;  %v8804_v63 = vcombine.high %v19618_v47, %v19606_v14  ;;  %v10578_v29 = vld [vmem:[%s21009_s5 + $0x1d0] sm:$0xff] }
 0x714   :  { %15524 = vmatmul.mubr.f32.vlgmr.msra.gmra.mxu1 %v10428_v56  ;;  %11613 = vmatpush1.xpose.msra.mxu0 %v10569_v2  ;;  %v10434_v8 = vsel %vm21407_vm7, %v9395_v39, %v9955_v51  ;;  %v10566_v2 = vld [vmem:[%s21009_s5 + $0x170] sm:$0xff]  ;;  %v19700_v41 = vcombine.low %v19688_v46, %v19674_v28  ;;  %v9959_v56 = vrot.slane %v19545_v45, %v21363_v31  ;;  %v10583_v45 = vld [vmem:[%s21009_s5 + $0x1f8] sm:$0x3]  ;;  %vm21419_vm14 = vmmov %vm21388_vm0 }
 0x715   :  { %11648 = vmatprep.mubr.f32.mxu0 %v10430_v25  ;;  %11683 = vmatpush1.xpose.msra.mxu1 %v10571_v57  ;;  %v10584_v57 = vld [vmem:[%s21009_s5 + $0x200] sm:$0x3]  ;;  %v9967_v11 = vrot.slane %v19692_v18, %v21344_v22  ;;  %v9399_v25 = vrot.slane %v19559_v3, %v21363_v31  ;;  %v9084_v51 = vcombine.high %v19627_v49, %v19593_v33  ;;  %vm21420_vm1 = vmmov %vm21388_vm0 }
 0x716   :  { %11718 = vmatprep.mubr.f32.mxu1 %v10432_v62  ;;  %11614 = vmatprep.subr.mxu0 %v10563_v30  ;;  %v9391_v30 = vrot.slane %v19559_v3, %v21361_v6  ;;  %v9415_v26 = vrot.slane %v19700_v41, %v21345_v15  ;;  %v9963_v21 = vrot.slane %v19692_v18, %v21346_v58  ;;  %vm21421_vm7 = vmmov %vm21388_vm0 }
 0x717   :  { %11684 = vmatprep.subr.mxu1 %v10565_v23  ;;  %v9975_v23 = vrot.slane %v19692_v18, %v21345_v15  ;;  %v10435_v3 = vsel %vm21408_vm13, %v9399_v25, %v9959_v56  ;;  %v9971_v33 = vrot.slane %v19692_v18, %v21349_v17  ;;  %v8800_v14 = vcombine.high %v19636_v12, %v19615_v61  ;;  %vm21422_vm13 = vmmov %vm21388_vm0 }
 0x718   :  { %11615 = vmatpush1.xpose.msra.mxu0 %v10562_v16  ;;  %v10433_v62 = vsel %vm21388_vm0, %v9391_v30, %v9951_v44  ;;  %v9407_v16 = vrot.slane %v19700_v41, %v21344_v22  ;;  %v19768_v47 = vrot.slane %v9088_v10, %v21400_v43  ;;  %v9403_v49 = vrot.slane %v19700_v41, %v21346_v58  ;;  %v10599_v10 = vld [vmem:[%s21009_s5 + $0x278] sm:$0x3] }
 0x719   :  { %11685 = vmatpush1.xpose.msra.mxu1 %v10564_v37  ;;  %11752 = vmatprep.subr.mxu0 %v10574_v36  ;;  %v10577_v37 = vld [vmem:[%s21009_s5 + $0x1c8] sm:$0xff]  ;;  %v10439_v1 = vsel %vm21410_vm8, %v9415_v26, %v9975_v23  ;;  %v9411_v39 = vrot.slane %v19700_v41, %v21349_v17  ;;  %v19780_v61 = vrot.slane %v9084_v51, %v21400_v43  ;;  %vm21424_vm8 = vmmov %vm21388_vm0 }
 0x71a   :  { %15526 = vmatprep.subr.mxu1 %v19003_v27  ;;  %v10437_v36 = vsel %vm21409_vm5, %v9407_v16, %v9967_v11  ;;  %v19783_v12 = vrot.slane %v8804_v63, %v21400_v43  ;;  %v19797_v44 = vrot.slane %v8800_v14, %v21400_v43  ;;  %v10582_v11 = vld [vmem:[%s21009_s5 + $0x1f0] sm:$0xff]  ;;  %v9979_v25 = vrot.slane %v19692_v18, %v21361_v6  ;;  %vm21423_vm5 = vmmov %vm21388_vm0 }
 0x71b   :  { %11649 = vmatmul.mubr.f32.vlgmr.msra.gmra.mxu0 %v10429_v20  ;;  %v9983_v20 = vrot.slane %v19692_v18, %v21356_v32  ;;  %v9987_v23 = vrot.slane %v19692_v18, %v21363_v31  ;;  %v9419_v16 = vrot.slane %v19700_v41, %v21361_v6  ;;  %v10590_v63 = vld [vmem:[%s21009_s5 + $0x230] sm:$0xff] }
 0x71c   :  { %11719 = vmatmul.mubr.f32.vlgmr.msra.gmra.mxu1 %v10431_v54  ;;  %11753 = vmatpush1.xpose.msra.mxu0 %v10573_v24  ;;  %v10588_v24 = vld [vmem:[%s21009_s5 + $0x220] sm:$0x3]  ;;  %v10436_v54 = vsel %vm21411_vm11, %v9403_v49, %v9963_v21  ;;  %v19809_v30 = vcombine.low %v19797_v44, %v19783_v12  ;;  %vm21425_vm11 = vmmov %vm21388_vm0 }
 0x71d   :  { %11788 = vmatprep.mubr.f32.mxu0 %v10434_v8  ;;  %15527 = vmatpush3.xpose.msra.mxu1 %v10575_v59  ;;  %v10587_v59 = vld [vmem:[%s21009_s5 + $0x218] sm:$0x3]  ;;  %v10589_v8 = vld [vmem:[%s21009_s5 + $0x228] sm:$0x3]  ;;  %v10440_v26 = vsel %vm21414_vm2, %v9419_v16, %v9979_v25  ;;  %v19900_v25 = vcombine.high %v19688_v46, %v19674_v28  ;;  %v10614_v46 = vld [vmem:[%s21009_s5 + $0x2f0] sm:$0x3] }
 0x71e   :  { %11754 = vmatprep.subr.mxu0 %v10567_v53  ;;  %15528 = vmatprep.subr.mxu1 %v19003_v27  ;;  %v9423_v53 = vrot.slane %v19700_v41, %v21356_v32  ;;  %v9431_v14 = vrot.slane %v19809_v30, %v21346_v58  ;;  %v9455_v16 = vrot.slane %v19809_v30, %v21363_v31  ;;  %vm21428_vm2 = vmmov %vm21388_vm0 }
 0x71f   :  { %15530 = vmatprep.mubr.msk.f32.mxu1 %vm21365_vm10, %v19003_v27 }
 0x720   :  { %11755 = vmatpush1.xpose.msra.mxu0 %v10566_v2  ;;  %v10438_v2 = vsel %vm21412_vm4, %v9411_v39, %v9971_v33  ;;  %v10441_v56 = vsel %vm21413_vm12, %v9423_v53, %v9983_v20  ;;  %v9439_v20 = vrot.slane %v19809_v30, %v21349_v17  ;;  %v10601_v39 = vld [vmem:[%s21009_s5 + $0x288] sm:$0x3]  ;;  %v9451_v53 = vrot.slane %v19809_v30, %v21356_v32  ;;  %vm21426_vm4 = vmmov %vm21388_vm0 }
 0x721   :  { %15529 = vmatpush3.xpose.msra.mxu1 %v10568_v60  ;;  %11892 = vmatprep.subr.mxu0 %v10584_v57  ;;  %v10581_v60 = vld [vmem:[%s21009_s5 + $0x1e8] sm:$0xff]  ;;  %v19801_v57 = vcombine.low %v19780_v61, %v19768_v47  ;;  %vm21427_vm12 = vmmov %vm21388_vm0 }
 0x722   :  { %11962 = vmatprep.subr.mxu1 %v10586_v4  ;;  %v10580_v4 = vld [vmem:[%s21009_s5 + $0x1e0] sm:$0xff] }
 0x723   :  { %11789 = vmatmul.mubr.f32.vlgmr.msra.gmra.mxu0 %v10433_v62  ;;  %v10600_v62 = vld [vmem:[%s21009_s5 + $0x280] sm:$0x3]  ;;  %v10003_v18 = vrot.slane %v19801_v57, %v21345_v15  ;;  %v9991_v21 = vrot.slane %v19801_v57, %v21346_v58  ;;  %v9999_v33 = vrot.slane %v19801_v57, %v21349_v17  ;;  %v10011_v49 = vrot.slane %v19801_v57, %v21356_v32 }
 0x724   :  { %15531 = vmatmul.mubr.f32.vlgmr.msra.gmra.mxu1 %v10435_v3  ;;  %11893 = vmatpush1.xpose.msra.mxu0 %v10583_v45  ;;  %v10598_v45 = vld [vmem:[%s21009_s5 + $0x270] sm:$0x3]  ;;  %v9427_v3 = vrot.slane %v19700_v41, %v21363_v31  ;;  %v10015_v28 = vrot.slane %v19801_v57, %v21363_v31 }
 0x725   :  { %11928 = vmatprep.mubr.f32.mxu0 %v10437_v36  ;;  %11963 = vmatpush1.xpose.msra.mxu1 %v10585_v13  ;;  %v9995_v13 = vrot.slane %v19801_v57, %v21344_v22  ;;  %v9443_v36 = vrot.slane %v19809_v30, %v21345_v15 }
 0x726   :  { %11998 = vmatprep.mubr.f32.mxu1 %v10439_v1  ;;  %11894 = vmatprep.subr.mxu0 %v10577_v37  ;;  %v9435_v37 = vrot.slane %v19809_v30, %v21344_v22  ;;  %v10442_v41 = vsel %vm21415_vm9, %v9427_v3, %v9987_v23  ;;  %v9447_v23 = vrot.slane %v19809_v30, %v21361_v6  ;;  %vm21429_vm9 = vmmov %vm21388_vm0 }
 0x727   :  { %11964 = vmatprep.subr.mxu1 %v10579_v9  ;;  %v10591_v9 = vld [vmem:[%s21009_s5 + $0x238] sm:$0xff]  ;;  %v10446_v51 = vsel %vm21417_vm6, %v9443_v36, %v10003_v18  ;;  %v10613_v18 = vld [vmem:[%s21009_s5 + $0x2e8] sm:$0x3]  ;;  %v10449_v30 = vsel %vm21388_vm0, %v9455_v16, %v10015_v28  ;;  %vm21431_vm6 = vmmov %vm21388_vm0 }
 0x728   :  { %11895 = vmatpush1.xpose.msra.mxu0 %v10576_v52  ;;  %v10444_v1 = vsel %vm21416_vm3, %v9435_v37, %v9995_v13  ;;  %v10593_v52 = vld [vmem:[%s21009_s5 + $0x248] sm:$0xff]  ;;  %v10619_v16 = vld [vmem:[%s21009_s5 + $0x318] sm:$0xff]  ;;  %vm21430_vm3 = vmmov %vm21388_vm0 }
 0x729   :  { %11965 = vmatpush1.xpose.msra.mxu1 %v10578_v29  ;;  %12032 = vmatprep.subr.mxu0 %v10588_v24  ;;  %v10592_v29 = vld [vmem:[%s21009_s5 + $0x240] sm:$0xff]  ;;  %v10602_v24 = vld [vmem:[%s21009_s5 + $0x290] sm:$0x3]  ;;  %v10605_v37 = vld [vmem:[%s21009_s5 + $0x2a8] sm:$0xff] }
 0x72a   :  { %15533 = vmatprep.subr.mxu1 %v19003_v27 }
 0x72b   :  { %11929 = vmatmul.mubr.f32.vlgmr.msra.gmra.mxu0 %v10436_v54  ;;  %v19878_v54 = vld [vmem:[#allocation2 + $0x80] sm:$0xff] }
 0x72c   :  { %11999 = vmatmul.mubr.f32.vlgmr.msra.gmra.mxu1 %v10438_v2  ;;  %12033 = vmatpush1.xpose.msra.mxu0 %v10587_v59  ;;  %v10443_v59 = vsel %vm21418_vm15, %v9431_v14, %v9991_v21  ;;  %v10445_v2 = vsel %vm21419_vm14, %v9439_v20, %v9999_v33  ;;  %v10615_v33 = vld [vmem:[%s21009_s5 + $0x2f8] sm:$0x3]  ;;  %v10617_v20 = vld [vmem:[%s21009_s5 + $0x308] sm:$0x3]  ;;  %vm21432_vm15 = vmmov %vm21388_vm0 }
 0x72d   :  { %12068 = vmatprep.mubr.f32.mxu0 %v10441_v56  ;;  %15534 = vmatpush3.xpose.msra.mxu1 %v10589_v8  ;;  %v10603_v8 = vld [vmem:[%s21009_s5 + $0x298] sm:$0x3]  ;;  %v19892_v56 = vcombine.high %v19671_v48, %v19659_v35  ;;  %v10596_v35 = vld [vmem:[%s21009_s5 + $0x260] sm:$0xff]  ;;  %v10007_v48 = vrot.slane %v19801_v57, %v21361_v6  ;;  %vm21433_vm14 = vmmov %vm21388_vm0 }
 0x72e   :  { %12034 = vmatprep.subr.mxu0 %v10581_v60  ;;  %15535 = vmatprep.subr.mxu1 %v19003_v27  ;;  %v10595_v60 = vld [vmem:[%s21009_s5 + $0x258] sm:$0xff] }
 0x72f   :  { %15537 = vmatprep.mubr.msk.f32.mxu1 %vm21365_vm10, %v19003_v27  ;;  %v10597_v27 = vld [vmem:[%s21009_s5 + $0x268] sm:$0x3]  ;;  %v10611_v57 = vld [vmem:[%s21009_s5 + $0x2d8] sm:$0x3]  ;;  %v10031_v13 = vrot.slane %v19892_v56, %v21345_v15  ;;  %v10447_v3 = vsel %vm21421_vm7, %v9447_v23, %v10007_v48  ;;  %v10039_v21 = vrot.slane %v19892_v56, %v21356_v32  ;;  %v9483_v48 = vrot.slane %v19900_v25, %v21363_v31  ;;  %vm21435_vm7 = vmmov %vm21388_vm0 }
 0x730   :  { %12035 = vmatpush1.xpose.msra.mxu0 %v10580_v4  ;;  %v10448_v4 = vsel %vm21420_vm1, %v9451_v53, %v10011_v49  ;;  %v9479_v49 = vrot.slane %v19900_v25, %v21356_v32  ;;  %v19981_v53 = vcombine.high %v19780_v61, %v19768_v47  ;;  %v10610_v47 = vld [vmem:[%s21009_s5 + $0x2d0] sm:$0xff]  ;;  %v10035_v61 = vrot.slane %v19892_v56, %v21361_v6  ;;  %v10627_v23 = vld [vmem:[%s21009_s5 + $0x358] sm:$0x3]  ;;  %vm21434_vm1 = vmmov %vm21388_vm0 }
 0x731   :  { %15536 = vmatpush3.xpose.msra.mxu1 %v10582_v11  ;;  %12172 = vmatprep.subr.mxu0 %v10598_v45  ;;  %v10594_v11 = vld [vmem:[%s21009_s5 + $0x250] sm:$0xff]  ;;  %v10612_v45 = vld [vmem:[%s21009_s5 + $0x2e0] sm:$0x3]  ;;  %vm21436_vm0 = vcmask 523264  }
 0x732   :  { %12242 = vmatprep.subr.mxu1 %v10600_v62  ;;  %v10023_v62 = vrot.slane %v19892_v56, %v21344_v22 }
 0x733   :  { %12069 = vmatmul.mubr.f32.vlgmr.msra.gmra.mxu0 %v10440_v26  ;;  %v9471_v26 = vrot.slane %v19900_v25, %v21345_v15 }
 0x734   :  { %15538 = vmatmul.mubr.f32.vlgmr.msra.gmra.mxu1 %v10442_v41  ;;  %12173 = vmatpush1.xpose.msra.mxu0 %v10597_v27  ;;  %v9463_v27 = vrot.slane %v19900_v25, %v21344_v22  ;;  %v10607_v41 = vld [vmem:[%s21009_s5 + $0x2b8] sm:$0xff] }
 0x735   :  { %12208 = vmatprep.mubr.f32.mxu0 %v10444_v1  ;;  %12243 = vmatpush1.xpose.msra.mxu1 %v10599_v10  ;;  %v10453_v36 = vsel %vm21423_vm5, %v9471_v26, %v10031_v13  ;;  %v10606_v1 = vld [vmem:[%s21009_s5 + $0x2b0] sm:$0xff]  ;;  %v10621_v13 = vld [vmem:[%s21009_s5 + $0x328] sm:$0xff]  ;;  %vm21438_vm5 = vmmov %vm21436_vm0 }
 0x736   :  { %12278 = vmatprep.mubr.f32.mxu1 %v10446_v51  ;;  %12174 = vmatprep.subr.mxu0 %v10591_v9  ;;  %v10451_v10 = vsel %vm21422_vm13, %v9463_v27, %v10023_v62  ;;  %v10604_v9 = vld [vmem:[%s21009_s5 + $0x2a0] sm:$0xff]  ;;  %v10618_v27 = vld [vmem:[%s21009_s5 + $0x310] sm:$0xff]  ;;  %vm21437_vm13 = vmmov %vm21436_vm0 }
 0x737   :  { %12244 = vmatprep.subr.mxu1 %v10593_v52  ;;  %v10019_v52 = vrot.slane %v19892_v56, %v21346_v58  ;;  %v10616_v51 = vld [vmem:[%s21009_s5 + $0x300] sm:$0x3]  ;;  %v10630_v26 = vld [vmem:[%s21009_s5 + $0x370] sm:$0x3] }
 0x738   :  { %12175 = vmatpush1.xpose.msra.mxu0 %v10590_v63  ;;  %v10027_v63 = vrot.slane %v19892_v56, %v21349_v17 }
 0x739   :  { %12245 = vmatpush1.xpose.msra.mxu1 %v10592_v29  ;;  %12312 = vmatprep.subr.mxu0 %v10602_v24  ;;  %v9459_v29 = vrot.slane %v19900_v25, %v21346_v58  ;;  %v9467_v24 = vrot.slane %v19900_v25, %v21349_v17 }
 0x73a   :  { %15540 = vmatprep.subr.mxu1 %v19878_v54 }
 0x73b   :  { %12209 = vmatmul.mubr.f32.vlgmr.msra.gmra.mxu0 %v10443_v59  ;;  %v10450_v14 = vsel %vm21424_vm8, %v9459_v29, %v10019_v52  ;;  %v10609_v59 = vld [vmem:[%s21009_s5 + $0x2c8] sm:$0xff]  ;;  %vm21439_vm8 = vmmov %vm21436_vm0 }
 0x73c   :  { %12279 = vmatmul.mubr.f32.vlgmr.msra.gmra.mxu1 %v10445_v2  ;;  %12313 = vmatpush1.xpose.msra.mxu0 %v10601_v39  ;;  %v10452_v39 = vsel %vm21425_vm11, %v9467_v24, %v10027_v63  ;;  %v10608_v2 = vld [vmem:[%s21009_s5 + $0x2c0] sm:$0xff]  ;;  %vm21441_vm11 = vmmov %vm21436_vm0 }
 0x73d   :  { %12348 = vmatprep.mubr.f32.mxu0 %v10448_v4  ;;  %15541 = vmatpush3.xpose.msra.mxu1 %v10603_v8  ;;  %v10455_v8 = vsel %vm21426_vm4, %v9479_v49, %v10039_v21  ;;  %v10626_v4 = vld [vmem:[%s21009_s5 + $0x350] sm:$0x3]  ;;  %v10623_v21 = vld [vmem:[%s21009_s5 + $0x338] sm:$0xff]  ;;  %v10063_v49 = vrot.slane %v19981_v53, %v21361_v6  ;;  %vm21442_vm4 = vmmov %vm21436_vm0 }
 0x73e   :  { %12314 = vmatprep.subr.mxu0 %v10595_v60  ;;  %15542 = vmatprep.subr.mxu1 %v19878_v54  ;;  %v19989_v60 = vcombine.high %v19797_v44, %v19783_v12  ;;  %v10043_v12 = vrot.slane %v19892_v56, %v21363_v31  ;;  %v10628_v44 = vld [vmem:[%s21009_s5 + $0x360] sm:$0x3]  ;;  %v10625_v56 = vld [vmem:[%s21009_s5 + $0x348] sm:$0x3] }
 0x73f   :  { %15544 = vmatprep.mubr.msk.f32.mxu1 %vm21365_vm10, %v19878_v54 }
 0x740   :  { %12315 = vmatpush1.xpose.msra.mxu0 %v10594_v11  ;;  %v9475_v11 = vrot.slane %v19900_v25, %v21361_v6  ;;  %v10456_v25 = vsel %vm21428_vm2, %v9483_v48, %v10043_v12  ;;  %v9499_v62 = vrot.slane %v19989_v60, %v21345_v15  ;;  %v9507_v52 = vrot.slane %v19989_v60, %v21356_v32  ;;  %v10641_v12 = vld [vmem:[%s21009_s5 + $0x3c8] sm:$0x3]  ;;  %vm21444_vm2 = vmmov %vm21436_vm0 }
 0x741   :  { %15543 = vmatpush3.xpose.msra.mxu1 %v10596_v35  ;;  %12452 = vmatprep.subr.mxu0 %v10612_v45  ;;  %v10051_v35 = vrot.slane %v19981_v53, %v21344_v22  ;;  %v10059_v45 = vrot.slane %v19981_v53, %v21345_v15 }
 0x742   :  { %12522 = vmatprep.subr.mxu1 %v10614_v46  ;;  %v10454_v28 = vsel %vm21427_vm12, %v9475_v11, %v10035_v61  ;;  %v9491_v46 = vrot.slane %v19989_v60, %v21344_v22  ;;  %v9511_v61 = vrot.slane %v19989_v60, %v21363_v31  ;;  %vm21443_vm12 = vmmov %vm21436_vm0 }
 0x743   :  { %12349 = vmatmul.mubr.f32.vlgmr.msra.gmra.mxu0 %v10447_v3  ;;  %v10460_v3 = vsel %vm21430_vm3, %v9499_v62, %v10059_v45  ;;  %v10634_v45 = vld [vmem:[%s21009_s5 + $0x390] sm:$0xff]  ;;  %vm21447_vm3 = vmmov %vm21436_vm0 }
 0x744   :  { %15545 = vmatmul.mubr.f32.vlgmr.msra.gmra.mxu1 %v10449_v30  ;;  %12453 = vmatpush1.xpose.msra.mxu0 %v10611_v57  ;;  %v10458_v57 = vsel %vm21429_vm9, %v9491_v46, %v10051_v35  ;;  %v10047_v30 = vrot.slane %v19981_v53, %v21346_v58  ;;  %v10635_v35 = vld [vmem:[%s21009_s5 + $0x398] sm:$0xff]  ;;  %vm21446_vm9 = vmmov %vm21436_vm0 }
 0x745   :  { %12488 = vmatprep.mubr.f32.mxu0 %v10451_v10  ;;  %12523 = vmatpush1.xpose.msra.mxu1 %v10613_v18  ;;  %v10620_v18 = vld [vmem:[%s21009_s5 + $0x320] sm:$0xff]  ;;  %v9487_v10 = vrot.slane %v19989_v60, %v21346_v58 }
 0x746   :  { %12558 = vmatprep.mubr.f32.mxu1 %v10453_v36  ;;  %12454 = vmatprep.subr.mxu0 %v10605_v37  ;;  %v10055_v37 = vrot.slane %v19981_v53, %v21349_v17  ;;  %v9495_v36 = vrot.slane %v19989_v60, %v21349_v17 }
 0x747   :  { %12524 = vmatprep.subr.mxu1 %v10607_v41  ;;  %v10067_v41 = vrot.slane %v19981_v53, %v21356_v32 }
 0x748   :  { %12455 = vmatpush1.xpose.msra.mxu0 %v10604_v9  ;;  %v10629_v9 = vld [vmem:[%s21009_s5 + $0x368] sm:$0x3]  ;;  %v10459_v29 = vsel %vm21432_vm15, %v9495_v36, %v10055_v37  ;;  %vm21451_vm15 = vmmov %vm21436_vm0 }
 0x749   :  { %12525 = vmatpush1.xpose.msra.mxu1 %v10606_v1  ;;  %12592 = vmatprep.subr.mxu0 %v10616_v51  ;;  %v10457_v1 = vsel %vm21431_vm6, %v9487_v10, %v10047_v30  ;;  %v10631_v51 = vld [vmem:[%s21009_s5 + $0x378] sm:$0x3]  ;;  %v10462_v24 = vsel %vm21433_vm14, %v9507_v52, %v10067_v41  ;;  %v21445_v52 = vld [vmem:[#allocation16_spill] sm:$0xff]  ;;  %vm21449_vm6 = vmmov %vm21436_vm0 }
 0x74a   :  { %15547 = vmatprep.subr.mxu1 %v19878_v54  ;;  %vm21452_vm14 = vmmov %vm21436_vm0 }
 0x74b   :  { %12489 = vmatmul.mubr.f32.vlgmr.msra.gmra.mxu0 %v10450_v14  ;;  %v10624_v14 = vld [vmem:[%s21009_s5 + $0x340] sm:$0xff] }
 0x74c   :  { %12559 = vmatmul.mubr.f32.vlgmr.msra.gmra.mxu1 %v10452_v39  ;;  %12593 = vmatpush1.xpose.msra.mxu0 %v10615_v33  ;;  %v10622_v33 = vld [vmem:[%s21009_s5 + $0x330] sm:$0xff] }
 0x74d   :  { %12628 = vmatprep.mubr.f32.mxu0 %v10455_v8  ;;  %15548 = vmatpush3.xpose.msra.mxu1 %v10617_v20  ;;  %v10640_v20 = vld [vmem:[%s21009_s5 + $0x3c0] sm:$0x3]  ;;  %v10642_v8 = vld [vmem:[%s21009_s5 + $0x3d0] sm:$0x3] }
 0x74e   :  { %12594 = vmatprep.subr.mxu0 %v10609_v59  ;;  %15549 = vmatprep.subr.mxu1 %v19878_v54  ;;  %v10071_v59 = vrot.slane %v19981_v53, %v21363_v31 }
 0x74f   :  { %15551 = vmatprep.mubr.msk.f32.mxu1 %vm21365_vm10, %v19878_v54 }
 0x750   :  { %12595 = vmatpush1.xpose.msra.mxu0 %v10608_v2 }
 0x751   :  { %15550 = vmatpush3.xpose.msra.mxu1 %v10610_v47  ;;  %12732 = vmatprep.subr.mxu0 %v10626_v4  ;;  %v9503_v47 = vrot.slane %v19989_v60, %v21361_v6  ;;  %v10639_v4 = vld [vmem:[%s21009_s5 + $0x3b8] sm:$0x3]  ;;  %v10463_v60 = vsel %vm21435_vm7, %v9511_v61, %v10071_v59  ;;  %v21450_v59 = vld [vmem:[#allocation17_spill] sm:$0xff] }
 0x752   :  { %12802 = vmatprep.subr.mxu1 %v10628_v44  ;;  %v10633_v44 = vld [vmem:[%s21009_s5 + $0x388] sm:$0xff] }
 0x753   :  { %12629 = vmatmul.mubr.f32.vlgmr.msra.gmra.mxu0 %v10454_v28  ;;  %v10461_v53 = vsel %vm21434_vm1, %v9503_v47, %v10063_v49  ;;  %v10644_v28 = vld [vmem:[%s21009_s5 + $0x3e0] sm:$0x3]  ;;  %vm21453_vm1 = vmmov %vm21436_vm0 }
 0x754   :  { %15552 = vmatmul.mubr.f32.vlgmr.msra.gmra.mxu1 %v10456_v25  ;;  %12733 = vmatpush1.xpose.msra.mxu0 %v10625_v56  ;;  %v10632_v56 = vld [vmem:[%s21009_s5 + $0x380] sm:$0xff] }
 0x755   :  { %12768 = vmatprep.mubr.f32.mxu0 %v10458_v57  ;;  %12803 = vmatpush1.xpose.msra.mxu1 %v10627_v23 }
 0x756   :  { %12838 = vmatprep.mubr.f32.mxu1 %v10460_v3  ;;  %12734 = vmatprep.subr.mxu0 %v10619_v16 }
 0x757   :  { %12804 = vmatprep.subr.mxu1 %v10621_v13 }
 0x758   :  { %12735 = vmatpush1.xpose.msra.mxu0 %v10618_v27  ;;  %v8605_v63 = vpop.permute.xlu0 %8604 }
 0x759   :  { %12805 = vmatpush1.xpose.msra.mxu1 %v10620_v18  ;;  %12872 = vmatprep.subr.mxu0 %v10630_v26  ;;  %v21440_v26 = vld [vmem:[#allocation20_spill] sm:$0xff] }
 0x75a   :  { %15554 = vmatprep.subr.mxu1 %v19878_v54 }
 0x75b   :  { %12769 = vmatmul.mubr.f32.vlgmr.msra.gmra.mxu0 %v10457_v1 }
 0x75c   :  { %12839 = vmatmul.mubr.f32.vlgmr.msra.gmra.mxu1 %v10459_v29  ;;  %12873 = vmatpush1.xpose.msra.mxu0 %v10629_v9 }
 0x75d   :  { %12908 = vmatprep.mubr.f32.mxu0 %v10462_v24  ;;  %15555 = vmatpush3.xpose.msra.mxu1 %v10631_v51  ;;  %v21448_v24 = vld [vmem:[#allocation35_spill] sm:$0xff] }
 0x75e   :  { %12874 = vmatprep.subr.mxu0 %v10623_v21  ;;  %15556 = vmatprep.subr.mxu1 %v19878_v54  ;;  %v8609_v39 = vpop.permute.xlu0 %8608  ;;  %v8607_v2 = vpop.permute.xlu1 %8606 }
 0x75f   :  { %15558 = vmatprep.mubr.msk.f32.mxu1 %vm21365_vm10, %v19878_v54  ;;  %v8650_v27 = vsel %vm21438_vm5, %v8605_v63, %v8607_v2  ;;  %v8651_v18 = vsel %vm21439_vm8, %v8607_v2, %v8609_v39 }
 0x760   :  { %12875 = vmatpush1.xpose.msra.mxu0 %v10622_v33  ;;  %v20131_v51 = vmax.f32 %v21445_v52, %v8650_v27  ;;  %v20136_v33 = vmax.f32 %v21448_v24, %v8651_v18 }
 0x761   :  { %15557 = vmatpush3.xpose.msra.mxu1 %v10624_v14  ;;  %13012 = vmatprep.subr.mxu0 %v10640_v20 }
 0x762   :  { %13082 = vmatprep.subr.mxu1 %v10642_v8  ;;  %v8613_v11 = vpop.permute.xlu0 %8612  ;;  %v8611_v48 = vpop.permute.xlu1 %8610 }
 0x763   :  { %12909 = vmatmul.mubr.f32.vlgmr.msra.gmra.mxu0 %v10461_v53  ;;  %v8652_v13 = vsel %vm21436_vm0, %v8609_v39, %v8611_v48  ;;  %v8653_v3 = vsel %vm21437_vm13, %v8611_v48, %v8613_v11  ;;  %vm21454_vm0 = vmmov %vm21435_vm7 }
 0x764   :  { %15559 = vmatmul.mubr.f32.vlgmr.msra.gmra.mxu1 %v10463_v60  ;;  %13013 = vmatpush1.xpose.msra.mxu0 %v10639_v4  ;;  %v20121_v37 = vmax.f32 %v21440_v26, %v8652_v13  ;;  %v20124_v10 = vmax.f32 %v19290_v7, %v8653_v3  ;;  %vm21455_vm13 = vmmov %vm21454_vm0 }
 0x765   :  { %13083 = vmatpush1.xpose.msra.mxu1 %v10641_v12  ;;  %13014 = vmatprep.subr.mxu0 %v10633_v44  ;;  %v8869_v12 = vcombine.low %v20131_v51, %v20136_v33  ;;  %vm21456_vm5 = vmmov %vm21454_vm0 }
 0x766   :  { %13084 = vmatprep.subr.mxu1 %v10635_v35  ;;  %v8871_v39 = vcombine.low %v20121_v37, %v20124_v10  ;;  %vm21457_vm8 = vmmov %vm21454_vm0 }
 0x767   :  { %v8617_v46 = vpop.permute.xlu0 %8616 }
 0x768   :  { %13015 = vmatpush1.xpose.msra.mxu0 %v10632_v56  ;;  %v8615_v23 = vpop.permute.xlu1 %8614  ;;  %v8882_v56 = vrot.slane %v8869_v12, %v21400_v43 }
 0x769   :  { %13085 = vmatpush1.xpose.msra.mxu1 %v10634_v45  ;;  %13152 = vmatprep.subr.mxu0 %v10644_v28  ;;  %v8654_v9 = vsel %vm21443_vm12, %v8613_v11, %v8615_v23  ;;  %v8655_v1 = vsel %vm21444_vm2, %v8615_v23, %v8617_v46  ;;  %vm21460_vm12 = vmmov %vm21454_vm0 }
 0x76a   :  { %15561 = vmatprep.subr.mxu1 %v19878_v54  ;;  %v20148_v8 = vmax.f32 %v21450_v59, %v8654_v9  ;;  %v20151_v2 = vmax.f32 %v19343_v38, %v8655_v1  ;;  %vm21461_vm2 = vmmov %vm21454_vm0 }
 0x76c   :  { %v8623_v25 = vpop.permute.xlu0 %8622  ;;  %v8621_v62 = vpop.permute.xlu1 %8620 }
 0x76d   :  { %v8657_v63 = vsel %vm21446_vm9, %v8621_v62, %v8623_v25  ;;  %vm21462_vm9 = vmmov %vm21454_vm0 }
 0x770   :  { %v8625_v16 = vpop.permute.xlu1 %8624 }
 0x771   :  { %v8627_v57 = vpop.permute.xlu0 %8626  ;;  %v8658_v29 = vsel %vm21447_vm3, %v8623_v25, %v8625_v16  ;;  %vm21463_vm3 = vmmov %vm21454_vm0 }
 0x772   :  { %v8659_v41 = vsel %vm21441_vm11, %v8625_v16, %v8627_v57  ;;  %vm21458_vm11 = vmmov %vm21454_vm0 }
 0x773   :  { %v20139_v7 = vmax.f32 %v19406_v50, %v8659_v41  ;;  %v20155_v50 = vmax.f32 %v19378_v40, %v8657_v63  ;;  %v8873_v40 = vcombine.low %v20148_v8, %v20151_v2 }
 0x774   :  { %v8629_v30 = vpop.permute.xlu1 %8628 }
 0x775   :  { %v8660_v36 = vsel %vm21442_vm4, %v8627_v57, %v8629_v30  ;;  %v8631_v21 = vpop.permute.xlu0 %8630  ;;  %v8910_v28 = vrot.slane %v8873_v40, %v21400_v43  ;;  %v10643_v40 = vld [vmem:[%s21009_s5 + $0x3d8] sm:$0x3]  ;;  %vm21459_vm4 = vmmov %vm21454_vm0 }
 0x776   :  { %v20142_v14 = vmax.f32 %v19413_v5, %v8660_v36  ;;  %v8661_v49 = vsel %vm21449_vm6, %v8629_v30, %v8631_v21  ;;  %v20158_v5 = vmax.f32 %v19369_v34, %v8658_v29  ;;  %vm21464_vm6 = vmmov %vm21454_vm0 }
 0x777   :  { %v20161_v61 = vmax.f32 %v19442_v0, %v8661_v49  ;;  %v8896_v0 = vrot.slane %v8871_v39, %v21400_v43 }
 0x778   :  { %v8633_v20 = vpop.permute.xlu1 %8632  ;;  %v9155_v38 = vcombine.low %v20139_v7, %v20142_v14 }
 0x779   :  { %v8662_v47 = vsel %vm21451_vm15, %v8631_v21, %v8633_v20  ;;  %v8932_v25 = vcombine.low %v8882_v56, %v8896_v0  ;;  %v8933_v18 = vcombine.high %v8882_v56, %v8896_v0  ;;  %v10637_v56 = vld [vmem:[%s21009_s5 + $0x3a8] sm:$0xff]  ;;  %vm21465_vm15 = vmmov %vm21454_vm0 }
 0x77a   :  { %v20164_v4 = vmax.f32 %v19470_v19, %v8662_v47  ;;  %v8619_v53 = vpop.permute.xlu0 %8618  ;;  %v9153_v19 = vcombine.low %v20155_v50, %v20158_v5  ;;  %v9180_v45 = vrot.slane %v9155_v38, %v21400_v43 }
 0x77b   :  { %v8656_v34 = vsel %vm21452_vm14, %v8617_v46, %v8619_v53  ;;  %v20198_v3 = vrot.slane %v8932_v25, %v21400_v43  ;;  %v20211_v52 = vrot.slane %v8933_v18, %v21400_v43  ;;  %v10638_v25 = vld [vmem:[%s21009_s5 + $0x3b0] sm:$0xff]  ;;  %v10656_v18 = vld [vmem:[%s21009_s5 + $0x440] sm:$0x3]  ;;  %vm21466_vm14 = vmmov %vm21454_vm0 }
 0x77c   :  { %v8635_v44 = vpop.permute.xlu1 %8634  ;;  %v9157_v60 = vcombine.low %v20161_v61, %v20164_v4  ;;  %v20180_v35 = vmax.f32 %v19331_v55, %v8656_v34  ;;  %v9166_v62 = vrot.slane %v9153_v19, %v21400_v43  ;;  %v10645_v34 = vld [vmem:[%s21009_s5 + $0x3e8] sm:$0x3] }
 0x77d   :  { %v8663_v11 = vsel %vm21453_vm1, %v8633_v20, %v8635_v44  ;;  %vm21467_vm1 = vmmov %vm21454_vm0 }
 0x77e   :  { %v20183_v48 = vmax.f32 %v19482_v42, %v8663_v11  ;;  %v8924_v46 = vrot.slane %v20180_v35, %v21400_v43  ;;  %v9194_v55 = vrot.slane %v9157_v60, %v21400_v43  ;;  %v9216_v42 = vcombine.low %v9166_v62, %v9180_v45 }
 0x77f   :  { %v9217_v30 = vcombine.high %v9166_v62, %v9180_v45 }
 0x780   :  { %v9208_v23 = vrot.slane %v20183_v48, %v21400_v43  ;;  %v8936_v16 = vcombine.low %v8910_v28, %v8924_v46  ;;  %v8937_v26 = vcombine.high %v8910_v28, %v8924_v46  ;;  %v20204_v36 = vrot.slane %v9216_v42, %v21400_v43 }
 0x781   :  { %v20214_v63 = vrot.slane %v9217_v30, %v21400_v43 }
 0x782   :  { %v9220_v57 = vcombine.low %v9194_v55, %v9208_v23  ;;  %v20195_v13 = vrot.slane %v8936_v16, %v21400_v43  ;;  %v9221_v41 = vcombine.high %v9194_v55, %v9208_v23  ;;  %v20217_v29 = vrot.slane %v8937_v26, %v21400_v43  ;;  %v10636_v23 = vld [vmem:[%s21009_s5 + $0x3a0] sm:$0xff] }
 0x784   :  { %v20201_v27 = vrot.slane %v9220_v57, %v21400_v43  ;;  %v8996_v9 = vcombine.low %v20198_v3, %v20195_v13  ;;  %v20220_v21 = vrot.slane %v9221_v41, %v21400_v43  ;;  %v20247_v45 = vcombine.low %v20211_v52, %v20217_v29  ;;  %v10654_v57 = vld [vmem:[%s21009_s5 + $0x430] sm:$0x3] }
 0x786   :  { %v9280_v1 = vcombine.low %v20204_v36, %v20201_v27  ;;  %v9519_v24 = vrot.slane %v8996_v9, %v21344_v22  ;;  %v9527_v20 = vrot.slane %v8996_v9, %v21345_v15  ;;  %v9515_v59 = vrot.slane %v8996_v9, %v21346_v58 }
 0x787   :  { %v9523_v53 = vrot.slane %v8996_v9, %v21349_v17  ;;  %v9535_v11 = vrot.slane %v8996_v9, %v21356_v32  ;;  %v20251_v28 = vcombine.low %v20214_v63, %v20220_v21  ;;  %v9531_v62 = vrot.slane %v8996_v9, %v21361_v6 }
 0x788   :  { %v10079_v49 = vrot.slane %v9280_v1, %v21344_v22  ;;  %v10087_v39 = vrot.slane %v9280_v1, %v21345_v15  ;;  %v10075_v47 = vrot.slane %v9280_v1, %v21346_v58  ;;  %v10083_v12 = vrot.slane %v9280_v1, %v21349_v17 }
 0x789   :  { %v10095_v0 = vrot.slane %v9280_v1, %v21356_v32  ;;  %v10091_v55 = vrot.slane %v9280_v1, %v21361_v6  ;;  %v9539_v16 = vrot.slane %v8996_v9, %v21363_v31  ;;  %v10099_v42 = vrot.slane %v9280_v1, %v21363_v31  ;;  %v10653_v1 = vld [vmem:[%s21009_s5 + $0x428] sm:$0x3] }
 0x78a   :  { %v10465_v38 = vsel %vm21435_vm7, %v9519_v24, %v10079_v49  ;;  %v10467_v44 = vsel %vm21454_vm0, %v9527_v20, %v10087_v39  ;;  %v10464_v19 = vsel %vm21455_vm13, %v9515_v59, %v10075_v47  ;;  %v10466_v60 = vsel %vm21456_vm5, %v9523_v53, %v10083_v12  ;;  %v10655_v20 = vld [vmem:[%s21009_s5 + $0x438] sm:$0x3]  ;;  %v10649_v47 = vld [vmem:[%s21009_s5 + $0x408] sm:$0xff]  ;;  %v10646_v12 = vld [vmem:[%s21009_s5 + $0x3f0] sm:$0xff] }
 0x78b   :  { %13048 = vmatprep.mubr.f32.mxu0 %v10465_v38  ;;  %13118 = vmatprep.mubr.f32.mxu1 %v10467_v44  ;;  %v10469_v46 = vsel %vm21457_vm8, %v9535_v11, %v10095_v0  ;;  %v9547_v30 = vrot.slane %v20247_v45, %v21344_v22  ;;  %v10107_v26 = vrot.slane %v20251_v28, %v21344_v22  ;;  %v10647_v59 = vld [vmem:[%s21009_s5 + $0x3f8] sm:$0xff]  ;;  %v10648_v38 = vld [vmem:[%s21009_s5 + $0x400] sm:$0xff]  ;;  %vm21468_vm7 = vmmov %vm21454_vm0 }
 0x78c   :  { %13049 = vmatmul.mubr.f32.vlgmr.msra.gmra.mxu0 %v10464_v19  ;;  %13119 = vmatmul.mubr.f32.vlgmr.msra.gmra.mxu1 %v10466_v60  ;;  %v9555_v41 = vrot.slane %v20247_v45, %v21345_v15  ;;  %v10115_v9 = vrot.slane %v20251_v28, %v21345_v15  ;;  %v10468_v24 = vsel %vm21458_vm11, %v9531_v62, %v10091_v55  ;;  %v10651_v62 = vld [vmem:[%s21009_s5 + $0x418] sm:$0xff]  ;;  %vm21469_vm13 = vmmov %vm21454_vm0 }
 0x78d   :  { %13153 = vmatpush1.xpose.msra.mxu0 %v10643_v40  ;;  %15562 = vmatpush3.xpose.msra.mxu1 %v10645_v34  ;;  %v10470_v49 = vsel %vm21459_vm4, %v9539_v16, %v10099_v42  ;;  %v10472_v39 = vsel %vm21460_vm12, %v9547_v30, %v10107_v26  ;;  %v9543_v44 = vrot.slane %v20247_v45, %v21346_v58  ;;  %v10658_v34 = vld [vmem:[%s21009_s5 + $0x450] sm:$0x3]  ;;  %vm21470_vm5 = vmmov %vm21454_vm0 }
 0x78e   :  { %13188 = vmatprep.mubr.f32.mxu0 %v10469_v46  ;;  %13154 = vmatprep.subr.mxu0 %v10637_v56  ;;  %v10474_v53 = vsel %vm21461_vm2, %v9555_v41, %v10115_v9  ;;  %v10103_v40 = vrot.slane %v20251_v28, %v21346_v58  ;;  %v9551_v11 = vrot.slane %v20247_v45, %v21349_v17  ;;  %v10657_v56 = vld [vmem:[%s21009_s5 + $0x448] sm:$0x3]  ;;  %v10670_v26 = vld [vmem:[%s21009_s5 + $0x4b0] sm:$0x3]  ;;  %vm21471_vm8 = vmmov %vm21454_vm0 }
 0x78f   :  { %15563 = vmatprep.subr.mxu1 %v19878_v54  ;;  %15565 = vmatprep.mubr.msk.f32.mxu1 %vm21365_vm10, %v19878_v54  ;;  %v10111_v0 = vrot.slane %v20251_v28, %v21349_v17  ;;  %v9563_v19 = vrot.slane %v20247_v45, %v21356_v32  ;;  %v10123_v60 = vrot.slane %v20251_v28, %v21356_v32  ;;  %vm21472_vm11 = vmmov %vm21454_vm0 }
 0x790   :  { %v10471_v46 = vsel %vm21462_vm9, %v9543_v44, %v10103_v40  ;;  %v20332_v55 = vcombine.high %v20198_v3, %v20195_v13  ;;  %v20336_v16 = vcombine.high %v20204_v36, %v20201_v27  ;;  %v10652_v13 = vld [vmem:[%s21009_s5 + $0x420] sm:$0xff]  ;;  %v9559_v3 = vrot.slane %v20247_v45, %v21361_v6  ;;  %v10662_v44 = vld [vmem:[%s21009_s5 + $0x470] sm:$0xff]  ;;  %vm21473_vm4 = vmmov %vm21454_vm0 }
 0x791   :  { %13155 = vmatpush1.xpose.msra.mxu0 %v10636_v23  ;;  %15564 = vmatpush3.xpose.msra.mxu1 %v10638_v25  ;;  %v10659_v23 = vld [vmem:[%s21009_s5 + $0x458] sm:$0x3]  ;;  %v10473_v25 = vsel %vm21463_vm3, %v9551_v11, %v10111_v0  ;;  %v10476_v42 = vsel %vm21464_vm6, %v9563_v19, %v10123_v60  ;;  %v10119_v27 = vrot.slane %v20251_v28, %v21361_v6  ;;  %v10668_v36 = vld [vmem:[%s21009_s5 + $0x4a0] sm:$0x3]  ;;  %vm21474_vm12 = vmmov %vm21454_vm0  ;;  %vm15224_vm6 = vcmask 74752  }
 0x792   :  { %13292 = vmatprep.subr.mxu0 %v10654_v57  ;;  %13362 = vmatprep.subr.mxu1 %v10656_v18  ;;  %v10650_v57 = vld [vmem:[%s21009_s5 + $0x410] sm:$0xff]  ;;  %v9567_v18 = vrot.slane %v20247_v45, %v21363_v31  ;;  %v10127_v30 = vrot.slane %v20251_v28, %v21363_v31  ;;  %v9575_v41 = vrot.slane %v20332_v55, %v21344_v22  ;;  %v10667_v45 = vld [vmem:[%s21009_s5 + $0x498] sm:$0x3]  ;;  %v10672_v11 = vld [vmem:[%s21009_s5 + $0x4c0] sm:$0x3] }
 0x793   :  { %v10135_v9 = vrot.slane %v20336_v16, %v21344_v22  ;;  %v9583_v28 = vrot.slane %v20332_v55, %v21345_v15  ;;  %v9571_v40 = vrot.slane %v20332_v55, %v21346_v58  ;;  %v9579_v19 = vrot.slane %v20332_v55, %v21349_v17  ;;  %vm21475_vm2 = vmmov %vm21454_vm0 }
 0x794   :  { %13189 = vmatmul.mubr.f32.vlgmr.msra.gmra.mxu0 %v10468_v24  ;;  %15566 = vmatmul.mubr.f32.vlgmr.msra.gmra.mxu1 %v10470_v49  ;;  %v10475_v24 = vsel %vm21465_vm15, %v9559_v3, %v10119_v27  ;;  %v10669_v49 = vld [vmem:[%s21009_s5 + $0x4a8] sm:$0x3]  ;;  %v10139_v60 = vrot.slane %v20336_v16, %v21349_v17  ;;  %v8872_v27 = vcombine.high %v20121_v37, %v20124_v10  ;;  %vm21476_vm9 = vmmov %vm21454_vm0 }
 0x795   :  { %13293 = vmatpush1.xpose.msra.mxu0 %v10653_v1  ;;  %13328 = vmatprep.mubr.f32.mxu0 %v10472_v39  ;;  %v10143_v1 = vrot.slane %v20336_v16, %v21345_v15  ;;  %v10661_v39 = vld [vmem:[%s21009_s5 + $0x468] sm:$0xff]  ;;  %v20433_v37 = vcombine.high %v20214_v63, %v20220_v21  ;;  %vm21477_vm3 = vmmov %vm21454_vm0 }
 0x796   :  { %13363 = vmatpush1.xpose.msra.mxu1 %v10655_v20  ;;  %13398 = vmatprep.mubr.f32.mxu1 %v10474_v53  ;;  %v10477_v20 = vsel %vm21466_vm14, %v9567_v18, %v10127_v30  ;;  %v10673_v3 = vld [vmem:[%s21009_s5 + $0x4c8] sm:$0x3]  ;;  %v9159_v18 = vcombine.high %v20183_v48, %v20183_v48  ;;  %v20429_v30 = vcombine.high %v20211_v52, %v20217_v29  ;;  %v10664_v52 = vld [vmem:[%s21009_s5 + $0x480] sm:$0xff]  ;;  %vm21478_vm15 = vmmov %vm21454_vm0 }
 0x797   :  { %13294 = vmatprep.subr.mxu0 %v10647_v59  ;;  %13364 = vmatprep.subr.mxu1 %v10649_v47  ;;  %v10479_v59 = vsel %vm21467_vm1, %v9575_v41, %v10135_v9  ;;  %v10663_v47 = vld [vmem:[%s21009_s5 + $0x478] sm:$0xff]  ;;  %v10481_v53 = vsel %vm21468_vm7, %v9583_v28, %v10143_v1  ;;  %v9156_v48 = vcombine.high %v20139_v7, %v20142_v14  ;;  %vm21479_vm14 = vmmov %vm21454_vm0 }
 0x798   :  { %v9587_v7 = vrot.slane %v20332_v55, %v21361_v6  ;;  %v10147_v14 = vrot.slane %v20336_v16, %v21361_v6  ;;  %v9154_v29 = vcombine.high %v20155_v50, %v20158_v5  ;;  %v9595_v41 = vrot.slane %v20332_v55, %v21363_v31  ;;  %vm21480_vm1 = vmmov %vm21454_vm0 }
 0x799   :  { %13295 = vmatpush1.xpose.msra.mxu0 %v10646_v12  ;;  %v10660_v12 = vld [vmem:[%s21009_s5 + $0x460] sm:$0xff]  ;;  %v10155_v9 = vrot.slane %v20336_v16, %v21363_v31  ;;  %v20471_v1 = vrot.slane %v9159_v18, %v21400_v43  ;;  %v9603_v50 = vrot.slane %v20429_v30, %v21344_v22  ;;  %v10163_v5 = vrot.slane %v20433_v37, %v21344_v22  ;;  %vm21481_vm7 = vmmov %vm21454_vm0 }
 0x79a   :  { %13365 = vmatpush1.xpose.msra.mxu1 %v10648_v38  ;;  %13432 = vmatprep.subr.mxu0 %v10658_v34  ;;  %v10131_v34 = vrot.slane %v20336_v16, %v21346_v58  ;;  %v9607_v18 = vrot.slane %v20429_v30, %v21349_v17 }
 0x79b   :  { %15568 = vmatprep.subr.mxu1 %v19878_v54 }
 0x79c   :  { %13329 = vmatmul.mubr.f32.vlgmr.msra.gmra.mxu0 %v10471_v46 }
 0x79d   :  { %13399 = vmatmul.mubr.f32.vlgmr.msra.gmra.mxu1 %v10473_v25  ;;  %13433 = vmatpush1.xpose.msra.mxu0 %v10657_v56  ;;  %v10151_v25 = vrot.slane %v20336_v16, %v21356_v32  ;;  %v20480_v16 = vrot.slane %v8872_v27, %v21400_v43  ;;  %v10686_v27 = vld [vmem:[%s21009_s5 + $0x530] sm:$0x3] }
 0x79e   :  { %13468 = vmatprep.mubr.f32.mxu0 %v10476_v42  ;;  %15569 = vmatpush3.xpose.msra.mxu1 %v10659_v23  ;;  %v9591_v23 = vrot.slane %v20332_v55, %v21356_v32  ;;  %v10671_v42 = vld [vmem:[%s21009_s5 + $0x4b8] sm:$0x3] }
 0x79f   :  { %13434 = vmatprep.subr.mxu0 %v10651_v62  ;;  %15570 = vmatprep.subr.mxu1 %v19878_v54 }
 0x7a0   :  { %15572 = vmatprep.mubr.msk.f32.mxu1 %vm21365_vm10, %v19878_v54  ;;  %v10483_v10 = vsel %vm21470_vm5, %v9591_v23, %v10151_v25  ;;  %v10674_v25 = vld [vmem:[%s21009_s5 + $0x4d0] sm:$0xff]  ;;  %vm21483_vm5 = vmmov %vm21454_vm0 }
 0x7a1   :  { %13435 = vmatpush1.xpose.msra.mxu0 %v10650_v57  ;;  %v8870_v57 = vcombine.high %v20131_v51, %v20136_v33  ;;  %v10480_v51 = vsel %vm21469_vm13, %v9579_v19, %v10139_v60  ;;  %v10665_v33 = vld [vmem:[%s21009_s5 + $0x488] sm:$0xff]  ;;  %v10486_v60 = vsel %vm21473_vm4, %v9603_v50, %v10163_v5  ;;  %v10680_v5 = vld [vmem:[%s21009_s5 + $0x500] sm:$0xff]  ;;  %vm21482_vm13 = vmmov %vm21454_vm0 }
 0x7a2   :  { %15571 = vmatpush3.xpose.msra.mxu1 %v10652_v13  ;;  %13572 = vmatprep.subr.mxu0 %v10668_v36  ;;  %v10478_v13 = vsel %vm21454_vm0, %v9571_v40, %v10131_v34  ;;  %v8875_v36 = vcombine.high %v20180_v35, %v20180_v35  ;;  %v8874_v35 = vcombine.high %v20148_v8, %v20151_v2  ;;  %v10666_v8 = vld [vmem:[%s21009_s5 + $0x490] sm:$0xff]  ;;  %vm21486_vm4 = vmmov %vm21454_vm0 }
 0x7a3   :  { %13642 = vmatprep.subr.mxu1 %v10670_v26  ;;  %v9158_v26 = vcombine.high %v20161_v61, %v20164_v4  ;;  %v10682_v2 = vld [vmem:[%s21009_s5 + $0x510] sm:$0x3]  ;;  %v20506_v40 = vrot.slane %v9154_v29, %v21400_v43  ;;  %v10484_v34 = vsel %vm21472_vm11, %v9595_v41, %v10155_v9  ;;  %v10679_v29 = vld [vmem:[%s21009_s5 + $0x4f8] sm:$0xff]  ;;  %vm21485_vm11 = vmmov %vm21454_vm0 }
 0x7a4   :  { %13469 = vmatmul.mubr.f32.vlgmr.msra.gmra.mxu0 %v10475_v24  ;;  %v20459_v21 = vrot.slane %v8875_v36, %v21400_v43 }
 0x7a5   :  { %15573 = vmatmul.mubr.f32.vlgmr.msra.gmra.mxu1 %v10477_v20  ;;  %13573 = vmatpush1.xpose.msra.mxu0 %v10667_v45  ;;  %v10684_v45 = vld [vmem:[%s21009_s5 + $0x520] sm:$0x3]  ;;  %v9611_v20 = vrot.slane %v20429_v30, %v21345_v15 }
 0x7a6   :  { %13608 = vmatprep.mubr.f32.mxu0 %v10479_v59  ;;  %13643 = vmatpush1.xpose.msra.mxu1 %v10669_v49  ;;  %v10681_v49 = vld [vmem:[%s21009_s5 + $0x508] sm:$0x3]  ;;  %v20490_v59 = vrot.slane %v8874_v35, %v21400_v43 }
 0x7a7   :  { %13678 = vmatprep.mubr.f32.mxu1 %v10481_v53  ;;  %13574 = vmatprep.subr.mxu0 %v10661_v39  ;;  %v10171_v39 = vrot.slane %v20433_v37, %v21345_v15  ;;  %v20496_v53 = vrot.slane %v9158_v26, %v21400_v43  ;;  %v9619_v26 = vrot.slane %v20429_v30, %v21356_v32 }
 0x7a8   :  { %13644 = vmatprep.subr.mxu1 %v10663_v47  ;;  %v20493_v47 = vrot.slane %v9156_v48, %v21400_v43 }
 0x7a9   :  { %13575 = vmatpush1.xpose.msra.mxu0 %v10660_v12  ;;  %v10482_v12 = vsel %vm21471_vm8, %v9587_v7, %v10147_v14  ;;  %v9222_v19 = vcombine.low %v20496_v53, %v20471_v1  ;;  %v10488_v23 = vsel %vm21474_vm12, %v9611_v20, %v10171_v39  ;;  %v10696_v20 = vld [vmem:[%s21009_s5 + $0x580] sm:$0x3]  ;;  %vm21484_vm8 = vmmov %vm21454_vm0 }
 0x7aa   :  { %v10810_v38 = vpop.f32.mrf.mxu0  ;;  %v10880_v0 = vpop.f32.mrf.mxu1  ;;  %13645 = vmatpush1.xpose.msra.mxu1 %v10662_v44  ;;  %13712 = vmatprep.subr.mxu0 %v10672_v11  ;;  %v20503_v44 = vrot.slane %v8870_v57, %v21400_v43  ;;  %v10675_v11 = vld [vmem:[%s21009_s5 + $0x4d8] sm:$0xff]  ;;  %v10676_v57 = vld [vmem:[%s21009_s5 + $0x4e0] sm:$0xff]  ;;  %vm21487_vm12 = vmmov %vm21454_vm0 }
 0x7ab   :  { %v10881_v56 = vadd.f32 %v10880_v0, %v10810_v38  ;;  %15575 = vmatprep.subr.mxu1 %v19878_v54  ;;  %v10683_v38 = vld [vmem:[%s21009_s5 + $0x518] sm:$0x3]  ;;  %v8938_v0 = vcombine.low %v20490_v59, %v20459_v21  ;;  %v20546_v48 = vrot.slane %v9222_v19, %v21400_v43 }
 0x7ac   :  { %v10812_v46 = vpop.f32.mrf.mxu0  ;;  %v10882_v62 = vpop.f32.mrf.mxu1  ;;  %13609 = vmatmul.mubr.f32.vlgmr.msra.gmra.mxu0 %v10478_v13  ;;  %v9599_v13 = vrot.slane %v20429_v30, %v21346_v58 }
 0x7ad   :  { %13679 = vmatmul.mubr.f32.vlgmr.msra.gmra.mxu1 %v10480_v51  ;;  %13713 = vmatpush1.xpose.msra.mxu0 %v10671_v42  ;;  %v8934_v46 = vcombine.low %v20503_v44, %v20480_v16  ;;  %v9218_v42 = vcombine.low %v20506_v40, %v20493_v47  ;;  %v10167_v51 = vrot.slane %v20433_v37, %v21349_v17 }
 0x7ae   :  { %13748 = vmatprep.mubr.f32.mxu0 %v10483_v10  ;;  %15576 = vmatpush3.xpose.msra.mxu1 %v10673_v3  ;;  %v10159_v3 = vrot.slane %v20433_v37, %v21346_v58  ;;  %v20543_v35 = vrot.slane %v8938_v0, %v21400_v43 }
 0x7af   :  { %13714 = vmatprep.subr.mxu0 %v10665_v33  ;;  %15577 = vmatprep.subr.mxu1 %v19878_v54  ;;  %v20556_v7 = vrot.slane %v8934_v46, %v21400_v43  ;;  %v20559_v14 = vrot.slane %v9218_v42, %v21400_v43 }
 0x7b0   :  { %15579 = vmatprep.mubr.msk.f32.mxu1 %vm21365_vm10, %v19878_v54 }
 0x7b1   :  { %13715 = vmatpush1.xpose.msra.mxu0 %v10664_v52  ;;  %v10179_v52 = vrot.slane %v20433_v37, %v21356_v32  ;;  %v20572_v41 = vcombine.low %v20556_v7, %v20543_v35  ;;  %v20576_v9 = vcombine.low %v20559_v14, %v20546_v48 }
 0x7b2   :  { %v10950_v63 = vpop.f32.mrf.mxu0  ;;  %15578 = vmatpush3.xpose.msra.mxu1 %v10666_v8  ;;  %13852 = vmatprep.subr.mxu0 %v10682_v2  ;;  %v10685_v8 = vld [vmem:[%s21009_s5 + $0x528] sm:$0x3]  ;;  %v10485_v2 = vsel %vm21475_vm2, %v9599_v13, %v10159_v3  ;;  %vm21488_vm2 = vmmov %vm21454_vm0 }
 0x7b3   :  { %v10951_v61 = vadd.f32 %v10950_v63, %v10881_v56  ;;  %v11020_v4 = vpop.f32.mrf.mxu1  ;;  %13922 = vmatprep.subr.mxu1 %v10684_v45  ;;  %v10677_v56 = vld [vmem:[%s21009_s5 + $0x4e8] sm:$0xff]  ;;  %v10490_v45 = vsel %vm21477_vm3, %v9619_v26, %v10179_v52  ;;  %v9631_v19 = vrot.slane %v20572_v41, %v21344_v22  ;;  %v10199_v46 = vrot.slane %v20576_v9, %v21345_v15  ;;  %vm21490_vm3 = vmmov %vm21454_vm0 }
 0x7b4   :  { %v10952_v28 = vpop.f32.mrf.mxu0  ;;  %13749 = vmatmul.mubr.f32.vlgmr.msra.gmra.mxu0 %v10482_v12  ;;  %v10689_v3 = vld [vmem:[%s21009_s5 + $0x548] sm:$0xff] }
 0x7b5   :  { %v20477_v24 = vadd.f32 %v11020_v4, %v10951_v61  ;;  %v15511_v55 = vpop.f32.mrf.mxu1  ;;  %15580 = vmatmul.mubr.f32.vlgmr.msra.gmra.mxu1 %v10484_v34  ;;  %13853 = vmatpush1.xpose.msra.mxu0 %v10681_v49  ;;  %v10687_v61 = vld [vmem:[%s21009_s5 + $0x538] sm:$0x3]  ;;  %v10487_v4 = vsel %vm21476_vm9, %v9607_v18, %v10167_v51  ;;  %v10678_v28 = vld [vmem:[%s21009_s5 + $0x4f0] sm:$0xff]  ;;  %v10175_v49 = vrot.slane %v20433_v37, %v21361_v6  ;;  %vm21489_vm9 = vmmov %vm21454_vm0 }
 0x7b6   :  { %13888 = vmatprep.mubr.f32.mxu0 %v10486_v60  ;;  %13923 = vmatpush1.xpose.msra.mxu1 %v10683_v38  ;;  %v9615_v55 = vrot.slane %v20429_v30, %v21361_v6  ;;  %v9623_v38 = vrot.slane %v20429_v30, %v21363_v31  ;;  %v10183_v34 = vrot.slane %v20433_v37, %v21363_v31  ;;  %v10695_v30 = vld [vmem:[%s21009_s5 + $0x578] sm:$0x3] }
 0x7b7   :  { %13958 = vmatprep.mubr.f32.mxu1 %v10488_v23  ;;  %13854 = vmatprep.subr.mxu0 %v10675_v11  ;;  %v10698_v11 = vld [vmem:[%s21009_s5 + $0x590] sm:$0x3]  ;;  %v10191_v60 = vrot.slane %v20576_v9, %v21344_v22  ;;  %v9639_v37 = vrot.slane %v20572_v41, %v21345_v15  ;;  %v15225_v23 = vsel %vm15224_vm6, %v20477_v24, 0.0  ;;  %v8939_v24 = vcombine.high %v20490_v59, %v20459_v21  ;;  %v10691_v18 = vld [vmem:[%s21009_s5 + $0x558] sm:$0xff]  ;;  %v10688_v21 = vld [vmem:[%s21009_s5 + $0x540] sm:$0xff] }
 0x7b8   :  { %13924 = vmatprep.subr.mxu1 %v10677_v56  ;;  %v8935_v51 = vcombine.high %v20503_v44, %v20480_v16  ;;  %v9219_v59 = vcombine.high %v20506_v40, %v20493_v47  ;;  %v9627_v16 = vrot.slane %v20572_v41, %v21346_v58  ;;  %v10187_v44 = vrot.slane %v20576_v9, %v21346_v58 }
 0x7b9   :  { %13855 = vmatpush1.xpose.msra.mxu0 %v10674_v25  ;;  %v10489_v25 = vsel %vm21478_vm15, %v9615_v55, %v10175_v49  ;;  %v9635_v47 = vrot.slane %v20572_v41, %v21349_v17  ;;  %v10195_v40 = vrot.slane %v20576_v9, %v21349_v17  ;;  %v20676_v55 = vld [vmem:[#allocation2 + $0x80] sm:$0xff]  ;;  %v10701_v49 = vld [vmem:[%s21009_s5 + $0x5a8] sm:$0x3]  ;;  %vm21491_vm15 = vmmov %vm21454_vm0 }
 0x7ba   :  { %13925 = vmatpush1.xpose.msra.mxu1 %v10676_v57  ;;  %13992 = vmatprep.subr.mxu0 %v10686_v27  ;;  %v10491_v57 = vsel %vm21479_vm14, %v9623_v38, %v10183_v34  ;;  %v9223_v27 = vcombine.high %v20496_v53, %v20471_v1  ;;  %v10690_v53 = vld [vmem:[%s21009_s5 + $0x550] sm:$0xff]  ;;  %v10692_v34 = vld [vmem:[%s21009_s5 + $0x560] sm:$0xff]  ;;  %vm21492_vm14 = vmmov %vm21454_vm0 }
 0x7bb   :  { %v11090_v62 = vpop.f32.mrf.mxu0  ;;  %v11160_v36 = vpop.f32.mrf.mxu1  ;;  %15582 = vmatprep.subr.mxu1 %v19878_v54 }
 0x7bc   :  { %v11161_v33 = vadd.f32 %v11160_v36, %v11090_v62  ;;  %13889 = vmatmul.mubr.f32.vlgmr.msra.gmra.mxu0 %v10485_v2  ;;  %v10697_v62 = vld [vmem:[%s21009_s5 + $0x588] sm:$0x3]  ;;  %v10493_v36 = vsel %vm21480_vm1, %v9631_v19, %v10191_v60  ;;  %v20660_v2 = vrot.slane %v9223_v27, %v21400_v43  ;;  %v9643_v19 = vrot.slane %v20572_v41, %v21361_v6  ;;  %vm21493_vm1 = vmmov %vm21454_vm0 }
 0x7bd   :  { %v11092_v10 = vpop.f32.mrf.mxu0  ;;  %v11162_v63 = vpop.f32.mrf.mxu1  ;;  %13959 = vmatmul.mubr.f32.vlgmr.msra.gmra.mxu1 %v10487_v4  ;;  %13993 = vmatpush1.xpose.msra.mxu0 %v10685_v8  ;;  %v20657_v8 = vrot.slane %v8939_v24, %v21400_v43  ;;  %v10207_v4 = vrot.slane %v20576_v9, %v21356_v32  ;;  %v10203_v60 = vrot.slane %v20576_v9, %v21361_v6 }
 0x7be   :  { %14028 = vmatprep.mubr.f32.mxu0 %v10490_v45  ;;  %15583 = vmatpush3.xpose.msra.mxu1 %v10687_v61  ;;  %v10700_v10 = vld [vmem:[%s21009_s5 + $0x5a0] sm:$0x3]  ;;  %v9647_v61 = vrot.slane %v20572_v41, %v21356_v32  ;;  %v10699_v45 = vld [vmem:[%s21009_s5 + $0x598] sm:$0x3] }
 0x7bf   :  { %13994 = vmatprep.subr.mxu0 %v10679_v29  ;;  %15584 = vmatprep.subr.mxu1 %v19878_v54  ;;  %v10496_v27 = vsel %vm21484_vm8, %v9643_v19, %v10203_v60  ;;  %v10706_v60 = vld [vmem:[%s21009_s5 + $0x5d0] sm:$0xff]  ;;  %vm21497_vm8 = vmmov %vm21454_vm0 }
 0x7c0   :  { %15586 = vmatprep.mubr.msk.f32.mxu1 %vm21365_vm10, %v19878_v54  ;;  %v10497_v38 = vsel %vm21483_vm5, %v9647_v61, %v10207_v4  ;;  %vm21496_vm5 = vmmov %vm21454_vm0 }
 0x7c1   :  { %13995 = vmatpush1.xpose.msra.mxu0 %v10678_v28  ;;  %v20670_v28 = vrot.slane %v8935_v51, %v21400_v43 }
 0x7c2   :  { %15585 = vmatpush3.xpose.msra.mxu1 %v10680_v5  ;;  %14132 = vmatprep.subr.mxu0 %v10696_v20  ;;  %v10492_v5 = vsel %vm21454_vm0, %v9627_v16, %v10187_v44  ;;  %v10494_v20 = vsel %vm21482_vm13, %v9635_v47, %v10195_v40  ;;  %v10704_v44 = vld [vmem:[%s21009_s5 + $0x5c0] sm:$0xff]  ;;  %v10714_v47 = vld [vmem:[%s21009_s5 + $0x610] sm:$0x3]  ;;  %vm21495_vm13 = vmmov %vm21454_vm0 }
 0x7c3   :  { %v11230_v50 = vpop.f32.mrf.mxu0  ;;  %14202 = vmatprep.subr.mxu1 %v10698_v11 }
 0x7c4   :  { %v11231_v39 = vadd.f32 %v11230_v50, %v11161_v33  ;;  %v11300_v12 = vpop.f32.mrf.mxu1  ;;  %14029 = vmatmul.mubr.f32.vlgmr.msra.gmra.mxu0 %v10489_v25  ;;  %v10495_v33 = vsel %vm21481_vm7, %v9639_v37, %v10199_v46  ;;  %v20673_v50 = vrot.slane %v9219_v59, %v21400_v43  ;;  %v20688_v43 = vcombine.low %v20670_v28, %v20657_v8  ;;  %v10705_v59 = vld [vmem:[%s21009_s5 + $0x5c8] sm:$0xff]  ;;  %vm21494_vm7 = vmmov %vm21454_vm0 }
 0x7c5   :  { %v11232_v0 = vpop.f32.mrf.mxu0  ;;  %15587 = vmatmul.mubr.f32.vlgmr.msra.gmra.mxu1 %v10491_v57  ;;  %14133 = vmatpush1.xpose.msra.mxu0 %v10695_v30  ;;  %v9651_v37 = vrot.slane %v20572_v41, %v21363_v31  ;;  %v10211_v46 = vrot.slane %v20576_v9, %v21363_v31  ;;  %v10709_v41 = vld [vmem:[%s21009_s5 + $0x5e8] sm:$0x3] }
 0x7c6   :  { %v11301_v56 = vadd.f32 %v11300_v12, %v11231_v39  ;;  %v15518_v54 = vpop.f32.mrf.mxu1  ;;  %14168 = vmatprep.mubr.f32.mxu0 %v10493_v36  ;;  %14203 = vmatpush1.xpose.msra.mxu1 %v10697_v62  ;;  %v10693_v39 = vld [vmem:[%s21009_s5 + $0x568] sm:$0xff]  ;;  %v20692_v12 = vcombine.low %v20673_v50, %v20660_v2  ;;  %v10694_v0 = vld [vmem:[%s21009_s5 + $0x570] sm:$0xff]  ;;  %v9659_v62 = vrot.slane %v20688_v43, %v21344_v22  ;;  %v10711_v36 = vld [vmem:[%s21009_s5 + $0x5f8] sm:$0x3] }
 0x7c7   :  { %14238 = vmatprep.mubr.f32.mxu1 %v10495_v33  ;;  %14134 = vmatprep.subr.mxu0 %v10689_v3  ;;  %v9667_v9 = vrot.slane %v20688_v43, %v21345_v15  ;;  %v10498_v51 = vsel %vm21485_vm11, %v9651_v37, %v10211_v46  ;;  %v9679_v37 = vrot.slane %v20688_v43, %v21363_v31  ;;  %vm21498_vm11 = vmmov %vm21454_vm0 }
 0x7c8   :  { %v15226_v42 = vsel %vm15224_vm6, %v11301_v56, 0.0  ;;  %14204 = vmatprep.subr.mxu1 %v10691_v18  ;;  %v10710_v56 = vld [vmem:[%s21009_s5 + $0x5f0] sm:$0x3]  ;;  %v10227_v24 = vrot.slane %v20692_v12, %v21345_v15  ;;  %v10239_v46 = vrot.slane %v20692_v12, %v21363_v31 }
 0x7c9   :  { %v20621_v13 = vadd.f32 %v15226_v42, %v15225_v23  ;;  %14135 = vmatpush1.xpose.msra.mxu0 %v10688_v21  ;;  %v10712_v23 = vld [vmem:[%s21009_s5 + $0x600] sm:$0x3]  ;;  %v10219_v42 = vrot.slane %v20692_v12, %v21344_v22  ;;  %v10703_v21 = vld [vmem:[%s21009_s5 + $0x5b8] sm:$0xff] }
 0x7ca   :  { %14205 = vmatpush1.xpose.msra.mxu1 %v10690_v53  ;;  %14272 = vmatprep.subr.mxu0 %v10700_v10  ;;  %v10502_v53 = vsel %vm21487_vm12, %v9667_v9, %v10227_v24  ;;  %v9655_v10 = vrot.slane %v20688_v43, %v21346_v58  ;;  %v10725_v24 = vld [vmem:[%s21009_s5 + $0x668] sm:$0x3]  ;;  %vm21500_vm12 = vmmov %vm21454_vm0 }
 0x7cb   :  { %v11370_v1 = vpop.f32.mrf.mxu0  ;;  %15589 = vmatprep.subr.mxu1 %v20676_v55 }
 0x7cc   :  { %v11440_v26 = vpop.f32.mrf.mxu1  ;;  %14169 = vmatmul.mubr.f32.vlgmr.msra.gmra.mxu0 %v10492_v5 }
 0x7cd   :  { %v11441_v52 = vadd.f32 %v11440_v26, %v11370_v1  ;;  %v11372_v63 = vpop.f32.mrf.mxu0  ;;  %14239 = vmatmul.mubr.f32.vlgmr.msra.gmra.mxu1 %v10494_v20  ;;  %14273 = vmatpush1.xpose.msra.mxu0 %v10699_v45  ;;  %v10500_v1 = vsel %vm21486_vm4, %v9659_v62, %v10219_v42  ;;  %v10215_v26 = vrot.slane %v20692_v12, %v21346_v58  ;;  %vm21499_vm4 = vmmov %vm21454_vm0 }
 0x7ce   :  { %v11442_v29 = vpop.f32.mrf.mxu1  ;;  %14308 = vmatprep.mubr.f32.mxu0 %v10497_v38  ;;  %15590 = vmatpush3.xpose.msra.mxu1 %v10701_v49  ;;  %v10223_v63 = vrot.slane %v20692_v12, %v21349_v17  ;;  %v10235_v45 = vrot.slane %v20692_v12, %v21356_v32  ;;  %v10713_v49 = vld [vmem:[%s21009_s5 + $0x608] sm:$0x3] }
 0x7cf   :  { %14274 = vmatprep.subr.mxu0 %v10693_v39  ;;  %15591 = vmatprep.subr.mxu1 %v20676_v55  ;;  %v9675_v29 = vrot.slane %v20688_v43, %v21356_v32  ;;  %v10499_v20 = vsel %vm21488_vm2, %v9655_v10, %v10215_v26  ;;  %v10715_v39 = vld [vmem:[%s21009_s5 + $0x618] sm:$0x3]  ;;  %v10728_v10 = vld [vmem:[%s21009_s5 + $0x680] sm:$0x3]  ;;  %vm21501_vm2 = vmmov %vm21454_vm0 }
 0x7d0   :  { %15593 = vmatprep.mubr.msk.f32.mxu1 %vm21365_vm10, %v20676_v55 }
 0x7d1   :  { %14275 = vmatpush1.xpose.msra.mxu0 %v10692_v34  ;;  %v10707_v34 = vld [vmem:[%s21009_s5 + $0x5d8] sm:$0xff]  ;;  %v10504_v19 = vsel %vm21490_vm3, %v9675_v29, %v10235_v45  ;;  %vm21503_vm3 = vmmov %vm21454_vm0 }
 0x7d2   :  { %15592 = vmatpush3.xpose.msra.mxu1 %v10694_v0  ;;  %14412 = vmatprep.subr.mxu0 %v10710_v56  ;;  %v20785_v0 = vcombine.high %v20559_v14, %v20546_v48  ;;  %v9671_v48 = vrot.slane %v20688_v43, %v21361_v6  ;;  %v10724_v14 = vld [vmem:[%s21009_s5 + $0x660] sm:$0x3]  ;;  %v10727_v45 = vld [vmem:[%s21009_s5 + $0x678] sm:$0x3] }
 0x7d3   :  { %v11510_v11 = vpop.f32.mrf.mxu0  ;;  %14482 = vmatprep.subr.mxu1 %v10712_v23  ;;  %v10726_v23 = vld [vmem:[%s21009_s5 + $0x670] sm:$0x3] }
 0x7d4   :  { %v11511_v54 = vadd.f32 %v11510_v11, %v11441_v52  ;;  %v11580_v30 = vpop.f32.mrf.mxu1  ;;  %14309 = vmatmul.mubr.f32.vlgmr.msra.gmra.mxu0 %v10496_v27  ;;  %v9663_v52 = vrot.slane %v20688_v43, %v21349_v17  ;;  %v20781_v11 = vcombine.high %v20556_v7, %v20543_v35  ;;  %v10708_v35 = vld [vmem:[%s21009_s5 + $0x5e0] sm:$0xff]  ;;  %v10231_v7 = vrot.slane %v20692_v12, %v21361_v6  ;;  %v10723_v43 = vld [vmem:[%s21009_s5 + $0x658] sm:$0x3] }
 0x7d5   :  { %v11512_v25 = vpop.f32.mrf.mxu0  ;;  %15594 = vmatmul.mubr.f32.vlgmr.msra.gmra.mxu1 %v10498_v51  ;;  %14413 = vmatpush1.xpose.msra.mxu0 %v10709_v41  ;;  %v10247_v42 = vrot.slane %v20785_v0, %v21344_v22  ;;  %v10255_v41 = vrot.slane %v20785_v0, %v21345_v15  ;;  %v10717_v51 = vld [vmem:[%s21009_s5 + $0x628] sm:$0xff] }
 0x7d6   :  { %v11581_v57 = vadd.f32 %v11580_v30, %v11511_v54  ;;  %v15525_v3 = vpop.f32.mrf.mxu1  ;;  %14448 = vmatprep.mubr.f32.mxu0 %v10500_v1  ;;  %14483 = vmatpush1.xpose.msra.mxu1 %v10711_v36  ;;  %v10501_v38 = vsel %vm21489_vm9, %v9663_v52, %v10223_v63  ;;  %v9687_v62 = vrot.slane %v20781_v11, %v21344_v22  ;;  %v10719_v1 = vld [vmem:[%s21009_s5 + $0x638] sm:$0xff]  ;;  %vm21502_vm9 = vmmov %vm21454_vm0 }
 0x7d7   :  { %14518 = vmatprep.mubr.f32.mxu1 %v10502_v53  ;;  %14414 = vmatprep.subr.mxu0 %v10703_v21  ;;  %v9695_v12 = vrot.slane %v20781_v11, %v21345_v15  ;;  %v10503_v9 = vsel %vm21491_vm15, %v9671_v48, %v10231_v7  ;;  %v10505_v36 = vsel %vm21492_vm14, %v9679_v37, %v10239_v46  ;;  %vm21504_vm15 = vmmov %vm21454_vm0 }
 0x7d8   :  { %v15228_v18 = vsel %vm15224_vm6, %v11581_v57, 0.0  ;;  %14484 = vmatprep.subr.mxu1 %v10705_v59  ;;  %v10507_v21 = vsel %vm21493_vm1, %v9687_v62, %v10247_v42  ;;  %v9707_v7 = vrot.slane %v20781_v11, %v21363_v31  ;;  %vm21505_vm14 = vmmov %vm21454_vm0 }
 0x7d9   :  { %v20736_v33 = vadd.f32 %v15228_v18, %v20621_v13  ;;  %v10702_v13 = vld [vmem:[%s21009_s5 + $0x5b0] sm:$0xff]  ;;  %v10509_v59 = vsel %vm21494_vm7, %v9695_v12, %v10255_v41  ;;  %v10731_v12 = vld [vmem:[%s21009_s5 + $0x698] sm:$0xff]  ;;  %v10733_v41 = vld [vmem:[%s21009_s5 + $0x6a8] sm:$0xff] }
 0x7da   :  { %14415 = vmatpush1.xpose.msra.mxu0 %v10702_v13  ;;  %14485 = vmatpush1.xpose.msra.mxu1 %v10704_v44  ;;  %v10718_v13 = vld [vmem:[%s21009_s5 + $0x630] sm:$0xff]  ;;  %v10243_v44 = vrot.slane %v20785_v0, %v21346_v58 }
 0x7db   :  { %v11650_v16 = vpop.f32.mrf.mxu0  ;;  %14552 = vmatprep.subr.mxu0 %v10714_v47  ;;  %15596 = vmatprep.subr.mxu1 %v20676_v55  ;;  %v9691_v47 = vrot.slane %v20781_v11, %v21349_v17 }
 0x7dc   :  { %v11720_v40 = vpop.f32.mrf.mxu1 }
 0x7dd   :  { %v11721_v61 = vadd.f32 %v11720_v40, %v11650_v16  ;;  %v11652_v4 = vpop.f32.mrf.mxu0  ;;  %14449 = vmatmul.mubr.f32.vlgmr.msra.gmra.mxu0 %v10499_v20  ;;  %14519 = vmatmul.mubr.f32.vlgmr.msra.gmra.mxu1 %v10501_v38  ;;  %v9683_v16 = vrot.slane %v20781_v11, %v21346_v58  ;;  %v10251_v40 = vrot.slane %v20785_v0, %v21349_v17 }
 0x7de   :  { %v11722_v5 = vpop.f32.mrf.mxu1  ;;  %14553 = vmatpush1.xpose.msra.mxu0 %v10713_v49  ;;  %14588 = vmatprep.mubr.f32.mxu0 %v10504_v19  ;;  %v10263_v4 = vrot.slane %v20785_v0, %v21356_v32  ;;  %v10729_v49 = vld [vmem:[%s21009_s5 + $0x688] sm:$0x3]  ;;  %v20874_v38 = vcombine.high %v20670_v28, %v20657_v8  ;;  %v10722_v8 = vld [vmem:[%s21009_s5 + $0x650] sm:$0xff]  ;;  %v10259_v28 = vrot.slane %v20785_v0, %v21361_v6 }
 0x7df   :  { %15597 = vmatpush3.xpose.msra.mxu1 %v10715_v39  ;;  %14554 = vmatprep.subr.mxu0 %v10707_v34  ;;  %v10506_v5 = vsel %vm21454_vm0, %v9683_v16, %v10243_v44  ;;  %v10508_v20 = vsel %vm21495_vm13, %v9691_v47, %v10251_v40  ;;  %v10721_v39 = vld [vmem:[%s21009_s5 + $0x648] sm:$0xff]  ;;  %v20878_v34 = vcombine.high %v20673_v50, %v20660_v2  ;;  %v10738_v50 = vld [vmem:[%s21009_s5 + $0x6d0] sm:$0x3] }
 0x7e0   :  { %15598 = vmatprep.subr.mxu1 %v20676_v55  ;;  %15600 = vmatprep.mubr.msk.f32.mxu1 %vm21365_vm10, %v20676_v55  ;;  %v9699_v2 = vrot.slane %v20781_v11, %v21361_v6  ;;  %v9715_v37 = vrot.slane %v20874_v38, %v21344_v22  ;;  %v9731_v16 = vrot.slane %v20874_v38, %v21356_v32 }
 0x7e1   :  { %v10275_v46 = vrot.slane %v20878_v34, %v21344_v22  ;;  %v10283_v62 = vrot.slane %v20878_v34, %v21345_v15  ;;  %v10739_v22 = vld [vmem:[%s21009_s5 + $0x6d8] sm:$0x3] }
 0x7e2   :  { %14555 = vmatpush1.xpose.msra.mxu0 %v10706_v60  ;;  %v10720_v60 = vld [vmem:[%s21009_s5 + $0x640] sm:$0xff]  ;;  %v10510_v42 = vsel %vm21497_vm8, %v9699_v2, %v10259_v28 }
 0x7e3   :  { %v11790_v56 = vpop.f32.mrf.mxu0  ;;  %15599 = vmatpush3.xpose.msra.mxu1 %v10708_v35  ;;  %14692 = vmatprep.subr.mxu0 %v10724_v14  ;;  %v10267_v14 = vrot.slane %v20785_v0, %v21363_v31  ;;  %v9723_v0 = vrot.slane %v20874_v38, %v21345_v15  ;;  %v10514_v15 = vsel %vm21499_vm4, %v9715_v37, %v10275_v46 }
 0x7e4   :  { %v11791_v54 = vadd.f32 %v11790_v56, %v11721_v61  ;;  %v11860_v30 = vpop.f32.mrf.mxu1  ;;  %14762 = vmatprep.subr.mxu1 %v10726_v23  ;;  %v9703_v61 = vrot.slane %v20781_v11, %v21356_v32  ;;  %v10737_v11 = vld [vmem:[%s21009_s5 + $0x6c8] sm:$0x3] }
 0x7e5   :  { %v11792_v25 = vpop.f32.mrf.mxu0  ;;  %14589 = vmatmul.mubr.f32.vlgmr.msra.gmra.mxu0 %v10503_v9  ;;  %v10516_v9 = vsel %vm21500_vm12, %v9723_v0, %v10283_v62 }
 0x7e6   :  { %v11861_v57 = vadd.f32 %v11860_v30, %v11791_v54  ;;  %v15532_v3 = vpop.f32.mrf.mxu1  ;;  %15601 = vmatmul.mubr.f32.vlgmr.msra.gmra.mxu1 %v10505_v36  ;;  %14693 = vmatpush1.xpose.msra.mxu0 %v10723_v43  ;;  %v10511_v19 = vsel %vm21496_vm5, %v9703_v61, %v10263_v4  ;;  %v10740_v54 = vld [vmem:[%s21009_s5 + $0x6e0] sm:$0x3]  ;;  %v9727_v4 = vrot.slane %v20874_v38, %v21361_v6 }
 0x7e7   :  { %14728 = vmatprep.mubr.f32.mxu0 %v10507_v21  ;;  %14763 = vmatpush1.xpose.msra.mxu1 %v10725_v24  ;;  %v10512_v3 = vsel %vm21498_vm11, %v9707_v7, %v10267_v14  ;;  %v10730_v24 = vld [vmem:[%s21009_s5 + $0x690] sm:$0xff]  ;;  %v10732_v36 = vld [vmem:[%s21009_s5 + $0x6a0] sm:$0xff] }
 0x7e8   :  { %v15230_v27 = vsel %vm15224_vm6, %v11861_v57, 0.0  ;;  %14798 = vmatprep.mubr.f32.mxu1 %v10509_v59  ;;  %14694 = vmatprep.subr.mxu0 %v10717_v51  ;;  %v10271_v51 = vrot.slane %v20878_v34, %v21346_v58  ;;  %v10742_v21 = vld [vmem:[%s21009_s5 + $0x6f0] sm:$0x3]  ;;  %v9719_v59 = vrot.slane %v20874_v38, %v21349_v17  ;;  %v10736_v61 = vld [vmem:[%s21009_s5 + $0x6c0] sm:$0xff] }
 0x7e9   :  { %v20829_v18 = vadd.f32 %v15230_v27, %v20736_v33  ;;  %v10716_v33 = vld [vmem:[%s21009_s5 + $0x620] sm:$0xff]  ;;  %14764 = vmatprep.subr.mxu1 %v10719_v1 }
 0x7ea   :  { %14695 = vmatpush1.xpose.msra.mxu0 %v10716_v33  ;;  %v10279_v33 = vrot.slane %v20878_v34, %v21349_v17  ;;  %v10743_v17 = vld [vmem:[%s21009_s5 + $0x6f8] sm:$0x3] }
 0x7eb   :  { %v11930_v53 = vpop.f32.mrf.mxu0  ;;  %14765 = vmatpush1.xpose.msra.mxu1 %v10718_v13  ;;  %14832 = vmatprep.subr.mxu0 %v10728_v10  ;;  %v10741_v10 = vld [vmem:[%s21009_s5 + $0x6e8] sm:$0x3] }
 0x7ec   :  { %v12000_v26 = vpop.f32.mrf.mxu1  ;;  %15603 = vmatprep.subr.mxu1 %v20676_v55  ;;  %v10515_v47 = vsel %vm21502_vm9, %v9719_v59, %v10279_v33 }
 0x7ed   :  { %v12001_v52 = vadd.f32 %v12000_v26, %v11930_v53  ;;  %v11932_v63 = vpop.f32.mrf.mxu0  ;;  %14729 = vmatmul.mubr.f32.vlgmr.msra.gmra.mxu0 %v10506_v5 }
 0x7ee   :  { %v12002_v29 = vpop.f32.mrf.mxu1  ;;  %14799 = vmatmul.mubr.f32.vlgmr.msra.gmra.mxu1 %v10508_v20  ;;  %14833 = vmatpush1.xpose.msra.mxu0 %v10727_v45  ;;  %v10295_v20 = vrot.slane %v20878_v34, %v21363_v31 }
 0x7ef   :  { %14868 = vmatprep.mubr.f32.mxu0 %v10511_v19  ;;  %15604 = vmatpush3.xpose.msra.mxu1 %v10729_v49  ;;  %v10287_v29 = vrot.slane %v20878_v34, %v21361_v6  ;;  %v9735_v49 = vrot.slane %v20874_v38, %v21363_v31 }
 0x7f0   :  { %14834 = vmatprep.subr.mxu0 %v10721_v39  ;;  %15605 = vmatprep.subr.mxu1 %v20676_v55 }
 0x7f1   :  { %15607 = vmatprep.mubr.msk.f32.mxu1 %vm21365_vm10, %v20676_v55 }
 0x7f2   :  { %14835 = vmatpush1.xpose.msra.mxu0 %v10720_v60 }
 0x7f3   :  { %v12070_v56 = vpop.f32.mrf.mxu0  ;;  %15606 = vmatpush3.xpose.msra.mxu1 %v10722_v8  ;;  %14972 = vmatprep.subr.mxu0 %v10738_v50  ;;  %v10519_v8 = vsel %vm21505_vm14, %v9735_v49, %v10295_v20 }
 0x7f4   :  { %v12071_v35 = vadd.f32 %v12070_v56, %v12001_v52  ;;  %v12140_v48 = vpop.f32.mrf.mxu1  ;;  %15042 = vmatprep.subr.mxu1 %v10740_v54  ;;  %v10734_v52 = vld [vmem:[%s21009_s5 + $0x6b0] sm:$0xff]  ;;  %v10517_v56 = vsel %vm21504_vm15, %v9727_v4, %v10287_v29 }
 0x7f5   :  { %v12072_v30 = vpop.f32.mrf.mxu0  ;;  %14869 = vmatmul.mubr.f32.vlgmr.msra.gmra.mxu0 %v10510_v42 }
 0x7f6   :  { %v12141_v23 = vadd.f32 %v12140_v48, %v12071_v35  ;;  %v15539_v25 = vpop.f32.mrf.mxu1  ;;  %15608 = vmatmul.mubr.f32.vlgmr.msra.gmra.mxu1 %v10512_v3  ;;  %14973 = vmatpush1.xpose.msra.mxu0 %v10737_v11 }
 0x7f7   :  { %15008 = vmatprep.mubr.f32.mxu0 %v10514_v15  ;;  %15043 = vmatpush1.xpose.msra.mxu1 %v10739_v22 }
 0x7f8   :  { %v15232_v57 = vsel %vm15224_vm6, %v12141_v23, 0.0  ;;  %15078 = vmatprep.mubr.f32.mxu1 %v10516_v9  ;;  %14974 = vmatprep.subr.mxu0 %v10731_v12 }
 0x7f9   :  { %v20922_v43 = vadd.f32 %v15232_v57, %v20829_v18  ;;  %v9711_v18 = vrot.slane %v20874_v38, %v21346_v58  ;;  %15044 = vmatprep.subr.mxu1 %v10733_v41  ;;  %v10291_v58 = vrot.slane %v20878_v34, %v21356_v32  ;;  %v10735_v32 = vld [vmem:[%s21009_s5 + $0x6b8] sm:$0xff] }
 0x7fa   :  { %14975 = vmatpush1.xpose.msra.mxu0 %v10730_v24 }
 0x7fb   :  { %v12210_v27 = vpop.f32.mrf.mxu0  ;;  %15045 = vmatpush1.xpose.msra.mxu1 %v10732_v36  ;;  %15112 = vmatprep.subr.mxu0 %v10742_v21  ;;  %v10513_v26 = vsel %vm21501_vm2, %v9711_v18, %v10271_v51  ;;  %v10518_v40 = vsel %vm21503_vm3, %v9731_v16, %v10291_v58 }
 0x7fc   :  { %v12280_v1 = vpop.f32.mrf.mxu1  ;;  %15610 = vmatprep.subr.mxu1 %v20676_v55 }
 0x7fd   :  { %v12281_v53 = vadd.f32 %v12280_v1, %v12210_v27  ;;  %v12212_v13 = vpop.f32.mrf.mxu0  ;;  %15009 = vmatmul.mubr.f32.vlgmr.msra.gmra.mxu0 %v10513_v26 }
 0x7fe   :  { %v12282_v44 = vpop.f32.mrf.mxu1  ;;  %15079 = vmatmul.mubr.f32.vlgmr.msra.gmra.mxu1 %v10515_v47  ;;  %15113 = vmatpush1.xpose.msra.mxu0 %v10741_v10 }
 0x7ff   :  { %15148 = vmatprep.mubr.f32.mxu0 %v10518_v40  ;;  %15611 = vmatpush3.xpose.msra.mxu1 %v10743_v17 }
 0x800   :  { %15114 = vmatprep.subr.mxu0 %v10735_v32  ;;  %15612 = vmatprep.subr.mxu1 %v20676_v55 }
 0x801   :  { %15614 = vmatprep.mubr.msk.f32.mxu1 %vm21365_vm10, %v20676_v55 }
 0x802   :  { %15115 = vmatpush1.xpose.msra.mxu0 %v10734_v52 }
 0x803   :  { %v12350_v63 = vpop.f32.mrf.mxu0  ;;  %15613 = vmatpush3.xpose.msra.mxu1 %v10736_v61 }
 0x804   :  { %v12351_v45 = vadd.f32 %v12350_v63, %v12281_v53  ;;  %v12420_v5 = vpop.f32.mrf.mxu1 }
 0x805   :  { %v12352_v39 = vpop.f32.mrf.mxu0  ;;  %15149 = vmatmul.mubr.f32.vlgmr.msra.gmra.mxu0 %v10517_v56 }
 0x806   :  { %v12421_v19 = vadd.f32 %v12420_v5, %v12351_v45  ;;  %v15546_v60 = vpop.f32.mrf.mxu1  ;;  %15615 = vmatmul.mubr.f32.vlgmr.msra.gmra.mxu1 %v10519_v8 }
 0x808   :  { %v15234_v6 = vsel %vm15224_vm6, %v12421_v19, 0.0 }
 0x809   :  { %v15235_v55 = vadd.f32 %v15234_v6, %v20922_v43 }
 0x80b   :  { %v12490_v2 = vpop.f32.mrf.mxu0 }
 0x80c   :  { %v12560_v38 = vpop.f32.mrf.mxu1 }
 0x80d   :  { %v12561_v28 = vadd.f32 %v12560_v38, %v12490_v2  ;;  %v12492_v50 = vpop.f32.mrf.mxu0 }
 0x80e   :  { %v12562_v31 = vpop.f32.mrf.mxu1 }
 0x813   :  { %v12630_v34 = vpop.f32.mrf.mxu0 }
 0x814   :  { %v12631_v35 = vadd.f32 %v12630_v34, %v12561_v28  ;;  %v12700_v48 = vpop.f32.mrf.mxu1 }
 0x815   :  { %v12632_v7 = vpop.f32.mrf.mxu0 }
 0x816   :  { %v12701_v14 = vadd.f32 %v12700_v48, %v12631_v35  ;;  %v15553_v54 = vpop.f32.mrf.mxu1 }
 0x818   :  { %v15236_v30 = vsel %vm15224_vm6, %v12701_v14, 0.0 }
 0x819   :  { %v15237_v37 = vadd.f32 %v15236_v30, %v15235_v55 }
 0x81b   :  { %v12770_v46 = vpop.f32.mrf.mxu0 }
 0x81c   :  { %v12840_v23 = vpop.f32.mrf.mxu1 }
 0x81d   :  { %v12841_v25 = vadd.f32 %v12840_v23, %v12770_v46  ;;  %v12772_v11 = vpop.f32.mrf.mxu0 }
 0x81e   :  { %v12842_v0 = vpop.f32.mrf.mxu1 }
 0x823   :  { %v12910_v62 = vpop.f32.mrf.mxu0 }
 0x824   :  { %v12911_v42 = vadd.f32 %v12910_v62, %v12841_v25  ;;  %v12980_v22 = vpop.f32.mrf.mxu1 }
 0x825   :  { %v12912_v57 = vpop.f32.mrf.mxu0 }
 0x826   :  { %v12981_v3 = vadd.f32 %v12980_v22, %v12911_v42  ;;  %v15560_v43 = vpop.f32.mrf.mxu1 }
 0x828   :  { %v15238_v12 = vsel %vm15224_vm6, %v12981_v3, 0.0 }
 0x829   :  { %v15239_v15 = vadd.f32 %v15238_v12, %v15237_v37 }
 0x84c   :  { %v13050_v41 = vpop.f32.mrf.mxu0  ;;  %v13120_v9 = vpop.f32.mrf.mxu1 }
 0x84d   :  { %v13121_v24 = vadd.f32 %v13120_v9, %v13050_v41 }
 0x84e   :  { %v13052_v27 = vpop.f32.mrf.mxu0  ;;  %v13122_v36 = vpop.f32.mrf.mxu1 }
 0x854   :  { %v13190_v18 = vpop.f32.mrf.mxu0  ;;  %v13260_v51 = vpop.f32.mrf.mxu1 }
 0x855   :  { %v13191_v21 = vadd.f32 %v13190_v18, %v13121_v24 }
 0x856   :  { %v13192_v1 = vpop.f32.mrf.mxu0  ;;  %v15567_v59 = vpop.f32.mrf.mxu1 }
 0x857   :  { %v13261_v33 = vadd.f32 %v13260_v51, %v13191_v21 }
 0x859   :  { %v15240_v53 = vsel %vm15224_vm6, %v13261_v33, 0.0 }
 0x85a   :  { %v15241_v13 = vadd.f32 %v15240_v53, %v15239_v15 }
 0x85c   :  { %v13330_v16 = vpop.f32.mrf.mxu0 }
 0x85d   :  { %v13400_v58 = vpop.f32.mrf.mxu1 }
 0x85e   :  { %v13401_v44 = vadd.f32 %v13400_v58, %v13330_v16  ;;  %v13332_v10 = vpop.f32.mrf.mxu0 }
 0x85f   :  { %v13402_v26 = vpop.f32.mrf.mxu1 }
 0x864   :  { %v13470_v17 = vpop.f32.mrf.mxu0 }
 0x865   :  { %v13471_v47 = vadd.f32 %v13470_v17, %v13401_v44  ;;  %v13540_v32 = vpop.f32.mrf.mxu1 }
 0x866   :  { %v13472_v40 = vpop.f32.mrf.mxu0 }
 0x867   :  { %v13541_v52 = vadd.f32 %v13540_v32, %v13471_v47  ;;  %v15574_v63 = vpop.f32.mrf.mxu1 }
 0x869   :  { %v15242_v61 = vsel %vm15224_vm6, %v13541_v52, 0.0 }
 0x86a   :  { %v15243_v4 = vadd.f32 %v15242_v61, %v15241_v13 }
 0x86c   :  { %v13610_v29 = vpop.f32.mrf.mxu0 }
 0x86d   :  { %v13680_v45 = vpop.f32.mrf.mxu1 }
 0x86e   :  { %v13681_v5 = vadd.f32 %v13680_v45, %v13610_v29  ;;  %v13612_v49 = vpop.f32.mrf.mxu0 }
 0x86f   :  { %v13682_v20 = vpop.f32.mrf.mxu1 }
 0x874   :  { %v13750_v39 = vpop.f32.mrf.mxu0 }
 0x875   :  { %v13751_v19 = vadd.f32 %v13750_v39, %v13681_v5  ;;  %v13820_v60 = vpop.f32.mrf.mxu1 }
 0x876   :  { %v13752_v56 = vpop.f32.mrf.mxu0 }
 0x877   :  { %v13821_v6 = vadd.f32 %v13820_v60, %v13751_v19  ;;  %v15581_v8 = vpop.f32.mrf.mxu1 }
 0x879   :  { %v15244_v55 = vsel %vm15224_vm6, %v13821_v6, 0.0 }
 0x87a   :  { %v15245_v2 = vadd.f32 %v15244_v55, %v15243_v4 }
 0x87c   :  { %v13890_v38 = vpop.f32.mrf.mxu0 }
 0x87d   :  { %v13960_v28 = vpop.f32.mrf.mxu1 }
 0x87e   :  { %v13892_v50 = vpop.f32.mrf.mxu0  ;;  %v13961_v36 = vadd.f32 %v13960_v28, %v13890_v38 }
 0x87f   :  { %v13962_v31 = vpop.f32.mrf.mxu1 }
 0x884   :  { %v14030_v34 = vpop.f32.mrf.mxu0 }
 0x885   :  { %v14100_v35 = vpop.f32.mrf.mxu1  ;;  %v14031_v21 = vadd.f32 %v14030_v34, %v13961_v36 }
 0x886   :  { %v14032_v48 = vpop.f32.mrf.mxu0 }
 0x887   :  { %v15588_v7 = vpop.f32.mrf.mxu1  ;;  %v14101_v13 = vadd.f32 %v14100_v35, %v14031_v21 }
 0x889   :  { %v15246_v32 = vsel %vm15224_vm6, %v14101_v13, 0.0 }
 0x88a   :  { %v15247_v4 = vadd.f32 %v15246_v32, %v15245_v2  ;;  %v15446_v2 = vld [vmem:[%s21010_s6] ss:$0 sm:$0xff] }
 0x88c   :  { %v14170_v14 = vpop.f32.mrf.mxu0 }
 0x88d   :  { %v14240_v54 = vpop.f32.mrf.mxu1 }
 0x88e   :  { %v14172_v30 = vpop.f32.mrf.mxu0  ;;  %v14241_v1 = vadd.f32 %v14240_v54, %v14170_v14 }
 0x88f   :  { %v14242_v37 = vpop.f32.mrf.mxu1 }
 0x894   :  { %v14310_v46 = vpop.f32.mrf.mxu0 }
 0x895   :  { %v14380_v23 = vpop.f32.mrf.mxu1  ;;  %v14311_v33 = vadd.f32 %v14310_v46, %v14241_v1 }
 0x896   :  { %v14312_v25 = vpop.f32.mrf.mxu0 }
 0x897   :  { %v15595_v11 = vpop.f32.mrf.mxu1  ;;  %v14381_v10 = vadd.f32 %v14380_v23, %v14311_v33 }
 0x899   :  { %v15248_v63 = vsel %vm15224_vm6, %v14381_v10, 0.0 }
 0x89a   :  { %v15249_v5 = vadd.f32 %v15248_v63, %v15247_v4 }
 0x89d   :  { %v14450_v0 = vpop.f32.mrf.mxu0  ;;  %v14520_v62 = vpop.f32.mrf.mxu1 }
 0x89e   :  { %v14521_v53 = vadd.f32 %v14520_v62, %v14450_v0 }
 0x89f   :  { %v14452_v42 = vpop.f32.mrf.mxu0  ;;  %v14522_v22 = vpop.f32.mrf.mxu1 }
 0x8a5   :  { %v14590_v57 = vpop.f32.mrf.mxu0 }
 0x8a6   :  { %v14660_v3 = vpop.f32.mrf.mxu1  ;;  %v14591_v16 = vadd.f32 %v14590_v57, %v14521_v53 }
 0x8a7   :  { %v14592_v43 = vpop.f32.mrf.mxu0 }
 0x8a8   :  { %v15602_v12 = vpop.f32.mrf.mxu1  ;;  %v14661_v40 = vadd.f32 %v14660_v3, %v14591_v16 }
 0x8aa   :  { %v15250_v29 = vsel %vm15224_vm6, %v14661_v40, 0.0 }
 0x8ab   :  { %v15251_v60 = vadd.f32 %v15250_v29, %v15249_v5 }
 0x8ad   :  { %v14730_v15 = vpop.f32.mrf.mxu0 }
 0x8ae   :  { %v14800_v41 = vpop.f32.mrf.mxu1 }
 0x8af   :  { %v14732_v9 = vpop.f32.mrf.mxu0  ;;  %v14801_v58 = vadd.f32 %v14800_v41, %v14730_v15 }
 0x8b0   :  { %v14802_v24 = vpop.f32.mrf.mxu1 }
 0x8b5   :  { %v14870_v27 = vpop.f32.mrf.mxu0 }
 0x8b6   :  { %v14940_v18 = vpop.f32.mrf.mxu1  ;;  %v14871_v26 = vadd.f32 %v14870_v27, %v14801_v58 }
 0x8b7   :  { %v14872_v51 = vpop.f32.mrf.mxu0 }
 0x8b8   :  { %v15609_v59 = vpop.f32.mrf.mxu1  ;;  %v14941_v61 = vadd.f32 %v14940_v18, %v14871_v26 }
 0x8ba   :  { %v15252_v20 = vsel %vm15224_vm6, %v14941_v61, 0.0 }
 0x8bb   :  { %v15253_v55 = vadd.f32 %v15252_v20, %v15251_v60 }
 0x8bd   :  { %v15010_v44 = vpop.f32.mrf.mxu0 }
 0x8be   :  { %v15080_v17 = vpop.f32.mrf.mxu1 }
 0x8bf   :  { %v15012_v47 = vpop.f32.mrf.mxu0  ;;  %v15081_v45 = vadd.f32 %v15080_v17, %v15010_v44 }
 0x8c0   :  { %v15082_v52 = vpop.f32.mrf.mxu1 }
 0x8c5   :  { %v15150_v49 = vpop.f32.mrf.mxu0 }
 0x8c6   :  { %v15151_v39 = vadd.f32 %v15150_v49, %v15081_v45  ;;  %v15220_v19 = vpop.f32.mrf.mxu1 }
 0x8c7   :  { %v15152_v56 = vpop.f32.mrf.mxu0 }
 0x8c8   :  { %v15221_v6 = vadd.f32 %v15220_v19, %v15151_v39  ;;  %v15616_v8 = vpop.f32.mrf.mxu1 }
 0x8ca   :  { %v15254_v38 = vsel %vm15224_vm6, %v15221_v6, 0.0 }
 0x8cb   :  { %v15255_v28 = vadd.f32 %v15254_v38, %v15253_v55 }
 0x8cd   :  { %v15263_v50 = vadd.f32 %v15446_v2, %v15255_v28 }
 0x8cf   :  { %15264 = vst.msk [vmem:[#allocation3] sm:$0x3] %vm15224_vm6, %v15263_v50 }
 0x8d0   :  { %15683 = shalt.err (!%p15680_p4)
}
 0x8d1   :  { %15274 = dma.vmem_to_hbm [thread:$0]  %s15272_s0, 32, %s21011_s7, [#allocation4]  }
 0x8d2   :  { %15692 = dma.done.wait [#allocation4], 32  }
 0x8d3   :  { %15693 = vsyncadd [#allocation4], 4294967264 }
 0x8d4   :  { %15278 = vsyncpa [#allocation4], 1 }

</bundles_post_ra>
